<compile_context>
chip_gen: v7x
topology: tpu7x:2x2x1
jax: 0.10.0
libtpu: 0.0.40
codegen_flags: <defaults>
</compile_context>

<pallas_src>
import numpy as np
import jax
import jax.numpy as jnp
from jax.experimental import pallas as pl
from jax.experimental.pallas import tpu as pltpu

BN_EPS = 1e-5
KSIZE = 3
STRIDE = 2


def _conv_out(size, pad):
    return (size + 2 * pad - KSIZE) // STRIDE + 1


def _round_up(v, m):
    return -(-v // m) * m


# ------------------------------ Pallas kernel ------------------------------ #
def _classifier_kernel(x_ref,
                       w1_ref, b1_ref, w2_ref, b2_ref,
                       w3_ref, b3_ref, w4_ref, b4_ref,
                       wl1_ref, bl1_ref, wl2_ref, bl2_ref,
                       out_ref):
    """Six lane-dense GEMMs with fused bias + activation epilogues."""

    def layer(a, w_ref, b_ref, act):
        # bf16 MXU operands, f32 accumulation, f32 epilogue, bf16 for next op.
        y = jnp.dot(a, w_ref[...], preferred_element_type=jnp.float32) + b_ref[...]
        if act == "relu":
            y = jnp.maximum(y, 0.0)
        else:  # "silu": y * sigmoid(y); sigmoid via tanh (stable, one EUP op)
            y = y * (0.5 * (1.0 + jnp.tanh(0.5 * y)))
        return y.astype(jnp.bfloat16)

    a = layer(x_ref[...], w1_ref, b1_ref, "relu")   # Conv1 + ReLU
    a = layer(a, w2_ref, b2_ref, "relu")            # Conv2 (+folded BN) + ReLU
    a = layer(a, w3_ref, b3_ref, "relu")            # Conv3 (+Dropout=id, folded BN) + ReLU
    a = layer(a, w4_ref, b4_ref, "silu")            # Conv4 + SiLU  (flatten == identity)
    a = layer(a, wl1_ref, bl1_ref, "relu")          # Linear(64, 256) + ReLU
    out = jnp.dot(a, wl2_ref[...], preferred_element_type=jnp.float32) + bl2_ref[...]
    out_ref[...] = out.astype(out_ref.dtype)        # lane-dense (128-padded) store


# ------------------------------ wrapper (JAX) ------------------------------ #
def _fold_bn(weight, bias, bn):
    """Fold an eval-mode BatchNorm (gamma, beta, mean, var) into conv w/b."""
    gamma, beta, mean, var = bn
    s = gamma / jnp.sqrt(var + BN_EPS)
    return weight * s[:, None, None, None], (bias - mean) * s + beta


def _toeplitz(weight, h_in, w_in, pad, dtype=jnp.bfloat16):
    """OIHW conv weight -> block-Toeplitz (H_in*W_in*C_in, H_out*W_out*C_out)
    matrix encoding the stride-2 3x3 conv and its zero padding.  Row and
    column feature layouts are h-major, w, c-minor, so the conv becomes a
    single GEMM on flattened activation slabs."""
    c_out, c_in, k_h, k_w = weight.shape
    h_out, w_out = _conv_out(h_in, pad), _conv_out(w_in, pad)
    sel_h = np.zeros((k_h, h_in, h_out), np.float32)   # static tap selection
    sel_w = np.zeros((k_w, w_in, w_out), np.float32)
    for kh in range(k_h):
        for ho in range(h_out):
            hi = STRIDE * ho + kh - pad
            if 0 <= hi < h_in:
                sel_h[kh, hi, ho] = 1.0
    for kw in range(k_w):
        for wo in range(w_out):
            wi = STRIDE * wo + kw - pad
            if 0 <= wi < w_in:
                sel_w[kw, wi, wo] = 1.0
    wt = jnp.einsum("oiyx,yhg,xwv->hwigvo", weight,
                    jnp.asarray(sel_h), jnp.asarray(sel_w),
                    precision=jax.lax.Precision.HIGHEST)
    wt = wt.reshape(h_in * w_in * c_in, h_out * w_out * c_out)
    return wt.astype(dtype), (h_out, w_out)


def _pad_to(a, shape):
    return jnp.pad(a, [(0, t - s) for s, t in zip(a.shape, shape)])


def _pack_params(params, h, w, output_dim):
    """Build the padded, lane-aligned kernel operands (runs once, eagerly)."""
    h1, w1 = _conv_out(h, 1), _conv_out(w, 1)
    h2, w2 = _conv_out(h1, 1), _conv_out(w1, 1)
    h3, w3 = _conv_out(h2, 0), _conv_out(w2, 0)
    h4, w4 = _conv_out(h3, 0), _conv_out(w3, 0)
    assert (h4, w4) == (1, 1), "Linear(2*32, 256) requires a 28x28-class input"

    # Fold the eval-mode BatchNorms into the preceding convs.
    cw2, cb2 = _fold_bn(params["w2"], params["b2"], params["bn2"])
    cw3, cb3 = _fold_bn(params["w3"], params["b3"], params["bn3"])

    convs = [
        (params["w1"], params["b1"], h,  w,  1),
        (cw2,          cb2,          h1, w1, 1),
        (cw3,          cb3,          h2, w2, 0),
        (params["w4"], params["b4"], h3, w3, 0),
    ]
    ops = []
    last_out = None
    for wgt, bias, hi_, wi_, pad in convs:
        wt, (ho_, wo_) = _toeplitz(wgt, hi_, wi_, pad)
        d_in, d_out = wt.shape
        d_in_p, d_out_p = _round_up(d_in, 128), _round_up(d_out, 128)
        ops.append(_pad_to(wt, (d_in_p, d_out_p)))                 # zero-padded K / lanes
        bt = jnp.tile(bias.astype(jnp.float32), ho_ * wo_).reshape(1, -1)
        ops.append(_pad_to(bt, (1, d_out_p)))                      # padded lanes -> bias 0
        last_out = d_out

    # Linear(64, 256): pad K 64 -> 128 (matches conv4's padded output lanes).
    wl1 = _pad_to(params["wl1"].T.astype(jnp.bfloat16),
                  (_round_up(last_out, 128), 256))
    bl1 = params["bl1"].reshape(1, -1).astype(jnp.float32)
    # Linear(256, output_dim): pad output lanes to 128 (lane-dense final store).
    d6p = _round_up(output_dim, 128)
    wl2 = _pad_to(params["wl2"].T.astype(jnp.bfloat16), (256, d6p))
    bl2 = _pad_to(params["bl2"].reshape(1, -1).astype(jnp.float32), (1, d6p))
    ops += [wl1, bl1, wl2, bl2]

    d0 = h * w                       # un-padded input feature dim (C_in == 1)
    return tuple(ops), d0, d6p


def make_forward(params, h, w, output_dim, max_batch_tile=256):
    ops, d0, d6p = _pack_params(params, h, w, output_dim)
    d0p = ops[0].shape[0]            # padded input feature dim (multiple of 128)

    # Weights / biases: whole-array VMEM blocks with a constant index_map so
    # they stay resident across the batch grid.
    w_specs = [pl.BlockSpec(o.shape, lambda i: (0, 0),
                            memory_space=pltpu.MemorySpace.VMEM) for o in ops]

    @jax.jit
    def forward(x):
        n = x.shape[0]
        n_tile = min(max_batch_tile, _round_up(n, 16))   # bf16 sublane multiple
        n_pad = _round_up(n, n_tile)
        # Lane-dense flat input slab (N, H*W), zero-padded to (n_pad, d0p).
        x_flat = x.reshape(n, -1).astype(jnp.bfloat16)
        x_pad = jnp.zeros((n_pad, d0p), jnp.bfloat16).at[:n, :d0].set(x_flat)

        out = pl.pallas_call(
            _classifier_kernel,
            out_shape=jax.ShapeDtypeStruct((n_pad, d6p), jnp.float32),
            grid=(n_pad // n_tile,),
            in_specs=[pl.BlockSpec((n_tile, d0p), lambda i: (i, 0),
                                   memory_space=pltpu.MemorySpace.VMEM)] + w_specs,
            out_specs=pl.BlockSpec((n_tile, d6p), lambda i: (i, 0),
                                   memory_space=pltpu.MemorySpace.VMEM),
            compiler_params=pltpu.CompilerParams(
                # batch axis is embarrassingly parallel (v7x: both TensorCores)
                dimension_semantics=("parallel",),
                # ~6.5 MiB resident weights + tiles: well under v7x's 64 MiB
                vmem_limit_bytes=40 * 1024 * 1024),
        )(x_pad, *ops)
        return out[:n, :output_dim]

    return forward


# ------------------------------ parameters --------------------------------- #
def _kaiming_conv(key, c_out, c_in, k):
    # kaiming_normal_, mode='fan_out', nonlinearity='relu'
    std = (2.0 / (c_out * k * k)) ** 0.5
    return std * jax.random.normal(key, (c_out, c_in, k, k), jnp.float32)


def _kaiming_linear(key, out_f, in_f):
    std = (2.0 / out_f) ** 0.5
    return std * jax.random.normal(key, (out_f, in_f), jnp.float32)


def _bn_state(key, c):
    # arbitrary eval-mode running stats / affine (PyTorch init would be 1,0,0,1)
    k1, k2, k3, k4 = jax.random.split(key, 4)
    gamma = 1.0 + 0.2 * jax.random.normal(k1, (c,), jnp.float32)
    beta = 0.1 * jax.random.normal(k2, (c,), jnp.float32)
    mean = 0.1 * jax.random.normal(k3, (c,), jnp.float32)
    var = 0.5 + jax.random.uniform(k4, (c,), jnp.float32)
    return gamma, beta, mean, var


def make_params(key, output_dim):
    ks = jax.random.split(key, 8)
    return {
        "w1": _kaiming_conv(ks[0], 8, 1, 3),   "b1": jnp.zeros((8,), jnp.float32),
        "w2": _kaiming_conv(ks[1], 16, 8, 3),  "b2": jnp.zeros((16,), jnp.float32),
        "w3": _kaiming_conv(ks[2], 32, 16, 3), "b3": jnp.zeros((32,), jnp.float32),
        "w4": _kaiming_conv(ks[3], 64, 32, 3), "b4": jnp.zeros((64,), jnp.float32),
        "wl1": _kaiming_linear(ks[4], 256, 2 * 32), "bl1": jnp.zeros((256,), jnp.float32),
        "wl2": _kaiming_linear(ks[5], output_dim, 256),
        "bl2": jnp.zeros((output_dim,), jnp.float32),
        "bn2": _bn_state(ks[6], 16),
        "bn3": _bn_state(ks[7], 32),
    }


# --------------------------- pure-JAX reference ---------------------------- #
def reference_forward(x, params):
    hi = jax.lax.Precision.HIGHEST

    def conv(x, w, b, stride, pad):
        y = jax.lax.conv_general_dilated(
            x, w, (stride, stride), [(pad, pad), (pad, pad)],
            dimension_numbers=("NCHW", "OIHW", "NCHW"), precision=hi)
        return y + b.reshape(1, -1, 1, 1)

    def bn(y, p):
        gamma, beta, mean, var = (v.reshape(1, -1, 1, 1) for v in p)
        return (y - mean) * (gamma / jnp.sqrt(var + BN_EPS)) + beta

    y = jax.nn.relu(conv(x, params["w1"], params["b1"], 2, 1))
    y = jax.nn.relu(bn(conv(y, params["w2"], params["b2"], 2, 1), params["bn2"]))
    y = jax.nn.relu(bn(conv(y, params["w3"], params["b3"], 2, 0), params["bn3"]))
    y = jax.nn.silu(conv(y, params["w4"], params["b4"], 2, 0))
    y = y.reshape(y.shape[0], -1)
    y = jax.nn.relu(jnp.dot(y, params["wl1"].T, precision=hi) + params["bl1"])
    return jnp.dot(y, params["wl2"].T, precision=hi) + params["bl2"]


if __name__ == "__main__":
    key = jax.random.PRNGKey(0)
    pkey, xkey = jax.random.split(key)
    output_dim = 10
    params = make_params(pkey, output_dim)

    # 28x28 single-channel input: the only spatial size for which the
    # flattened conv output (64 = 2*32 features) matches Linear(2*32, 256).
    x = jax.random.normal(xkey, (2, 1, 28, 28), jnp.float32)

    forward = make_forward(params, 28, 28, output_dim)
    out = jax.block_until_ready(forward(x))
    ref = jax.block_until_ready(reference_forward(x, params))

    assert out.shape == (2, output_dim), out.shape
    np.testing.assert_allclose(np.asarray(out), np.asarray(ref), rtol=2e-2, atol=2e-2)
    print("KERNEL_OK")
</pallas_src>

<mosaic_0001>
module attributes {stable_mosaic.version = 11 : i64} {
  func.func @_classifier_kernel(%arg0: i32, %arg1: memref<16x896xbf16, #tpu.memory_space<vmem>>, %arg2: memref<896x1664xbf16, #tpu.memory_space<vmem>>, %arg3: memref<1x1664xf32, #tpu.memory_space<vmem>>, %arg4: memref<1664x896xbf16, #tpu.memory_space<vmem>>, %arg5: memref<1x896xf32, #tpu.memory_space<vmem>>, %arg6: memref<896x384xbf16, #tpu.memory_space<vmem>>, %arg7: memref<1x384xf32, #tpu.memory_space<vmem>>, %arg8: memref<384x128xbf16, #tpu.memory_space<vmem>>, %arg9: memref<1x128xf32, #tpu.memory_space<vmem>>, %arg10: memref<128x256xbf16, #tpu.memory_space<vmem>>, %arg11: memref<1x256xf32, #tpu.memory_space<vmem>>, %arg12: memref<256x128xbf16, #tpu.memory_space<vmem>>, %arg13: memref<1x128xf32, #tpu.memory_space<vmem>>, %arg14: memref<16x128xf32, #tpu.memory_space<vmem>>) attributes {dimension_semantics = [#tpu.dimension_semantics<parallel>], iteration_bounds = array<i64: 1>, scalar_prefetch = 0 : i64, scratch_operands = 0 : i64, tpu.core_type = #tpu.core_type<tc>, window_params = [{transform_indices = @transform_0, window_bounds = array<i64: 16, 896>}, {pipeline_mode = #tpu.pipeline_mode<synchronous>, transform_indices = @transform_1, window_bounds = array<i64: 896, 1664>}, {pipeline_mode = #tpu.pipeline_mode<synchronous>, transform_indices = @transform_2, window_bounds = array<i64: 1, 1664>}, {pipeline_mode = #tpu.pipeline_mode<synchronous>, transform_indices = @transform_3, window_bounds = array<i64: 1664, 896>}, {pipeline_mode = #tpu.pipeline_mode<synchronous>, transform_indices = @transform_4, window_bounds = array<i64: 1, 896>}, {pipeline_mode = #tpu.pipeline_mode<synchronous>, transform_indices = @transform_5, window_bounds = array<i64: 896, 384>}, {pipeline_mode = #tpu.pipeline_mode<synchronous>, transform_indices = @transform_6, window_bounds = array<i64: 1, 384>}, {pipeline_mode = #tpu.pipeline_mode<synchronous>, transform_indices = @transform_7, window_bounds = array<i64: 384, 128>}, {pipeline_mode = #tpu.pipeline_mode<synchronous>, transform_indices = @transform_8, window_bounds = array<i64: 1, 128>}, {pipeline_mode = #tpu.pipeline_mode<synchronous>, transform_indices = @transform_9, window_bounds = array<i64: 128, 256>}, {pipeline_mode = #tpu.pipeline_mode<synchronous>, transform_indices = @transform_10, window_bounds = array<i64: 1, 256>}, {pipeline_mode = #tpu.pipeline_mode<synchronous>, transform_indices = @transform_11, window_bounds = array<i64: 256, 128>}, {pipeline_mode = #tpu.pipeline_mode<synchronous>, transform_indices = @transform_12, window_bounds = array<i64: 1, 128>}, {transform_indices = @transform_13, window_bounds = array<i64: 16, 128>}]} {
    %c0 = arith.constant 0 : index
    %c0_0 = arith.constant 0 : index
    %0 = vector.load %arg1[%c0, %c0_0] : memref<16x896xbf16, #tpu.memory_space<vmem>>, vector<16x896xbf16>
    %c0_1 = arith.constant 0 : index
    %c0_2 = arith.constant 0 : index
    %1 = vector.load %arg2[%c0_1, %c0_2] : memref<896x1664xbf16, #tpu.memory_space<vmem>>, vector<896x1664xbf16>
    %cst = arith.constant dense<0.000000e+00> : vector<16x1664xf32>
    %2 = tpu.matmul %0, %1, %cst {dimension_numbers = #tpu.dot_dimension_numbers<[1], [0], [0], [1], [0, 0, 1, 1], [], []>} : vector<16x896xbf16>, vector<896x1664xbf16>, vector<16x1664xf32> -> vector<16x1664xf32>
    %c0_3 = arith.constant 0 : index
    %c0_4 = arith.constant 0 : index
    %3 = vector.load %arg3[%c0_3, %c0_4] : memref<1x1664xf32, #tpu.memory_space<vmem>>, vector<1x1664xf32>
    %4 = vector.broadcast %3 : vector<1x1664xf32> to vector<16x1664xf32>
    %5 = arith.addf %2, %4 : vector<16x1664xf32>
    %cst_5 = arith.constant 0.000000e+00 : f32
    %6 = vector.broadcast %cst_5 : f32 to vector<16x1664xf32>
    %7 = arith.maximumf %5, %6 : vector<16x1664xf32>
    %8 = arith.truncf %7 : vector<16x1664xf32> to vector<16x1664xbf16>
    %c0_6 = arith.constant 0 : index
    %c0_7 = arith.constant 0 : index
    %9 = vector.load %arg4[%c0_6, %c0_7] : memref<1664x896xbf16, #tpu.memory_space<vmem>>, vector<1664x896xbf16>
    %cst_8 = arith.constant dense<0.000000e+00> : vector<16x896xf32>
    %10 = tpu.matmul %8, %9, %cst_8 {dimension_numbers = #tpu.dot_dimension_numbers<[1], [0], [0], [1], [0, 0, 1, 1], [], []>} : vector<16x1664xbf16>, vector<1664x896xbf16>, vector<16x896xf32> -> vector<16x896xf32>
    %c0_9 = arith.constant 0 : index
    %c0_10 = arith.constant 0 : index
    %11 = vector.load %arg5[%c0_9, %c0_10] : memref<1x896xf32, #tpu.memory_space<vmem>>, vector<1x896xf32>
    %12 = vector.broadcast %11 : vector<1x896xf32> to vector<16x896xf32>
    %13 = arith.addf %10, %12 : vector<16x896xf32>
    %cst_11 = arith.constant 0.000000e+00 : f32
    %14 = vector.broadcast %cst_11 : f32 to vector<16x896xf32>
    %15 = arith.maximumf %13, %14 : vector<16x896xf32>
    %16 = arith.truncf %15 : vector<16x896xf32> to vector<16x896xbf16>
    %c0_12 = arith.constant 0 : index
    %c0_13 = arith.constant 0 : index
    %17 = vector.load %arg6[%c0_12, %c0_13] : memref<896x384xbf16, #tpu.memory_space<vmem>>, vector<896x384xbf16>
    %cst_14 = arith.constant dense<0.000000e+00> : vector<16x384xf32>
    %18 = tpu.matmul %16, %17, %cst_14 {dimension_numbers = #tpu.dot_dimension_numbers<[1], [0], [0], [1], [0, 0, 1, 1], [], []>} : vector<16x896xbf16>, vector<896x384xbf16>, vector<16x384xf32> -> vector<16x384xf32>
    %c0_15 = arith.constant 0 : index
    %c0_16 = arith.constant 0 : index
    %19 = vector.load %arg7[%c0_15, %c0_16] : memref<1x384xf32, #tpu.memory_space<vmem>>, vector<1x384xf32>
    %20 = vector.broadcast %19 : vector<1x384xf32> to vector<16x384xf32>
    %21 = arith.addf %18, %20 : vector<16x384xf32>
    %cst_17 = arith.constant 0.000000e+00 : f32
    %22 = vector.broadcast %cst_17 : f32 to vector<16x384xf32>
    %23 = arith.maximumf %21, %22 : vector<16x384xf32>
    %24 = arith.truncf %23 : vector<16x384xf32> to vector<16x384xbf16>
    %c0_18 = arith.constant 0 : index
    %c0_19 = arith.constant 0 : index
    %25 = vector.load %arg8[%c0_18, %c0_19] : memref<384x128xbf16, #tpu.memory_space<vmem>>, vector<384x128xbf16>
    %cst_20 = arith.constant dense<0.000000e+00> : vector<16x128xf32>
    %26 = tpu.matmul %24, %25, %cst_20 {dimension_numbers = #tpu.dot_dimension_numbers<[1], [0], [0], [1], [0, 0, 1, 1], [], []>} : vector<16x384xbf16>, vector<384x128xbf16>, vector<16x128xf32> -> vector<16x128xf32>
    %c0_21 = arith.constant 0 : index
    %c0_22 = arith.constant 0 : index
    %27 = vector.load %arg9[%c0_21, %c0_22] : memref<1x128xf32, #tpu.memory_space<vmem>>, vector<1x128xf32>
    %28 = vector.broadcast %27 : vector<1x128xf32> to vector<16x128xf32>
    %29 = arith.addf %26, %28 : vector<16x128xf32>
    %cst_23 = arith.constant 5.000000e-01 : f32
    %30 = vector.broadcast %cst_23 : f32 to vector<16x128xf32>
    %31 = arith.mulf %30, %29 : vector<16x128xf32>
    %32 = math.tanh %31 : vector<16x128xf32>
    %cst_24 = arith.constant 1.000000e+00 : f32
    %33 = vector.broadcast %cst_24 : f32 to vector<16x128xf32>
    %34 = arith.addf %33, %32 : vector<16x128xf32>
    %cst_25 = arith.constant 5.000000e-01 : f32
    %35 = vector.broadcast %cst_25 : f32 to vector<16x128xf32>
    %36 = arith.mulf %35, %34 : vector<16x128xf32>
    %37 = arith.mulf %29, %36 : vector<16x128xf32>
    %38 = arith.truncf %37 : vector<16x128xf32> to vector<16x128xbf16>
    %c0_26 = arith.constant 0 : index
    %c0_27 = arith.constant 0 : index
    %39 = vector.load %arg10[%c0_26, %c0_27] : memref<128x256xbf16, #tpu.memory_space<vmem>>, vector<128x256xbf16>
    %cst_28 = arith.constant dense<0.000000e+00> : vector<16x256xf32>
    %40 = tpu.matmul %38, %39, %cst_28 {dimension_numbers = #tpu.dot_dimension_numbers<[1], [0], [0], [1], [0, 0, 1, 1], [], []>} : vector<16x128xbf16>, vector<128x256xbf16>, vector<16x256xf32> -> vector<16x256xf32>
    %c0_29 = arith.constant 0 : index
    %c0_30 = arith.constant 0 : index
    %41 = vector.load %arg11[%c0_29, %c0_30] : memref<1x256xf32, #tpu.memory_space<vmem>>, vector<1x256xf32>
    %42 = vector.broadcast %41 : vector<1x256xf32> to vector<16x256xf32>
    %43 = arith.addf %40, %42 : vector<16x256xf32>
    %cst_31 = arith.constant 0.000000e+00 : f32
    %44 = vector.broadcast %cst_31 : f32 to vector<16x256xf32>
    %45 = arith.maximumf %43, %44 : vector<16x256xf32>
    %46 = arith.truncf %45 : vector<16x256xf32> to vector<16x256xbf16>
    %c0_32 = arith.constant 0 : index
    %c0_33 = arith.constant 0 : index
    %47 = vector.load %arg12[%c0_32, %c0_33] : memref<256x128xbf16, #tpu.memory_space<vmem>>, vector<256x128xbf16>
    %cst_34 = arith.constant dense<0.000000e+00> : vector<16x128xf32>
    %48 = tpu.matmul %46, %47, %cst_34 {dimension_numbers = #tpu.dot_dimension_numbers<[1], [0], [0], [1], [0, 0, 1, 1], [], []>} : vector<16x256xbf16>, vector<256x128xbf16>, vector<16x128xf32> -> vector<16x128xf32>
    %c0_35 = arith.constant 0 : index
    %c0_36 = arith.constant 0 : index
    %49 = vector.load %arg13[%c0_35, %c0_36] : memref<1x128xf32, #tpu.memory_space<vmem>>, vector<1x128xf32>
    %50 = vector.broadcast %49 : vector<1x128xf32> to vector<16x128xf32>
    %51 = arith.addf %48, %50 : vector<16x128xf32>
    %c0_37 = arith.constant 0 : index
    %c0_38 = arith.constant 0 : index
    %52 = vector.load %arg14[%c0_37, %c0_38] : memref<16x128xf32, #tpu.memory_space<vmem>>, vector<16x128xf32>
    tpu.vector_store %arg14[%c0_37, %c0_38], %51 {strides = array<i32>} : memref<16x128xf32, #tpu.memory_space<vmem>>, vector<16x128xf32>,
    return
  }
  func.func @transform_0(%arg0: i32) -> (i32, i32) {
    %c0_i32 = arith.constant 0 : i32
    %c0_i32_0 = arith.constant 0 : i32
    return %arg0, %c0_i32 : i32, i32
  }
  func.func @transform_1(%arg0: i32) -> (i32, i32) {
    %c0_i32 = arith.constant 0 : i32
    %c0_i32_0 = arith.constant 0 : i32
    %c0_i32_1 = arith.constant 0 : i32
    return %c0_i32, %c0_i32_0 : i32, i32
  }
  func.func @transform_2(%arg0: i32) -> (i32, i32) {
    %c0_i32 = arith.constant 0 : i32
    %c0_i32_0 = arith.constant 0 : i32
    %c0_i32_1 = arith.constant 0 : i32
    return %c0_i32, %c0_i32_0 : i32, i32
  }
  func.func @transform_3(%arg0: i32) -> (i32, i32) {
    %c0_i32 = arith.constant 0 : i32
    %c0_i32_0 = arith.constant 0 : i32
    %c0_i32_1 = arith.constant 0 : i32
    return %c0_i32, %c0_i32_0 : i32, i32
  }
  func.func @transform_4(%arg0: i32) -> (i32, i32) {
    %c0_i32 = arith.constant 0 : i32
    %c0_i32_0 = arith.constant 0 : i32
    %c0_i32_1 = arith.constant 0 : i32
    return %c0_i32, %c0_i32_0 : i32, i32
  }
  func.func @transform_5(%arg0: i32) -> (i32, i32) {
    %c0_i32 = arith.constant 0 : i32
    %c0_i32_0 = arith.constant 0 : i32
    %c0_i32_1 = arith.constant 0 : i32
    return %c0_i32, %c0_i32_0 : i32, i32
  }
  func.func @transform_6(%arg0: i32) -> (i32, i32) {
    %c0_i32 = arith.constant 0 : i32
    %c0_i32_0 = arith.constant 0 : i32
    %c0_i32_1 = arith.constant 0 : i32
    return %c0_i32, %c0_i32_0 : i32, i32
  }
  func.func @transform_7(%arg0: i32) -> (i32, i32) {
    %c0_i32 = arith.constant 0 : i32
    %c0_i32_0 = arith.constant 0 : i32
    %c0_i32_1 = arith.constant 0 : i32
    return %c0_i32, %c0_i32_0 : i32, i32
  }
  func.func @transform_8(%arg0: i32) -> (i32, i32) {
    %c0_i32 = arith.constant 0 : i32
    %c0_i32_0 = arith.constant 0 : i32
    %c0_i32_1 = arith.constant 0 : i32
    return %c0_i32, %c0_i32_0 : i32, i32
  }
  func.func @transform_9(%arg0: i32) -> (i32, i32) {
    %c0_i32 = arith.constant 0 : i32
    %c0_i32_0 = arith.constant 0 : i32
    %c0_i32_1 = arith.constant 0 : i32
    return %c0_i32, %c0_i32_0 : i32, i32
  }
  func.func @transform_10(%arg0: i32) -> (i32, i32) {
    %c0_i32 = arith.constant 0 : i32
    %c0_i32_0 = arith.constant 0 : i32
    %c0_i32_1 = arith.constant 0 : i32
    return %c0_i32, %c0_i32_0 : i32, i32
  }
  func.func @transform_11(%arg0: i32) -> (i32, i32) {
    %c0_i32 = arith.constant 0 : i32
    %c0_i32_0 = arith.constant 0 : i32
    %c0_i32_1 = arith.constant 0 : i32
    return %c0_i32, %c0_i32_0 : i32, i32
  }
  func.func @transform_12(%arg0: i32) -> (i32, i32) {
    %c0_i32 = arith.constant 0 : i32
    %c0_i32_0 = arith.constant 0 : i32
    %c0_i32_1 = arith.constant 0 : i32
    return %c0_i32, %c0_i32_0 : i32, i32
  }
  func.func @transform_13(%arg0: i32) -> (i32, i32) {
    %c0_i32 = arith.constant 0 : i32
    %c0_i32_0 = arith.constant 0 : i32
    return %arg0, %c0_i32 : i32, i32
  }
}

</mosaic_0001>

<bundles_post_ra>
// kernel: forward.1
= control target key start
LH: loop header
LB: loop body
LE: loop exit
PB: predicated region body
PF: predicated region fallthrough
CT: control target
= control target key end

     0   :  { %vm18548_vm0 = vmmov 0   ;;  %s24048_s1 = inlined_call_operand.vmem [shape: bf16[896,1664], index: 1, kind: input, shape index: {}]   ;;  %s24049_s0 = inlined_call_operand.vmem [shape: bf16[16,896], index: 0, kind: input, shape index: {}]   ;;  %s24050_s2 = inlined_call_operand.vmem [shape: f32[1,1664], index: 2, kind: input, shape index: {}]   ;;  %s24051_s3 = inlined_call_operand.vmem [shape: bf16[1664,896], index: 3, kind: input, shape index: {}]   ;;  %s24052_s5 = inlined_call_operand.vmem [shape: bf16[896,384], index: 5, kind: input, shape index: {}]   ;;  %s24053_s4 = inlined_call_operand.vmem [shape: f32[1,896], index: 4, kind: input, shape index: {}]   ;;  %s24054_s7 = inlined_call_operand.vmem [shape: bf16[384,128], index: 7, kind: input, shape index: {}]   ;;  %s24055_s6 = inlined_call_operand.vmem [shape: f32[1,384], index: 6, kind: input, shape index: {}]   ;;  %s24056_s9 = inlined_call_operand.vmem [shape: bf16[128,256], index: 9, kind: input, shape index: {}]   ;;  %s24057_s11 = inlined_call_operand.vmem [shape: bf16[256,128], index: 11, kind: input, shape index: {}]   ;;  %s24058_s8 = inlined_call_operand.vmem [shape: f32[1,128], index: 8, kind: input, shape index: {}, may-alias: {8,12}]   ;;  %s24059_s10 = inlined_call_operand.vmem [shape: f32[1,256], index: 10, kind: input, shape index: {}]   ;;  %s24060_s12 = inlined_call_operand.vmem [shape: f32[1,128], index: 12, kind: input, shape index: {}, may-alias: {8,12}]   ;;  %s24061_s13 = inlined_call_operand.vmem [shape: f32[16,128], index: 13, kind: output, shape index: {}]  }
   0x1   :  { %v16122_v0 = vld [vmem:[%s24048_s1 + $0x4] ss:$52 sps:$4 sm:$0xff]   ;;  %v16124_v1 = vld [vmem:[%s24048_s1 + $0xc] ss:$52 sps:$4 sm:$0xff]   ;;  %v16127_v3 = vld [vmem:[%s24048_s1 + $0x8] ss:$52 sps:$4 sm:$0xff]  }
   0x2   :  { %4638 = vmatprep.subr.bf16.mxu0 %v16122_v0  ;;  %v16126_v2 = vld [vmem:[%s24048_s1] ss:$52 sps:$4 sm:$0xff]   ;;  %4810 = vmatprep.subr.bf16.mxu1 %v16124_v1  ;;  %v16132_v6 = vld [vmem:[%s24048_s1 + $0x68] ss:$52 sps:$4 sm:$0xff]   ;;  %v16133_v7 = vld [vmem:[%s24048_s1 + $0x70] ss:$52 sps:$4 sm:$0xff]  }
   0x3   :  { %v16128_v4 = vld [vmem:[%s24048_s1 + $0x6c] ss:$52 sps:$4 sm:$0xff]   ;;  %4639 = vmatpush1.bf16.msra.mxu0 %v16126_v2  ;;  %4811 = vmatpush1.bf16.msra.mxu1 %v16127_v3  ;;  %v16130_v5 = vld [vmem:[%s24048_s1 + $0x74] ss:$52 sps:$4 sm:$0xff]   ;;  %v16136_v9 = vld [vmem:[%s24048_s1 + $0xdc] ss:$52 sps:$4 sm:$0xff]  }
   0x4   :  { %4640 = vmatprep.subr.bf16.mxu0 %v16128_v4  ;;  %4812 = vmatprep.subr.bf16.mxu1 %v16130_v5  ;;  %v16134_v8 = vld [vmem:[%s24048_s1 + $0xd4] ss:$52 sps:$4 sm:$0xff]   ;;  %v16138_v10 = vld [vmem:[%s24048_s1 + $0xd0] ss:$52 sps:$4 sm:$0xff]   ;;  %v16139_v11 = vld [vmem:[%s24048_s1 + $0xd8] ss:$52 sps:$4 sm:$0xff]  }
   0x5   :  { %v16140_v12 = vld [vmem:[%s24048_s1 + $0x13c] ss:$52 sps:$4 sm:$0xff]   ;;  %v16142_v13 = vld [vmem:[%s24048_s1 + $0x144] ss:$52 sps:$4 sm:$0xff]   ;;  %v16145_v15 = vld [vmem:[%s24048_s1 + $0x140] ss:$52 sps:$4 sm:$0xff]  }
   0x6   :  { %v16144_v14 = vld [vmem:[%s24048_s1 + $0x138] ss:$52 sps:$4 sm:$0xff]   ;;  %v16150_v18 = vld [vmem:[%s24048_s1 + $0x1a0] ss:$52 sps:$4 sm:$0xff]   ;;  %v16151_v19 = vld [vmem:[%s24048_s1 + $0x1a8] ss:$52 sps:$4 sm:$0xff]  }
   0x7   :  { %4641 = vmatpush1.bf16.msra.mxu0 %v16132_v6  ;;  %4813 = vmatpush1.bf16.msra.mxu1 %v16133_v7  ;;  %v16146_v16 = vld [vmem:[%s24048_s1 + $0x1a4] ss:$52 sps:$4 sm:$0xff]   ;;  %v16148_v17 = vld [vmem:[%s24048_s1 + $0x1ac] ss:$52 sps:$4 sm:$0xff]   ;;  %v16154_v21 = vld [vmem:[%s24048_s1 + $0x214] ss:$52 sps:$4 sm:$0xff]  }
   0x8   :  { %4642 = vmatprep.subr.bf16.mxu0 %v16134_v8  ;;  %4814 = vmatprep.subr.bf16.mxu1 %v16136_v9  ;;  %v16152_v20 = vld [vmem:[%s24048_s1 + $0x20c] ss:$52 sps:$4 sm:$0xff]   ;;  %v16156_v22 = vld [vmem:[%s24048_s1 + $0x208] ss:$52 sps:$4 sm:$0xff]   ;;  %v16157_v23 = vld [vmem:[%s24048_s1 + $0x210] ss:$52 sps:$4 sm:$0xff]  }
   0x9   :  { %v16158_v24 = vld [vmem:[%s24048_s1 + $0x274] ss:$52 sps:$4 sm:$0xff]   ;;  %v16160_v25 = vld [vmem:[%s24048_s1 + $0x27c] ss:$52 sps:$4 sm:$0xff]   ;;  %v16163_v27 = vld [vmem:[%s24048_s1 + $0x278] ss:$52 sps:$4 sm:$0xff]  }
   0xa   :  { %v16162_v26 = vld [vmem:[%s24048_s1 + $0x270] ss:$52 sps:$4 sm:$0xff]   ;;  %v16168_v30 = vld [vmem:[%s24048_s1 + $0x2d8] ss:$52 sps:$4 sm:$0xff]   ;;  %v16169_v31 = vld [vmem:[%s24048_s1 + $0x2e0] ss:$52 sps:$4 sm:$0xff]  }
   0xb   :  { %4643 = vmatpush1.bf16.msra.mxu0 %v16138_v10  ;;  %4815 = vmatpush1.bf16.msra.mxu1 %v16139_v11  ;;  %v16164_v28 = vld [vmem:[%s24048_s1 + $0x2dc] ss:$52 sps:$4 sm:$0xff]   ;;  %v16166_v29 = vld [vmem:[%s24048_s1 + $0x2e4] ss:$52 sps:$4 sm:$0xff]   ;;  %v16172_v33 = vld [vmem:[%s24048_s1 + $0x34c] ss:$52 sps:$4 sm:$0xff]  }
   0xc   :  { %4644 = vmatprep.subr.bf16.mxu0 %v16140_v12  ;;  %4816 = vmatprep.subr.bf16.mxu1 %v16142_v13  ;;  %v16170_v32 = vld [vmem:[%s24048_s1 + $0x344] ss:$52 sps:$4 sm:$0xff]   ;;  %v16174_v34 = vld [vmem:[%s24048_s1 + $0x340] ss:$52 sps:$4 sm:$0xff]   ;;  %v16175_v35 = vld [vmem:[%s24048_s1 + $0x348] ss:$52 sps:$4 sm:$0xff]  }
   0xd   :  { %v16176_v36 = vld [vmem:[%s24048_s1 + $0x3ac] ss:$52 sps:$4 sm:$0xff]   ;;  %v16178_v37 = vld [vmem:[%s24048_s1 + $0x3b4] ss:$52 sps:$4 sm:$0xff]   ;;  %v16181_v39 = vld [vmem:[%s24048_s1 + $0x3b0] ss:$52 sps:$4 sm:$0xff]  }
   0xe   :  { %v16180_v38 = vld [vmem:[%s24048_s1 + $0x3a8] ss:$52 sps:$4 sm:$0xff]   ;;  %v16186_v42 = vld [vmem:[%s24048_s1 + $0x410] ss:$52 sps:$4 sm:$0xff]   ;;  %v16187_v43 = vld [vmem:[%s24048_s1 + $0x418] ss:$52 sps:$4 sm:$0xff]  }
   0xf   :  { %4645 = vmatpush1.bf16.msra.mxu0 %v16144_v14  ;;  %4817 = vmatpush1.bf16.msra.mxu1 %v16145_v15  ;;  %v16182_v40 = vld [vmem:[%s24048_s1 + $0x414] ss:$52 sps:$4 sm:$0xff]   ;;  %v16184_v41 = vld [vmem:[%s24048_s1 + $0x41c] ss:$52 sps:$4 sm:$0xff]   ;;  %v16190_v45 = vld [vmem:[%s24048_s1 + $0x484] ss:$52 sps:$4 sm:$0xff]  }
  0x10   :  { %4646 = vmatprep.subr.bf16.mxu0 %v16146_v16  ;;  %4818 = vmatprep.subr.bf16.mxu1 %v16148_v17  ;;  %v16188_v44 = vld [vmem:[%s24048_s1 + $0x47c] ss:$52 sps:$4 sm:$0xff]   ;;  %v16192_v46 = vld [vmem:[%s24048_s1 + $0x478] ss:$52 sps:$4 sm:$0xff]   ;;  %v16218_v47 = vld [vmem:[%s24049_s0 + $0x4] ss:$28 sps:$4 sm:$0xff]  }
  0x11   :  { %v16193_v48 = vld [vmem:[%s24048_s1 + $0x480] ss:$52 sps:$4 sm:$0xff]   ;;  %v16194_v49 = vld [vmem:[%s24048_s1 + $0x4e4] ss:$52 sps:$4 sm:$0xff]   ;;  %4670 = vmatprep.mubr.bf16.mxu0 %v16218_v47  ;;  %4842 = vmatprep.mubr.bf16.mxu1 %v16218_v47  ;;  %v16199_v52 = vld [vmem:[%s24048_s1 + $0x4e8] ss:$52 sps:$4 sm:$0xff]  }
  0x12   :  { %v16196_v50 = vld [vmem:[%s24048_s1 + $0x4ec] ss:$52 sps:$4 sm:$0xff]   ;;  %v16202_v54 = vld [vmem:[%s24048_s1 + $0x554] ss:$52 sps:$4 sm:$0xff]   ;;  %v16205_v56 = vld [vmem:[%s24048_s1 + $0x550] ss:$52 sps:$4 sm:$0xff]  }
  0x13   :  { %4647 = vmatpush1.bf16.msra.mxu0 %v16150_v18  ;;  %4819 = vmatpush1.bf16.msra.mxu1 %v16151_v19  ;;  %v16198_v51 = vld [vmem:[%s24048_s1 + $0x4e0] ss:$52 sps:$4 sm:$0xff]   ;;  %v16204_v55 = vld [vmem:[%s24048_s1 + $0x548] ss:$52 sps:$4 sm:$0xff]   ;;  %v16210_v59 = vld [vmem:[%s24048_s1 + $0x5b0] ss:$52 sps:$4 sm:$0xff]  }
  0x14   :  { %4648 = vmatprep.subr.bf16.mxu0 %v16152_v20  ;;  %4820 = vmatprep.subr.bf16.mxu1 %v16154_v21  ;;  %v16200_v53 = vld [vmem:[%s24048_s1 + $0x54c] ss:$52 sps:$4 sm:$0xff]   ;;  %v16206_v57 = vld [vmem:[%s24048_s1 + $0x5b4] ss:$52 sps:$4 sm:$0xff]   ;;  %v16208_v58 = vld [vmem:[%s24048_s1 + $0x5bc] ss:$52 sps:$4 sm:$0xff]  }
  0x15   :  { %v16211_v60 = vld [vmem:[%s24048_s1 + $0x5b8] ss:$52 sps:$4 sm:$0xff]   ;;  %v16212_v61 = vld [vmem:[%s24048_s1 + $0x61c] ss:$52 sps:$4 sm:$0xff]   ;;  %v16217_v0 = vld [vmem:[%s24048_s1 + $0x620] ss:$52 sps:$4 sm:$0xff]  }
  0x16   :  { %v16214_v62 = vld [vmem:[%s24048_s1 + $0x624] ss:$52 sps:$4 sm:$0xff]   ;;  %v16225_v2 = vld [vmem:[%s24048_s1 + $0x68c] ss:$52 sps:$4 sm:$0xff]   ;;  %v16223_v4 = vld [vmem:[%s24048_s1 + $0x688] ss:$52 sps:$4 sm:$0xff]  }
  0x17   :  { %4649 = vmatpush1.bf16.msra.mxu0 %v16156_v22  ;;  %4821 = vmatpush1.bf16.msra.mxu1 %v16157_v23  ;;  %v16216_v63 = vld [vmem:[%s24048_s1 + $0x618] ss:$52 sps:$4 sm:$0xff]   ;;  %v16220_v3 = vld [vmem:[%s24048_s1 + $0x680] ss:$52 sps:$4 sm:$0xff]   ;;  %v16227_v8 = vld [vmem:[%s24048_s1 + $0x6e8] ss:$52 sps:$4 sm:$0xff]  }
  0x18   :  { %4650 = vmatprep.subr.bf16.mxu0 %v16158_v24  ;;  %4822 = vmatprep.subr.bf16.mxu1 %v16160_v25  ;;  %v16222_v1 = vld [vmem:[%s24048_s1 + $0x684] ss:$52 sps:$4 sm:$0xff]   ;;  %v16226_v5 = vld [vmem:[%s24049_s0] ss:$28 sps:$4 sm:$0xff]   ;;  %v16232_v7 = vld [vmem:[%s24048_s1 + $0x6f4] ss:$52 sps:$4 sm:$0xff]  }
  0x19   :  { %v16229_v6 = vld [vmem:[%s24048_s1 + $0x6ec] ss:$52 sps:$4 sm:$0xff]   ;;  %v16230_v9 = vld [vmem:[%s24048_s1 + $0x6f0] ss:$52 sps:$4 sm:$0xff]   ;;  %v16235_v10 = vld [vmem:[%s24048_s1 + $0x754] ss:$52 sps:$4 sm:$0xff]  }
  0x1a   :  { %v16238_v11 = vld [vmem:[%s24048_s1 + $0x75c] ss:$52 sps:$4 sm:$0xff]   ;;  %v16236_v13 = vld [vmem:[%s24048_s1 + $0x758] ss:$52 sps:$4 sm:$0xff]   ;;  %v16242_v17 = vld [vmem:[%s24048_s1 + $0x7c0] ss:$52 sps:$4 sm:$0xff]  }
  0x1b   :  { %4651 = vmatpush1.bf16.msra.mxu0 %v16162_v26  ;;  %4823 = vmatpush1.bf16.msra.mxu1 %v16163_v27  ;;  %v16233_v12 = vld [vmem:[%s24048_s1 + $0x750] ss:$52 sps:$4 sm:$0xff]   ;;  %v16239_v16 = vld [vmem:[%s24048_s1 + $0x7b8] ss:$52 sps:$4 sm:$0xff]   ;;  %v16245_v20 = vld [vmem:[%s24048_s1 + $0x820] ss:$52 sps:$4 sm:$0xff]  }
  0x1c   :  { %4652 = vmatprep.subr.bf16.mxu0 %v16164_v28  ;;  %4824 = vmatprep.subr.bf16.mxu1 %v16166_v29  ;;  %v16241_v14 = vld [vmem:[%s24048_s1 + $0x7bc] ss:$52 sps:$4 sm:$0xff]   ;;  %v16244_v15 = vld [vmem:[%s24048_s1 + $0x7c4] ss:$52 sps:$4 sm:$0xff]   ;;  %v16250_v19 = vld [vmem:[%s24048_s1 + $0x82c] ss:$52 sps:$4 sm:$0xff]  }
  0x1d   :  { %v16247_v18 = vld [vmem:[%s24048_s1 + $0x824] ss:$52 sps:$4 sm:$0xff]   ;;  %v16248_v21 = vld [vmem:[%s24048_s1 + $0x828] ss:$52 sps:$4 sm:$0xff]   ;;  %v16253_v22 = vld [vmem:[%s24048_s1 + $0x88c] ss:$52 sps:$4 sm:$0xff]  }
  0x1e   :  { %v16256_v23 = vld [vmem:[%s24048_s1 + $0x894] ss:$52 sps:$4 sm:$0xff]   ;;  %v16254_v25 = vld [vmem:[%s24048_s1 + $0x890] ss:$52 sps:$4 sm:$0xff]  }
  0x1f   :  { %4653 = vmatpush1.bf16.msra.mxu0 %v16168_v30  ;;  %4825 = vmatpush1.bf16.msra.mxu1 %v16169_v31  ;;  %v16251_v24 = vld [vmem:[%s24048_s1 + $0x888] ss:$52 sps:$4 sm:$0xff]   ;;  %v16257_v28 = vld [vmem:[%s24048_s1 + $0x8f0] ss:$52 sps:$4 sm:$0xff]   ;;  %v16260_v30 = vld [vmem:[%s24048_s1 + $0x8f8] ss:$52 sps:$4 sm:$0xff]  }
  0x20   :  { %4654 = vmatprep.subr.bf16.mxu0 %v16170_v32  ;;  %4826 = vmatprep.subr.bf16.mxu1 %v16172_v33  ;;  %v16259_v26 = vld [vmem:[%s24048_s1 + $0x8f4] ss:$52 sps:$4 sm:$0xff]   ;;  %v16262_v27 = vld [vmem:[%s24048_s1 + $0x8fc] ss:$52 sps:$4 sm:$0xff]   ;;  %v16268_v32 = vld [vmem:[%s24048_s1 + $0x964] ss:$52 sps:$4 sm:$0xff]  }
  0x21   :  { %v16317_v29 = vld [vmem:[%s24049_s0 + $0xc] ss:$28 sps:$4 sm:$0xff]   ;;  %v16265_v31 = vld [vmem:[%s24048_s1 + $0x95c] ss:$52 sps:$4 sm:$0xff]  }
  0x22   :  { %v16263_v33 = vld [vmem:[%s24048_s1 + $0x958] ss:$52 sps:$4 sm:$0xff]   ;;  %v16289_v47 = vld [vmem:[%s24048_s1 + $0xafc] ss:$52 sps:$4 sm:$0xff]  }
  0x23   :  { %4655 = vmatpush1.bf16.msra.mxu0 %v16174_v34  ;;  %4827 = vmatpush1.bf16.msra.mxu1 %v16175_v35  ;;  %v16266_v34 = vld [vmem:[%s24048_s1 + $0x960] ss:$52 sps:$4 sm:$0xff]   ;;  %v16271_v35 = vld [vmem:[%s24048_s1 + $0x9c4] ss:$52 sps:$4 sm:$0xff]  }
  0x24   :  { %4656 = vmatprep.subr.bf16.mxu0 %v16176_v36  ;;  %4828 = vmatprep.subr.bf16.mxu1 %v16178_v37  ;;  %v16274_v36 = vld [vmem:[%s24048_s1 + $0x9cc] ss:$52 sps:$4 sm:$0xff]  }
  0x25   :  { %v16269_v37 = vld [vmem:[%s24048_s1 + $0x9c0] ss:$52 sps:$4 sm:$0xff]  }
  0x27   :  { %4657 = vmatpush1.bf16.msra.mxu0 %v16180_v38  ;;  %4829 = vmatpush1.bf16.msra.mxu1 %v16181_v39  ;;  %v16272_v38 = vld [vmem:[%s24048_s1 + $0x9c8] ss:$52 sps:$4 sm:$0xff]   ;;  %v16277_v39 = vld [vmem:[%s24048_s1 + $0xa2c] ss:$52 sps:$4 sm:$0xff]  }
  0x28   :  { %4658 = vmatprep.subr.bf16.mxu0 %v16182_v40  ;;  %4830 = vmatprep.subr.bf16.mxu1 %v16184_v41  ;;  %v16280_v40 = vld [vmem:[%s24048_s1 + $0xa34] ss:$52 sps:$4 sm:$0xff]  }
  0x29   :  { %v16275_v41 = vld [vmem:[%s24048_s1 + $0xa28] ss:$52 sps:$4 sm:$0xff]  }
  0x2b   :  { %4659 = vmatpush1.bf16.msra.mxu0 %v16186_v42  ;;  %4831 = vmatpush1.bf16.msra.mxu1 %v16187_v43  ;;  %v16278_v42 = vld [vmem:[%s24048_s1 + $0xa30] ss:$52 sps:$4 sm:$0xff]   ;;  %v16283_v43 = vld [vmem:[%s24048_s1 + $0xa94] ss:$52 sps:$4 sm:$0xff]  }
  0x2c   :  { %4660 = vmatprep.subr.bf16.mxu0 %v16188_v44  ;;  %4832 = vmatprep.subr.bf16.mxu1 %v16190_v45  ;;  %v16286_v44 = vld [vmem:[%s24048_s1 + $0xa9c] ss:$52 sps:$4 sm:$0xff]  }
  0x2d   :  { %v16281_v45 = vld [vmem:[%s24048_s1 + $0xa90] ss:$52 sps:$4 sm:$0xff]  }
  0x2f   :  { %4661 = vmatpush1.bf16.msra.mxu0 %v16192_v46  ;;  %4833 = vmatpush1.bf16.msra.mxu1 %v16193_v48  ;;  %v16284_v46 = vld [vmem:[%s24048_s1 + $0xa98] ss:$52 sps:$4 sm:$0xff]  }
  0x30   :  { %4662 = vmatprep.subr.bf16.mxu0 %v16194_v49  ;;  %4834 = vmatprep.subr.bf16.mxu1 %v16196_v50  ;;  %v16292_v48 = vld [vmem:[%s24048_s1 + $0xb04] ss:$52 sps:$4 sm:$0xff]   ;;  %v16290_v50 = vld [vmem:[%s24048_s1 + $0xb00] ss:$52 sps:$4 sm:$0xff]  }
  0x31   :  { %v16287_v49 = vld [vmem:[%s24048_s1 + $0xaf8] ss:$52 sps:$4 sm:$0xff]  }
  0x33   :  { %4663 = vmatpush1.bf16.msra.mxu0 %v16198_v51  ;;  %4835 = vmatpush1.bf16.msra.mxu1 %v16199_v52  ;;  %v16295_v51 = vld [vmem:[%s24048_s1 + $0xb64] ss:$52 sps:$4 sm:$0xff]   ;;  %v16298_v52 = vld [vmem:[%s24048_s1 + $0xb6c] ss:$52 sps:$4 sm:$0xff]  }
  0x34   :  { %4664 = vmatprep.subr.bf16.mxu0 %v16200_v53  ;;  %4836 = vmatprep.subr.bf16.mxu1 %v16202_v54  ;;  %v16293_v53 = vld [vmem:[%s24048_s1 + $0xb60] ss:$52 sps:$4 sm:$0xff]   ;;  %v16296_v54 = vld [vmem:[%s24048_s1 + $0xb68] ss:$52 sps:$4 sm:$0xff]  }
  0x37   :  { %4665 = vmatpush1.bf16.msra.mxu0 %v16204_v55  ;;  %4837 = vmatpush1.bf16.msra.mxu1 %v16205_v56  ;;  %v16301_v55 = vld [vmem:[%s24048_s1 + $0xbcc] ss:$52 sps:$4 sm:$0xff]   ;;  %v16304_v56 = vld [vmem:[%s24048_s1 + $0xbd4] ss:$52 sps:$4 sm:$0xff]  }
  0x38   :  { %4666 = vmatprep.subr.bf16.mxu0 %v16206_v57  ;;  %4838 = vmatprep.subr.bf16.mxu1 %v16208_v58  ;;  %v16299_v57 = vld [vmem:[%s24048_s1 + $0xbc8] ss:$52 sps:$4 sm:$0xff]   ;;  %v16302_v58 = vld [vmem:[%s24048_s1 + $0xbd0] ss:$52 sps:$4 sm:$0xff]  }
  0x3b   :  { %4667 = vmatpush1.bf16.msra.mxu0 %v16210_v59  ;;  %4839 = vmatpush1.bf16.msra.mxu1 %v16211_v60  ;;  %v16307_v59 = vld [vmem:[%s24048_s1 + $0xc34] ss:$52 sps:$4 sm:$0xff]   ;;  %v16310_v60 = vld [vmem:[%s24048_s1 + $0xc3c] ss:$52 sps:$4 sm:$0xff]  }
  0x3c   :  { %4668 = vmatprep.subr.bf16.mxu0 %v16212_v61  ;;  %4840 = vmatprep.subr.bf16.mxu1 %v16214_v62  ;;  %v16305_v61 = vld [vmem:[%s24048_s1 + $0xc30] ss:$52 sps:$4 sm:$0xff]   ;;  %v16308_v62 = vld [vmem:[%s24048_s1 + $0xc38] ss:$52 sps:$4 sm:$0xff]  }
  0x3f   :  { %4669 = vmatpush1.bf16.msra.mxu0 %v16216_v63  ;;  %4841 = vmatpush1.bf16.msra.mxu1 %v16217_v0  ;;  %v16313_v63 = vld [vmem:[%s24048_s1 + $0xc9c] ss:$52 sps:$4 sm:$0xff]   ;;  %v16316_v0 = vld [vmem:[%s24048_s1 + $0xca4] ss:$52 sps:$4 sm:$0xff]  }
  0x40   :  { %4681 = vmatprep.subr.bf16.mxu0 %v16222_v1  ;;  %4853 = vmatprep.subr.bf16.mxu1 %v16225_v2  ;;  %v16311_v1 = vld [vmem:[%s24048_s1 + $0xc98] ss:$52 sps:$4 sm:$0xff]   ;;  %v16314_v2 = vld [vmem:[%s24048_s1 + $0xca0] ss:$52 sps:$4 sm:$0xff]  }
  0x42   :  { %4671 = vmatmul.mubr.bf16.vlgmr.msra.gmra.mrb[0].mxu0 %v16226_v5  ;;  %4843 = vmatmul.mubr.bf16.vlgmr.msra.gmra.mrb[0].mxu1 %v16226_v5  ;;  %v16319_v5 = vld [vmem:[%s24048_s1 + $0xd00] ss:$52 sps:$4 sm:$0xff]  }
  0x43   :  { %4682 = vmatpush1.bf16.msra.mxu0 %v16220_v3  ;;  %4854 = vmatpush1.bf16.msra.mxu1 %v16223_v4  ;;  %v16321_v3 = vld [vmem:[%s24048_s1 + $0xd04] ss:$52 sps:$4 sm:$0xff]   ;;  %v16324_v4 = vld [vmem:[%s24048_s1 + $0xd0c] ss:$52 sps:$4 sm:$0xff]  }
  0x44   :  { %4683 = vmatprep.subr.bf16.mxu0 %v16229_v6  ;;  %4855 = vmatprep.subr.bf16.mxu1 %v16232_v7  ;;  %v16322_v6 = vld [vmem:[%s24048_s1 + $0xd08] ss:$52 sps:$4 sm:$0xff]  }
  0x45   :  { %4713 = vmatprep.mubr.bf16.mxu0 %v16317_v29  ;;  %4885 = vmatprep.mubr.bf16.mxu1 %v16317_v29  ;;  %v16325_v7 = vld [vmem:[%s24049_s0 + $0x8] ss:$28 sps:$4 sm:$0xff]  }
  0x46   :  { %v16358_v29 = vld [vmem:[%s24048_s1 + $0xf74] ss:$52 sps:$4 sm:$0xff]  }
  0x47   :  { %4684 = vmatpush1.bf16.msra.mxu0 %v16227_v8  ;;  %4856 = vmatpush1.bf16.msra.mxu1 %v16230_v9  ;;  %v16328_v8 = vld [vmem:[%s24048_s1 + $0xd6c] ss:$52 sps:$4 sm:$0xff]   ;;  %v16331_v9 = vld [vmem:[%s24048_s1 + $0xd74] ss:$52 sps:$4 sm:$0xff]  }
  0x48   :  { %4685 = vmatprep.subr.bf16.mxu0 %v16235_v10  ;;  %4857 = vmatprep.subr.bf16.mxu1 %v16238_v11  ;;  %v16326_v10 = vld [vmem:[%s24048_s1 + $0xd68] ss:$52 sps:$4 sm:$0xff]   ;;  %v16416_v11 = vld [vmem:[%s24049_s0 + $0x14] ss:$28 sps:$4 sm:$0xff]  }
  0x4b   :  { %4686 = vmatpush1.bf16.msra.mxu0 %v16233_v12  ;;  %4858 = vmatpush1.bf16.msra.mxu1 %v16236_v13  ;;  %v16329_v12 = vld [vmem:[%s24048_s1 + $0xd70] ss:$52 sps:$4 sm:$0xff]   ;;  %v16334_v13 = vld [vmem:[%s24048_s1 + $0xdd4] ss:$52 sps:$4 sm:$0xff]  }
  0x4c   :  { %4687 = vmatprep.subr.bf16.mxu0 %v16241_v14  ;;  %4859 = vmatprep.subr.bf16.mxu1 %v16244_v15  ;;  %v16337_v14 = vld [vmem:[%s24048_s1 + $0xddc] ss:$52 sps:$4 sm:$0xff]  }
  0x4d   :  { %v16332_v15 = vld [vmem:[%s24048_s1 + $0xdd0] ss:$52 sps:$4 sm:$0xff]  }
  0x4f   :  { %4688 = vmatpush1.bf16.msra.mxu0 %v16239_v16  ;;  %4860 = vmatpush1.bf16.msra.mxu1 %v16242_v17  ;;  %v16335_v16 = vld [vmem:[%s24048_s1 + $0xdd8] ss:$52 sps:$4 sm:$0xff]   ;;  %v16340_v17 = vld [vmem:[%s24048_s1 + $0xe3c] ss:$52 sps:$4 sm:$0xff]  }
  0x50   :  { %4689 = vmatprep.subr.bf16.mxu0 %v16247_v18  ;;  %4861 = vmatprep.subr.bf16.mxu1 %v16250_v19  ;;  %v16343_v18 = vld [vmem:[%s24048_s1 + $0xe44] ss:$52 sps:$4 sm:$0xff]  }
  0x51   :  { %v16338_v19 = vld [vmem:[%s24048_s1 + $0xe38] ss:$52 sps:$4 sm:$0xff]  }
  0x53   :  { %4690 = vmatpush1.bf16.msra.mxu0 %v16245_v20  ;;  %4862 = vmatpush1.bf16.msra.mxu1 %v16248_v21  ;;  %v16341_v20 = vld [vmem:[%s24048_s1 + $0xe40] ss:$52 sps:$4 sm:$0xff]   ;;  %v16346_v21 = vld [vmem:[%s24048_s1 + $0xea4] ss:$52 sps:$4 sm:$0xff]  }
  0x54   :  { %4691 = vmatprep.subr.bf16.mxu0 %v16253_v22  ;;  %4863 = vmatprep.subr.bf16.mxu1 %v16256_v23  ;;  %v16349_v22 = vld [vmem:[%s24048_s1 + $0xeac] ss:$52 sps:$4 sm:$0xff]  }
  0x55   :  { %v16344_v23 = vld [vmem:[%s24048_s1 + $0xea0] ss:$52 sps:$4 sm:$0xff]  }
  0x57   :  { %4692 = vmatpush1.bf16.msra.mxu0 %v16251_v24  ;;  %4864 = vmatpush1.bf16.msra.mxu1 %v16254_v25  ;;  %v16347_v24 = vld [vmem:[%s24048_s1 + $0xea8] ss:$52 sps:$4 sm:$0xff]   ;;  %v16352_v25 = vld [vmem:[%s24048_s1 + $0xf0c] ss:$52 sps:$4 sm:$0xff]  }
  0x58   :  { %4693 = vmatprep.subr.bf16.mxu0 %v16259_v26  ;;  %4865 = vmatprep.subr.bf16.mxu1 %v16262_v27  ;;  %v16355_v26 = vld [vmem:[%s24048_s1 + $0xf14] ss:$52 sps:$4 sm:$0xff]  }
  0x59   :  { %v16350_v27 = vld [vmem:[%s24048_s1 + $0xf08] ss:$52 sps:$4 sm:$0xff]  }
  0x5b   :  { %4694 = vmatpush1.bf16.msra.mxu0 %v16257_v28  ;;  %4866 = vmatpush1.bf16.msra.mxu1 %v16260_v30  ;;  %v16353_v28 = vld [vmem:[%s24048_s1 + $0xf10] ss:$52 sps:$4 sm:$0xff]  }
  0x5c   :  { %4695 = vmatprep.subr.bf16.mxu0 %v16265_v31  ;;  %4867 = vmatprep.subr.bf16.mxu1 %v16268_v32  ;;  %v16361_v30 = vld [vmem:[%s24048_s1 + $0xf7c] ss:$52 sps:$4 sm:$0xff]   ;;  %v16359_v32 = vld [vmem:[%s24048_s1 + $0xf78] ss:$52 sps:$4 sm:$0xff]  }
  0x5d   :  { %v16356_v31 = vld [vmem:[%s24048_s1 + $0xf70] ss:$52 sps:$4 sm:$0xff]  }
  0x5f   :  { %4696 = vmatpush1.bf16.msra.mxu0 %v16263_v33  ;;  %4868 = vmatpush1.bf16.msra.mxu1 %v16266_v34  ;;  %v16364_v33 = vld [vmem:[%s24048_s1 + $0xfdc] ss:$52 sps:$4 sm:$0xff]   ;;  %v16367_v34 = vld [vmem:[%s24048_s1 + $0xfe4] ss:$52 sps:$4 sm:$0xff]  }
  0x60   :  { %4697 = vmatprep.subr.bf16.mxu0 %v16271_v35  ;;  %4869 = vmatprep.subr.bf16.mxu1 %v16274_v36  ;;  %v16362_v35 = vld [vmem:[%s24048_s1 + $0xfd8] ss:$52 sps:$4 sm:$0xff]   ;;  %v16365_v36 = vld [vmem:[%s24048_s1 + $0xfe0] ss:$52 sps:$4 sm:$0xff]  }
  0x63   :  { %4698 = vmatpush1.bf16.msra.mxu0 %v16269_v37  ;;  %4870 = vmatpush1.bf16.msra.mxu1 %v16272_v38  ;;  %v16370_v37 = vld [vmem:[%s24048_s1 + $0x1044] ss:$52 sps:$4 sm:$0xff]   ;;  %v16373_v38 = vld [vmem:[%s24048_s1 + $0x104c] ss:$52 sps:$4 sm:$0xff]  }
  0x64   :  { %4699 = vmatprep.subr.bf16.mxu0 %v16277_v39  ;;  %4871 = vmatprep.subr.bf16.mxu1 %v16280_v40  ;;  %v16368_v39 = vld [vmem:[%s24048_s1 + $0x1040] ss:$52 sps:$4 sm:$0xff]   ;;  %v16371_v40 = vld [vmem:[%s24048_s1 + $0x1048] ss:$52 sps:$4 sm:$0xff]  }
  0x67   :  { %4700 = vmatpush1.bf16.msra.mxu0 %v16275_v41  ;;  %4872 = vmatpush1.bf16.msra.mxu1 %v16278_v42  ;;  %v16376_v41 = vld [vmem:[%s24048_s1 + $0x10ac] ss:$52 sps:$4 sm:$0xff]   ;;  %v16379_v42 = vld [vmem:[%s24048_s1 + $0x10b4] ss:$52 sps:$4 sm:$0xff]  }
  0x68   :  { %4701 = vmatprep.subr.bf16.mxu0 %v16283_v43  ;;  %4873 = vmatprep.subr.bf16.mxu1 %v16286_v44  ;;  %v16374_v43 = vld [vmem:[%s24048_s1 + $0x10a8] ss:$52 sps:$4 sm:$0xff]   ;;  %v16377_v44 = vld [vmem:[%s24048_s1 + $0x10b0] ss:$52 sps:$4 sm:$0xff]  }
  0x6b   :  { %4702 = vmatpush1.bf16.msra.mxu0 %v16281_v45  ;;  %4874 = vmatpush1.bf16.msra.mxu1 %v16284_v46  ;;  %v16382_v45 = vld [vmem:[%s24048_s1 + $0x1114] ss:$52 sps:$4 sm:$0xff]   ;;  %v16385_v46 = vld [vmem:[%s24048_s1 + $0x111c] ss:$52 sps:$4 sm:$0xff]  }
  0x6c   :  { %4703 = vmatprep.subr.bf16.mxu0 %v16289_v47  ;;  %4875 = vmatprep.subr.bf16.mxu1 %v16292_v48  ;;  %v16380_v47 = vld [vmem:[%s24048_s1 + $0x1110] ss:$52 sps:$4 sm:$0xff]   ;;  %v16383_v48 = vld [vmem:[%s24048_s1 + $0x1118] ss:$52 sps:$4 sm:$0xff]  }
  0x6f   :  { %4704 = vmatpush1.bf16.msra.mxu0 %v16287_v49  ;;  %4876 = vmatpush1.bf16.msra.mxu1 %v16290_v50  ;;  %v16388_v49 = vld [vmem:[%s24048_s1 + $0x117c] ss:$52 sps:$4 sm:$0xff]   ;;  %v16391_v50 = vld [vmem:[%s24048_s1 + $0x1184] ss:$52 sps:$4 sm:$0xff]  }
  0x70   :  { %4705 = vmatprep.subr.bf16.mxu0 %v16295_v51  ;;  %4877 = vmatprep.subr.bf16.mxu1 %v16298_v52  ;;  %v16386_v51 = vld [vmem:[%s24048_s1 + $0x1178] ss:$52 sps:$4 sm:$0xff]   ;;  %v16389_v52 = vld [vmem:[%s24048_s1 + $0x1180] ss:$52 sps:$4 sm:$0xff]  }
  0x73   :  { %4706 = vmatpush1.bf16.msra.mxu0 %v16293_v53  ;;  %4878 = vmatpush1.bf16.msra.mxu1 %v16296_v54  ;;  %v16394_v53 = vld [vmem:[%s24048_s1 + $0x11e4] ss:$52 sps:$4 sm:$0xff]   ;;  %v16397_v54 = vld [vmem:[%s24048_s1 + $0x11ec] ss:$52 sps:$4 sm:$0xff]  }
  0x74   :  { %4707 = vmatprep.subr.bf16.mxu0 %v16301_v55  ;;  %4879 = vmatprep.subr.bf16.mxu1 %v16304_v56  ;;  %v16392_v55 = vld [vmem:[%s24048_s1 + $0x11e0] ss:$52 sps:$4 sm:$0xff]   ;;  %v16395_v56 = vld [vmem:[%s24048_s1 + $0x11e8] ss:$52 sps:$4 sm:$0xff]  }
  0x77   :  { %4708 = vmatpush1.bf16.msra.mxu0 %v16299_v57  ;;  %4880 = vmatpush1.bf16.msra.mxu1 %v16302_v58  ;;  %v16400_v57 = vld [vmem:[%s24048_s1 + $0x124c] ss:$52 sps:$4 sm:$0xff]   ;;  %v16403_v58 = vld [vmem:[%s24048_s1 + $0x1254] ss:$52 sps:$4 sm:$0xff]  }
  0x78   :  { %4709 = vmatprep.subr.bf16.mxu0 %v16307_v59  ;;  %4881 = vmatprep.subr.bf16.mxu1 %v16310_v60  ;;  %v16398_v59 = vld [vmem:[%s24048_s1 + $0x1248] ss:$52 sps:$4 sm:$0xff]   ;;  %v16401_v60 = vld [vmem:[%s24048_s1 + $0x1250] ss:$52 sps:$4 sm:$0xff]  }
  0x7b   :  { %4710 = vmatpush1.bf16.msra.mxu0 %v16305_v61  ;;  %4882 = vmatpush1.bf16.msra.mxu1 %v16308_v62  ;;  %v16406_v61 = vld [vmem:[%s24048_s1 + $0x12b4] ss:$52 sps:$4 sm:$0xff]   ;;  %v16409_v62 = vld [vmem:[%s24048_s1 + $0x12bc] ss:$52 sps:$4 sm:$0xff]  }
  0x7c   :  { %4711 = vmatprep.subr.bf16.mxu0 %v16313_v63  ;;  %4883 = vmatprep.subr.bf16.mxu1 %v16316_v0  ;;  %v16404_v63 = vld [vmem:[%s24048_s1 + $0x12b0] ss:$52 sps:$4 sm:$0xff]   ;;  %v16407_v0 = vld [vmem:[%s24048_s1 + $0x12b8] ss:$52 sps:$4 sm:$0xff]  }
  0x7f   :  { %4712 = vmatpush1.bf16.msra.mxu0 %v16311_v1  ;;  %4884 = vmatpush1.bf16.msra.mxu1 %v16314_v2  ;;  %v16412_v1 = vld [vmem:[%s24048_s1 + $0x131c] ss:$52 sps:$4 sm:$0xff]   ;;  %v16415_v2 = vld [vmem:[%s24048_s1 + $0x1324] ss:$52 sps:$4 sm:$0xff]  }
  0x80   :  { %4724 = vmatprep.subr.bf16.mxu0 %v16321_v3  ;;  %4896 = vmatprep.subr.bf16.mxu1 %v16324_v4  ;;  %v16410_v3 = vld [vmem:[%s24048_s1 + $0x1318] ss:$52 sps:$4 sm:$0xff]   ;;  %v16413_v4 = vld [vmem:[%s24048_s1 + $0x1320] ss:$52 sps:$4 sm:$0xff]  }
  0x82   :  { %4714 = vmatmul.mubr.bf16.vlgmr.msra.gmra.mrb[0].mxu0 %v16325_v7  ;;  %4886 = vmatmul.mubr.bf16.vlgmr.msra.gmra.mrb[0].mxu1 %v16325_v7  ;;  %v16418_v7 = vld [vmem:[%s24048_s1 + $0x1380] ss:$52 sps:$4 sm:$0xff]  }
  0x83   :  { %4725 = vmatpush1.bf16.msra.mxu0 %v16319_v5  ;;  %4897 = vmatpush1.bf16.msra.mxu1 %v16322_v6  ;;  %v16420_v5 = vld [vmem:[%s24048_s1 + $0x1384] ss:$52 sps:$4 sm:$0xff]   ;;  %v16423_v6 = vld [vmem:[%s24048_s1 + $0x138c] ss:$52 sps:$4 sm:$0xff]  }
  0x84   :  { %4726 = vmatprep.subr.bf16.mxu0 %v16328_v8  ;;  %4898 = vmatprep.subr.bf16.mxu1 %v16331_v9  ;;  %v16424_v8 = vld [vmem:[%s24049_s0 + $0x10] ss:$28 sps:$4 sm:$0xff]   ;;  %v16421_v9 = vld [vmem:[%s24048_s1 + $0x1388] ss:$52 sps:$4 sm:$0xff]  }
  0x85   :  { %4756 = vmatprep.mubr.bf16.mxu0 %v16416_v11  ;;  %4928 = vmatprep.mubr.bf16.mxu1 %v16416_v11  ;;  %v16430_v11 = vld [vmem:[%s24048_s1 + $0x13f4] ss:$52 sps:$4 sm:$0xff]  }
  0x87   :  { %4727 = vmatpush1.bf16.msra.mxu0 %v16326_v10  ;;  %4899 = vmatpush1.bf16.msra.mxu1 %v16329_v12  ;;  %v16427_v10 = vld [vmem:[%s24048_s1 + $0x13ec] ss:$52 sps:$4 sm:$0xff]   ;;  %v16425_v12 = vld [vmem:[%s24048_s1 + $0x13e8] ss:$52 sps:$4 sm:$0xff]  }
  0x88   :  { %4728 = vmatprep.subr.bf16.mxu0 %v16334_v13  ;;  %4900 = vmatprep.subr.bf16.mxu1 %v16337_v14  ;;  %v16428_v13 = vld [vmem:[%s24048_s1 + $0x13f0] ss:$52 sps:$4 sm:$0xff]   ;;  %v16433_v14 = vld [vmem:[%s24048_s1 + $0x1454] ss:$52 sps:$4 sm:$0xff]  }
  0x8b   :  { %4729 = vmatpush1.bf16.msra.mxu0 %v16332_v15  ;;  %4901 = vmatpush1.bf16.msra.mxu1 %v16335_v16  ;;  %v16436_v15 = vld [vmem:[%s24048_s1 + $0x145c] ss:$52 sps:$4 sm:$0xff]   ;;  %v18546_v16 = vmov 0  }
  0x8c   :  { %4730 = vmatprep.subr.bf16.mxu0 %v16340_v17  ;;  %4902 = vmatprep.subr.bf16.mxu1 %v16343_v18  ;;  %v16431_v17 = vld [vmem:[%s24048_s1 + $0x1450] ss:$52 sps:$4 sm:$0xff]   ;;  %v16434_v18 = vld [vmem:[%s24048_s1 + $0x1458] ss:$52 sps:$4 sm:$0xff]  }
  0x8f   :  { %4731 = vmatpush1.bf16.msra.mxu0 %v16338_v19  ;;  %4903 = vmatpush1.bf16.msra.mxu1 %v16341_v20  ;;  %v16439_v19 = vld [vmem:[%s24048_s1 + $0x14bc] ss:$52 sps:$4 sm:$0xff]   ;;  %v16442_v20 = vld [vmem:[%s24048_s1 + $0x14c4] ss:$52 sps:$4 sm:$0xff]  }
  0x90   :  { %4732 = vmatprep.subr.bf16.mxu0 %v16346_v21  ;;  %4904 = vmatprep.subr.bf16.mxu1 %v16349_v22  ;;  %v16437_v21 = vld [vmem:[%s24048_s1 + $0x14b8] ss:$52 sps:$4 sm:$0xff]   ;;  %v16440_v22 = vld [vmem:[%s24048_s1 + $0x14c0] ss:$52 sps:$4 sm:$0xff]  }
  0x93   :  { %4733 = vmatpush1.bf16.msra.mxu0 %v16344_v23  ;;  %4905 = vmatpush1.bf16.msra.mxu1 %v16347_v24  ;;  %v16445_v23 = vld [vmem:[%s24048_s1 + $0x1524] ss:$52 sps:$4 sm:$0xff]   ;;  %v16448_v24 = vld [vmem:[%s24048_s1 + $0x152c] ss:$52 sps:$4 sm:$0xff]  }
  0x94   :  { %4734 = vmatprep.subr.bf16.mxu0 %v16352_v25  ;;  %4906 = vmatprep.subr.bf16.mxu1 %v16355_v26  ;;  %v16443_v25 = vld [vmem:[%s24048_s1 + $0x1520] ss:$52 sps:$4 sm:$0xff]   ;;  %v16446_v26 = vld [vmem:[%s24048_s1 + $0x1528] ss:$52 sps:$4 sm:$0xff]  }
  0x97   :  { %4735 = vmatpush1.bf16.msra.mxu0 %v16350_v27  ;;  %4907 = vmatpush1.bf16.msra.mxu1 %v16353_v28  ;;  %v16451_v27 = vld [vmem:[%s24048_s1 + $0x158c] ss:$52 sps:$4 sm:$0xff]   ;;  %v16454_v28 = vld [vmem:[%s24048_s1 + $0x1594] ss:$52 sps:$4 sm:$0xff]  }
  0x98   :  { %4736 = vmatprep.subr.bf16.mxu0 %v16358_v29  ;;  %4908 = vmatprep.subr.bf16.mxu1 %v16361_v30  ;;  %v16449_v29 = vld [vmem:[%s24048_s1 + $0x1588] ss:$52 sps:$4 sm:$0xff]   ;;  %v16452_v30 = vld [vmem:[%s24048_s1 + $0x1590] ss:$52 sps:$4 sm:$0xff]  }
  0x9b   :  { %4737 = vmatpush1.bf16.msra.mxu0 %v16356_v31  ;;  %4909 = vmatpush1.bf16.msra.mxu1 %v16359_v32  ;;  %v16457_v31 = vld [vmem:[%s24048_s1 + $0x15f4] ss:$52 sps:$4 sm:$0xff]   ;;  %v16460_v32 = vld [vmem:[%s24048_s1 + $0x15fc] ss:$52 sps:$4 sm:$0xff]  }
  0x9c   :  { %4738 = vmatprep.subr.bf16.mxu0 %v16364_v33  ;;  %4910 = vmatprep.subr.bf16.mxu1 %v16367_v34  ;;  %v16455_v33 = vld [vmem:[%s24048_s1 + $0x15f0] ss:$52 sps:$4 sm:$0xff]   ;;  %v16458_v34 = vld [vmem:[%s24048_s1 + $0x15f8] ss:$52 sps:$4 sm:$0xff]  }
  0x9f   :  { %4739 = vmatpush1.bf16.msra.mxu0 %v16362_v35  ;;  %4911 = vmatpush1.bf16.msra.mxu1 %v16365_v36  ;;  %v16463_v35 = vld [vmem:[%s24048_s1 + $0x165c] ss:$52 sps:$4 sm:$0xff]   ;;  %v16466_v36 = vld [vmem:[%s24048_s1 + $0x1664] ss:$52 sps:$4 sm:$0xff]  }
  0xa0   :  { %4740 = vmatprep.subr.bf16.mxu0 %v16370_v37  ;;  %4912 = vmatprep.subr.bf16.mxu1 %v16373_v38  ;;  %v16461_v37 = vld [vmem:[%s24048_s1 + $0x1658] ss:$52 sps:$4 sm:$0xff]   ;;  %v16464_v38 = vld [vmem:[%s24048_s1 + $0x1660] ss:$52 sps:$4 sm:$0xff]  }
  0xa3   :  { %4741 = vmatpush1.bf16.msra.mxu0 %v16368_v39  ;;  %4913 = vmatpush1.bf16.msra.mxu1 %v16371_v40  ;;  %v16470_v39 = vld [vmem:[%s24048_s1 + $0x14] ss:$52 sps:$4 sm:$0xff]   ;;  %v16473_v40 = vld [vmem:[%s24048_s1 + $0x1c] ss:$52 sps:$4 sm:$0xff]  }
  0xa4   :  { %4742 = vmatprep.subr.bf16.mxu0 %v16376_v41  ;;  %4914 = vmatprep.subr.bf16.mxu1 %v16379_v42  ;;  %v16467_v41 = vld [vmem:[%s24049_s0 + $0x18] ss:$28 sps:$4 sm:$0xff]   ;;  %v16468_v42 = vld [vmem:[%s24048_s1 + $0x10] ss:$52 sps:$4 sm:$0xff]  }
  0xa7   :  { %4743 = vmatpush1.bf16.msra.mxu0 %v16374_v43  ;;  %4915 = vmatpush1.bf16.msra.mxu1 %v16377_v44  ;;  %v16471_v43 = vld [vmem:[%s24048_s1 + $0x18] ss:$52 sps:$4 sm:$0xff]   ;;  %v16476_v44 = vld [vmem:[%s24048_s1 + $0x7c] ss:$52 sps:$4 sm:$0xff]  }
  0xa8   :  { %4744 = vmatprep.subr.bf16.mxu0 %v16382_v45  ;;  %4916 = vmatprep.subr.bf16.mxu1 %v16385_v46  ;;  %v16479_v45 = vld [vmem:[%s24048_s1 + $0x84] ss:$52 sps:$4 sm:$0xff]  }
  0xa9   :  { %v16474_v46 = vld [vmem:[%s24048_s1 + $0x78] ss:$52 sps:$4 sm:$0xff]  }
  0xab   :  { %4745 = vmatpush1.bf16.msra.mxu0 %v16380_v47  ;;  %4917 = vmatpush1.bf16.msra.mxu1 %v16383_v48  ;;  %v16477_v47 = vld [vmem:[%s24048_s1 + $0x80] ss:$52 sps:$4 sm:$0xff]   ;;  %v16482_v48 = vld [vmem:[%s24048_s1 + $0xe4] ss:$52 sps:$4 sm:$0xff]  }
  0xac   :  { %4746 = vmatprep.subr.bf16.mxu0 %v16388_v49  ;;  %4918 = vmatprep.subr.bf16.mxu1 %v16391_v50  ;;  %v16485_v49 = vld [vmem:[%s24048_s1 + $0xec] ss:$52 sps:$4 sm:$0xff]  }
  0xad   :  { %v18528_v50 = vld [vmem:[%s24049_s0 + $0x4] ss:$28 sps:$4 sm:$0xff]  }
  0xaf   :  { %4747 = vmatpush1.bf16.msra.mxu0 %v16386_v51  ;;  %4919 = vmatpush1.bf16.msra.mxu1 %v16389_v52  ;;  %v16480_v51 = vld [vmem:[%s24048_s1 + $0xe0] ss:$52 sps:$4 sm:$0xff]   ;;  %v16483_v52 = vld [vmem:[%s24048_s1 + $0xe8] ss:$52 sps:$4 sm:$0xff]  }
  0xb0   :  { %4748 = vmatprep.subr.bf16.mxu0 %v16394_v53  ;;  %4920 = vmatprep.subr.bf16.mxu1 %v16397_v54  ;;  %v16488_v53 = vld [vmem:[%s24048_s1 + $0x14c] ss:$52 sps:$4 sm:$0xff]   ;;  %v16491_v54 = vld [vmem:[%s24048_s1 + $0x154] ss:$52 sps:$4 sm:$0xff]  }
  0xb3   :  { %4749 = vmatpush1.bf16.msra.mxu0 %v16392_v55  ;;  %4921 = vmatpush1.bf16.msra.mxu1 %v16395_v56  ;;  %v16486_v55 = vld [vmem:[%s24048_s1 + $0x148] ss:$52 sps:$4 sm:$0xff]   ;;  %v16489_v56 = vld [vmem:[%s24048_s1 + $0x150] ss:$52 sps:$4 sm:$0xff]  }
  0xb4   :  { %4750 = vmatprep.subr.bf16.mxu0 %v16400_v57  ;;  %4922 = vmatprep.subr.bf16.mxu1 %v16403_v58  ;;  %v16494_v57 = vld [vmem:[%s24048_s1 + $0x1b4] ss:$52 sps:$4 sm:$0xff]   ;;  %v16497_v58 = vld [vmem:[%s24048_s1 + $0x1bc] ss:$52 sps:$4 sm:$0xff]  }
  0xb7   :  { %4751 = vmatpush1.bf16.msra.mxu0 %v16398_v59  ;;  %4923 = vmatpush1.bf16.msra.mxu1 %v16401_v60  ;;  %v16492_v59 = vld [vmem:[%s24048_s1 + $0x1b0] ss:$52 sps:$4 sm:$0xff]   ;;  %v16495_v60 = vld [vmem:[%s24048_s1 + $0x1b8] ss:$52 sps:$4 sm:$0xff]  }
  0xb8   :  { %4752 = vmatprep.subr.bf16.mxu0 %v16406_v61  ;;  %4924 = vmatprep.subr.bf16.mxu1 %v16409_v62  ;;  %v16500_v61 = vld [vmem:[%s24048_s1 + $0x21c] ss:$52 sps:$4 sm:$0xff]   ;;  %v16503_v62 = vld [vmem:[%s24048_s1 + $0x224] ss:$52 sps:$4 sm:$0xff]  }
  0xbb   :  { %4753 = vmatpush1.bf16.msra.mxu0 %v16404_v63  ;;  %4925 = vmatpush1.bf16.msra.mxu1 %v16407_v0  ;;  %v16498_v63 = vld [vmem:[%s24048_s1 + $0x218] ss:$52 sps:$4 sm:$0xff]   ;;  %v16501_v0 = vld [vmem:[%s24048_s1 + $0x220] ss:$52 sps:$4 sm:$0xff]  }
  0xbc   :  { %4754 = vmatprep.subr.bf16.mxu0 %v16412_v1  ;;  %4926 = vmatprep.subr.bf16.mxu1 %v16415_v2  ;;  %v16506_v1 = vld [vmem:[%s24048_s1 + $0x284] ss:$52 sps:$4 sm:$0xff]   ;;  %v16509_v2 = vld [vmem:[%s24048_s1 + $0x28c] ss:$52 sps:$4 sm:$0xff]  }
  0xbf   :  { %4755 = vmatpush1.bf16.msra.mxu0 %v16410_v3  ;;  %4927 = vmatpush1.bf16.msra.mxu1 %v16413_v4  ;;  %v16504_v3 = vld [vmem:[%s24048_s1 + $0x280] ss:$52 sps:$4 sm:$0xff]   ;;  %v16507_v4 = vld [vmem:[%s24048_s1 + $0x288] ss:$52 sps:$4 sm:$0xff]  }
  0xc0   :  { %4767 = vmatprep.subr.bf16.mxu0 %v16420_v5  ;;  %4939 = vmatprep.subr.bf16.mxu1 %v16423_v6  ;;  %v16512_v5 = vld [vmem:[%s24048_s1 + $0x2ec] ss:$52 sps:$4 sm:$0xff]   ;;  %v16515_v6 = vld [vmem:[%s24048_s1 + $0x2f4] ss:$52 sps:$4 sm:$0xff]  }
  0xc2   :  { %4757 = vmatmul.mubr.bf16.vlgmr.msra.gmra.mrb[0].mxu0 %v16424_v8  ;;  %4929 = vmatmul.mubr.bf16.vlgmr.msra.gmra.mrb[0].mxu1 %v16424_v8  ;;  %v16513_v8 = vld [vmem:[%s24048_s1 + $0x2f0] ss:$52 sps:$4 sm:$0xff]  }
  0xc3   :  { %4768 = vmatpush1.bf16.msra.mxu0 %v16418_v7  ;;  %4940 = vmatpush1.bf16.msra.mxu1 %v16421_v9  ;;  %v16510_v7 = vld [vmem:[%s24048_s1 + $0x2e8] ss:$52 sps:$4 sm:$0xff]  }
  0xc4   :  { %4769 = vmatprep.subr.bf16.mxu0 %v16427_v10  ;;  %4941 = vmatprep.subr.bf16.mxu1 %v16430_v11  ;;  %v16518_v9 = vld [vmem:[%s24048_s1 + $0x354] ss:$52 sps:$4 sm:$0xff]   ;;  %v16521_v10 = vld [vmem:[%s24048_s1 + $0x35c] ss:$52 sps:$4 sm:$0xff]  }
  0xc5   :  { %4799 = vmatprep.mubr.bf16.mxu0 %v18546_v16  ;;  %4971 = vmatprep.mubr.bf16.mxu1 %v18546_v16  ;;  %v16516_v11 = vld [vmem:[%s24048_s1 + $0x350] ss:$52 sps:$4 sm:$0xff]  }
  0xc7   :  { %4770 = vmatpush1.bf16.msra.mxu0 %v16425_v12  ;;  %4942 = vmatpush1.bf16.msra.mxu1 %v16428_v13  ;;  %v16519_v12 = vld [vmem:[%s24048_s1 + $0x358] ss:$52 sps:$4 sm:$0xff]   ;;  %v16524_v13 = vld [vmem:[%s24048_s1 + $0x3bc] ss:$52 sps:$4 sm:$0xff]  }
  0xc8   :  { %4771 = vmatprep.subr.bf16.mxu0 %v16433_v14  ;;  %4943 = vmatprep.subr.bf16.mxu1 %v16436_v15  ;;  %v16527_v14 = vld [vmem:[%s24048_s1 + $0x3c4] ss:$52 sps:$4 sm:$0xff]  }
  0xc9   :  { %v16522_v15 = vld [vmem:[%s24048_s1 + $0x3b8] ss:$52 sps:$4 sm:$0xff]  }
  0xcb   :  { %4772 = vmatpush1.bf16.msra.mxu0 %v16431_v17  ;;  %4944 = vmatpush1.bf16.msra.mxu1 %v16434_v18  ;;  %v16525_v17 = vld [vmem:[%s24048_s1 + $0x3c0] ss:$52 sps:$4 sm:$0xff]   ;;  %v16530_v18 = vld [vmem:[%s24048_s1 + $0x424] ss:$52 sps:$4 sm:$0xff]  }
  0xcc   :  { %4773 = vmatprep.subr.bf16.mxu0 %v16439_v19  ;;  %4945 = vmatprep.subr.bf16.mxu1 %v16442_v20  ;;  %v16533_v19 = vld [vmem:[%s24048_s1 + $0x42c] ss:$52 sps:$4 sm:$0xff]  }
  0xcd   :  { %v16528_v20 = vld [vmem:[%s24048_s1 + $0x420] ss:$52 sps:$4 sm:$0xff]  }
  0xcf   :  { %4774 = vmatpush1.bf16.msra.mxu0 %v16437_v21  ;;  %4946 = vmatpush1.bf16.msra.mxu1 %v16440_v22  ;;  %v16531_v21 = vld [vmem:[%s24048_s1 + $0x428] ss:$52 sps:$4 sm:$0xff]   ;;  %v16536_v22 = vld [vmem:[%s24048_s1 + $0x48c] ss:$52 sps:$4 sm:$0xff]  }
  0xd0   :  { %4775 = vmatprep.subr.bf16.mxu0 %v16445_v23  ;;  %4947 = vmatprep.subr.bf16.mxu1 %v16448_v24  ;;  %v16539_v23 = vld [vmem:[%s24048_s1 + $0x494] ss:$52 sps:$4 sm:$0xff]  }
  0xd1   :  { %v16534_v24 = vld [vmem:[%s24048_s1 + $0x488] ss:$52 sps:$4 sm:$0xff]  }
  0xd3   :  { %4776 = vmatpush1.bf16.msra.mxu0 %v16443_v25  ;;  %4948 = vmatpush1.bf16.msra.mxu1 %v16446_v26  ;;  %v16537_v25 = vld [vmem:[%s24048_s1 + $0x490] ss:$52 sps:$4 sm:$0xff]   ;;  %v16542_v26 = vld [vmem:[%s24048_s1 + $0x4f4] ss:$52 sps:$4 sm:$0xff]  }
  0xd4   :  { %4777 = vmatprep.subr.bf16.mxu0 %v16451_v27  ;;  %4949 = vmatprep.subr.bf16.mxu1 %v16454_v28  ;;  %v16545_v27 = vld [vmem:[%s24048_s1 + $0x4fc] ss:$52 sps:$4 sm:$0xff]  }
  0xd5   :  { %v16540_v28 = vld [vmem:[%s24048_s1 + $0x4f0] ss:$52 sps:$4 sm:$0xff]  }
  0xd7   :  { %4778 = vmatpush1.bf16.msra.mxu0 %v16449_v29  ;;  %4950 = vmatpush1.bf16.msra.mxu1 %v16452_v30  ;;  %v16543_v29 = vld [vmem:[%s24048_s1 + $0x4f8] ss:$52 sps:$4 sm:$0xff]   ;;  %v16548_v30 = vld [vmem:[%s24048_s1 + $0x55c] ss:$52 sps:$4 sm:$0xff]  }
  0xd8   :  { %4779 = vmatprep.subr.bf16.mxu0 %v16457_v31  ;;  %4951 = vmatprep.subr.bf16.mxu1 %v16460_v32  ;;  %v16551_v31 = vld [vmem:[%s24048_s1 + $0x564] ss:$52 sps:$4 sm:$0xff]  }
  0xd9   :  { %v16546_v32 = vld [vmem:[%s24048_s1 + $0x558] ss:$52 sps:$4 sm:$0xff]  }
  0xdb   :  { %4780 = vmatpush1.bf16.msra.mxu0 %v16455_v33  ;;  %4952 = vmatpush1.bf16.msra.mxu1 %v16458_v34  ;;  %v16549_v33 = vld [vmem:[%s24048_s1 + $0x560] ss:$52 sps:$4 sm:$0xff]   ;;  %v16554_v34 = vld [vmem:[%s24048_s1 + $0x5c4] ss:$52 sps:$4 sm:$0xff]  }
  0xdc   :  { %4781 = vmatprep.subr.bf16.mxu0 %v16463_v35  ;;  %4953 = vmatprep.subr.bf16.mxu1 %v16466_v36  ;;  %v16557_v35 = vld [vmem:[%s24048_s1 + $0x5cc] ss:$52 sps:$4 sm:$0xff]  }
  0xdd   :  { %v16552_v36 = vld [vmem:[%s24048_s1 + $0x5c0] ss:$52 sps:$4 sm:$0xff]  }
  0xdf   :  { %4782 = vmatpush1.bf16.msra.mxu0 %v16461_v37  ;;  %4954 = vmatpush1.bf16.msra.mxu1 %v16464_v38  ;;  %v16555_v37 = vld [vmem:[%s24048_s1 + $0x5c8] ss:$52 sps:$4 sm:$0xff]   ;;  %v16560_v38 = vld [vmem:[%s24048_s1 + $0x62c] ss:$52 sps:$4 sm:$0xff]  }
  0xe0   :  { %4982 = vmatprep.subr.bf16.mxu0 %v16470_v39  ;;  %5154 = vmatprep.subr.bf16.mxu1 %v16473_v40  ;;  %v16563_v39 = vld [vmem:[%s24048_s1 + $0x634] ss:$52 sps:$4 sm:$0xff]  }
  0xe1   :  { %v16558_v40 = vld [vmem:[%s24048_s1 + $0x628] ss:$52 sps:$4 sm:$0xff]  }
  0xe2   :  { %4800 = vmatmul.mubr.bf16.vlgmr.msra.gmra.mrb[0].mxu0 %v16467_v41  ;;  %4972 = vmatmul.mubr.bf16.vlgmr.msra.gmra.mrb[0].mxu1 %v16467_v41  ;;  %v16561_v41 = vld [vmem:[%s24048_s1 + $0x630] ss:$52 sps:$4 sm:$0xff]  }
  0xe3   :  { %4983 = vmatpush1.bf16.msra.mxu0 %v16468_v42  ;;  %5155 = vmatpush1.bf16.msra.mxu1 %v16471_v43  ;;  %v16566_v42 = vld [vmem:[%s24048_s1 + $0x694] ss:$52 sps:$4 sm:$0xff]   ;;  %v16569_v43 = vld [vmem:[%s24048_s1 + $0x69c] ss:$52 sps:$4 sm:$0xff]  }
  0xe4   :  { %4984 = vmatprep.subr.bf16.mxu0 %v16476_v44  ;;  %5156 = vmatprep.subr.bf16.mxu1 %v16479_v45  ;;  %v16564_v44 = vld [vmem:[%s24048_s1 + $0x690] ss:$52 sps:$4 sm:$0xff]   ;;  %v16567_v45 = vld [vmem:[%s24048_s1 + $0x698] ss:$52 sps:$4 sm:$0xff]  }
  0xe5   :  { %5014 = vmatprep.mubr.bf16.mxu0 %v18528_v50  ;;  %5186 = vmatprep.mubr.bf16.mxu1 %v18528_v50  ;;  %v16573_v50 = vld [vmem:[%s24048_s1 + $0x700] ss:$52 sps:$4 sm:$0xff]  }
  0xe7   :  { %4985 = vmatpush1.bf16.msra.mxu0 %v16474_v46  ;;  %5157 = vmatpush1.bf16.msra.mxu1 %v16477_v47  ;;  %v16572_v46 = vld [vmem:[%s24048_s1 + $0x6fc] ss:$52 sps:$4 sm:$0xff]   ;;  %v16575_v47 = vld [vmem:[%s24048_s1 + $0x704] ss:$52 sps:$4 sm:$0xff]  }
  0xe8   :  { %4986 = vmatprep.subr.bf16.mxu0 %v16482_v48  ;;  %5158 = vmatprep.subr.bf16.mxu1 %v16485_v49  ;;  %v18529_v48 = vld [vmem:[%s24049_s0] ss:$28 sps:$4 sm:$0xff]   ;;  %v16570_v49 = vld [vmem:[%s24048_s1 + $0x6f8] ss:$52 sps:$4 sm:$0xff]  }
  0xeb   :  { %4987 = vmatpush1.bf16.msra.mxu0 %v16480_v51  ;;  %5159 = vmatpush1.bf16.msra.mxu1 %v16483_v52  ;;  %v16578_v51 = vld [vmem:[%s24048_s1 + $0x764] ss:$52 sps:$4 sm:$0xff]   ;;  %v16581_v52 = vld [vmem:[%s24048_s1 + $0x76c] ss:$52 sps:$4 sm:$0xff]  }
  0xec   :  { %4988 = vmatprep.subr.bf16.mxu0 %v16488_v53  ;;  %5160 = vmatprep.subr.bf16.mxu1 %v16491_v54  ;;  %v18530_v53 = vld [vmem:[%s24049_s0 + $0xc] ss:$28 sps:$4 sm:$0xff]   ;;  %v16576_v54 = vld [vmem:[%s24048_s1 + $0x760] ss:$52 sps:$4 sm:$0xff]  }
  0xef   :  { %4989 = vmatpush1.bf16.msra.mxu0 %v16486_v55  ;;  %5161 = vmatpush1.bf16.msra.mxu1 %v16489_v56  ;;  %v16579_v55 = vld [vmem:[%s24048_s1 + $0x768] ss:$52 sps:$4 sm:$0xff]   ;;  %v16584_v56 = vld [vmem:[%s24048_s1 + $0x7cc] ss:$52 sps:$4 sm:$0xff]  }
  0xf0   :  { %4990 = vmatprep.subr.bf16.mxu0 %v16494_v57  ;;  %5162 = vmatprep.subr.bf16.mxu1 %v16497_v58  ;;  %v16587_v57 = vld [vmem:[%s24048_s1 + $0x7d4] ss:$52 sps:$4 sm:$0xff]  }
  0xf1   :  { %v16582_v58 = vld [vmem:[%s24048_s1 + $0x7c8] ss:$52 sps:$4 sm:$0xff]  }
  0xf3   :  { %4991 = vmatpush1.bf16.msra.mxu0 %v16492_v59  ;;  %5163 = vmatpush1.bf16.msra.mxu1 %v16495_v60  ;;  %v16585_v59 = vld [vmem:[%s24048_s1 + $0x7d0] ss:$52 sps:$4 sm:$0xff]   ;;  %v16590_v60 = vld [vmem:[%s24048_s1 + $0x834] ss:$52 sps:$4 sm:$0xff]  }
  0xf4   :  { %4992 = vmatprep.subr.bf16.mxu0 %v16500_v61  ;;  %5164 = vmatprep.subr.bf16.mxu1 %v16503_v62  ;;  %v16593_v61 = vld [vmem:[%s24048_s1 + $0x83c] ss:$52 sps:$4 sm:$0xff]  }
  0xf5   :  { %v16588_v62 = vld [vmem:[%s24048_s1 + $0x830] ss:$52 sps:$4 sm:$0xff]  }
  0xf7   :  { %4993 = vmatpush1.bf16.msra.mxu0 %v16498_v63  ;;  %5165 = vmatpush1.bf16.msra.mxu1 %v16501_v0  ;;  %v16591_v63 = vld [vmem:[%s24048_s1 + $0x838] ss:$52 sps:$4 sm:$0xff]   ;;  %v16596_v0 = vld [vmem:[%s24048_s1 + $0x89c] ss:$52 sps:$4 sm:$0xff]  }
  0xf8   :  { %4994 = vmatprep.subr.bf16.mxu0 %v16506_v1  ;;  %5166 = vmatprep.subr.bf16.mxu1 %v16509_v2  ;;  %v16599_v1 = vld [vmem:[%s24048_s1 + $0x8a4] ss:$52 sps:$4 sm:$0xff]  }
  0xf9   :  { %v16594_v2 = vld [vmem:[%s24048_s1 + $0x898] ss:$52 sps:$4 sm:$0xff]  }
  0xfb   :  { %4995 = vmatpush1.bf16.msra.mxu0 %v16504_v3  ;;  %5167 = vmatpush1.bf16.msra.mxu1 %v16507_v4  ;;  %v16597_v3 = vld [vmem:[%s24048_s1 + $0x8a0] ss:$52 sps:$4 sm:$0xff]   ;;  %v16602_v4 = vld [vmem:[%s24048_s1 + $0x904] ss:$52 sps:$4 sm:$0xff]  }
  0xfc   :  { %4996 = vmatprep.subr.bf16.mxu0 %v16512_v5  ;;  %5168 = vmatprep.subr.bf16.mxu1 %v16515_v6  ;;  %v16605_v5 = vld [vmem:[%s24048_s1 + $0x90c] ss:$52 sps:$4 sm:$0xff]  }
  0xfd   :  { %v16600_v6 = vld [vmem:[%s24048_s1 + $0x900] ss:$52 sps:$4 sm:$0xff]  }
  0xff   :  { %4997 = vmatpush1.bf16.msra.mxu0 %v16510_v7  ;;  %5169 = vmatpush1.bf16.msra.mxu1 %v16513_v8  ;;  %v16603_v7 = vld [vmem:[%s24048_s1 + $0x908] ss:$52 sps:$4 sm:$0xff]   ;;  %v16608_v8 = vld [vmem:[%s24048_s1 + $0x96c] ss:$52 sps:$4 sm:$0xff]  }
 0x100   :  { %4998 = vmatprep.subr.bf16.mxu0 %v16518_v9  ;;  %5170 = vmatprep.subr.bf16.mxu1 %v16521_v10  ;;  %v16611_v9 = vld [vmem:[%s24048_s1 + $0x974] ss:$52 sps:$4 sm:$0xff]  }
 0x101   :  { %v16606_v10 = vld [vmem:[%s24048_s1 + $0x968] ss:$52 sps:$4 sm:$0xff]  }
 0x103   :  { %4999 = vmatpush1.bf16.msra.mxu0 %v16516_v11  ;;  %5171 = vmatpush1.bf16.msra.mxu1 %v16519_v12  ;;  %v16609_v11 = vld [vmem:[%s24048_s1 + $0x970] ss:$52 sps:$4 sm:$0xff]   ;;  %v16614_v12 = vld [vmem:[%s24048_s1 + $0x9d4] ss:$52 sps:$4 sm:$0xff]  }
 0x104   :  { %5000 = vmatprep.subr.bf16.mxu0 %v16524_v13  ;;  %5172 = vmatprep.subr.bf16.mxu1 %v16527_v14  ;;  %v16617_v13 = vld [vmem:[%s24048_s1 + $0x9dc] ss:$52 sps:$4 sm:$0xff]  }
 0x105   :  { %v16612_v14 = vld [vmem:[%s24048_s1 + $0x9d0] ss:$52 sps:$4 sm:$0xff]  }
 0x107   :  { %5001 = vmatpush1.bf16.msra.mxu0 %v16522_v15  ;;  %5173 = vmatpush1.bf16.msra.mxu1 %v16525_v17  ;;  %v16615_v15 = vld [vmem:[%s24048_s1 + $0x9d8] ss:$52 sps:$4 sm:$0xff]   ;;  %v16620_v17 = vld [vmem:[%s24048_s1 + $0xa3c] ss:$52 sps:$4 sm:$0xff]  }
 0x108   :  { %5002 = vmatprep.subr.bf16.mxu0 %v16530_v18  ;;  %5174 = vmatprep.subr.bf16.mxu1 %v16533_v19  ;;  %v16623_v18 = vld [vmem:[%s24048_s1 + $0xa44] ss:$52 sps:$4 sm:$0xff]  }
 0x109   :  { %v16618_v19 = vld [vmem:[%s24048_s1 + $0xa38] ss:$52 sps:$4 sm:$0xff]  }
 0x10b   :  { %5003 = vmatpush1.bf16.msra.mxu0 %v16528_v20  ;;  %5175 = vmatpush1.bf16.msra.mxu1 %v16531_v21  ;;  %v16621_v20 = vld [vmem:[%s24048_s1 + $0xa40] ss:$52 sps:$4 sm:$0xff]   ;;  %v16626_v21 = vld [vmem:[%s24048_s1 + $0xaa4] ss:$52 sps:$4 sm:$0xff]  }
 0x10c   :  { %5004 = vmatprep.subr.bf16.mxu0 %v16536_v22  ;;  %5176 = vmatprep.subr.bf16.mxu1 %v16539_v23  ;;  %v16629_v22 = vld [vmem:[%s24048_s1 + $0xaac] ss:$52 sps:$4 sm:$0xff]  }
 0x10d   :  { %v16624_v23 = vld [vmem:[%s24048_s1 + $0xaa0] ss:$52 sps:$4 sm:$0xff]  }
 0x10f   :  { %5005 = vmatpush1.bf16.msra.mxu0 %v16534_v24  ;;  %5177 = vmatpush1.bf16.msra.mxu1 %v16537_v25  ;;  %v16627_v24 = vld [vmem:[%s24048_s1 + $0xaa8] ss:$52 sps:$4 sm:$0xff]   ;;  %v16632_v25 = vld [vmem:[%s24048_s1 + $0xb0c] ss:$52 sps:$4 sm:$0xff]  }
 0x110   :  { %5006 = vmatprep.subr.bf16.mxu0 %v16542_v26  ;;  %5178 = vmatprep.subr.bf16.mxu1 %v16545_v27  ;;  %v16635_v26 = vld [vmem:[%s24048_s1 + $0xb14] ss:$52 sps:$4 sm:$0xff]  }
 0x111   :  { %v16630_v27 = vld [vmem:[%s24048_s1 + $0xb08] ss:$52 sps:$4 sm:$0xff]  }
 0x113   :  { %5007 = vmatpush1.bf16.msra.mxu0 %v16540_v28  ;;  %5179 = vmatpush1.bf16.msra.mxu1 %v16543_v29  ;;  %v16633_v28 = vld [vmem:[%s24048_s1 + $0xb10] ss:$52 sps:$4 sm:$0xff]   ;;  %v16638_v29 = vld [vmem:[%s24048_s1 + $0xb74] ss:$52 sps:$4 sm:$0xff]  }
 0x114   :  { %5008 = vmatprep.subr.bf16.mxu0 %v16548_v30  ;;  %5180 = vmatprep.subr.bf16.mxu1 %v16551_v31  ;;  %v16641_v30 = vld [vmem:[%s24048_s1 + $0xb7c] ss:$52 sps:$4 sm:$0xff]  }
 0x115   :  { %v16636_v31 = vld [vmem:[%s24048_s1 + $0xb70] ss:$52 sps:$4 sm:$0xff]  }
 0x117   :  { %5009 = vmatpush1.bf16.msra.mxu0 %v16546_v32  ;;  %5181 = vmatpush1.bf16.msra.mxu1 %v16549_v33  ;;  %v16639_v32 = vld [vmem:[%s24048_s1 + $0xb78] ss:$52 sps:$4 sm:$0xff]   ;;  %v16644_v33 = vld [vmem:[%s24048_s1 + $0xbdc] ss:$52 sps:$4 sm:$0xff]  }
 0x118   :  { %5010 = vmatprep.subr.bf16.mxu0 %v16554_v34  ;;  %5182 = vmatprep.subr.bf16.mxu1 %v16557_v35  ;;  %v16647_v34 = vld [vmem:[%s24048_s1 + $0xbe4] ss:$52 sps:$4 sm:$0xff]  }
 0x119   :  { %v16642_v35 = vld [vmem:[%s24048_s1 + $0xbd8] ss:$52 sps:$4 sm:$0xff]  }
 0x11b   :  { %5011 = vmatpush1.bf16.msra.mxu0 %v16552_v36  ;;  %5183 = vmatpush1.bf16.msra.mxu1 %v16555_v37  ;;  %v16645_v36 = vld [vmem:[%s24048_s1 + $0xbe0] ss:$52 sps:$4 sm:$0xff]   ;;  %v16650_v37 = vld [vmem:[%s24048_s1 + $0xc44] ss:$52 sps:$4 sm:$0xff]  }
 0x11c   :  { %5012 = vmatprep.subr.bf16.mxu0 %v16560_v38  ;;  %5184 = vmatprep.subr.bf16.mxu1 %v16563_v39  ;;  %v16653_v38 = vld [vmem:[%s24048_s1 + $0xc4c] ss:$52 sps:$4 sm:$0xff]  }
 0x11d   :  { %v16648_v39 = vld [vmem:[%s24048_s1 + $0xc40] ss:$52 sps:$4 sm:$0xff]  }
 0x11f   :  { %5013 = vmatpush1.bf16.msra.mxu0 %v16558_v40  ;;  %5185 = vmatpush1.bf16.msra.mxu1 %v16561_v41  ;;  %v16651_v40 = vld [vmem:[%s24048_s1 + $0xc48] ss:$52 sps:$4 sm:$0xff]   ;;  %v16656_v41 = vld [vmem:[%s24048_s1 + $0xcac] ss:$52 sps:$4 sm:$0xff]  }
 0x120   :  { %5025 = vmatprep.subr.bf16.mxu0 %v16566_v42  ;;  %5197 = vmatprep.subr.bf16.mxu1 %v16569_v43  ;;  %v16659_v42 = vld [vmem:[%s24048_s1 + $0xcb4] ss:$52 sps:$4 sm:$0xff]  }
 0x121   :  { %v16654_v43 = vld [vmem:[%s24048_s1 + $0xca8] ss:$52 sps:$4 sm:$0xff]  }
 0x122   :  { %5015 = vmatmul.mubr.bf16.vlgmr.msra.gmra.mrb[4].mxu0 %v18529_v48  ;;  %5187 = vmatmul.mubr.bf16.vlgmr.msra.gmra.mrb[4].mxu1 %v18529_v48  ;;  %v16663_v48 = vld [vmem:[%s24048_s1 + $0xd18] ss:$52 sps:$4 sm:$0xff]  }
 0x123   :  { %5026 = vmatpush1.bf16.msra.mxu0 %v16564_v44  ;;  %5198 = vmatpush1.bf16.msra.mxu1 %v16567_v45  ;;  %v16657_v44 = vld [vmem:[%s24048_s1 + $0xcb0] ss:$52 sps:$4 sm:$0xff]   ;;  %v16662_v45 = vld [vmem:[%s24048_s1 + $0xd14] ss:$52 sps:$4 sm:$0xff]  }
 0x124   :  { %5027 = vmatprep.subr.bf16.mxu0 %v16572_v46  ;;  %5199 = vmatprep.subr.bf16.mxu1 %v16575_v47  ;;  %v16665_v46 = vld [vmem:[%s24048_s1 + $0xd1c] ss:$52 sps:$4 sm:$0xff]  }
 0x125   :  { %5057 = vmatprep.mubr.bf16.mxu0 %v18530_v53  ;;  %5229 = vmatprep.mubr.bf16.mxu1 %v18530_v53  ;;  %v16660_v47 = vld [vmem:[%s24048_s1 + $0xd10] ss:$52 sps:$4 sm:$0xff]   ;;  %v16669_v53 = vld [vmem:[%s24048_s1 + $0xd80] ss:$52 sps:$4 sm:$0xff]  }
 0x127   :  { %5028 = vmatpush1.bf16.msra.mxu0 %v16570_v49  ;;  %5200 = vmatpush1.bf16.msra.mxu1 %v16573_v50  ;;  %v16668_v49 = vld [vmem:[%s24048_s1 + $0xd7c] ss:$52 sps:$4 sm:$0xff]   ;;  %v16671_v50 = vld [vmem:[%s24048_s1 + $0xd84] ss:$52 sps:$4 sm:$0xff]  }
 0x128   :  { %5029 = vmatprep.subr.bf16.mxu0 %v16578_v51  ;;  %5201 = vmatprep.subr.bf16.mxu1 %v16581_v52  ;;  %v18531_v51 = vld [vmem:[%s24049_s0 + $0x8] ss:$28 sps:$4 sm:$0xff]   ;;  %v16666_v52 = vld [vmem:[%s24048_s1 + $0xd78] ss:$52 sps:$4 sm:$0xff]  }
 0x12b   :  { %5030 = vmatpush1.bf16.msra.mxu0 %v16576_v54  ;;  %5202 = vmatpush1.bf16.msra.mxu1 %v16579_v55  ;;  %v16674_v54 = vld [vmem:[%s24048_s1 + $0xde4] ss:$52 sps:$4 sm:$0xff]   ;;  %v16677_v55 = vld [vmem:[%s24048_s1 + $0xdec] ss:$52 sps:$4 sm:$0xff]  }
 0x12c   :  { %5031 = vmatprep.subr.bf16.mxu0 %v16584_v56  ;;  %5203 = vmatprep.subr.bf16.mxu1 %v16587_v57  ;;  %v18532_v56 = vld [vmem:[%s24049_s0 + $0x14] ss:$28 sps:$4 sm:$0xff]  }
 0x12d   :  { %v16672_v57 = vld [vmem:[%s24048_s1 + $0xde0] ss:$52 sps:$4 sm:$0xff]  }
 0x12f   :  { %5032 = vmatpush1.bf16.msra.mxu0 %v16582_v58  ;;  %5204 = vmatpush1.bf16.msra.mxu1 %v16585_v59  ;;  %v16675_v58 = vld [vmem:[%s24048_s1 + $0xde8] ss:$52 sps:$4 sm:$0xff]   ;;  %v16680_v59 = vld [vmem:[%s24048_s1 + $0xe4c] ss:$52 sps:$4 sm:$0xff]  }
 0x130   :  { %5033 = vmatprep.subr.bf16.mxu0 %v16590_v60  ;;  %5205 = vmatprep.subr.bf16.mxu1 %v16593_v61  ;;  %v16683_v60 = vld [vmem:[%s24048_s1 + $0xe54] ss:$52 sps:$4 sm:$0xff]  }
 0x131   :  { %v16678_v61 = vld [vmem:[%s24048_s1 + $0xe48] ss:$52 sps:$4 sm:$0xff]  }
 0x133   :  { %5034 = vmatpush1.bf16.msra.mxu0 %v16588_v62  ;;  %5206 = vmatpush1.bf16.msra.mxu1 %v16591_v63  ;;  %v16681_v62 = vld [vmem:[%s24048_s1 + $0xe50] ss:$52 sps:$4 sm:$0xff]   ;;  %v16686_v63 = vld [vmem:[%s24048_s1 + $0xeb4] ss:$52 sps:$4 sm:$0xff]  }
 0x134   :  { %5035 = vmatprep.subr.bf16.mxu0 %v16596_v0  ;;  %5207 = vmatprep.subr.bf16.mxu1 %v16599_v1  ;;  %v16689_v0 = vld [vmem:[%s24048_s1 + $0xebc] ss:$52 sps:$4 sm:$0xff]  }
 0x135   :  { %v16684_v1 = vld [vmem:[%s24048_s1 + $0xeb0] ss:$52 sps:$4 sm:$0xff]  }
 0x137   :  { %5036 = vmatpush1.bf16.msra.mxu0 %v16594_v2  ;;  %5208 = vmatpush1.bf16.msra.mxu1 %v16597_v3  ;;  %v16687_v2 = vld [vmem:[%s24048_s1 + $0xeb8] ss:$52 sps:$4 sm:$0xff]   ;;  %v16692_v3 = vld [vmem:[%s24048_s1 + $0xf1c] ss:$52 sps:$4 sm:$0xff]  }
 0x138   :  { %5037 = vmatprep.subr.bf16.mxu0 %v16602_v4  ;;  %5209 = vmatprep.subr.bf16.mxu1 %v16605_v5  ;;  %v16695_v4 = vld [vmem:[%s24048_s1 + $0xf24] ss:$52 sps:$4 sm:$0xff]  }
 0x139   :  { %v16690_v5 = vld [vmem:[%s24048_s1 + $0xf18] ss:$52 sps:$4 sm:$0xff]  }
 0x13b   :  { %5038 = vmatpush1.bf16.msra.mxu0 %v16600_v6  ;;  %5210 = vmatpush1.bf16.msra.mxu1 %v16603_v7  ;;  %v16693_v6 = vld [vmem:[%s24048_s1 + $0xf20] ss:$52 sps:$4 sm:$0xff]   ;;  %v16698_v7 = vld [vmem:[%s24048_s1 + $0xf84] ss:$52 sps:$4 sm:$0xff]  }
 0x13c   :  { %5039 = vmatprep.subr.bf16.mxu0 %v16608_v8  ;;  %5211 = vmatprep.subr.bf16.mxu1 %v16611_v9  ;;  %v16701_v8 = vld [vmem:[%s24048_s1 + $0xf8c] ss:$52 sps:$4 sm:$0xff]  }
 0x13d   :  { %v16696_v9 = vld [vmem:[%s24048_s1 + $0xf80] ss:$52 sps:$4 sm:$0xff]  }
 0x13f   :  { %5040 = vmatpush1.bf16.msra.mxu0 %v16606_v10  ;;  %5212 = vmatpush1.bf16.msra.mxu1 %v16609_v11  ;;  %v16699_v10 = vld [vmem:[%s24048_s1 + $0xf88] ss:$52 sps:$4 sm:$0xff]   ;;  %v16704_v11 = vld [vmem:[%s24048_s1 + $0xfec] ss:$52 sps:$4 sm:$0xff]  }
 0x140   :  { %5041 = vmatprep.subr.bf16.mxu0 %v16614_v12  ;;  %5213 = vmatprep.subr.bf16.mxu1 %v16617_v13  ;;  %v16707_v12 = vld [vmem:[%s24048_s1 + $0xff4] ss:$52 sps:$4 sm:$0xff]  }
 0x141   :  { %v16702_v13 = vld [vmem:[%s24048_s1 + $0xfe8] ss:$52 sps:$4 sm:$0xff]  }
 0x143   :  { %5042 = vmatpush1.bf16.msra.mxu0 %v16612_v14  ;;  %5214 = vmatpush1.bf16.msra.mxu1 %v16615_v15  ;;  %v16705_v14 = vld [vmem:[%s24048_s1 + $0xff0] ss:$52 sps:$4 sm:$0xff]   ;;  %v16710_v15 = vld [vmem:[%s24048_s1 + $0x1054] ss:$52 sps:$4 sm:$0xff]  }
 0x144   :  { %5043 = vmatprep.subr.bf16.mxu0 %v16620_v17  ;;  %5215 = vmatprep.subr.bf16.mxu1 %v16623_v18  ;;  %v16713_v17 = vld [vmem:[%s24048_s1 + $0x105c] ss:$52 sps:$4 sm:$0xff]  }
 0x145   :  { %v16708_v18 = vld [vmem:[%s24048_s1 + $0x1050] ss:$52 sps:$4 sm:$0xff]  }
 0x147   :  { %5044 = vmatpush1.bf16.msra.mxu0 %v16618_v19  ;;  %5216 = vmatpush1.bf16.msra.mxu1 %v16621_v20  ;;  %v16711_v19 = vld [vmem:[%s24048_s1 + $0x1058] ss:$52 sps:$4 sm:$0xff]   ;;  %v16716_v20 = vld [vmem:[%s24048_s1 + $0x10bc] ss:$52 sps:$4 sm:$0xff]  }
 0x148   :  { %5045 = vmatprep.subr.bf16.mxu0 %v16626_v21  ;;  %5217 = vmatprep.subr.bf16.mxu1 %v16629_v22  ;;  %v16719_v21 = vld [vmem:[%s24048_s1 + $0x10c4] ss:$52 sps:$4 sm:$0xff]  }
 0x149   :  { %v16714_v22 = vld [vmem:[%s24048_s1 + $0x10b8] ss:$52 sps:$4 sm:$0xff]  }
 0x14b   :  { %5046 = vmatpush1.bf16.msra.mxu0 %v16624_v23  ;;  %5218 = vmatpush1.bf16.msra.mxu1 %v16627_v24  ;;  %v16717_v23 = vld [vmem:[%s24048_s1 + $0x10c0] ss:$52 sps:$4 sm:$0xff]   ;;  %v16722_v24 = vld [vmem:[%s24048_s1 + $0x1124] ss:$52 sps:$4 sm:$0xff]  }
 0x14c   :  { %5047 = vmatprep.subr.bf16.mxu0 %v16632_v25  ;;  %5219 = vmatprep.subr.bf16.mxu1 %v16635_v26  ;;  %v16725_v25 = vld [vmem:[%s24048_s1 + $0x112c] ss:$52 sps:$4 sm:$0xff]  }
 0x14d   :  { %v16720_v26 = vld [vmem:[%s24048_s1 + $0x1120] ss:$52 sps:$4 sm:$0xff]  }
 0x14f   :  { %5048 = vmatpush1.bf16.msra.mxu0 %v16630_v27  ;;  %5220 = vmatpush1.bf16.msra.mxu1 %v16633_v28  ;;  %v16723_v27 = vld [vmem:[%s24048_s1 + $0x1128] ss:$52 sps:$4 sm:$0xff]   ;;  %v16728_v28 = vld [vmem:[%s24048_s1 + $0x118c] ss:$52 sps:$4 sm:$0xff]  }
 0x150   :  { %5049 = vmatprep.subr.bf16.mxu0 %v16638_v29  ;;  %5221 = vmatprep.subr.bf16.mxu1 %v16641_v30  ;;  %v16731_v29 = vld [vmem:[%s24048_s1 + $0x1194] ss:$52 sps:$4 sm:$0xff]  }
 0x151   :  { %v16726_v30 = vld [vmem:[%s24048_s1 + $0x1188] ss:$52 sps:$4 sm:$0xff]  }
 0x153   :  { %5050 = vmatpush1.bf16.msra.mxu0 %v16636_v31  ;;  %5222 = vmatpush1.bf16.msra.mxu1 %v16639_v32  ;;  %v16729_v31 = vld [vmem:[%s24048_s1 + $0x1190] ss:$52 sps:$4 sm:$0xff]   ;;  %v16734_v32 = vld [vmem:[%s24048_s1 + $0x11f4] ss:$52 sps:$4 sm:$0xff]  }
 0x154   :  { %5051 = vmatprep.subr.bf16.mxu0 %v16644_v33  ;;  %5223 = vmatprep.subr.bf16.mxu1 %v16647_v34  ;;  %v16737_v33 = vld [vmem:[%s24048_s1 + $0x11fc] ss:$52 sps:$4 sm:$0xff]  }
 0x155   :  { %v16732_v34 = vld [vmem:[%s24048_s1 + $0x11f0] ss:$52 sps:$4 sm:$0xff]  }
 0x157   :  { %5052 = vmatpush1.bf16.msra.mxu0 %v16642_v35  ;;  %5224 = vmatpush1.bf16.msra.mxu1 %v16645_v36  ;;  %v16735_v35 = vld [vmem:[%s24048_s1 + $0x11f8] ss:$52 sps:$4 sm:$0xff]   ;;  %v16740_v36 = vld [vmem:[%s24048_s1 + $0x125c] ss:$52 sps:$4 sm:$0xff]  }
 0x158   :  { %5053 = vmatprep.subr.bf16.mxu0 %v16650_v37  ;;  %5225 = vmatprep.subr.bf16.mxu1 %v16653_v38  ;;  %v16743_v37 = vld [vmem:[%s24048_s1 + $0x1264] ss:$52 sps:$4 sm:$0xff]  }
 0x159   :  { %v16738_v38 = vld [vmem:[%s24048_s1 + $0x1258] ss:$52 sps:$4 sm:$0xff]  }
 0x15b   :  { %5054 = vmatpush1.bf16.msra.mxu0 %v16648_v39  ;;  %5226 = vmatpush1.bf16.msra.mxu1 %v16651_v40  ;;  %v16741_v39 = vld [vmem:[%s24048_s1 + $0x1260] ss:$52 sps:$4 sm:$0xff]   ;;  %v16746_v40 = vld [vmem:[%s24048_s1 + $0x12c4] ss:$52 sps:$4 sm:$0xff]  }
 0x15c   :  { %5055 = vmatprep.subr.bf16.mxu0 %v16656_v41  ;;  %5227 = vmatprep.subr.bf16.mxu1 %v16659_v42  ;;  %v16749_v41 = vld [vmem:[%s24048_s1 + $0x12cc] ss:$52 sps:$4 sm:$0xff]  }
 0x15d   :  { %v16744_v42 = vld [vmem:[%s24048_s1 + $0x12c0] ss:$52 sps:$4 sm:$0xff]  }
 0x15f   :  { %5056 = vmatpush1.bf16.msra.mxu0 %v16654_v43  ;;  %5228 = vmatpush1.bf16.msra.mxu1 %v16657_v44  ;;  %v16747_v43 = vld [vmem:[%s24048_s1 + $0x12c8] ss:$52 sps:$4 sm:$0xff]   ;;  %v16752_v44 = vld [vmem:[%s24048_s1 + $0x132c] ss:$52 sps:$4 sm:$0xff]  }
 0x160   :  { %5068 = vmatprep.subr.bf16.mxu0 %v16662_v45  ;;  %5240 = vmatprep.subr.bf16.mxu1 %v16665_v46  ;;  %v16755_v45 = vld [vmem:[%s24048_s1 + $0x1334] ss:$52 sps:$4 sm:$0xff]  }
 0x161   :  { %v16750_v46 = vld [vmem:[%s24048_s1 + $0x1328] ss:$52 sps:$4 sm:$0xff]  }
 0x162   :  { %5058 = vmatmul.mubr.bf16.vlgmr.msra.gmra.mrb[4].mxu0 %v18531_v51  ;;  %5230 = vmatmul.mubr.bf16.vlgmr.msra.gmra.mrb[4].mxu1 %v18531_v51  ;;  %v16759_v51 = vld [vmem:[%s24048_s1 + $0x1398] ss:$52 sps:$4 sm:$0xff]  }
 0x163   :  { %5069 = vmatpush1.bf16.msra.mxu0 %v16660_v47  ;;  %5241 = vmatpush1.bf16.msra.mxu1 %v16663_v48  ;;  %v16753_v47 = vld [vmem:[%s24048_s1 + $0x1330] ss:$52 sps:$4 sm:$0xff]   ;;  %v16758_v48 = vld [vmem:[%s24048_s1 + $0x1394] ss:$52 sps:$4 sm:$0xff]  }
 0x164   :  { %5070 = vmatprep.subr.bf16.mxu0 %v16668_v49  ;;  %5242 = vmatprep.subr.bf16.mxu1 %v16671_v50  ;;  %v16761_v49 = vld [vmem:[%s24048_s1 + $0x139c] ss:$52 sps:$4 sm:$0xff]  }
 0x165   :  { %5100 = vmatprep.mubr.bf16.mxu0 %v18532_v56  ;;  %5272 = vmatprep.mubr.bf16.mxu1 %v18532_v56  ;;  %v16756_v50 = vld [vmem:[%s24048_s1 + $0x1390] ss:$52 sps:$4 sm:$0xff]   ;;  %v16765_v56 = vld [vmem:[%s24048_s1 + $0x1400] ss:$52 sps:$4 sm:$0xff]  }
 0x167   :  { %5071 = vmatpush1.bf16.msra.mxu0 %v16666_v52  ;;  %5243 = vmatpush1.bf16.msra.mxu1 %v16669_v53  ;;  %v16764_v52 = vld [vmem:[%s24048_s1 + $0x13fc] ss:$52 sps:$4 sm:$0xff]   ;;  %v16767_v53 = vld [vmem:[%s24048_s1 + $0x1404] ss:$52 sps:$4 sm:$0xff]  }
 0x168   :  { %5072 = vmatprep.subr.bf16.mxu0 %v16674_v54  ;;  %5244 = vmatprep.subr.bf16.mxu1 %v16677_v55  ;;  %v18533_v54 = vld [vmem:[%s24049_s0 + $0x10] ss:$28 sps:$4 sm:$0xff]  }
 0x169   :  { %v16762_v55 = vld [vmem:[%s24048_s1 + $0x13f8] ss:$52 sps:$4 sm:$0xff]  }
 0x16b   :  { %5073 = vmatpush1.bf16.msra.mxu0 %v16672_v57  ;;  %5245 = vmatpush1.bf16.msra.mxu1 %v16675_v58  ;;  %v16770_v57 = vld [vmem:[%s24048_s1 + $0x1464] ss:$52 sps:$4 sm:$0xff]   ;;  %v16773_v58 = vld [vmem:[%s24048_s1 + $0x146c] ss:$52 sps:$4 sm:$0xff]  }
 0x16c   :  { %5074 = vmatprep.subr.bf16.mxu0 %v16680_v59  ;;  %5246 = vmatprep.subr.bf16.mxu1 %v16683_v60  ;;  %v841_v59 = vlaneseq  ;;  %v16768_v60 = vld [vmem:[%s24048_s1 + $0x1460] ss:$52 sps:$4 sm:$0xff]  }
 0x16f   :  { %5075 = vmatpush1.bf16.msra.mxu0 %v16678_v61  ;;  %5247 = vmatpush1.bf16.msra.mxu1 %v16681_v62  ;;  %v16771_v61 = vld [vmem:[%s24048_s1 + $0x1468] ss:$52 sps:$4 sm:$0xff]   ;;  %v16776_v62 = vld [vmem:[%s24048_s1 + $0x14cc] ss:$52 sps:$4 sm:$0xff]  }
 0x170   :  { %5076 = vmatprep.subr.bf16.mxu0 %v16686_v63  ;;  %5248 = vmatprep.subr.bf16.mxu1 %v16689_v0  ;;  %v16779_v63 = vld [vmem:[%s24048_s1 + $0x14d4] ss:$52 sps:$4 sm:$0xff]   ;;  %v19952_v0 = vshrl.u32 %v841_v59, 7 }
 0x171   :  { %v16804_v59 = vld [vmem:[%s24048_s1 + $0x20] ss:$52 sps:$4 sm:$0xff]  }
 0x173   :  { %5077 = vmatpush1.bf16.msra.mxu0 %v16684_v1  ;;  %5249 = vmatpush1.bf16.msra.mxu1 %v16687_v2  ;;  %v16774_v1 = vld [vmem:[%s24048_s1 + $0x14c8] ss:$52 sps:$4 sm:$0xff]   ;;  %v16777_v2 = vld [vmem:[%s24048_s1 + $0x14d0] ss:$52 sps:$4 sm:$0xff]  }
 0x174   :  { %5078 = vmatprep.subr.bf16.mxu0 %v16692_v3  ;;  %5250 = vmatprep.subr.bf16.mxu1 %v16695_v4  ;;  %v16782_v3 = vld [vmem:[%s24048_s1 + $0x1534] ss:$52 sps:$4 sm:$0xff]   ;;  %v16785_v4 = vld [vmem:[%s24048_s1 + $0x153c] ss:$52 sps:$4 sm:$0xff]  }
 0x177   :  { %5079 = vmatpush1.bf16.msra.mxu0 %v16690_v5  ;;  %5251 = vmatpush1.bf16.msra.mxu1 %v16693_v6  ;;  %v19967_v5 = vsub.s32 0, %v19952_v0  ;;  %v19970_v6 = vsub.s32 2, %v19952_v0 }
 0x178   :  { %5080 = vmatprep.subr.bf16.mxu0 %v16698_v7  ;;  %5252 = vmatprep.subr.bf16.mxu1 %v16701_v8  ;;  %v16780_v7 = vld [vmem:[%s24048_s1 + $0x1530] ss:$52 sps:$4 sm:$0xff]   ;;  %v16783_v8 = vld [vmem:[%s24048_s1 + $0x1538] ss:$52 sps:$4 sm:$0xff]  }
 0x17b   :  { %5081 = vmatpush1.bf16.msra.mxu0 %v16696_v9  ;;  %5253 = vmatpush1.bf16.msra.mxu1 %v16699_v10  ;;  %v837_v9 = vld [vmem:[%s24050_s2] sm:$0xff]  ;;  %v19982_v10 = vsub.s32 1, %v19952_v0 }
 0x17c   :  { %5082 = vmatprep.subr.bf16.mxu0 %v16704_v11  ;;  %5254 = vmatprep.subr.bf16.mxu1 %v16707_v12  ;;  %v19985_v11 = vsub.s32 3, %v19952_v0  ;;  %v16788_v12 = vld [vmem:[%s24048_s1 + $0x159c] ss:$52 sps:$4 sm:$0xff]  }
 0x17f   :  { %5083 = vmatpush1.bf16.msra.mxu0 %v16702_v13  ;;  %5255 = vmatpush1.bf16.msra.mxu1 %v16705_v14  ;;  %v16791_v13 = vld [vmem:[%s24048_s1 + $0x15a4] ss:$52 sps:$4 sm:$0xff]   ;;  %v844_v14 = vrot.slane %v837_v9, %v19967_v5 }
 0x180   :  { %5084 = vmatprep.subr.bf16.mxu0 %v16710_v15  ;;  %5256 = vmatprep.subr.bf16.mxu1 %v16713_v17  ;;  %v852_v15 = vrot.slane %v837_v9, %v19970_v6  ;;  %v848_v17 = vrot.slane %v837_v9, %v19982_v10 }
 0x183   :  { %5085 = vmatpush1.bf16.msra.mxu0 %v16708_v18  ;;  %5257 = vmatpush1.bf16.msra.mxu1 %v16711_v19  ;;  %v16786_v18 = vld [vmem:[%s24048_s1 + $0x1598] ss:$52 sps:$4 sm:$0xff]   ;;  %v16789_v19 = vld [vmem:[%s24048_s1 + $0x15a0] ss:$52 sps:$4 sm:$0xff]  }
 0x184   :  { %5086 = vmatprep.subr.bf16.mxu0 %v16716_v20  ;;  %5258 = vmatprep.subr.bf16.mxu1 %v16719_v21  ;;  %v856_v20 = vrot.slane %v837_v9, %v19985_v11  ;;  %v16794_v21 = vld [vmem:[%s24048_s1 + $0x1604] ss:$52 sps:$4 sm:$0xff]  }
 0x185   :  { %v16819_v9 = vld [vmem:[%s24048_s1 + $0xf8] ss:$52 sps:$4 sm:$0xff]  }
 0x187   :  { %5087 = vmatpush1.bf16.msra.mxu0 %v16714_v22  ;;  %5259 = vmatpush1.bf16.msra.mxu1 %v16717_v23  ;;  %v16797_v22 = vld [vmem:[%s24048_s1 + $0x160c] ss:$52 sps:$4 sm:$0xff]  }
 0x188   :  { %5088 = vmatprep.subr.bf16.mxu0 %v16722_v24  ;;  %5260 = vmatprep.subr.bf16.mxu1 %v16725_v25  ;;  %v16792_v24 = vld [vmem:[%s24048_s1 + $0x1600] ss:$52 sps:$4 sm:$0xff]  }
 0x18b   :  { %5089 = vmatpush1.bf16.msra.mxu0 %v16720_v26  ;;  %5261 = vmatpush1.bf16.msra.mxu1 %v16723_v27 }
 0x18c   :  { %5090 = vmatprep.subr.bf16.mxu0 %v16728_v28  ;;  %5262 = vmatprep.subr.bf16.mxu1 %v16731_v29 }
 0x18f   :  { %5091 = vmatpush1.bf16.msra.mxu0 %v16726_v30  ;;  %5263 = vmatpush1.bf16.msra.mxu1 %v16729_v31 }
 0x190   :  { %5092 = vmatprep.subr.bf16.mxu0 %v16734_v32  ;;  %5264 = vmatprep.subr.bf16.mxu1 %v16737_v33  ;;  %v16795_v32 = vld [vmem:[%s24048_s1 + $0x1608] ss:$52 sps:$4 sm:$0xff]   ;;  %v16800_v33 = vld [vmem:[%s24048_s1 + $0x166c] ss:$52 sps:$4 sm:$0xff]  }
 0x193   :  { %5093 = vmatpush1.bf16.msra.mxu0 %v16732_v34  ;;  %5265 = vmatpush1.bf16.msra.mxu1 %v16735_v35 }
 0x194   :  { %5094 = vmatprep.subr.bf16.mxu0 %v16740_v36  ;;  %5266 = vmatprep.subr.bf16.mxu1 %v16743_v37 }
 0x197   :  { %5095 = vmatpush1.bf16.msra.mxu0 %v16738_v38  ;;  %5267 = vmatpush1.bf16.msra.mxu1 %v16741_v39  ;;  %v16803_v38 = vld [vmem:[%s24048_s1 + $0x1674] ss:$52 sps:$4 sm:$0xff]  }
 0x198   :  { %5096 = vmatprep.subr.bf16.mxu0 %v16746_v40  ;;  %5268 = vmatprep.subr.bf16.mxu1 %v16749_v41 }
 0x19b   :  { %5097 = vmatpush1.bf16.msra.mxu0 %v16744_v42  ;;  %5269 = vmatpush1.bf16.msra.mxu1 %v16747_v43 }
 0x19c   :  { %5098 = vmatprep.subr.bf16.mxu0 %v16752_v44  ;;  %5270 = vmatprep.subr.bf16.mxu1 %v16755_v45  ;;  %v16798_v44 = vld [vmem:[%s24048_s1 + $0x1668] ss:$52 sps:$4 sm:$0xff]  }
 0x19f   :  { %5099 = vmatpush1.bf16.msra.mxu0 %v16750_v46  ;;  %5271 = vmatpush1.bf16.msra.mxu1 %v16753_v47 }
 0x1a0   :  { %5111 = vmatprep.subr.bf16.mxu0 %v16758_v48  ;;  %5283 = vmatprep.subr.bf16.mxu1 %v16761_v49 }
 0x1a2   :  { %5101 = vmatmul.mubr.bf16.vlgmr.msra.gmra.mrb[4].mxu0 %v18533_v54  ;;  %5273 = vmatmul.mubr.bf16.vlgmr.msra.gmra.mrb[4].mxu1 %v18533_v54  ;;  %v16806_v54 = vld [vmem:[%s24048_s1 + $0x24] ss:$52 sps:$4 sm:$0xff]  }
 0x1a3   :  { %5112 = vmatpush1.bf16.msra.mxu0 %v16756_v50  ;;  %5284 = vmatpush1.bf16.msra.mxu1 %v16759_v51  ;;  %v16801_v51 = vld [vmem:[%s24048_s1 + $0x1670] ss:$52 sps:$4 sm:$0xff]  }
 0x1a4   :  { %5113 = vmatprep.subr.bf16.mxu0 %v16764_v52  ;;  %5285 = vmatprep.subr.bf16.mxu1 %v16767_v53 }
 0x1a5   :  { %5143 = vmatprep.mubr.bf16.mxu0 %v18546_v16  ;;  %5315 = vmatprep.mubr.bf16.mxu1 %v18546_v16 }
 0x1a7   :  { %5114 = vmatpush1.bf16.msra.mxu0 %v16762_v55  ;;  %5286 = vmatpush1.bf16.msra.mxu1 %v16765_v56  ;;  %v16809_v55 = vld [vmem:[%s24048_s1 + $0x2c] ss:$52 sps:$4 sm:$0xff]  }
 0x1a8   :  { %5115 = vmatprep.subr.bf16.mxu0 %v16770_v57  ;;  %5287 = vmatprep.subr.bf16.mxu1 %v16773_v58 }
 0x1ab   :  { %5116 = vmatpush1.bf16.msra.mxu0 %v16768_v60  ;;  %5288 = vmatpush1.bf16.msra.mxu1 %v16771_v61  ;;  %v16807_v60 = vld [vmem:[%s24048_s1 + $0x28] ss:$52 sps:$4 sm:$0xff]   ;;  %v16812_v61 = vld [vmem:[%s24048_s1 + $0x8c] ss:$52 sps:$4 sm:$0xff]  }
 0x1ac   :  { %5117 = vmatprep.subr.bf16.mxu0 %v16776_v62  ;;  %5289 = vmatprep.subr.bf16.mxu1 %v16779_v63  ;;  %v16815_v62 = vld [vmem:[%s24048_s1 + $0x94] ss:$52 sps:$4 sm:$0xff]  }
 0x1ad   :  { %v18534_v63 = vld [vmem:[%s24049_s0 + $0x18] ss:$28 sps:$4 sm:$0xff]  }
 0x1af   :  { %5118 = vmatpush1.bf16.msra.mxu0 %v16774_v1  ;;  %5290 = vmatpush1.bf16.msra.mxu1 %v16777_v2  ;;  %v16810_v1 = vld [vmem:[%s24048_s1 + $0x88] ss:$52 sps:$4 sm:$0xff]   ;;  %v16813_v2 = vld [vmem:[%s24048_s1 + $0x90] ss:$52 sps:$4 sm:$0xff]  }
 0x1b0   :  { %5119 = vmatprep.subr.bf16.mxu0 %v16782_v3  ;;  %5291 = vmatprep.subr.bf16.mxu1 %v16785_v4  ;;  %v16818_v3 = vld [vmem:[%s24048_s1 + $0xf4] ss:$52 sps:$4 sm:$0xff]   ;;  %v16821_v4 = vld [vmem:[%s24048_s1 + $0xfc] ss:$52 sps:$4 sm:$0xff]  }
 0x1b3   :  { %5120 = vmatpush1.bf16.msra.mxu0 %v16780_v7  ;;  %5292 = vmatpush1.bf16.msra.mxu1 %v16783_v8  ;;  %v18535_v7 = vld [vmem:[%s24049_s0 + $0x4] ss:$28 sps:$4 sm:$0xff]  }
 0x1b4   :  { %5121 = vmatprep.subr.bf16.mxu0 %v16788_v12  ;;  %5293 = vmatprep.subr.bf16.mxu1 %v16791_v13  ;;  %v16816_v8 = vld [vmem:[%s24048_s1 + $0xf0] ss:$52 sps:$4 sm:$0xff]  }
 0x1b5   :  { %v4801_v23 = vpop.f32.mrb[0].mxu0  ;;  %v4973_v25 = vpop.f32.mrb[0].mxu1  ;;  %v16824_v12 = vld [vmem:[%s24048_s1 + $0x15c] ss:$52 sps:$4 sm:$0xff]   ;;  %v16827_v13 = vld [vmem:[%s24048_s1 + $0x164] ss:$52 sps:$4 sm:$0xff]  }
 0x1b6   :  { %v15923_v26 = vadd.f32 %v4801_v23, %v844_v14  ;;  %v4803_v27 = vpop.f32.mrb[1].mxu0  ;;  %v15927_v28 = vadd.f32 %v4973_v25, %v852_v15  ;;  %v4975_v29 = vpop.f32.mrb[1].mxu1  ;;  %v16834_v23 = vld [vmem:[%s24048_s1 + $0x228] ss:$52 sps:$4 sm:$0xff]  }
 0x1b7   :  { %v15924_v30 = vadd.f32 %v4803_v27, %v848_v17  ;;  %v4805_v31 = vpop.f32.mrb[2].mxu0  ;;  %5122 = vmatpush1.bf16.msra.mxu0 %v16786_v18  ;;  %5294 = vmatpush1.bf16.msra.mxu1 %v16789_v19  ;;  %v15928_v34 = vadd.f32 %v4975_v29, %v856_v20  ;;  %v4977_v35 = vpop.f32.mrb[2].mxu1  ;;  %v16833_v18 = vld [vmem:[%s24048_s1 + $0x1cc] ss:$52 sps:$4 sm:$0xff]   ;;  %v16842_v25 = vld [vmem:[%s24048_s1 + $0x294] ss:$52 sps:$4 sm:$0xff]  }
 0x1b8   :  { %v15925_v36 = vadd.f32 %v4805_v31, %v844_v14  ;;  %v4807_v37 = vpop.f32.mrb[3].mxu0  ;;  %5123 = vmatprep.subr.bf16.mxu0 %v16794_v21  ;;  %5295 = vmatprep.subr.bf16.mxu1 %v16797_v22  ;;  %v5836_v39 = vmax.f32 %v15927_v28, 0.0  ;;  %v15929_v40 = vadd.f32 %v4977_v35, %v852_v15  ;;  %v4979_v41 = vpop.f32.mrb[3].mxu1  ;;  %v5834_v42 = vmax.f32 %v15923_v26, 0.0  ;;  %v16822_v14 = vld [vmem:[%s24048_s1 + $0x158] ss:$52 sps:$4 sm:$0xff]  }
 0x1b9   :  { %v15926_v43 = vadd.f32 %v4807_v37, %v848_v17  ;;  %v5837_v45 = vmax.f32 %v15928_v34, 0.0  ;;  %v15930_v46 = vadd.f32 %v4979_v41, %v856_v20  ;;  %v5835_v49 = vmax.f32 %v15924_v30, 0.0  ;;  %v16825_v15 = vld [vmem:[%s24048_s1 + $0x160] ss:$52 sps:$4 sm:$0xff]   ;;  %v16830_v17 = vld [vmem:[%s24048_s1 + $0x1c4] ss:$52 sps:$4 sm:$0xff]  }
 0x1ba   :  { %v5847_v47 = vmax.f32 %v15925_v36, 0.0  ;;  %v5849_v48 = vmax.f32 %v15929_v40, 0.0  ;;  %v16828_v19 = vld [vmem:[%s24048_s1 + $0x1c0] ss:$52 sps:$4 sm:$0xff]   ;;  %v16831_v20 = vld [vmem:[%s24048_s1 + $0x1c8] ss:$52 sps:$4 sm:$0xff]  }
 0x1bb   :  { %v5848_v50 = vmax.f32 %v15926_v43, 0.0  ;;  %5124 = vmatpush1.bf16.msra.mxu0 %v16792_v24  ;;  %5296 = vmatpush1.bf16.msra.mxu1 %v16795_v32  ;;  %v5850_v52 = vmax.f32 %v15930_v46, 0.0  ;;  %v16836_v21 = vld [vmem:[%s24048_s1 + $0x22c] ss:$52 sps:$4 sm:$0xff]   ;;  %v16839_v22 = vld [vmem:[%s24048_s1 + $0x234] ss:$52 sps:$4 sm:$0xff]  }
 0x1bc   :  { %v20027_v53 = vpack.c.bf16 %v5847_v47, %v5834_v42  ;;  %5125 = vmatprep.subr.bf16.mxu0 %v16800_v33  ;;  %5297 = vmatprep.subr.bf16.mxu1 %v16803_v38  ;;  %v20035_v56 = vpack.c.bf16 %v5849_v48, %v5836_v39  ;;  %v16837_v24 = vld [vmem:[%s24048_s1 + $0x230] ss:$52 sps:$4 sm:$0xff]   ;;  %v16843_v28 = vld [vmem:[%s24048_s1 + $0x298] ss:$52 sps:$4 sm:$0xff]   ;;  %v16849_v32 = vld [vmem:[%s24048_s1 + $0x300] ss:$52 sps:$4 sm:$0xff]  }
 0x1bd   :  { %v20037_v57 = vpack.c.bf16 %v5848_v50, %v5835_v49  ;;  %v20039_v58 = vpack.c.bf16 %v5850_v52, %v5837_v45  ;;  %v16845_v26 = vld [vmem:[%s24048_s1 + $0x29c] ss:$52 sps:$4 sm:$0xff]   ;;  %v16851_v30 = vld [vmem:[%s24048_s1 + $0x304] ss:$52 sps:$4 sm:$0xff]   ;;  %v16857_v34 = vld [vmem:[%s24048_s1 + $0x36c] ss:$52 sps:$4 sm:$0xff]  }
 0x1be   :  { %v16840_v27 = vld [vmem:[%s24048_s1 + $0x290] ss:$52 sps:$4 sm:$0xff]   ;;  %v16846_v31 = vld [vmem:[%s24048_s1 + $0x2f8] ss:$52 sps:$4 sm:$0xff]   ;;  %v16852_v35 = vld [vmem:[%s24048_s1 + $0x360] ss:$52 sps:$4 sm:$0xff]  }
 0x1bf   :  { %5126 = vmatpush1.bf16.msra.mxu0 %v16798_v44  ;;  %5298 = vmatpush1.bf16.msra.mxu1 %v16801_v51  ;;  %v16848_v29 = vld [vmem:[%s24048_s1 + $0x2fc] ss:$52 sps:$4 sm:$0xff]   ;;  %v16854_v33 = vld [vmem:[%s24048_s1 + $0x364] ss:$52 sps:$4 sm:$0xff]   ;;  %v16860_v37 = vld [vmem:[%s24048_s1 + $0x3cc] ss:$52 sps:$4 sm:$0xff]  }
 0x1c0   :  { %5326 = vmatprep.subr.bf16.mxu0 %v16806_v54  ;;  %5498 = vmatprep.subr.bf16.mxu1 %v16809_v55  ;;  %v16855_v36 = vld [vmem:[%s24048_s1 + $0x368] ss:$52 sps:$4 sm:$0xff]   ;;  %v16861_v40 = vld [vmem:[%s24048_s1 + $0x3d0] ss:$52 sps:$4 sm:$0xff]   ;;  %v16867_v44 = vld [vmem:[%s24048_s1 + $0x438] ss:$52 sps:$4 sm:$0xff]  }
 0x1c1   :  { %v16863_v38 = vld [vmem:[%s24048_s1 + $0x3d4] ss:$52 sps:$4 sm:$0xff]   ;;  %v16869_v42 = vld [vmem:[%s24048_s1 + $0x43c] ss:$52 sps:$4 sm:$0xff]   ;;  %v16875_v46 = vld [vmem:[%s24048_s1 + $0x4a4] ss:$52 sps:$4 sm:$0xff]  }
 0x1c2   :  { %5144 = vmatmul.mubr.bf16.vlgmr.msra.gmra.mrb[4].mxu0 %v18534_v63  ;;  %5316 = vmatmul.mubr.bf16.vlgmr.msra.gmra.mrb[4].mxu1 %v18534_v63  ;;  %v16858_v39 = vld [vmem:[%s24048_s1 + $0x3c8] ss:$52 sps:$4 sm:$0xff]   ;;  %v16864_v43 = vld [vmem:[%s24048_s1 + $0x430] ss:$52 sps:$4 sm:$0xff]   ;;  %v16870_v47 = vld [vmem:[%s24048_s1 + $0x498] ss:$52 sps:$4 sm:$0xff]  }
 0x1c3   :  { %5327 = vmatpush1.bf16.msra.mxu0 %v16804_v59  ;;  %5499 = vmatpush1.bf16.msra.mxu1 %v16807_v60  ;;  %v16866_v41 = vld [vmem:[%s24048_s1 + $0x434] ss:$52 sps:$4 sm:$0xff]   ;;  %v16872_v45 = vld [vmem:[%s24048_s1 + $0x49c] ss:$52 sps:$4 sm:$0xff]   ;;  %v16878_v49 = vld [vmem:[%s24048_s1 + $0x504] ss:$52 sps:$4 sm:$0xff]  }
 0x1c4   :  { %5328 = vmatprep.subr.bf16.mxu0 %v16812_v61  ;;  %5500 = vmatprep.subr.bf16.mxu1 %v16815_v62  ;;  %v16873_v48 = vld [vmem:[%s24048_s1 + $0x4a0] ss:$52 sps:$4 sm:$0xff]   ;;  %v16879_v52 = vld [vmem:[%s24048_s1 + $0x508] ss:$52 sps:$4 sm:$0xff]   ;;  %v16885_v60 = vld [vmem:[%s24048_s1 + $0x570] ss:$52 sps:$4 sm:$0xff]  }
 0x1c5   :  { %5358 = vmatprep.mubr.bf16.mxu0 %v18535_v7  ;;  %5530 = vmatprep.mubr.bf16.mxu1 %v18535_v7  ;;  %v16881_v50 = vld [vmem:[%s24048_s1 + $0x50c] ss:$52 sps:$4 sm:$0xff]   ;;  %v16887_v55 = vld [vmem:[%s24048_s1 + $0x574] ss:$52 sps:$4 sm:$0xff]   ;;  %v16893_v62 = vld [vmem:[%s24048_s1 + $0x5dc] ss:$52 sps:$4 sm:$0xff]  }
 0x1c6   :  { %v16876_v51 = vld [vmem:[%s24048_s1 + $0x500] ss:$52 sps:$4 sm:$0xff]   ;;  %v16882_v59 = vld [vmem:[%s24048_s1 + $0x568] ss:$52 sps:$4 sm:$0xff]   ;;  %v16888_v63 = vld [vmem:[%s24048_s1 + $0x5d0] ss:$52 sps:$4 sm:$0xff]  }
 0x1c7   :  { %5329 = vmatpush1.bf16.msra.mxu0 %v16810_v1  ;;  %5501 = vmatpush1.bf16.msra.mxu1 %v16813_v2  ;;  %v16884_v54 = vld [vmem:[%s24048_s1 + $0x56c] ss:$52 sps:$4 sm:$0xff]   ;;  %v16890_v61 = vld [vmem:[%s24048_s1 + $0x5d4] ss:$52 sps:$4 sm:$0xff]   ;;  %v16896_v2 = vld [vmem:[%s24048_s1 + $0x63c] ss:$52 sps:$4 sm:$0xff]  }
 0x1c8   :  { %5330 = vmatprep.subr.bf16.mxu0 %v16818_v3  ;;  %5502 = vmatprep.subr.bf16.mxu1 %v16821_v4  ;;  %v16891_v1 = vld [vmem:[%s24048_s1 + $0x5d8] ss:$52 sps:$4 sm:$0xff]   ;;  %v16897_v7 = vld [vmem:[%s24048_s1 + $0x640] ss:$52 sps:$4 sm:$0xff]  }
 0x1c9   :  { %v16899_v3 = vld [vmem:[%s24048_s1 + $0x644] ss:$52 sps:$4 sm:$0xff]  }
 0x1ca   :  { %v16894_v4 = vld [vmem:[%s24048_s1 + $0x638] ss:$52 sps:$4 sm:$0xff]  }
 0x1cb   :  { %5331 = vmatpush1.bf16.msra.mxu0 %v16816_v8  ;;  %5503 = vmatpush1.bf16.msra.mxu1 %v16819_v9  ;;  %v16902_v8 = vld [vmem:[%s24048_s1 + $0x6a4] ss:$52 sps:$4 sm:$0xff]   ;;  %v16905_v9 = vld [vmem:[%s24048_s1 + $0x6ac] ss:$52 sps:$4 sm:$0xff]  }
 0x1cc   :  { %5332 = vmatprep.subr.bf16.mxu0 %v16824_v12  ;;  %5504 = vmatprep.subr.bf16.mxu1 %v16827_v13  ;;  %v16900_v12 = vld [vmem:[%s24048_s1 + $0x6a0] ss:$52 sps:$4 sm:$0xff]   ;;  %v16903_v13 = vld [vmem:[%s24048_s1 + $0x6a8] ss:$52 sps:$4 sm:$0xff]  }
 0x1cf   :  { %5333 = vmatpush1.bf16.msra.mxu0 %v16822_v14  ;;  %5505 = vmatpush1.bf16.msra.mxu1 %v16825_v15  ;;  %v16908_v14 = vld [vmem:[%s24048_s1 + $0x70c] ss:$52 sps:$4 sm:$0xff]   ;;  %v16911_v15 = vld [vmem:[%s24048_s1 + $0x714] ss:$52 sps:$4 sm:$0xff]  }
 0x1d0   :  { %5334 = vmatprep.subr.bf16.mxu0 %v16830_v17  ;;  %5506 = vmatprep.subr.bf16.mxu1 %v16833_v18  ;;  %v18536_v17 = vld [vmem:[%s24049_s0] ss:$28 sps:$4 sm:$0xff]  }
 0x1d1   :  { %v16906_v18 = vld [vmem:[%s24048_s1 + $0x708] ss:$52 sps:$4 sm:$0xff]  }
 0x1d3   :  { %5335 = vmatpush1.bf16.msra.mxu0 %v16828_v19  ;;  %5507 = vmatpush1.bf16.msra.mxu1 %v16831_v20  ;;  %v16909_v19 = vld [vmem:[%s24048_s1 + $0x710] ss:$52 sps:$4 sm:$0xff]   ;;  %v16914_v20 = vld [vmem:[%s24048_s1 + $0x774] ss:$52 sps:$4 sm:$0xff]  }
 0x1d4   :  { %5336 = vmatprep.subr.bf16.mxu0 %v16836_v21  ;;  %5508 = vmatprep.subr.bf16.mxu1 %v16839_v22  ;;  %v16917_v21 = vld [vmem:[%s24048_s1 + $0x77c] ss:$52 sps:$4 sm:$0xff]   ;;  %v20269_v22 = vld [vmem:[%s24049_s0 + $0xc] ss:$28 sps:$4 sm:$0xff]  }
 0x1d7   :  { %5337 = vmatpush1.bf16.msra.mxu0 %v16834_v23  ;;  %5509 = vmatpush1.bf16.msra.mxu1 %v16837_v24  ;;  %v16912_v23 = vld [vmem:[%s24048_s1 + $0x770] ss:$52 sps:$4 sm:$0xff]   ;;  %v16915_v24 = vld [vmem:[%s24048_s1 + $0x778] ss:$52 sps:$4 sm:$0xff]  }
 0x1d8   :  { %5338 = vmatprep.subr.bf16.mxu0 %v16842_v25  ;;  %5510 = vmatprep.subr.bf16.mxu1 %v16845_v26  ;;  %v16920_v25 = vld [vmem:[%s24048_s1 + $0x7dc] ss:$52 sps:$4 sm:$0xff]   ;;  %v16923_v26 = vld [vmem:[%s24048_s1 + $0x7e4] ss:$52 sps:$4 sm:$0xff]  }
 0x1db   :  { %5339 = vmatpush1.bf16.msra.mxu0 %v16840_v27  ;;  %5511 = vmatpush1.bf16.msra.mxu1 %v16843_v28  ;;  %v16918_v27 = vld [vmem:[%s24048_s1 + $0x7d8] ss:$52 sps:$4 sm:$0xff]   ;;  %v16921_v28 = vld [vmem:[%s24048_s1 + $0x7e0] ss:$52 sps:$4 sm:$0xff]  }
 0x1dc   :  { %5340 = vmatprep.subr.bf16.mxu0 %v16848_v29  ;;  %5512 = vmatprep.subr.bf16.mxu1 %v16851_v30  ;;  %v16926_v29 = vld [vmem:[%s24048_s1 + $0x844] ss:$52 sps:$4 sm:$0xff]   ;;  %v16929_v30 = vld [vmem:[%s24048_s1 + $0x84c] ss:$52 sps:$4 sm:$0xff]  }
 0x1df   :  { %5341 = vmatpush1.bf16.msra.mxu0 %v16846_v31  ;;  %5513 = vmatpush1.bf16.msra.mxu1 %v16849_v32  ;;  %v16924_v31 = vld [vmem:[%s24048_s1 + $0x840] ss:$52 sps:$4 sm:$0xff]   ;;  %v16927_v32 = vld [vmem:[%s24048_s1 + $0x848] ss:$52 sps:$4 sm:$0xff]  }
 0x1e0   :  { %5342 = vmatprep.subr.bf16.mxu0 %v16854_v33  ;;  %5514 = vmatprep.subr.bf16.mxu1 %v16857_v34  ;;  %v16932_v33 = vld [vmem:[%s24048_s1 + $0x8ac] ss:$52 sps:$4 sm:$0xff]   ;;  %v16935_v34 = vld [vmem:[%s24048_s1 + $0x8b4] ss:$52 sps:$4 sm:$0xff]  }
 0x1e3   :  { %5343 = vmatpush1.bf16.msra.mxu0 %v16852_v35  ;;  %5515 = vmatpush1.bf16.msra.mxu1 %v16855_v36  ;;  %v16930_v35 = vld [vmem:[%s24048_s1 + $0x8a8] ss:$52 sps:$4 sm:$0xff]   ;;  %v16933_v36 = vld [vmem:[%s24048_s1 + $0x8b0] ss:$52 sps:$4 sm:$0xff]  }
 0x1e4   :  { %5344 = vmatprep.subr.bf16.mxu0 %v16860_v37  ;;  %5516 = vmatprep.subr.bf16.mxu1 %v16863_v38  ;;  %v16938_v37 = vld [vmem:[%s24048_s1 + $0x914] ss:$52 sps:$4 sm:$0xff]   ;;  %v16941_v38 = vld [vmem:[%s24048_s1 + $0x91c] ss:$52 sps:$4 sm:$0xff]  }
 0x1e7   :  { %5345 = vmatpush1.bf16.msra.mxu0 %v16858_v39  ;;  %5517 = vmatpush1.bf16.msra.mxu1 %v16861_v40  ;;  %v16936_v39 = vld [vmem:[%s24048_s1 + $0x910] ss:$52 sps:$4 sm:$0xff]   ;;  %v16939_v40 = vld [vmem:[%s24048_s1 + $0x918] ss:$52 sps:$4 sm:$0xff]  }
 0x1e8   :  { %5346 = vmatprep.subr.bf16.mxu0 %v16866_v41  ;;  %5518 = vmatprep.subr.bf16.mxu1 %v16869_v42  ;;  %v16944_v41 = vld [vmem:[%s24048_s1 + $0x97c] ss:$52 sps:$4 sm:$0xff]   ;;  %v16947_v42 = vld [vmem:[%s24048_s1 + $0x984] ss:$52 sps:$4 sm:$0xff]  }
 0x1eb   :  { %5347 = vmatpush1.bf16.msra.mxu0 %v16864_v43  ;;  %5519 = vmatpush1.bf16.msra.mxu1 %v16867_v44  ;;  %v16942_v43 = vld [vmem:[%s24048_s1 + $0x978] ss:$52 sps:$4 sm:$0xff]   ;;  %v16945_v44 = vld [vmem:[%s24048_s1 + $0x980] ss:$52 sps:$4 sm:$0xff]  }
 0x1ec   :  { %5348 = vmatprep.subr.bf16.mxu0 %v16872_v45  ;;  %5520 = vmatprep.subr.bf16.mxu1 %v16875_v46  ;;  %v16950_v45 = vld [vmem:[%s24048_s1 + $0x9e4] ss:$52 sps:$4 sm:$0xff]   ;;  %v16953_v46 = vld [vmem:[%s24048_s1 + $0x9ec] ss:$52 sps:$4 sm:$0xff]  }
 0x1ef   :  { %5349 = vmatpush1.bf16.msra.mxu0 %v16870_v47  ;;  %5521 = vmatpush1.bf16.msra.mxu1 %v16873_v48  ;;  %v16948_v47 = vld [vmem:[%s24048_s1 + $0x9e0] ss:$52 sps:$4 sm:$0xff]   ;;  %v16951_v48 = vld [vmem:[%s24048_s1 + $0x9e8] ss:$52 sps:$4 sm:$0xff]  }
 0x1f0   :  { %5350 = vmatprep.subr.bf16.mxu0 %v16878_v49  ;;  %5522 = vmatprep.subr.bf16.mxu1 %v16881_v50  ;;  %v16956_v49 = vld [vmem:[%s24048_s1 + $0xa4c] ss:$52 sps:$4 sm:$0xff]   ;;  %v16959_v50 = vld [vmem:[%s24048_s1 + $0xa54] ss:$52 sps:$4 sm:$0xff]  }
 0x1f3   :  { %5351 = vmatpush1.bf16.msra.mxu0 %v16876_v51  ;;  %5523 = vmatpush1.bf16.msra.mxu1 %v16879_v52  ;;  %v16954_v51 = vld [vmem:[%s24048_s1 + $0xa48] ss:$52 sps:$4 sm:$0xff]   ;;  %v16957_v52 = vld [vmem:[%s24048_s1 + $0xa50] ss:$52 sps:$4 sm:$0xff]  }
 0x1f4   :  { %5352 = vmatprep.subr.bf16.mxu0 %v16884_v54  ;;  %5524 = vmatprep.subr.bf16.mxu1 %v16887_v55  ;;  %v16962_v54 = vld [vmem:[%s24048_s1 + $0xab4] ss:$52 sps:$4 sm:$0xff]   ;;  %v16965_v55 = vld [vmem:[%s24048_s1 + $0xabc] ss:$52 sps:$4 sm:$0xff]  }
 0x1f7   :  { %5353 = vmatpush1.bf16.msra.mxu0 %v16882_v59  ;;  %5525 = vmatpush1.bf16.msra.mxu1 %v16885_v60  ;;  %v16960_v59 = vld [vmem:[%s24048_s1 + $0xab0] ss:$52 sps:$4 sm:$0xff]   ;;  %v16963_v60 = vld [vmem:[%s24048_s1 + $0xab8] ss:$52 sps:$4 sm:$0xff]  }
 0x1f8   :  { %5354 = vmatprep.subr.bf16.mxu0 %v16890_v61  ;;  %5526 = vmatprep.subr.bf16.mxu1 %v16893_v62  ;;  %v16968_v61 = vld [vmem:[%s24048_s1 + $0xb1c] ss:$52 sps:$4 sm:$0xff]   ;;  %v16971_v62 = vld [vmem:[%s24048_s1 + $0xb24] ss:$52 sps:$4 sm:$0xff]  }
 0x1fb   :  { %5355 = vmatpush1.bf16.msra.mxu0 %v16888_v63  ;;  %5527 = vmatpush1.bf16.msra.mxu1 %v16891_v1  ;;  %v16966_v63 = vld [vmem:[%s24048_s1 + $0xb18] ss:$52 sps:$4 sm:$0xff]   ;;  %v16969_v1 = vld [vmem:[%s24048_s1 + $0xb20] ss:$52 sps:$4 sm:$0xff]  }
 0x1fc   :  { %5356 = vmatprep.subr.bf16.mxu0 %v16896_v2  ;;  %5528 = vmatprep.subr.bf16.mxu1 %v16899_v3  ;;  %v16974_v2 = vld [vmem:[%s24048_s1 + $0xb84] ss:$52 sps:$4 sm:$0xff]   ;;  %v16977_v3 = vld [vmem:[%s24048_s1 + $0xb8c] ss:$52 sps:$4 sm:$0xff]  }
 0x1ff   :  { %5357 = vmatpush1.bf16.msra.mxu0 %v16894_v4  ;;  %5529 = vmatpush1.bf16.msra.mxu1 %v16897_v7  ;;  %v16972_v4 = vld [vmem:[%s24048_s1 + $0xb80] ss:$52 sps:$4 sm:$0xff]   ;;  %v16975_v7 = vld [vmem:[%s24048_s1 + $0xb88] ss:$52 sps:$4 sm:$0xff]  }
 0x200   :  { %5369 = vmatprep.subr.bf16.mxu0 %v16902_v8  ;;  %5541 = vmatprep.subr.bf16.mxu1 %v16905_v9  ;;  %v16980_v8 = vld [vmem:[%s24048_s1 + $0xbec] ss:$52 sps:$4 sm:$0xff]   ;;  %v16983_v9 = vld [vmem:[%s24048_s1 + $0xbf4] ss:$52 sps:$4 sm:$0xff]  }
 0x202   :  { %5359 = vmatmul.mubr.bf16.vlgmr.msra.gmra.mrb[8].mxu0 %v18536_v17  ;;  %5531 = vmatmul.mubr.bf16.vlgmr.msra.gmra.mrb[8].mxu1 %v18536_v17  ;;  %v16984_v17 = vld [vmem:[%s24048_s1 + $0xc50] ss:$52 sps:$4 sm:$0xff]  }
 0x203   :  { %5370 = vmatpush1.bf16.msra.mxu0 %v16900_v12  ;;  %5542 = vmatpush1.bf16.msra.mxu1 %v16903_v13  ;;  %v16978_v12 = vld [vmem:[%s24048_s1 + $0xbe8] ss:$52 sps:$4 sm:$0xff]   ;;  %v16981_v13 = vld [vmem:[%s24048_s1 + $0xbf0] ss:$52 sps:$4 sm:$0xff]  }
 0x204   :  { %5371 = vmatprep.subr.bf16.mxu0 %v16908_v14  ;;  %5543 = vmatprep.subr.bf16.mxu1 %v16911_v15  ;;  %v16986_v14 = vld [vmem:[%s24048_s1 + $0xc54] ss:$52 sps:$4 sm:$0xff]   ;;  %v16989_v15 = vld [vmem:[%s24048_s1 + $0xc5c] ss:$52 sps:$4 sm:$0xff]  }
 0x205   :  { %5401 = vmatprep.mubr.bf16.mxu0 %v20269_v22  ;;  %5573 = vmatprep.mubr.bf16.mxu1 %v20269_v22 }
 0x207   :  { %5372 = vmatpush1.bf16.msra.mxu0 %v16906_v18  ;;  %5544 = vmatpush1.bf16.msra.mxu1 %v16909_v19  ;;  %v16987_v18 = vld [vmem:[%s24048_s1 + $0xc58] ss:$52 sps:$4 sm:$0xff]   ;;  %v16992_v19 = vld [vmem:[%s24048_s1 + $0xcbc] ss:$52 sps:$4 sm:$0xff]  }
 0x208   :  { %5373 = vmatprep.subr.bf16.mxu0 %v16914_v20  ;;  %5545 = vmatprep.subr.bf16.mxu1 %v16917_v21  ;;  %v16995_v20 = vld [vmem:[%s24048_s1 + $0xcc4] ss:$52 sps:$4 sm:$0xff]  }
 0x209   :  { %v16990_v21 = vld [vmem:[%s24048_s1 + $0xcb8] ss:$52 sps:$4 sm:$0xff]  }
 0x20b   :  { %5374 = vmatpush1.bf16.msra.mxu0 %v16912_v23  ;;  %5546 = vmatpush1.bf16.msra.mxu1 %v16915_v24  ;;  %v16993_v23 = vld [vmem:[%s24048_s1 + $0xcc0] ss:$52 sps:$4 sm:$0xff]   ;;  %v16998_v24 = vld [vmem:[%s24048_s1 + $0xd24] ss:$52 sps:$4 sm:$0xff]  }
 0x20c   :  { %5375 = vmatprep.subr.bf16.mxu0 %v16920_v25  ;;  %5547 = vmatprep.subr.bf16.mxu1 %v16923_v26  ;;  %v17001_v25 = vld [vmem:[%s24048_s1 + $0xd2c] ss:$52 sps:$4 sm:$0xff]  }
 0x20d   :  { %v16996_v26 = vld [vmem:[%s24048_s1 + $0xd20] ss:$52 sps:$4 sm:$0xff]  }
 0x20f   :  { %5376 = vmatpush1.bf16.msra.mxu0 %v16918_v27  ;;  %5548 = vmatpush1.bf16.msra.mxu1 %v16921_v28  ;;  %v16999_v27 = vld [vmem:[%s24048_s1 + $0xd28] ss:$52 sps:$4 sm:$0xff]   ;;  %v17004_v28 = vld [vmem:[%s24048_s1 + $0xd8c] ss:$52 sps:$4 sm:$0xff]  }
 0x210   :  { %5377 = vmatprep.subr.bf16.mxu0 %v16926_v29  ;;  %5549 = vmatprep.subr.bf16.mxu1 %v16929_v30  ;;  %v17007_v29 = vld [vmem:[%s24048_s1 + $0xd94] ss:$52 sps:$4 sm:$0xff]  }
 0x211   :  { %v20456_v30 = vld [vmem:[%s24049_s0 + $0x8] ss:$28 sps:$4 sm:$0xff]  }
 0x213   :  { %5378 = vmatpush1.bf16.msra.mxu0 %v16924_v31  ;;  %5550 = vmatpush1.bf16.msra.mxu1 %v16927_v32  ;;  %v17002_v31 = vld [vmem:[%s24048_s1 + $0xd88] ss:$52 sps:$4 sm:$0xff]   ;;  %v17005_v32 = vld [vmem:[%s24048_s1 + $0xd90] ss:$52 sps:$4 sm:$0xff]  }
 0x214   :  { %5379 = vmatprep.subr.bf16.mxu0 %v16932_v33  ;;  %5551 = vmatprep.subr.bf16.mxu1 %v16935_v34  ;;  %v17010_v33 = vld [vmem:[%s24048_s1 + $0xdf4] ss:$52 sps:$4 sm:$0xff]   ;;  %v17013_v34 = vld [vmem:[%s24048_s1 + $0xdfc] ss:$52 sps:$4 sm:$0xff]  }
 0x217   :  { %5380 = vmatpush1.bf16.msra.mxu0 %v16930_v35  ;;  %5552 = vmatpush1.bf16.msra.mxu1 %v16933_v36  ;;  %v20475_v35 = vld [vmem:[%s24049_s0 + $0x14] ss:$28 sps:$4 sm:$0xff]  }
 0x218   :  { %5381 = vmatprep.subr.bf16.mxu0 %v16938_v37  ;;  %5553 = vmatprep.subr.bf16.mxu1 %v16941_v38  ;;  %v17008_v36 = vld [vmem:[%s24048_s1 + $0xdf0] ss:$52 sps:$4 sm:$0xff]   ;;  %v17011_v37 = vld [vmem:[%s24048_s1 + $0xdf8] ss:$52 sps:$4 sm:$0xff]  }
 0x219   :  { %v17016_v38 = vld [vmem:[%s24048_s1 + $0xe5c] ss:$52 sps:$4 sm:$0xff]  }
 0x21b   :  { %5382 = vmatpush1.bf16.msra.mxu0 %v16936_v39  ;;  %5554 = vmatpush1.bf16.msra.mxu1 %v16939_v40  ;;  %v17019_v39 = vld [vmem:[%s24048_s1 + $0xe64] ss:$52 sps:$4 sm:$0xff]  }
 0x21c   :  { %5383 = vmatprep.subr.bf16.mxu0 %v16944_v41  ;;  %5555 = vmatprep.subr.bf16.mxu1 %v16947_v42  ;;  %v17014_v40 = vld [vmem:[%s24048_s1 + $0xe58] ss:$52 sps:$4 sm:$0xff]   ;;  %v17017_v41 = vld [vmem:[%s24048_s1 + $0xe60] ss:$52 sps:$4 sm:$0xff]  }
 0x21d   :  { %v17022_v42 = vld [vmem:[%s24048_s1 + $0xec4] ss:$52 sps:$4 sm:$0xff]  }
 0x21f   :  { %5384 = vmatpush1.bf16.msra.mxu0 %v16942_v43  ;;  %5556 = vmatpush1.bf16.msra.mxu1 %v16945_v44  ;;  %v17025_v43 = vld [vmem:[%s24048_s1 + $0xecc] ss:$52 sps:$4 sm:$0xff]  }
 0x220   :  { %5385 = vmatprep.subr.bf16.mxu0 %v16950_v45  ;;  %5557 = vmatprep.subr.bf16.mxu1 %v16953_v46  ;;  %v17020_v44 = vld [vmem:[%s24048_s1 + $0xec0] ss:$52 sps:$4 sm:$0xff]   ;;  %v17023_v45 = vld [vmem:[%s24048_s1 + $0xec8] ss:$52 sps:$4 sm:$0xff]  }
 0x221   :  { %v17028_v46 = vld [vmem:[%s24048_s1 + $0xf2c] ss:$52 sps:$4 sm:$0xff]  }
 0x223   :  { %5386 = vmatpush1.bf16.msra.mxu0 %v16948_v47  ;;  %5558 = vmatpush1.bf16.msra.mxu1 %v16951_v48  ;;  %v17031_v47 = vld [vmem:[%s24048_s1 + $0xf34] ss:$52 sps:$4 sm:$0xff]  }
 0x224   :  { %5387 = vmatprep.subr.bf16.mxu0 %v16956_v49  ;;  %5559 = vmatprep.subr.bf16.mxu1 %v16959_v50  ;;  %v17026_v48 = vld [vmem:[%s24048_s1 + $0xf28] ss:$52 sps:$4 sm:$0xff]   ;;  %v17029_v49 = vld [vmem:[%s24048_s1 + $0xf30] ss:$52 sps:$4 sm:$0xff]  }
 0x225   :  { %v17034_v50 = vld [vmem:[%s24048_s1 + $0xf94] ss:$52 sps:$4 sm:$0xff]  }
 0x227   :  { %5388 = vmatpush1.bf16.msra.mxu0 %v16954_v51  ;;  %5560 = vmatpush1.bf16.msra.mxu1 %v16957_v52  ;;  %v17037_v51 = vld [vmem:[%s24048_s1 + $0xf9c] ss:$52 sps:$4 sm:$0xff]  }
 0x228   :  { %5389 = vmatprep.subr.bf16.mxu0 %v16962_v54  ;;  %5561 = vmatprep.subr.bf16.mxu1 %v16965_v55  ;;  %v17032_v52 = vld [vmem:[%s24048_s1 + $0xf90] ss:$52 sps:$4 sm:$0xff]   ;;  %v17035_v54 = vld [vmem:[%s24048_s1 + $0xf98] ss:$52 sps:$4 sm:$0xff]  }
 0x229   :  { %v17040_v55 = vld [vmem:[%s24048_s1 + $0xffc] ss:$52 sps:$4 sm:$0xff]  }
 0x22b   :  { %5390 = vmatpush1.bf16.msra.mxu0 %v16960_v59  ;;  %5562 = vmatpush1.bf16.msra.mxu1 %v16963_v60  ;;  %v17043_v59 = vld [vmem:[%s24048_s1 + $0x1004] ss:$52 sps:$4 sm:$0xff]  }
 0x22c   :  { %5391 = vmatprep.subr.bf16.mxu0 %v16968_v61  ;;  %5563 = vmatprep.subr.bf16.mxu1 %v16971_v62  ;;  %v17038_v60 = vld [vmem:[%s24048_s1 + $0xff8] ss:$52 sps:$4 sm:$0xff]   ;;  %v17041_v61 = vld [vmem:[%s24048_s1 + $0x1000] ss:$52 sps:$4 sm:$0xff]  }
 0x22d   :  { %v17046_v62 = vld [vmem:[%s24048_s1 + $0x1064] ss:$52 sps:$4 sm:$0xff]  }
 0x22f   :  { %5392 = vmatpush1.bf16.msra.mxu0 %v16966_v63  ;;  %5564 = vmatpush1.bf16.msra.mxu1 %v16969_v1  ;;  %v17049_v63 = vld [vmem:[%s24048_s1 + $0x106c] ss:$52 sps:$4 sm:$0xff]  }
 0x230   :  { %5393 = vmatprep.subr.bf16.mxu0 %v16974_v2  ;;  %5565 = vmatprep.subr.bf16.mxu1 %v16977_v3  ;;  %v17044_v1 = vld [vmem:[%s24048_s1 + $0x1060] ss:$52 sps:$4 sm:$0xff]   ;;  %v17047_v2 = vld [vmem:[%s24048_s1 + $0x1068] ss:$52 sps:$4 sm:$0xff]  }
 0x231   :  { %v17052_v3 = vld [vmem:[%s24048_s1 + $0x10cc] ss:$52 sps:$4 sm:$0xff]  }
 0x233   :  { %5394 = vmatpush1.bf16.msra.mxu0 %v16972_v4  ;;  %5566 = vmatpush1.bf16.msra.mxu1 %v16975_v7  ;;  %v17055_v4 = vld [vmem:[%s24048_s1 + $0x10d4] ss:$52 sps:$4 sm:$0xff]  }
 0x234   :  { %5395 = vmatprep.subr.bf16.mxu0 %v16980_v8  ;;  %5567 = vmatprep.subr.bf16.mxu1 %v16983_v9  ;;  %v17050_v7 = vld [vmem:[%s24048_s1 + $0x10c8] ss:$52 sps:$4 sm:$0xff]   ;;  %v17053_v8 = vld [vmem:[%s24048_s1 + $0x10d0] ss:$52 sps:$4 sm:$0xff]  }
 0x235   :  { %v17058_v9 = vld [vmem:[%s24048_s1 + $0x1134] ss:$52 sps:$4 sm:$0xff]  }
 0x237   :  { %5396 = vmatpush1.bf16.msra.mxu0 %v16978_v12  ;;  %5568 = vmatpush1.bf16.msra.mxu1 %v16981_v13  ;;  %v17061_v12 = vld [vmem:[%s24048_s1 + $0x113c] ss:$52 sps:$4 sm:$0xff]  }
 0x238   :  { %5397 = vmatprep.subr.bf16.mxu0 %v16986_v14  ;;  %5569 = vmatprep.subr.bf16.mxu1 %v16989_v15  ;;  %v17056_v13 = vld [vmem:[%s24048_s1 + $0x1130] ss:$52 sps:$4 sm:$0xff]   ;;  %v17059_v14 = vld [vmem:[%s24048_s1 + $0x1138] ss:$52 sps:$4 sm:$0xff]  }
 0x239   :  { %v17064_v15 = vld [vmem:[%s24048_s1 + $0x119c] ss:$52 sps:$4 sm:$0xff]  }
 0x23b   :  { %5398 = vmatpush1.bf16.msra.mxu0 %v16984_v17  ;;  %5570 = vmatpush1.bf16.msra.mxu1 %v16987_v18  ;;  %v17067_v17 = vld [vmem:[%s24048_s1 + $0x11a4] ss:$52 sps:$4 sm:$0xff]  }
 0x23c   :  { %5399 = vmatprep.subr.bf16.mxu0 %v16992_v19  ;;  %5571 = vmatprep.subr.bf16.mxu1 %v16995_v20  ;;  %v17062_v18 = vld [vmem:[%s24048_s1 + $0x1198] ss:$52 sps:$4 sm:$0xff]   ;;  %v17065_v19 = vld [vmem:[%s24048_s1 + $0x11a0] ss:$52 sps:$4 sm:$0xff]  }
 0x23d   :  { %v17070_v20 = vld [vmem:[%s24048_s1 + $0x1204] ss:$52 sps:$4 sm:$0xff]  }
 0x23f   :  { %5400 = vmatpush1.bf16.msra.mxu0 %v16990_v21  ;;  %5572 = vmatpush1.bf16.msra.mxu1 %v16993_v23  ;;  %v17073_v21 = vld [vmem:[%s24048_s1 + $0x120c] ss:$52 sps:$4 sm:$0xff]  }
 0x240   :  { %5412 = vmatprep.subr.bf16.mxu0 %v16998_v24  ;;  %5584 = vmatprep.subr.bf16.mxu1 %v17001_v25  ;;  %v17068_v23 = vld [vmem:[%s24048_s1 + $0x1200] ss:$52 sps:$4 sm:$0xff]   ;;  %v17071_v24 = vld [vmem:[%s24048_s1 + $0x1208] ss:$52 sps:$4 sm:$0xff]  }
 0x241   :  { %v17076_v25 = vld [vmem:[%s24048_s1 + $0x126c] ss:$52 sps:$4 sm:$0xff]  }
 0x242   :  { %5402 = vmatmul.mubr.bf16.vlgmr.msra.gmra.mrb[8].mxu0 %v20456_v30  ;;  %5574 = vmatmul.mubr.bf16.vlgmr.msra.gmra.mrb[8].mxu1 %v20456_v30 }
 0x243   :  { %5413 = vmatpush1.bf16.msra.mxu0 %v16996_v26  ;;  %5585 = vmatpush1.bf16.msra.mxu1 %v16999_v27  ;;  %v17079_v26 = vld [vmem:[%s24048_s1 + $0x1274] ss:$52 sps:$4 sm:$0xff]  }
 0x244   :  { %5414 = vmatprep.subr.bf16.mxu0 %v17004_v28  ;;  %5586 = vmatprep.subr.bf16.mxu1 %v17007_v29  ;;  %v17074_v27 = vld [vmem:[%s24048_s1 + $0x1268] ss:$52 sps:$4 sm:$0xff]   ;;  %v17077_v28 = vld [vmem:[%s24048_s1 + $0x1270] ss:$52 sps:$4 sm:$0xff]  }
 0x245   :  { %5444 = vmatprep.mubr.bf16.mxu0 %v20475_v35  ;;  %5616 = vmatprep.mubr.bf16.mxu1 %v20475_v35  ;;  %v17082_v29 = vld [vmem:[%s24048_s1 + $0x12d4] ss:$52 sps:$4 sm:$0xff]  }
 0x247   :  { %5415 = vmatpush1.bf16.msra.mxu0 %v17002_v31  ;;  %5587 = vmatpush1.bf16.msra.mxu1 %v17005_v32  ;;  %v17085_v31 = vld [vmem:[%s24048_s1 + $0x12dc] ss:$52 sps:$4 sm:$0xff]  }
 0x248   :  { %5416 = vmatprep.subr.bf16.mxu0 %v17010_v33  ;;  %5588 = vmatprep.subr.bf16.mxu1 %v17013_v34  ;;  %v17080_v32 = vld [vmem:[%s24048_s1 + $0x12d0] ss:$52 sps:$4 sm:$0xff]   ;;  %v17083_v33 = vld [vmem:[%s24048_s1 + $0x12d8] ss:$52 sps:$4 sm:$0xff]  }
 0x249   :  { %v17088_v34 = vld [vmem:[%s24048_s1 + $0x133c] ss:$52 sps:$4 sm:$0xff]  }
 0x24b   :  { %5417 = vmatpush1.bf16.msra.mxu0 %v17008_v36  ;;  %5589 = vmatpush1.bf16.msra.mxu1 %v17011_v37  ;;  %v17091_v36 = vld [vmem:[%s24048_s1 + $0x1344] ss:$52 sps:$4 sm:$0xff]  }
 0x24c   :  { %5418 = vmatprep.subr.bf16.mxu0 %v17016_v38  ;;  %5590 = vmatprep.subr.bf16.mxu1 %v17019_v39  ;;  %v17086_v37 = vld [vmem:[%s24048_s1 + $0x1338] ss:$52 sps:$4 sm:$0xff]   ;;  %v17089_v38 = vld [vmem:[%s24048_s1 + $0x1340] ss:$52 sps:$4 sm:$0xff]  }
 0x24d   :  { %v17094_v39 = vld [vmem:[%s24048_s1 + $0x13a4] ss:$52 sps:$4 sm:$0xff]  }
 0x24f   :  { %5419 = vmatpush1.bf16.msra.mxu0 %v17014_v40  ;;  %5591 = vmatpush1.bf16.msra.mxu1 %v17017_v41  ;;  %v17097_v40 = vld [vmem:[%s24048_s1 + $0x13ac] ss:$52 sps:$4 sm:$0xff]  }
 0x250   :  { %5420 = vmatprep.subr.bf16.mxu0 %v17022_v42  ;;  %5592 = vmatprep.subr.bf16.mxu1 %v17025_v43  ;;  %v17092_v41 = vld [vmem:[%s24048_s1 + $0x13a0] ss:$52 sps:$4 sm:$0xff]   ;;  %v17095_v42 = vld [vmem:[%s24048_s1 + $0x13a8] ss:$52 sps:$4 sm:$0xff]  }
 0x251   :  { %v17100_v43 = vld [vmem:[%s24048_s1 + $0x140c] ss:$52 sps:$4 sm:$0xff]  }
 0x253   :  { %5421 = vmatpush1.bf16.msra.mxu0 %v17020_v44  ;;  %5593 = vmatpush1.bf16.msra.mxu1 %v17023_v45  ;;  %v17103_v44 = vld [vmem:[%s24048_s1 + $0x1414] ss:$52 sps:$4 sm:$0xff]  }
 0x254   :  { %5422 = vmatprep.subr.bf16.mxu0 %v17028_v46  ;;  %5594 = vmatprep.subr.bf16.mxu1 %v17031_v47  ;;  %v17098_v45 = vld [vmem:[%s24048_s1 + $0x1408] ss:$52 sps:$4 sm:$0xff]   ;;  %v17101_v46 = vld [vmem:[%s24048_s1 + $0x1410] ss:$52 sps:$4 sm:$0xff]  }
 0x255   :  { %v20668_v47 = vld [vmem:[%s24049_s0 + $0x10] ss:$28 sps:$4 sm:$0xff]  }
 0x257   :  { %5423 = vmatpush1.bf16.msra.mxu0 %v17026_v48  ;;  %5595 = vmatpush1.bf16.msra.mxu1 %v17029_v49  ;;  %v17106_v48 = vld [vmem:[%s24048_s1 + $0x1474] ss:$52 sps:$4 sm:$0xff]   ;;  %v17109_v49 = vld [vmem:[%s24048_s1 + $0x147c] ss:$52 sps:$4 sm:$0xff]  }
 0x258   :  { %5424 = vmatprep.subr.bf16.mxu0 %v17034_v50  ;;  %5596 = vmatprep.subr.bf16.mxu1 %v17037_v51  ;;  %v17104_v50 = vld [vmem:[%s24048_s1 + $0x1470] ss:$52 sps:$4 sm:$0xff]   ;;  %v17107_v51 = vld [vmem:[%s24048_s1 + $0x1478] ss:$52 sps:$4 sm:$0xff]  }
 0x25b   :  { %5425 = vmatpush1.bf16.msra.mxu0 %v17032_v52  ;;  %5597 = vmatpush1.bf16.msra.mxu1 %v17035_v54  ;;  %v17112_v52 = vld [vmem:[%s24048_s1 + $0x14dc] ss:$52 sps:$4 sm:$0xff]   ;;  %v17115_v54 = vld [vmem:[%s24048_s1 + $0x14e4] ss:$52 sps:$4 sm:$0xff]  }
 0x25c   :  { %5426 = vmatprep.subr.bf16.mxu0 %v17040_v55  ;;  %5598 = vmatprep.subr.bf16.mxu1 %v17043_v59  ;;  %v17110_v55 = vld [vmem:[%s24048_s1 + $0x14d8] ss:$52 sps:$4 sm:$0xff]   ;;  %v17113_v59 = vld [vmem:[%s24048_s1 + $0x14e0] ss:$52 sps:$4 sm:$0xff]  }
 0x25f   :  { %5427 = vmatpush1.bf16.msra.mxu0 %v17038_v60  ;;  %5599 = vmatpush1.bf16.msra.mxu1 %v17041_v61  ;;  %v17118_v60 = vld [vmem:[%s24048_s1 + $0x1544] ss:$52 sps:$4 sm:$0xff]   ;;  %v17121_v61 = vld [vmem:[%s24048_s1 + $0x154c] ss:$52 sps:$4 sm:$0xff]  }
 0x260   :  { %5428 = vmatprep.subr.bf16.mxu0 %v17046_v62  ;;  %5600 = vmatprep.subr.bf16.mxu1 %v17049_v63  ;;  %v17116_v62 = vld [vmem:[%s24048_s1 + $0x1540] ss:$52 sps:$4 sm:$0xff]   ;;  %v17119_v63 = vld [vmem:[%s24048_s1 + $0x1548] ss:$52 sps:$4 sm:$0xff]  }
 0x263   :  { %5429 = vmatpush1.bf16.msra.mxu0 %v17044_v1  ;;  %5601 = vmatpush1.bf16.msra.mxu1 %v17047_v2  ;;  %v20711_v1 = vsub.s32 4, %v19952_v0  ;;  %v867_v2 = vsub.s32 6, %v19952_v0 }
 0x264   :  { %5430 = vmatprep.subr.bf16.mxu0 %v17052_v3  ;;  %5602 = vmatprep.subr.bf16.mxu1 %v17055_v4  ;;  %v863_v3 = vsub.s32 5, %v19952_v0  ;;  %v871_v4 = vsub.s32 7, %v19952_v0  ;;  %v18420_v0 = vld [vmem:[%s24052_s5 + $0x480] ss:$12 sps:$4 sm:$0xff]  }
 0x267   :  { %5431 = vmatpush1.bf16.msra.mxu0 %v17050_v7  ;;  %5603 = vmatpush1.bf16.msra.mxu1 %v17053_v8  ;;  %v17124_v7 = vld [vmem:[%s24048_s1 + $0x15ac] ss:$52 sps:$4 sm:$0xff]   ;;  %v17127_v8 = vld [vmem:[%s24048_s1 + $0x15b4] ss:$52 sps:$4 sm:$0xff]  }
 0x268   :  { %5432 = vmatprep.subr.bf16.mxu0 %v17058_v9  ;;  %5604 = vmatprep.subr.bf16.mxu1 %v17061_v12  ;;  %v17122_v9 = vld [vmem:[%s24048_s1 + $0x15a8] ss:$52 sps:$4 sm:$0xff]   ;;  %v17125_v12 = vld [vmem:[%s24048_s1 + $0x15b0] ss:$52 sps:$4 sm:$0xff]  }
 0x26b   :  { %5433 = vmatpush1.bf16.msra.mxu0 %v17056_v13  ;;  %5605 = vmatpush1.bf16.msra.mxu1 %v17059_v14  ;;  %v18541_v13 = vld [vmem:[%s24050_s2] sm:$0xff] }
 0x26c   :  { %5434 = vmatprep.subr.bf16.mxu0 %v17064_v15  ;;  %5606 = vmatprep.subr.bf16.mxu1 %v17067_v17  ;;  %v860_v14 = vrot.slane %v18541_v13, %v20711_v1  ;;  %v868_v15 = vrot.slane %v18541_v13, %v867_v2  ;;  %v864_v17 = vrot.slane %v18541_v13, %v863_v3 }
 0x26f   :  { %5435 = vmatpush1.bf16.msra.mxu0 %v17062_v18  ;;  %5607 = vmatpush1.bf16.msra.mxu1 %v17065_v19  ;;  %v872_v18 = vrot.slane %v18541_v13, %v871_v4  ;;  %v17130_v19 = vld [vmem:[%s24048_s1 + $0x1614] ss:$52 sps:$4 sm:$0xff]   ;;  %v17142_v4 = vld [vmem:[%s24048_s1 + $0x30] ss:$52 sps:$4 sm:$0xff]   ;;  %v17146_v13 = vld [vmem:[%s24048_s1 + $0x98] ss:$52 sps:$4 sm:$0xff]  }
 0x270   :  { %5436 = vmatprep.subr.bf16.mxu0 %v17070_v20  ;;  %5608 = vmatprep.subr.bf16.mxu1 %v17073_v21  ;;  %v17133_v20 = vld [vmem:[%s24048_s1 + $0x161c] ss:$52 sps:$4 sm:$0xff]  }
 0x273   :  { %5437 = vmatpush1.bf16.msra.mxu0 %v17068_v23  ;;  %5609 = vmatpush1.bf16.msra.mxu1 %v17071_v24  ;;  %v17128_v23 = vld [vmem:[%s24048_s1 + $0x1610] ss:$52 sps:$4 sm:$0xff]   ;;  %v17131_v24 = vld [vmem:[%s24048_s1 + $0x1618] ss:$52 sps:$4 sm:$0xff]  }
 0x274   :  { %5438 = vmatprep.subr.bf16.mxu0 %v17076_v25  ;;  %5610 = vmatprep.subr.bf16.mxu1 %v17079_v26 }
 0x277   :  { %5439 = vmatpush1.bf16.msra.mxu0 %v17074_v27  ;;  %5611 = vmatpush1.bf16.msra.mxu1 %v17077_v28  ;;  %v17136_v28 = vld [vmem:[%s24048_s1 + $0x167c] ss:$52 sps:$4 sm:$0xff]  }
 0x278   :  { %5440 = vmatprep.subr.bf16.mxu0 %v17082_v29  ;;  %5612 = vmatprep.subr.bf16.mxu1 %v17085_v31 }
 0x27b   :  { %5441 = vmatpush1.bf16.msra.mxu0 %v17080_v32  ;;  %5613 = vmatpush1.bf16.msra.mxu1 %v17083_v33 }
 0x27c   :  { %5442 = vmatprep.subr.bf16.mxu0 %v17088_v34  ;;  %5614 = vmatprep.subr.bf16.mxu1 %v17091_v36 }
 0x27f   :  { %5443 = vmatpush1.bf16.msra.mxu0 %v17086_v37  ;;  %5615 = vmatpush1.bf16.msra.mxu1 %v17089_v38 }
 0x280   :  { %5455 = vmatprep.subr.bf16.mxu0 %v17094_v39  ;;  %5627 = vmatprep.subr.bf16.mxu1 %v17097_v40  ;;  %v17139_v39 = vld [vmem:[%s24048_s1 + $0x1684] ss:$52 sps:$4 sm:$0xff]  }
 0x282   :  { %5445 = vmatmul.mubr.bf16.vlgmr.msra.gmra.mrb[8].mxu0 %v20668_v47  ;;  %5617 = vmatmul.mubr.bf16.vlgmr.msra.gmra.mrb[8].mxu1 %v20668_v47 }
 0x283   :  { %5456 = vmatpush1.bf16.msra.mxu0 %v17092_v41  ;;  %5628 = vmatpush1.bf16.msra.mxu1 %v17095_v42 }
 0x284   :  { %5457 = vmatprep.subr.bf16.mxu0 %v17100_v43  ;;  %5629 = vmatprep.subr.bf16.mxu1 %v17103_v44  ;;  %v17134_v44 = vld [vmem:[%s24048_s1 + $0x1678] ss:$52 sps:$4 sm:$0xff]  }
 0x285   :  { %5487 = vmatprep.mubr.bf16.mxu0 %v18546_v16  ;;  %5659 = vmatprep.mubr.bf16.mxu1 %v18546_v16 }
 0x287   :  { %5458 = vmatpush1.bf16.msra.mxu0 %v17098_v45  ;;  %5630 = vmatpush1.bf16.msra.mxu1 %v17101_v46  ;;  %v17137_v45 = vld [vmem:[%s24048_s1 + $0x1680] ss:$52 sps:$4 sm:$0xff]  }
 0x288   :  { %5459 = vmatprep.subr.bf16.mxu0 %v17106_v48  ;;  %5631 = vmatprep.subr.bf16.mxu1 %v17109_v49 }
 0x28b   :  { %5460 = vmatpush1.bf16.msra.mxu0 %v17104_v50  ;;  %5632 = vmatpush1.bf16.msra.mxu1 %v17107_v51 }
 0x28c   :  { %5461 = vmatprep.subr.bf16.mxu0 %v17112_v52  ;;  %5633 = vmatprep.subr.bf16.mxu1 %v17115_v54 }
 0x28f   :  { %5462 = vmatpush1.bf16.msra.mxu0 %v17110_v55  ;;  %5634 = vmatpush1.bf16.msra.mxu1 %v17113_v59 }
 0x290   :  { %5463 = vmatprep.subr.bf16.mxu0 %v17118_v60  ;;  %5635 = vmatprep.subr.bf16.mxu1 %v17121_v61  ;;  %v17140_v60 = vld [vmem:[%s24048_s1 + $0x370] ss:$52 sps:$4 sm:$0xff]  }
 0x291   :  { %v17141_v61 = vld [vmem:[%s24048_s1 + $0x9f0] ss:$52 sps:$4 sm:$0xff]  }
 0x293   :  { %5464 = vmatpush1.bf16.msra.mxu0 %v17116_v62  ;;  %5636 = vmatpush1.bf16.msra.mxu1 %v17119_v63 }
 0x294   :  { %5465 = vmatprep.subr.bf16.mxu0 %v17124_v7  ;;  %5637 = vmatprep.subr.bf16.mxu1 %v17127_v8  ;;  %v17143_v7 = vld [vmem:[%s24048_s1 + $0x6b0] ss:$52 sps:$4 sm:$0xff]  }
 0x295   :  { %v5145_v21 = vpop.f32.mrb[4].mxu0  ;;  %v5317_v25 = vpop.f32.mrb[4].mxu1 }
 0x296   :  { %v15931_v26 = vadd.f32 %v5145_v21, %v860_v14  ;;  %v5147_v27 = vpop.f32.mrb[5].mxu0  ;;  %v15935_v29 = vadd.f32 %v5317_v25, %v868_v15  ;;  %v5319_v31 = vpop.f32.mrb[5].mxu1  ;;  %v17151_v21 = vld [vmem:[%s24048_s1 + $0x780] ss:$52 sps:$4 sm:$0xff]   ;;  %v17155_v25 = vld [vmem:[%s24048_s1 + $0x7e8] ss:$52 sps:$4 sm:$0xff]  }
 0x297   :  { %v15932_v32 = vadd.f32 %v5147_v27, %v864_v17  ;;  %v5149_v33 = vpop.f32.mrb[6].mxu0  ;;  %5466 = vmatpush1.bf16.msra.mxu0 %v17122_v9  ;;  %5638 = vmatpush1.bf16.msra.mxu1 %v17125_v12  ;;  %v15936_v34 = vadd.f32 %v5319_v31, %v872_v18  ;;  %v5321_v36 = vpop.f32.mrb[6].mxu1  ;;  %v17144_v9 = vld [vmem:[%s24048_s1 + $0x3d8] ss:$52 sps:$4 sm:$0xff]   ;;  %v17157_v27 = vld [vmem:[%s24048_s1 + $0xb90] ss:$52 sps:$4 sm:$0xff]  }
 0x298   :  { %v15933_v37 = vadd.f32 %v5149_v33, %v860_v14  ;;  %v5151_v38 = vpop.f32.mrb[7].mxu0  ;;  %5467 = vmatprep.subr.bf16.mxu0 %v17130_v19  ;;  %5639 = vmatprep.subr.bf16.mxu1 %v17133_v20  ;;  %v5840_v40 = vmax.f32 %v15935_v29, 0.0  ;;  %v15937_v41 = vadd.f32 %v5321_v36, %v868_v15  ;;  %v5323_v42 = vpop.f32.mrb[7].mxu1  ;;  %v5838_v49 = vmax.f32 %v15931_v26, 0.0  ;;  %v17145_v12 = vld [vmem:[%s24048_s1 + $0xa58] ss:$52 sps:$4 sm:$0xff]  }
 0x299   :  { %v15934_v43 = vadd.f32 %v5151_v38, %v864_v17  ;;  %v5841_v46 = vmax.f32 %v15936_v34, 0.0  ;;  %v15938_v48 = vadd.f32 %v5323_v42, %v872_v18  ;;  %v5839_v52 = vmax.f32 %v15932_v32, 0.0  ;;  %v17147_v14 = vld [vmem:[%s24048_s1 + $0x718] ss:$52 sps:$4 sm:$0xff]   ;;  %v17148_v17 = vld [vmem:[%s24048_s1 + $0x440] ss:$52 sps:$4 sm:$0xff]  }
 0x29a   :  { %v5851_v50 = vmax.f32 %v15933_v37, 0.0  ;;  %v5853_v51 = vmax.f32 %v15937_v41, 0.0  ;;  %v20795_v15 = vld [vmem:[%s24049_s0 + $0x18] ss:$28 sps:$4 sm:$0xff]   ;;  %v18543_v20 = vld [vmem:[%s24049_s0 + $0x4] ss:$28 sps:$4 sm:$0xff]  }
 0x29b   :  { %v5852_v54 = vmax.f32 %v15934_v43, 0.0  ;;  %5468 = vmatpush1.bf16.msra.mxu0 %v17128_v23  ;;  %5640 = vmatpush1.bf16.msra.mxu1 %v17131_v24  ;;  %v5854_v55 = vmax.f32 %v15938_v48, 0.0  ;;  %v17149_v18 = vld [vmem:[%s24048_s1 + $0xac0] ss:$52 sps:$4 sm:$0xff]   ;;  %v17152_v23 = vld [vmem:[%s24048_s1 + $0x4a8] ss:$52 sps:$4 sm:$0xff]  }
 0x29c   :  { %v20760_v59 = vpack.c.bf16 %v5851_v50, %v5838_v49  ;;  %5469 = vmatprep.subr.bf16.mxu0 %v17136_v28  ;;  %5641 = vmatprep.subr.bf16.mxu1 %v17139_v39  ;;  %v20768_v62 = vpack.c.bf16 %v5853_v51, %v5840_v40  ;;  %v17150_v19 = vld [vmem:[%s24048_s1 + $0x100] ss:$52 sps:$4 sm:$0xff]   ;;  %v17153_v24 = vld [vmem:[%s24048_s1 + $0xb28] ss:$52 sps:$4 sm:$0xff]   ;;  %v17156_v26 = vld [vmem:[%s24048_s1 + $0x510] ss:$52 sps:$4 sm:$0xff]  }
 0x29d   :  { %v20770_v63 = vpack.c.bf16 %v5852_v54, %v5839_v52  ;;  %v20778_v8 = vpack.c.bf16 %v5854_v55, %v5841_v46  ;;  %v17158_v28 = vld [vmem:[%s24048_s1 + $0x1d0] ss:$52 sps:$4 sm:$0xff]   ;;  %v17160_v31 = vld [vmem:[%s24048_s1 + $0x578] ss:$52 sps:$4 sm:$0xff]   ;;  %v17164_v36 = vld [vmem:[%s24048_s1 + $0x5e0] ss:$52 sps:$4 sm:$0xff]  }
 0x29e   :  { %v17159_v29 = vld [vmem:[%s24048_s1 + $0x850] ss:$52 sps:$4 sm:$0xff]   ;;  %v17161_v32 = vld [vmem:[%s24048_s1 + $0xbf8] ss:$52 sps:$4 sm:$0xff]   ;;  %v17165_v37 = vld [vmem:[%s24048_s1 + $0xc60] ss:$52 sps:$4 sm:$0xff]  }
 0x29f   :  { %5470 = vmatpush1.bf16.msra.mxu0 %v17134_v44  ;;  %5642 = vmatpush1.bf16.msra.mxu1 %v17137_v45  ;;  %v17162_v33 = vld [vmem:[%s24048_s1 + $0x238] ss:$52 sps:$4 sm:$0xff]   ;;  %v17166_v38 = vld [vmem:[%s24048_s1 + $0x2a0] ss:$52 sps:$4 sm:$0xff]   ;;  %v17168_v40 = vld [vmem:[%s24048_s1 + $0x648] ss:$52 sps:$4 sm:$0xff]  }
 0x2a0   :  { %15499 = vmatprep.subr.bf16.mxu0 %v17140_v60  ;;  %15521 = vmatprep.subr.bf16.mxu1 %v17141_v61  ;;  %v17163_v34 = vld [vmem:[%s24048_s1 + $0x8b8] ss:$52 sps:$4 sm:$0xff]   ;;  %v17167_v39 = vld [vmem:[%s24048_s1 + $0x920] ss:$52 sps:$4 sm:$0xff]   ;;  %v17169_v41 = vld [vmem:[%s24048_s1 + $0xcc8] ss:$52 sps:$4 sm:$0xff]  }
 0x2a1   :  { %v17170_v42 = vld [vmem:[%s24048_s1 + $0x308] ss:$52 sps:$4 sm:$0xff]   ;;  %v17172_v44 = vld [vmem:[%s24048_s1 + $0x1070] ss:$52 sps:$4 sm:$0xff]   ;;  %v18547_v48 = vmov 0.0  }
 0x2a2   :  { %5488 = vmatmul.mubr.bf16.vlgmr.msra.gmra.mrb[8].mxu0 %v20795_v15  ;;  %5660 = vmatmul.mubr.bf16.vlgmr.msra.gmra.mrb[8].mxu1 %v20795_v15  ;;  %v17171_v43 = vld [vmem:[%s24048_s1 + $0x988] ss:$52 sps:$4 sm:$0xff]   ;;  %v17173_v45 = vld [vmem:[%s24048_s1 + $0xd30] ss:$52 sps:$4 sm:$0xff]   ;;  %v17175_v49 = vld [vmem:[%s24048_s1 + $0x10d8] ss:$52 sps:$4 sm:$0xff]  }
 0x2a3   :  { %15500 = vmatpush3.bf16.msra.mxu0 %v17142_v4  ;;  %15522 = vmatpush3.bf16.msra.mxu1 %v17143_v7  ;;  %v17174_v46 = vld [vmem:[%s24048_s1 + $0x13b0] ss:$52 sps:$4 sm:$0xff]   ;;  %v17176_v50 = vld [vmem:[%s24048_s1 + $0xd98] ss:$52 sps:$4 sm:$0xff]   ;;  %v18544_v52 = vld [vmem:[%s24049_s0] ss:$28 sps:$4 sm:$0xff]  }
 0x2a4   :  { %15501 = vmatprep.subr.bf16.mxu0 %v17144_v9  ;;  %15523 = vmatprep.subr.bf16.mxu1 %v17145_v12  ;;  %v17177_v51 = vld [vmem:[%s24048_s1 + $0x1418] ss:$52 sps:$4 sm:$0xff]   ;;  %v17178_v54 = vld [vmem:[%s24048_s1 + $0x1140] ss:$52 sps:$4 sm:$0xff]   ;;  %v17182_v61 = vld [vmem:[%s24048_s1 + $0xe68] ss:$52 sps:$4 sm:$0xff]  }
 0x2a5   :  { %5702 = vmatprep.mubr.bf16.mxu0 %v18543_v20  ;;  %5743 = vmatprep.mubr.bf16.mxu1 %v20269_v22  ;;  %v17154_v22 = vld [vmem:[%s24048_s1 + $0x168] ss:$52 sps:$4 sm:$0xff]   ;;  %v17179_v55 = vld [vmem:[%s24048_s1 + $0xe00] ss:$52 sps:$4 sm:$0xff]   ;;  %v17184_v4 = vld [vmem:[%s24048_s1 + $0x1210] ss:$52 sps:$4 sm:$0xff]  }
 0x2a6   :  { %v17180_v60 = vld [vmem:[%s24048_s1 + $0x1480] ss:$52 sps:$4 sm:$0xff]   ;;  %v17185_v7 = vld [vmem:[%s24048_s1 + $0xed0] ss:$52 sps:$4 sm:$0xff]   ;;  %v17187_v12 = vld [vmem:[%s24048_s1 + $0x1278] ss:$52 sps:$4 sm:$0xff]  }
 0x2a7   :  { %15502 = vmatpush3.bf16.msra.mxu0 %v17146_v13  ;;  %15524 = vmatpush3.bf16.msra.mxu1 %v17147_v14  ;;  %v17186_v9 = vld [vmem:[%s24048_s1 + $0x1550] ss:$52 sps:$4 sm:$0xff]   ;;  %v17188_v13 = vld [vmem:[%s24048_s1 + $0xf38] ss:$52 sps:$4 sm:$0xff]   ;;  %v17193_v20 = vld [vmem:[%s24048_s1 + $0x1348] ss:$52 sps:$4 sm:$0xff]  }
 0x2a8   :  { %15503 = vmatprep.subr.bf16.mxu0 %v17148_v17  ;;  %15525 = vmatprep.subr.bf16.mxu1 %v17149_v18  ;;  %v17189_v14 = vld [vmem:[%s24048_s1 + $0x15b8] ss:$52 sps:$4 sm:$0xff]   ;;  %v17190_v17 = vld [vmem:[%s24048_s1 + $0x12e0] ss:$52 sps:$4 sm:$0xff]  }
 0x2a9   :  { %v17191_v18 = vld [vmem:[%s24048_s1 + $0xfa0] ss:$52 sps:$4 sm:$0xff]  }
 0x2ab   :  { %15504 = vmatpush3.bf16.msra.mxu0 %v17150_v19  ;;  %15526 = vmatpush3.bf16.msra.mxu1 %v17151_v21  ;;  %v17192_v19 = vld [vmem:[%s24048_s1 + $0x1620] ss:$52 sps:$4 sm:$0xff]   ;;  %v17194_v21 = vld [vmem:[%s24048_s1 + $0x1008] ss:$52 sps:$4 sm:$0xff]  }
 0x2ac   :  { %15505 = vmatprep.subr.bf16.mxu0 %v17152_v23  ;;  %15527 = vmatprep.subr.bf16.mxu1 %v17153_v24  ;;  %v17195_v23 = vld [vmem:[%s24048_s1 + $0x1688] ss:$52 sps:$4 sm:$0xff]   ;;  %v17198_v24 = vld [vmem:[%s24051_s3 + $0x4] ss:$28 sps:$4 sm:$0xff]  }
 0x2af   :  { %15506 = vmatpush3.bf16.msra.mxu0 %v17154_v22  ;;  %15528 = vmatpush3.bf16.msra.mxu1 %v17155_v25  ;;  %v17201_v22 = vld [vmem:[%s24051_s3 + $0xc] ss:$28 sps:$4 sm:$0xff]   ;;  %v17196_v25 = vld [vmem:[%s24051_s3] ss:$28 sps:$4 sm:$0xff]  }
 0x2b0   :  { %15507 = vmatprep.subr.bf16.mxu0 %v17156_v26  ;;  %15529 = vmatprep.subr.bf16.mxu1 %v17157_v27  ;;  %v17199_v26 = vld [vmem:[%s24051_s3 + $0x8] ss:$28 sps:$4 sm:$0xff]   ;;  %v17204_v27 = vld [vmem:[%s24051_s3 + $0x3c] ss:$28 sps:$4 sm:$0xff]  }
 0x2b3   :  { %15508 = vmatpush3.bf16.msra.mxu0 %v17158_v28  ;;  %15530 = vmatpush3.bf16.msra.mxu1 %v17159_v29  ;;  %v17207_v28 = vld [vmem:[%s24051_s3 + $0x44] ss:$28 sps:$4 sm:$0xff]   ;;  %v17202_v29 = vld [vmem:[%s24051_s3 + $0x38] ss:$28 sps:$4 sm:$0xff]  }
 0x2b4   :  { %15509 = vmatprep.subr.bf16.mxu0 %v17160_v31  ;;  %15531 = vmatprep.subr.bf16.mxu1 %v17161_v32  ;;  %v17205_v31 = vld [vmem:[%s24051_s3 + $0x40] ss:$28 sps:$4 sm:$0xff]   ;;  %v17210_v32 = vld [vmem:[%s24051_s3 + $0x74] ss:$28 sps:$4 sm:$0xff]  }
 0x2b7   :  { %15510 = vmatpush3.bf16.msra.mxu0 %v17162_v33  ;;  %15532 = vmatpush3.bf16.msra.mxu1 %v17163_v34  ;;  %v17211_v33 = vld [vmem:[%s24051_s3 + $0x78] ss:$28 sps:$4 sm:$0xff]   ;;  %v17216_v34 = vld [vmem:[%s24051_s3 + $0xac] ss:$28 sps:$4 sm:$0xff]  }
 0x2b8   :  { %15511 = vmatprep.subr.bf16.mxu0 %v17164_v36  ;;  %15533 = vmatprep.subr.bf16.mxu1 %v17165_v37  ;;  %v17214_v36 = vld [vmem:[%s24051_s3 + $0xa8] ss:$28 sps:$4 sm:$0xff]   ;;  %v17219_v37 = vld [vmem:[%s24051_s3 + $0xb4] ss:$28 sps:$4 sm:$0xff]  }
 0x2bb   :  { %15512 = vmatpush3.bf16.msra.mxu0 %v17166_v38  ;;  %15534 = vmatpush3.bf16.msra.mxu1 %v17167_v39  ;;  %v17217_v38 = vld [vmem:[%s24051_s3 + $0xb0] ss:$28 sps:$4 sm:$0xff]   ;;  %v17222_v39 = vld [vmem:[%s24051_s3 + $0xe4] ss:$28 sps:$4 sm:$0xff]  }
 0x2bc   :  { %15513 = vmatprep.subr.bf16.mxu0 %v17168_v40  ;;  %15535 = vmatprep.subr.bf16.mxu1 %v17169_v41  ;;  %v17220_v40 = vld [vmem:[%s24051_s3 + $0xe0] ss:$28 sps:$4 sm:$0xff]   ;;  %v17225_v41 = vld [vmem:[%s24051_s3 + $0xec] ss:$28 sps:$4 sm:$0xff]  }
 0x2bf   :  { %15514 = vmatpush3.bf16.msra.mxu0 %v17170_v42  ;;  %15536 = vmatpush3.bf16.msra.mxu1 %v17171_v43  ;;  %v17223_v42 = vld [vmem:[%s24051_s3 + $0xe8] ss:$28 sps:$4 sm:$0xff]   ;;  %v17228_v43 = vld [vmem:[%s24051_s3 + $0x11c] ss:$28 sps:$4 sm:$0xff]  }
 0x2c0   :  { %15543 = vmatprep.subr.bf16.mxu0 %v17172_v44  ;;  %15843 = vmatprep.subr.bf16.mxu1 %v18547_v48  ;;  %v17226_v44 = vld [vmem:[%s24051_s3 + $0x118] ss:$28 sps:$4 sm:$0xff]  }
 0x2c2   :  { %5703 = vmatmul.mubr.bf16.vlgmr.msra.gmra.mrb[12].mxu0 %v18544_v52  ;;  %5744 = vmatmul.mubr.bf16.vlgmr.msra.gmra.mrb[12].mxu1 %v20456_v30  ;;  %v17181_v30 = vld [vmem:[%s24048_s1 + $0x11a8] ss:$52 sps:$4 sm:$0xff]   ;;  %v17235_v52 = vld [vmem:[%s24051_s3 + $0x158] ss:$28 sps:$4 sm:$0xff]  }
 0x2c3   :  { %15544 = vmatpush3.bf16.msra.mxu0 %v17173_v45  ;;  %15844 = vmatpush3.bf16.msra.mxu1 %v17174_v46  ;;  %v17231_v45 = vld [vmem:[%s24051_s3 + $0x124] ss:$28 sps:$4 sm:$0xff]  }
 0x2c4   :  { %15545 = vmatprep.subr.bf16.mxu0 %v17175_v49  ;;  %15845 = vmatprep.subr.bf16.mxu1 %v18547_v48  ;;  %v17229_v46 = vld [vmem:[%s24051_s3 + $0x120] ss:$28 sps:$4 sm:$0xff]   ;;  %v17234_v49 = vld [vmem:[%s24051_s3 + $0x154] ss:$28 sps:$4 sm:$0xff]  }
 0x2c5   :  { %5784 = vmatprep.mubr.bf16.mxu0 %v20475_v35  ;;  %15859 = vmatprep.mubr.msk.bf16.mxu1 %vm18548_vm0, %v18547_v48  ;;  %v17183_v35 = vld [vmem:[%s24048_s1 + $0x14e8] ss:$52 sps:$4 sm:$0xff]  }
 0x2c7   :  { %15546 = vmatpush3.bf16.msra.mxu0 %v17176_v50  ;;  %15846 = vmatpush3.bf16.msra.mxu1 %v17177_v51  ;;  %v17237_v50 = vld [vmem:[%s24051_s3 + $0x15c] ss:$28 sps:$4 sm:$0xff]   ;;  %v17232_v51 = vld [vmem:[%s24051_s3 + $0x150] ss:$28 sps:$4 sm:$0xff]  }
 0x2c8   :  { %15547 = vmatprep.subr.bf16.mxu0 %v17178_v54  ;;  %15847 = vmatprep.subr.bf16.mxu1 %v18547_v48  ;;  %v17240_v54 = vld [vmem:[%s24051_s3 + $0x18c] ss:$28 sps:$4 sm:$0xff]  }
 0x2cb   :  { %15548 = vmatpush3.bf16.msra.mxu0 %v17179_v55  ;;  %15848 = vmatpush3.bf16.msra.mxu1 %v17180_v60  ;;  %v17243_v55 = vld [vmem:[%s24051_s3 + $0x194] ss:$28 sps:$4 sm:$0xff]   ;;  %v17238_v60 = vld [vmem:[%s24051_s3 + $0x188] ss:$28 sps:$4 sm:$0xff]  }
 0x2cc   :  { %15549 = vmatprep.subr.bf16.mxu0 %v17181_v30  ;;  %15849 = vmatprep.subr.bf16.mxu1 %v18547_v48  ;;  %v17241_v30 = vld [vmem:[%s24051_s3 + $0x190] ss:$28 sps:$4 sm:$0xff]  }
 0x2cf   :  { %15550 = vmatpush3.bf16.msra.mxu0 %v17182_v61  ;;  %15850 = vmatpush3.bf16.msra.mxu1 %v17183_v35  ;;  %v17246_v61 = vld [vmem:[%s24051_s3 + $0x1c4] ss:$28 sps:$4 sm:$0xff]   ;;  %v17249_v35 = vld [vmem:[%s24051_s3 + $0x1cc] ss:$28 sps:$4 sm:$0xff]  }
 0x2d0   :  { %15551 = vmatprep.subr.bf16.mxu0 %v17184_v4  ;;  %15851 = vmatprep.subr.bf16.mxu1 %v18547_v48  ;;  %v17244_v4 = vld [vmem:[%s24051_s3 + $0x1c0] ss:$28 sps:$4 sm:$0xff]  }
 0x2d3   :  { %15552 = vmatpush3.bf16.msra.mxu0 %v17185_v7  ;;  %15852 = vmatpush3.bf16.msra.mxu1 %v17186_v9  ;;  %v17247_v7 = vld [vmem:[%s24051_s3 + $0x1c8] ss:$28 sps:$4 sm:$0xff]   ;;  %v17252_v9 = vld [vmem:[%s24051_s3 + $0x1fc] ss:$28 sps:$4 sm:$0xff]  }
 0x2d4   :  { %15553 = vmatprep.subr.bf16.mxu0 %v17187_v12  ;;  %15853 = vmatprep.subr.bf16.mxu1 %v18547_v48  ;;  %v17250_v12 = vld [vmem:[%s24051_s3 + $0x1f8] ss:$28 sps:$4 sm:$0xff]  }
 0x2d7   :  { %15554 = vmatpush3.bf16.msra.mxu0 %v17188_v13  ;;  %15854 = vmatpush3.bf16.msra.mxu1 %v17189_v14  ;;  %v17255_v13 = vld [vmem:[%s24051_s3 + $0x204] ss:$28 sps:$4 sm:$0xff]  }
 0x2d8   :  { %15555 = vmatprep.subr.bf16.mxu0 %v17190_v17  ;;  %15855 = vmatprep.subr.bf16.mxu1 %v18547_v48  ;;  %v17253_v14 = vld [vmem:[%s24051_s3 + $0x200] ss:$28 sps:$4 sm:$0xff]   ;;  %v17258_v17 = vld [vmem:[%s24051_s3 + $0x234] ss:$28 sps:$4 sm:$0xff]  }
 0x2db   :  { %15556 = vmatpush3.bf16.msra.mxu0 %v17191_v18  ;;  %15856 = vmatpush3.bf16.msra.mxu1 %v17192_v19  ;;  %v17256_v18 = vld [vmem:[%s24051_s3 + $0x230] ss:$28 sps:$4 sm:$0xff]   ;;  %v17261_v19 = vld [vmem:[%s24051_s3 + $0x23c] ss:$28 sps:$4 sm:$0xff]  }
 0x2dc   :  { %15557 = vmatprep.subr.bf16.mxu0 %v17193_v20  ;;  %15857 = vmatprep.subr.bf16.mxu1 %v18547_v48  ;;  %v17259_v20 = vld [vmem:[%s24051_s3 + $0x238] ss:$28 sps:$4 sm:$0xff]  }
 0x2df   :  { %15558 = vmatpush3.bf16.msra.mxu0 %v17194_v21  ;;  %15858 = vmatpush3.bf16.msra.mxu1 %v17195_v23  ;;  %v17264_v21 = vld [vmem:[%s24051_s3 + $0x26c] ss:$28 sps:$4 sm:$0xff]  }
 0x2e0   :  { %10486 = vmatprep.subr.bf16.mxu0 %v17198_v24  ;;  %10787 = vmatprep.subr.bf16.mxu1 %v17201_v22  ;;  %v17262_v23 = vld [vmem:[%s24051_s3 + $0x268] ss:$28 sps:$4 sm:$0xff]   ;;  %v17267_v24 = vld [vmem:[%s24051_s3 + $0x274] ss:$28 sps:$4 sm:$0xff]  }
 0x2e1   :  { %v17265_v22 = vld [vmem:[%s24051_s3 + $0x270] ss:$28 sps:$4 sm:$0xff]  }
 0x2e2   :  { %5785 = vmatmul.mubr.bf16.vlgmr.msra.gmra.mrb[16].mxu0 %v20668_v47  ;;  %15860 = vmatmul.mubr.bf16.vlgmr.msra.gmra.mrb[16].mxu1 %v20795_v15  ;;  %v17213_v47 = vld [vmem:[%s24051_s3 + $0x7c] ss:$28 sps:$4 sm:$0xff]   ;;  %v17208_v15 = vld [vmem:[%s24051_s3 + $0x70] ss:$28 sps:$4 sm:$0xff]  }
 0x2e3   :  { %10487 = vmatpush1.bf16.msra.mxu0 %v17196_v25  ;;  %10518 = vmatprep.mubr.bf16.mxu0 %v20037_v57  ;;  %v17270_v25 = vld [vmem:[%s24051_s3 + $0x2a4] ss:$28 sps:$4 sm:$0xff]  }
 0x2e4   :  { %10788 = vmatpush1.bf16.msra.mxu1 %v17199_v26  ;;  %10819 = vmatprep.mubr.bf16.mxu1 %v20037_v57  ;;  %v17268_v26 = vld [vmem:[%s24051_s3 + $0x2a0] ss:$28 sps:$4 sm:$0xff]  }
 0x2e5   :  { %10488 = vmatprep.subr.bf16.mxu0 %v17204_v27  ;;  %10789 = vmatprep.subr.bf16.mxu1 %v17207_v28  ;;  %v17273_v27 = vld [vmem:[%s24051_s3 + $0x2ac] ss:$28 sps:$4 sm:$0xff]  }
 0x2e6   :  { %v17271_v28 = vld [vmem:[%s24051_s3 + $0x2a8] ss:$28 sps:$4 sm:$0xff]  }
 0x2e7   :  { %10489 = vmatpush1.bf16.msra.mxu0 %v17202_v29  ;;  %v17276_v29 = vld [vmem:[%s24051_s3 + $0x2dc] ss:$28 sps:$4 sm:$0xff]  }
 0x2e8   :  { %10790 = vmatpush1.bf16.msra.mxu1 %v17205_v31  ;;  %10490 = vmatprep.subr.bf16.mxu0 %v17210_v32  ;;  %v17274_v31 = vld [vmem:[%s24051_s3 + $0x2d8] ss:$28 sps:$4 sm:$0xff]   ;;  %v17279_v32 = vld [vmem:[%s24051_s3 + $0x2e4] ss:$28 sps:$4 sm:$0xff]  }
 0x2e9   :  { %10791 = vmatprep.subr.bf16.mxu1 %v17213_v47  ;;  %v17277_v47 = vld [vmem:[%s24051_s3 + $0x2e0] ss:$28 sps:$4 sm:$0xff]  }
 0x2eb   :  { %10491 = vmatpush1.bf16.msra.mxu0 %v17208_v15  ;;  %v17282_v15 = vld [vmem:[%s24051_s3 + $0x314] ss:$28 sps:$4 sm:$0xff]  }
 0x2ec   :  { %10792 = vmatpush1.bf16.msra.mxu1 %v17211_v33  ;;  %10492 = vmatprep.subr.bf16.mxu0 %v17216_v34  ;;  %v17285_v33 = vld [vmem:[%s24051_s3 + $0x31c] ss:$28 sps:$4 sm:$0xff]   ;;  %v17280_v34 = vld [vmem:[%s24051_s3 + $0x310] ss:$28 sps:$4 sm:$0xff]  }
 0x2ed   :  { %10793 = vmatprep.subr.bf16.mxu1 %v17219_v37  ;;  %v17288_v37 = vld [vmem:[%s24051_s3 + $0x34c] ss:$28 sps:$4 sm:$0xff]  }
 0x2ef   :  { %10493 = vmatpush1.bf16.msra.mxu0 %v17214_v36  ;;  %v17283_v36 = vld [vmem:[%s24051_s3 + $0x318] ss:$28 sps:$4 sm:$0xff]  }
 0x2f0   :  { %10794 = vmatpush1.bf16.msra.mxu1 %v17217_v38  ;;  %10494 = vmatprep.subr.bf16.mxu0 %v17222_v39  ;;  %v17291_v38 = vld [vmem:[%s24051_s3 + $0x354] ss:$28 sps:$4 sm:$0xff]   ;;  %v17286_v39 = vld [vmem:[%s24051_s3 + $0x348] ss:$28 sps:$4 sm:$0xff]  }
 0x2f1   :  { %10795 = vmatprep.subr.bf16.mxu1 %v17225_v41  ;;  %v17294_v41 = vld [vmem:[%s24051_s3 + $0x384] ss:$28 sps:$4 sm:$0xff]  }
 0x2f3   :  { %10495 = vmatpush1.bf16.msra.mxu0 %v17220_v40  ;;  %v17289_v40 = vld [vmem:[%s24051_s3 + $0x350] ss:$28 sps:$4 sm:$0xff]  }
 0x2f4   :  { %10796 = vmatpush1.bf16.msra.mxu1 %v17223_v42  ;;  %10496 = vmatprep.subr.bf16.mxu0 %v17228_v43  ;;  %v17292_v42 = vld [vmem:[%s24051_s3 + $0x380] ss:$28 sps:$4 sm:$0xff]   ;;  %v17297_v43 = vld [vmem:[%s24051_s3 + $0x38c] ss:$28 sps:$4 sm:$0xff]  }
 0x2f5   :  { %10797 = vmatprep.subr.bf16.mxu1 %v17231_v45  ;;  %v17300_v45 = vld [vmem:[%s24051_s3 + $0x3bc] ss:$28 sps:$4 sm:$0xff]  }
 0x2f7   :  { %10497 = vmatpush1.bf16.msra.mxu0 %v17226_v44  ;;  %v17295_v44 = vld [vmem:[%s24051_s3 + $0x388] ss:$28 sps:$4 sm:$0xff]  }
 0x2f8   :  { %10798 = vmatpush1.bf16.msra.mxu1 %v17229_v46  ;;  %10498 = vmatprep.subr.bf16.mxu0 %v17234_v49  ;;  %v17298_v46 = vld [vmem:[%s24051_s3 + $0x3b8] ss:$28 sps:$4 sm:$0xff]   ;;  %v17301_v49 = vld [vmem:[%s24051_s3 + $0x3c0] ss:$28 sps:$4 sm:$0xff]  }
 0x2f9   :  { %10799 = vmatprep.subr.bf16.mxu1 %v17237_v50  ;;  %v17303_v50 = vld [vmem:[%s24051_s3 + $0x3c4] ss:$28 sps:$4 sm:$0xff]  }
 0x2fb   :  { %10499 = vmatpush1.bf16.msra.mxu0 %v17232_v51  ;;  %v17306_v51 = vld [vmem:[%s24051_s3 + $0x3f4] ss:$28 sps:$4 sm:$0xff]  }
 0x2fc   :  { %10800 = vmatpush1.bf16.msra.mxu1 %v17235_v52  ;;  %10500 = vmatprep.subr.bf16.mxu0 %v17240_v54  ;;  %v17309_v52 = vld [vmem:[%s24051_s3 + $0x3fc] ss:$28 sps:$4 sm:$0xff]   ;;  %v17304_v54 = vld [vmem:[%s24051_s3 + $0x3f0] ss:$28 sps:$4 sm:$0xff]  }
 0x2fd   :  { %10801 = vmatprep.subr.bf16.mxu1 %v17243_v55  ;;  %v17307_v55 = vld [vmem:[%s24051_s3 + $0x3f8] ss:$28 sps:$4 sm:$0xff]  }
 0x2ff   :  { %10501 = vmatpush1.bf16.msra.mxu0 %v17238_v60  ;;  %v17312_v60 = vld [vmem:[%s24051_s3 + $0x42c] ss:$28 sps:$4 sm:$0xff]  }
 0x300   :  { %10802 = vmatpush1.bf16.msra.mxu1 %v17241_v30  ;;  %10502 = vmatprep.subr.bf16.mxu0 %v17246_v61  ;;  %v17310_v30 = vld [vmem:[%s24051_s3 + $0x428] ss:$28 sps:$4 sm:$0xff]   ;;  %v17315_v61 = vld [vmem:[%s24051_s3 + $0x434] ss:$28 sps:$4 sm:$0xff]  }
 0x301   :  { %10803 = vmatprep.subr.bf16.mxu1 %v17249_v35  ;;  %v17313_v35 = vld [vmem:[%s24051_s3 + $0x430] ss:$28 sps:$4 sm:$0xff]  }
 0x303   :  { %10503 = vmatpush1.bf16.msra.mxu0 %v17244_v4  ;;  %v17318_v4 = vld [vmem:[%s24051_s3 + $0x464] ss:$28 sps:$4 sm:$0xff]  }
 0x304   :  { %10804 = vmatpush1.bf16.msra.mxu1 %v17247_v7  ;;  %10504 = vmatprep.subr.bf16.mxu0 %v17252_v9  ;;  %v17316_v7 = vld [vmem:[%s24051_s3 + $0x460] ss:$28 sps:$4 sm:$0xff]   ;;  %v17321_v9 = vld [vmem:[%s24051_s3 + $0x46c] ss:$28 sps:$4 sm:$0xff]  }
 0x305   :  { %10805 = vmatprep.subr.bf16.mxu1 %v17255_v13  ;;  %v17324_v13 = vld [vmem:[%s24051_s3 + $0x49c] ss:$28 sps:$4 sm:$0xff]  }
 0x307   :  { %10505 = vmatpush1.bf16.msra.mxu0 %v17250_v12  ;;  %v17319_v12 = vld [vmem:[%s24051_s3 + $0x468] ss:$28 sps:$4 sm:$0xff]  }
 0x308   :  { %10806 = vmatpush1.bf16.msra.mxu1 %v17253_v14  ;;  %10506 = vmatprep.subr.bf16.mxu0 %v17258_v17  ;;  %v17322_v14 = vld [vmem:[%s24051_s3 + $0x498] ss:$28 sps:$4 sm:$0xff]   ;;  %v17327_v17 = vld [vmem:[%s24051_s3 + $0x4a4] ss:$28 sps:$4 sm:$0xff]  }
 0x309   :  { %10807 = vmatprep.subr.bf16.mxu1 %v17261_v19  ;;  %v17330_v19 = vld [vmem:[%s24051_s3 + $0x4d4] ss:$28 sps:$4 sm:$0xff]  }
 0x30b   :  { %10507 = vmatpush1.bf16.msra.mxu0 %v17256_v18  ;;  %v17325_v18 = vld [vmem:[%s24051_s3 + $0x4a0] ss:$28 sps:$4 sm:$0xff]  }
 0x30c   :  { %10808 = vmatpush1.bf16.msra.mxu1 %v17259_v20  ;;  %10508 = vmatprep.subr.bf16.mxu0 %v17264_v21  ;;  %v17333_v20 = vld [vmem:[%s24051_s3 + $0x4dc] ss:$28 sps:$4 sm:$0xff]   ;;  %v17328_v21 = vld [vmem:[%s24051_s3 + $0x4d0] ss:$28 sps:$4 sm:$0xff]  }
 0x30d   :  { %10809 = vmatprep.subr.bf16.mxu1 %v17267_v24  ;;  %v17336_v24 = vld [vmem:[%s24051_s3 + $0x50c] ss:$28 sps:$4 sm:$0xff]  }
 0x30f   :  { %10509 = vmatpush1.bf16.msra.mxu0 %v17262_v23  ;;  %v17331_v23 = vld [vmem:[%s24051_s3 + $0x4d8] ss:$28 sps:$4 sm:$0xff]  }
 0x310   :  { %10810 = vmatpush1.bf16.msra.mxu1 %v17265_v22  ;;  %10510 = vmatprep.subr.bf16.mxu0 %v17270_v25  ;;  %v17339_v22 = vld [vmem:[%s24051_s3 + $0x514] ss:$28 sps:$4 sm:$0xff]   ;;  %v17334_v25 = vld [vmem:[%s24051_s3 + $0x508] ss:$28 sps:$4 sm:$0xff]  }
 0x311   :  { %10811 = vmatprep.subr.bf16.mxu1 %v17273_v27  ;;  %v17342_v27 = vld [vmem:[%s24051_s3 + $0x544] ss:$28 sps:$4 sm:$0xff]  }
 0x313   :  { %10511 = vmatpush1.bf16.msra.mxu0 %v17268_v26  ;;  %v17337_v26 = vld [vmem:[%s24051_s3 + $0x510] ss:$28 sps:$4 sm:$0xff]  }
 0x314   :  { %10812 = vmatpush1.bf16.msra.mxu1 %v17271_v28  ;;  %10512 = vmatprep.subr.bf16.mxu0 %v17276_v29  ;;  %v17345_v28 = vld [vmem:[%s24051_s3 + $0x54c] ss:$28 sps:$4 sm:$0xff]   ;;  %v17340_v29 = vld [vmem:[%s24051_s3 + $0x540] ss:$28 sps:$4 sm:$0xff]  }
 0x315   :  { %10813 = vmatprep.subr.bf16.mxu1 %v17279_v32  ;;  %v17348_v32 = vld [vmem:[%s24051_s3 + $0x57c] ss:$28 sps:$4 sm:$0xff]  }
 0x317   :  { %10513 = vmatpush1.bf16.msra.mxu0 %v17274_v31  ;;  %v17343_v31 = vld [vmem:[%s24051_s3 + $0x548] ss:$28 sps:$4 sm:$0xff]  }
 0x318   :  { %10814 = vmatpush1.bf16.msra.mxu1 %v17277_v47  ;;  %10514 = vmatprep.subr.bf16.mxu0 %v17282_v15  ;;  %v17351_v47 = vld [vmem:[%s24051_s3 + $0x584] ss:$28 sps:$4 sm:$0xff]   ;;  %v17346_v15 = vld [vmem:[%s24051_s3 + $0x578] ss:$28 sps:$4 sm:$0xff]  }
 0x319   :  { %10815 = vmatprep.subr.bf16.mxu1 %v17285_v33  ;;  %v17349_v33 = vld [vmem:[%s24051_s3 + $0x580] ss:$28 sps:$4 sm:$0xff]  }
 0x31b   :  { %10515 = vmatpush1.bf16.msra.mxu0 %v17280_v34  ;;  %v17354_v34 = vld [vmem:[%s24051_s3 + $0x5b4] ss:$28 sps:$4 sm:$0xff]  }
 0x31c   :  { %10816 = vmatpush1.bf16.msra.mxu1 %v17283_v36  ;;  %10516 = vmatprep.subr.bf16.mxu0 %v17288_v37  ;;  %v17352_v36 = vld [vmem:[%s24051_s3 + $0x5b0] ss:$28 sps:$4 sm:$0xff]   ;;  %v17357_v37 = vld [vmem:[%s24051_s3 + $0x5bc] ss:$28 sps:$4 sm:$0xff]  }
 0x31d   :  { %10817 = vmatprep.subr.bf16.mxu1 %v17291_v38  ;;  %v17355_v38 = vld [vmem:[%s24051_s3 + $0x5b8] ss:$28 sps:$4 sm:$0xff]  }
 0x31f   :  { %10517 = vmatpush1.bf16.msra.mxu0 %v17286_v39  ;;  %v17360_v39 = vld [vmem:[%s24051_s3 + $0x5ec] ss:$28 sps:$4 sm:$0xff]  }
 0x320   :  { %10818 = vmatpush1.bf16.msra.mxu1 %v17289_v40  ;;  %10529 = vmatprep.subr.bf16.mxu0 %v17294_v41  ;;  %v17358_v40 = vld [vmem:[%s24051_s3 + $0x5e8] ss:$28 sps:$4 sm:$0xff]   ;;  %v17363_v41 = vld [vmem:[%s24051_s3 + $0x5f4] ss:$28 sps:$4 sm:$0xff]  }
 0x321   :  { %10830 = vmatprep.subr.bf16.mxu1 %v17297_v43  ;;  %v17366_v43 = vld [vmem:[%s24051_s3 + $0x624] ss:$28 sps:$4 sm:$0xff]  }
 0x322   :  { %10519 = vmatmul.mubr.bf16.vlgmr.msra.gmra.mrb[20].mxu0 %v20027_v53 }
 0x323   :  { %10820 = vmatmul.mubr.bf16.vlgmr.msra.gmra.mrb[20].mxu1 %v20027_v53  ;;  %10530 = vmatpush1.bf16.msra.mxu0 %v17292_v42  ;;  %v17361_v42 = vld [vmem:[%s24051_s3 + $0x5f0] ss:$28 sps:$4 sm:$0xff]  }
 0x324   :  { %10561 = vmatprep.mubr.bf16.mxu0 %v20039_v58  ;;  %10831 = vmatpush1.bf16.msra.mxu1 %v17295_v44  ;;  %v17364_v44 = vld [vmem:[%s24051_s3 + $0x620] ss:$28 sps:$4 sm:$0xff]  }
 0x325   :  { %10862 = vmatprep.mubr.bf16.mxu1 %v20039_v58  ;;  %10531 = vmatprep.subr.bf16.mxu0 %v17300_v45  ;;  %v17369_v45 = vld [vmem:[%s24051_s3 + $0x62c] ss:$28 sps:$4 sm:$0xff]  }
 0x326   :  { %10832 = vmatprep.subr.bf16.mxu1 %v17303_v50  ;;  %v17370_v50 = vld [vmem:[%s24051_s3 + $0x658] ss:$28 sps:$4 sm:$0xff]  }
 0x327   :  { %10532 = vmatpush1.bf16.msra.mxu0 %v17298_v46  ;;  %v17367_v46 = vld [vmem:[%s24051_s3 + $0x628] ss:$28 sps:$4 sm:$0xff]  }
 0x328   :  { %10833 = vmatpush1.bf16.msra.mxu1 %v17301_v49  ;;  %10533 = vmatprep.subr.bf16.mxu0 %v17306_v51  ;;  %v17372_v49 = vld [vmem:[%s24051_s3 + $0x65c] ss:$28 sps:$4 sm:$0xff]   ;;  %v17375_v51 = vld [vmem:[%s24051_s3 + $0x664] ss:$28 sps:$4 sm:$0xff]  }
 0x329   :  { %10834 = vmatprep.subr.bf16.mxu1 %v17309_v52  ;;  %v17373_v52 = vld [vmem:[%s24051_s3 + $0x660] ss:$28 sps:$4 sm:$0xff]  }
 0x32b   :  { %10534 = vmatpush1.bf16.msra.mxu0 %v17304_v54  ;;  %v17378_v54 = vld [vmem:[%s24051_s3 + $0x694] ss:$28 sps:$4 sm:$0xff]  }
 0x32c   :  { %10835 = vmatpush1.bf16.msra.mxu1 %v17307_v55  ;;  %10535 = vmatprep.subr.bf16.mxu0 %v17312_v60  ;;  %v17376_v55 = vld [vmem:[%s24051_s3 + $0x690] ss:$28 sps:$4 sm:$0xff]   ;;  %v17381_v60 = vld [vmem:[%s24051_s3 + $0x69c] ss:$28 sps:$4 sm:$0xff]  }
 0x32d   :  { %10836 = vmatprep.subr.bf16.mxu1 %v17315_v61  ;;  %v17384_v61 = vld [vmem:[%s24051_s3 + $0x6cc] ss:$28 sps:$4 sm:$0xff]  }
 0x32f   :  { %10536 = vmatpush1.bf16.msra.mxu0 %v17310_v30  ;;  %v17379_v30 = vld [vmem:[%s24051_s3 + $0x698] ss:$28 sps:$4 sm:$0xff]  }
 0x330   :  { %10837 = vmatpush1.bf16.msra.mxu1 %v17313_v35  ;;  %10537 = vmatprep.subr.bf16.mxu0 %v17318_v4  ;;  %v17382_v35 = vld [vmem:[%s24051_s3 + $0x6c8] ss:$28 sps:$4 sm:$0xff]   ;;  %v17387_v4 = vld [vmem:[%s24051_s3 + $0x6d4] ss:$28 sps:$4 sm:$0xff]  }
 0x331   :  { %10838 = vmatprep.subr.bf16.mxu1 %v17321_v9  ;;  %v17390_v9 = vld [vmem:[%s24051_s3 + $0x704] ss:$28 sps:$4 sm:$0xff]  }
 0x333   :  { %10538 = vmatpush1.bf16.msra.mxu0 %v17316_v7  ;;  %v17385_v7 = vld [vmem:[%s24051_s3 + $0x6d0] ss:$28 sps:$4 sm:$0xff]  }
 0x334   :  { %10839 = vmatpush1.bf16.msra.mxu1 %v17319_v12  ;;  %10539 = vmatprep.subr.bf16.mxu0 %v17324_v13  ;;  %v17388_v12 = vld [vmem:[%s24051_s3 + $0x700] ss:$28 sps:$4 sm:$0xff]   ;;  %v17393_v13 = vld [vmem:[%s24051_s3 + $0x70c] ss:$28 sps:$4 sm:$0xff]  }
 0x335   :  { %10840 = vmatprep.subr.bf16.mxu1 %v17327_v17  ;;  %v17396_v17 = vld [vmem:[%s24051_s3 + $0x73c] ss:$28 sps:$4 sm:$0xff]  }
 0x337   :  { %10540 = vmatpush1.bf16.msra.mxu0 %v17322_v14  ;;  %v17391_v14 = vld [vmem:[%s24051_s3 + $0x708] ss:$28 sps:$4 sm:$0xff]  }
 0x338   :  { %10841 = vmatpush1.bf16.msra.mxu1 %v17325_v18  ;;  %10541 = vmatprep.subr.bf16.mxu0 %v17330_v19  ;;  %v17394_v18 = vld [vmem:[%s24051_s3 + $0x738] ss:$28 sps:$4 sm:$0xff]   ;;  %v17397_v19 = vld [vmem:[%s24051_s3 + $0x740] ss:$28 sps:$4 sm:$0xff]  }
 0x339   :  { %10842 = vmatprep.subr.bf16.mxu1 %v17333_v20  ;;  %v17399_v20 = vld [vmem:[%s24051_s3 + $0x744] ss:$28 sps:$4 sm:$0xff]  }
 0x33b   :  { %10542 = vmatpush1.bf16.msra.mxu0 %v17328_v21  ;;  %v17402_v21 = vld [vmem:[%s24051_s3 + $0x774] ss:$28 sps:$4 sm:$0xff]  }
 0x33c   :  { %10843 = vmatpush1.bf16.msra.mxu1 %v17331_v23  ;;  %10543 = vmatprep.subr.bf16.mxu0 %v17336_v24  ;;  %v17405_v23 = vld [vmem:[%s24051_s3 + $0x77c] ss:$28 sps:$4 sm:$0xff]   ;;  %v17400_v24 = vld [vmem:[%s24051_s3 + $0x770] ss:$28 sps:$4 sm:$0xff]  }
 0x33d   :  { %10844 = vmatprep.subr.bf16.mxu1 %v17339_v22  ;;  %v17403_v22 = vld [vmem:[%s24051_s3 + $0x778] ss:$28 sps:$4 sm:$0xff]  }
 0x33f   :  { %10544 = vmatpush1.bf16.msra.mxu0 %v17334_v25  ;;  %v17408_v25 = vld [vmem:[%s24051_s3 + $0x7ac] ss:$28 sps:$4 sm:$0xff]  }
 0x340   :  { %10845 = vmatpush1.bf16.msra.mxu1 %v17337_v26  ;;  %10545 = vmatprep.subr.bf16.mxu0 %v17342_v27  ;;  %v17406_v26 = vld [vmem:[%s24051_s3 + $0x7a8] ss:$28 sps:$4 sm:$0xff]   ;;  %v17411_v27 = vld [vmem:[%s24051_s3 + $0x7b4] ss:$28 sps:$4 sm:$0xff]  }
 0x341   :  { %10846 = vmatprep.subr.bf16.mxu1 %v17345_v28  ;;  %v17409_v28 = vld [vmem:[%s24051_s3 + $0x7b0] ss:$28 sps:$4 sm:$0xff]  }
 0x343   :  { %10546 = vmatpush1.bf16.msra.mxu0 %v17340_v29  ;;  %v17414_v29 = vld [vmem:[%s24051_s3 + $0x7e4] ss:$28 sps:$4 sm:$0xff]  }
 0x344   :  { %10847 = vmatpush1.bf16.msra.mxu1 %v17343_v31  ;;  %10547 = vmatprep.subr.bf16.mxu0 %v17348_v32  ;;  %v17417_v31 = vld [vmem:[%s24051_s3 + $0x7ec] ss:$28 sps:$4 sm:$0xff]   ;;  %v17412_v32 = vld [vmem:[%s24051_s3 + $0x7e0] ss:$28 sps:$4 sm:$0xff]  }
 0x345   :  { %10848 = vmatprep.subr.bf16.mxu1 %v17351_v47  ;;  %v21418_v47 = vld [vmem:[%s24050_s2 + $0x8] sm:$0x1f] }
 0x347   :  { %10548 = vmatpush1.bf16.msra.mxu0 %v17346_v15  ;;  %v17415_v15 = vld [vmem:[%s24051_s3 + $0x7e8] ss:$28 sps:$4 sm:$0xff]  }
 0x348   :  { %10849 = vmatpush1.bf16.msra.mxu1 %v17349_v33  ;;  %10549 = vmatprep.subr.bf16.mxu0 %v17354_v34  ;;  %v17420_v33 = vld [vmem:[%s24051_s3 + $0x81c] ss:$28 sps:$4 sm:$0xff]   ;;  %v17423_v34 = vld [vmem:[%s24051_s3 + $0x824] ss:$28 sps:$4 sm:$0xff]  }
 0x349   :  { %10850 = vmatprep.subr.bf16.mxu1 %v17357_v37  ;;  %v876_v37 = vrot.slane %v21418_v47, %v19967_v5 }
 0x34b   :  { %10550 = vmatpush1.bf16.msra.mxu0 %v17352_v36  ;;  %v17418_v36 = vld [vmem:[%s24051_s3 + $0x818] ss:$28 sps:$4 sm:$0xff]  }
 0x34c   :  { %10851 = vmatpush1.bf16.msra.mxu1 %v17355_v38  ;;  %10551 = vmatprep.subr.bf16.mxu0 %v17360_v39  ;;  %v884_v38 = vrot.slane %v21418_v47, %v19970_v6  ;;  %v880_v39 = vrot.slane %v21418_v47, %v19982_v10 }
 0x34d   :  { %10852 = vmatprep.subr.bf16.mxu1 %v17363_v41  ;;  %v17421_v41 = vld [vmem:[%s24051_s3 + $0x820] ss:$28 sps:$4 sm:$0xff]  }
 0x34f   :  { %10552 = vmatpush1.bf16.msra.mxu0 %v17358_v40  ;;  %v888_v40 = vrot.slane %v21418_v47, %v19985_v11 }
 0x350   :  { %10853 = vmatpush1.bf16.msra.mxu1 %v17361_v42  ;;  %10553 = vmatprep.subr.bf16.mxu0 %v17366_v43  ;;  %v17426_v42 = vld [vmem:[%s24051_s3 + $0x854] ss:$28 sps:$4 sm:$0xff]   ;;  %v17429_v43 = vld [vmem:[%s24051_s3 + $0x85c] ss:$28 sps:$4 sm:$0xff]  }
 0x351   :  { %10854 = vmatprep.subr.bf16.mxu1 %v17369_v45  ;;  %v17424_v45 = vld [vmem:[%s24051_s3 + $0x850] ss:$28 sps:$4 sm:$0xff]  }
 0x353   :  { %10554 = vmatpush1.bf16.msra.mxu0 %v17364_v44 }
 0x354   :  { %10855 = vmatpush1.bf16.msra.mxu1 %v17367_v46  ;;  %10555 = vmatprep.subr.bf16.mxu0 %v17372_v49 }
 0x355   :  { %10856 = vmatprep.subr.bf16.mxu1 %v17375_v51  ;;  %v17427_v51 = vld [vmem:[%s24051_s3 + $0x858] ss:$28 sps:$4 sm:$0xff]  }
 0x357   :  { %10556 = vmatpush1.bf16.msra.mxu0 %v17370_v50 }
 0x358   :  { %10857 = vmatpush1.bf16.msra.mxu1 %v17373_v52  ;;  %10557 = vmatprep.subr.bf16.mxu0 %v17378_v54 }
 0x359   :  { %10858 = vmatprep.subr.bf16.mxu1 %v17381_v60 }
 0x35b   :  { %10558 = vmatpush1.bf16.msra.mxu0 %v17376_v55 }
 0x35c   :  { %10859 = vmatpush1.bf16.msra.mxu1 %v17379_v30  ;;  %10559 = vmatprep.subr.bf16.mxu0 %v17384_v61 }
 0x35d   :  { %10860 = vmatprep.subr.bf16.mxu1 %v17387_v4 }
 0x35f   :  { %10560 = vmatpush1.bf16.msra.mxu0 %v17382_v35 }
 0x360   :  { %10861 = vmatpush1.bf16.msra.mxu1 %v17385_v7  ;;  %10572 = vmatprep.subr.bf16.mxu0 %v17390_v9  ;;  %v17432_v7 = vld [vmem:[%s24051_s3 + $0x88c] ss:$28 sps:$4 sm:$0xff]  }
 0x361   :  { %10873 = vmatprep.subr.bf16.mxu1 %v17393_v13 }
 0x362   :  { %10562 = vmatmul.mubr.bf16.vlgmr.msra.gmra.mrb[20].mxu0 %v20035_v56 }
 0x363   :  { %10863 = vmatmul.mubr.bf16.vlgmr.msra.gmra.mrb[20].mxu1 %v20035_v56  ;;  %10573 = vmatpush1.bf16.msra.mxu0 %v17388_v12 }
 0x364   :  { %10604 = vmatprep.mubr.bf16.mxu0 %v20770_v63  ;;  %10874 = vmatpush1.bf16.msra.mxu1 %v17391_v14 }
 0x365   :  { %10905 = vmatprep.mubr.bf16.mxu1 %v20770_v63  ;;  %10574 = vmatprep.subr.bf16.mxu0 %v17396_v17  ;;  %v17430_v17 = vld [vmem:[%s24051_s3 + $0x888] ss:$28 sps:$4 sm:$0xff]  }
 0x366   :  { %10875 = vmatprep.subr.bf16.mxu1 %v17399_v20 }
 0x367   :  { %10575 = vmatpush1.bf16.msra.mxu0 %v17394_v18  ;;  %v17435_v18 = vld [vmem:[%s24051_s3 + $0x894] ss:$28 sps:$4 sm:$0xff]  }
 0x368   :  { %10876 = vmatpush1.bf16.msra.mxu1 %v17397_v19  ;;  %10576 = vmatprep.subr.bf16.mxu0 %v17402_v21 }
 0x369   :  { %10877 = vmatprep.subr.bf16.mxu1 %v17405_v23 }
 0x36b   :  { %10577 = vmatpush1.bf16.msra.mxu0 %v17400_v24 }
 0x36c   :  { %10878 = vmatpush1.bf16.msra.mxu1 %v17403_v22  ;;  %10578 = vmatprep.subr.bf16.mxu0 %v17408_v25 }
 0x36d   :  { %10879 = vmatprep.subr.bf16.mxu1 %v17411_v27 }
 0x36f   :  { %10579 = vmatpush1.bf16.msra.mxu0 %v17406_v26 }
 0x370   :  { %10880 = vmatpush1.bf16.msra.mxu1 %v17409_v28  ;;  %10580 = vmatprep.subr.bf16.mxu0 %v17414_v29  ;;  %v17433_v28 = vld [vmem:[%s24051_s3 + $0x890] ss:$28 sps:$4 sm:$0xff]   ;;  %v17438_v29 = vld [vmem:[%s24051_s3 + $0x8c4] ss:$28 sps:$4 sm:$0xff]  }
 0x371   :  { %10881 = vmatprep.subr.bf16.mxu1 %v17417_v31 }
 0x373   :  { %10581 = vmatpush1.bf16.msra.mxu0 %v17412_v32 }
 0x374   :  { %10882 = vmatpush1.bf16.msra.mxu1 %v17415_v15  ;;  %10582 = vmatprep.subr.bf16.mxu0 %v17420_v33  ;;  %v17436_v15 = vld [vmem:[%s24051_s3 + $0x8c0] ss:$28 sps:$4 sm:$0xff]   ;;  %v17441_v33 = vld [vmem:[%s24051_s3 + $0x8cc] ss:$28 sps:$4 sm:$0xff]  }
 0x375   :  { %v5489_v44 = vpop.f32.mrb[8].mxu0  ;;  %10883 = vmatprep.subr.bf16.mxu1 %v17423_v34  ;;  %v5661_v46 = vpop.f32.mrb[8].mxu1 }
 0x376   :  { %v15939_v49 = vadd.f32 %v5489_v44, %v876_v37  ;;  %v5491_v50 = vpop.f32.mrb[9].mxu0  ;;  %v15943_v52 = vadd.f32 %v5661_v46, %v884_v38  ;;  %v5663_v54 = vpop.f32.mrb[9].mxu1  ;;  %v17451_v44 = vld [vmem:[%s24051_s3 + $0x938] ss:$28 sps:$4 sm:$0xff]   ;;  %v17454_v46 = vld [vmem:[%s24051_s3 + $0x968] ss:$28 sps:$4 sm:$0xff]  }
 0x377   :  { %v15940_v55 = vadd.f32 %v5491_v50, %v880_v39  ;;  %v5493_v60 = vpop.f32.mrb[10].mxu0  ;;  %10583 = vmatpush1.bf16.msra.mxu0 %v17418_v36  ;;  %v15944_v30 = vadd.f32 %v5663_v54, %v888_v40  ;;  %v5665_v61 = vpop.f32.mrb[10].mxu1  ;;  %v17439_v36 = vld [vmem:[%s24051_s3 + $0x8c8] ss:$28 sps:$4 sm:$0xff]   ;;  %v17457_v50 = vld [vmem:[%s24051_s3 + $0x970] ss:$28 sps:$4 sm:$0xff]  }
 0x378   :  { %v15941_v35 = vadd.f32 %v5493_v60, %v876_v37  ;;  %10884 = vmatpush1.bf16.msra.mxu1 %v17421_v41  ;;  %v5495_v4 = vpop.f32.mrb[11].mxu0  ;;  %10584 = vmatprep.subr.bf16.mxu0 %v17426_v42  ;;  %v5844_v9 = vmax.f32 %v15943_v52, 0.0  ;;  %v15945_v12 = vadd.f32 %v5665_v61, %v884_v38  ;;  %v5667_v13 = vpop.f32.mrb[11].mxu1  ;;  %v5842_v21 = vmax.f32 %v15939_v49, 0.0  ;;  %v17444_v37 = vld [vmem:[%s24051_s3 + $0x8fc] ss:$28 sps:$4 sm:$0xff]  }
 0x379   :  { %v15942_v14 = vadd.f32 %v5495_v4, %v880_v39  ;;  %10885 = vmatprep.subr.bf16.mxu1 %v17429_v43  ;;  %v5845_v19 = vmax.f32 %v15944_v30, 0.0  ;;  %v15946_v20 = vadd.f32 %v5667_v13, %v888_v40  ;;  %v5843_v23 = vmax.f32 %v15940_v55, 0.0  ;;  %v17442_v38 = vld [vmem:[%s24051_s3 + $0x8f8] ss:$28 sps:$4 sm:$0xff]   ;;  %v17447_v39 = vld [vmem:[%s24051_s3 + $0x904] ss:$28 sps:$4 sm:$0xff]  }
 0x37a   :  { %v5855_v24 = vmax.f32 %v15941_v35, 0.0  ;;  %v5857_v22 = vmax.f32 %v15945_v12, 0.0  ;;  %v17445_v40 = vld [vmem:[%s24051_s3 + $0x900] ss:$28 sps:$4 sm:$0xff]   ;;  %v17450_v41 = vld [vmem:[%s24051_s3 + $0x934] ss:$28 sps:$4 sm:$0xff]   ;;  %v892_v12 = vrot.slane %v21418_v47, %v20711_v1 }
 0x37b   :  { %v5856_v25 = vmax.f32 %v15942_v14, 0.0  ;;  %10585 = vmatpush1.bf16.msra.mxu0 %v17424_v45  ;;  %v5858_v26 = vmax.f32 %v15946_v20, 0.0  ;;  %v17448_v42 = vld [vmem:[%s24051_s3 + $0x930] ss:$28 sps:$4 sm:$0xff]   ;;  %v17453_v43 = vld [vmem:[%s24051_s3 + $0x93c] ss:$28 sps:$4 sm:$0xff]  }
 0x37c   :  { %v21464_v27 = vpack.c.bf16 %v5855_v24, %v5842_v21  ;;  %10886 = vmatpush1.bf16.msra.mxu1 %v17427_v51  ;;  %10586 = vmatprep.subr.bf16.mxu0 %v17432_v7  ;;  %v21472_v31 = vpack.c.bf16 %v5857_v22, %v5844_v9  ;;  %v17456_v45 = vld [vmem:[%s24051_s3 + $0x96c] ss:$28 sps:$4 sm:$0xff]   ;;  %v17459_v49 = vld [vmem:[%s24051_s3 + $0x974] ss:$28 sps:$4 sm:$0xff]   ;;  %v17462_v51 = vld [vmem:[%s24051_s3 + $0x9a4] ss:$28 sps:$4 sm:$0xff]  }
 0x37d   :  { %v21474_v32 = vpack.c.bf16 %v5856_v25, %v5843_v23  ;;  %10887 = vmatprep.subr.bf16.mxu1 %v17435_v18  ;;  %v21482_v34 = vpack.c.bf16 %v5858_v26, %v5845_v19  ;;  %v17460_v52 = vld [vmem:[%s24051_s3 + $0x9a0] ss:$28 sps:$4 sm:$0xff]   ;;  %v17465_v54 = vld [vmem:[%s24051_s3 + $0x9ac] ss:$28 sps:$4 sm:$0xff]   ;;  %v17466_v61 = vld [vmem:[%s24051_s3 + $0x9d8] ss:$28 sps:$4 sm:$0xff]  }
 0x37e   :  { %v17463_v55 = vld [vmem:[%s24051_s3 + $0x9a8] ss:$28 sps:$4 sm:$0xff]   ;;  %v17468_v60 = vld [vmem:[%s24051_s3 + $0x9dc] ss:$28 sps:$4 sm:$0xff]   ;;  %v17474_v4 = vld [vmem:[%s24051_s3 + $0xa14] ss:$28 sps:$4 sm:$0xff]  }
 0x37f   :  { %10587 = vmatpush1.bf16.msra.mxu0 %v17430_v17  ;;  %v17471_v30 = vld [vmem:[%s24051_s3 + $0x9e4] ss:$28 sps:$4 sm:$0xff]   ;;  %v17477_v7 = vld [vmem:[%s24051_s3 + $0xa1c] ss:$28 sps:$4 sm:$0xff]   ;;  %v17472_v14 = vld [vmem:[%s24051_s3 + $0xa10] ss:$28 sps:$4 sm:$0xff]  }
 0x380   :  { %10888 = vmatpush1.bf16.msra.mxu1 %v17433_v28  ;;  %10588 = vmatprep.subr.bf16.mxu0 %v17438_v29  ;;  %v17469_v35 = vld [vmem:[%s24051_s3 + $0x9e0] ss:$28 sps:$4 sm:$0xff]   ;;  %v17475_v47 = vld [vmem:[%s24051_s3 + $0xa18] ss:$28 sps:$4 sm:$0xff]   ;;  %v17480_v25 = vld [vmem:[%s24051_s3 + $0xa4c] ss:$28 sps:$4 sm:$0xff]  }
 0x381   :  { %10889 = vmatprep.subr.bf16.mxu1 %v17441_v33  ;;  %v17483_v33 = vld [vmem:[%s24051_s3 + $0xa54] ss:$28 sps:$4 sm:$0xff]  }
 0x383   :  { %10589 = vmatpush1.bf16.msra.mxu0 %v17436_v15  ;;  %v17478_v15 = vld [vmem:[%s24051_s3 + $0xa48] ss:$28 sps:$4 sm:$0xff]  }
 0x384   :  { %10890 = vmatpush1.bf16.msra.mxu1 %v17439_v36  ;;  %10590 = vmatprep.subr.bf16.mxu0 %v17444_v37 }
 0x385   :  { %10891 = vmatprep.subr.bf16.mxu1 %v17447_v39  ;;  %v17486_v39 = vld [vmem:[%s24051_s3 + $0xa84] ss:$28 sps:$4 sm:$0xff]  }
 0x387   :  { %10591 = vmatpush1.bf16.msra.mxu0 %v17442_v38  ;;  %v17481_v38 = vld [vmem:[%s24051_s3 + $0xa50] ss:$28 sps:$4 sm:$0xff]  }
 0x388   :  { %10892 = vmatpush1.bf16.msra.mxu1 %v17445_v40  ;;  %10592 = vmatprep.subr.bf16.mxu0 %v17450_v41  ;;  %v17484_v41 = vld [vmem:[%s24051_s3 + $0xa80] ss:$28 sps:$4 sm:$0xff]  }
 0x389   :  { %10893 = vmatprep.subr.bf16.mxu1 %v17453_v43  ;;  %v17487_v43 = vld [vmem:[%s24051_s3 + $0xa88] ss:$28 sps:$4 sm:$0xff]  }
 0x38b   :  { %10593 = vmatpush1.bf16.msra.mxu0 %v17448_v42  ;;  %v17489_v42 = vld [vmem:[%s24051_s3 + $0xa8c] ss:$28 sps:$4 sm:$0xff]  }
 0x38c   :  { %10894 = vmatpush1.bf16.msra.mxu1 %v17451_v44  ;;  %10594 = vmatprep.subr.bf16.mxu0 %v17456_v45  ;;  %v17492_v44 = vld [vmem:[%s24051_s3 + $0xabc] ss:$28 sps:$4 sm:$0xff]  }
 0x38d   :  { %10895 = vmatprep.subr.bf16.mxu1 %v17459_v49  ;;  %v17490_v45 = vld [vmem:[%s24051_s3 + $0xab8] ss:$28 sps:$4 sm:$0xff]   ;;  %v17495_v49 = vld [vmem:[%s24051_s3 + $0xac4] ss:$28 sps:$4 sm:$0xff]  }
 0x38f   :  { %10595 = vmatpush1.bf16.msra.mxu0 %v17454_v46  ;;  %v17493_v46 = vld [vmem:[%s24051_s3 + $0xac0] ss:$28 sps:$4 sm:$0xff]  }
 0x390   :  { %10896 = vmatpush1.bf16.msra.mxu1 %v17457_v50  ;;  %10596 = vmatprep.subr.bf16.mxu0 %v17462_v51  ;;  %v17498_v50 = vld [vmem:[%s24051_s3 + $0xaf4] ss:$28 sps:$4 sm:$0xff]   ;;  %v17501_v51 = vld [vmem:[%s24051_s3 + $0xafc] ss:$28 sps:$4 sm:$0xff]  }
 0x391   :  { %10897 = vmatprep.subr.bf16.mxu1 %v17465_v54  ;;  %v17499_v54 = vld [vmem:[%s24051_s3 + $0xaf8] ss:$28 sps:$4 sm:$0xff]  }
 0x393   :  { %10597 = vmatpush1.bf16.msra.mxu0 %v17460_v52  ;;  %v17496_v52 = vld [vmem:[%s24051_s3 + $0xaf0] ss:$28 sps:$4 sm:$0xff]  }
 0x394   :  { %10898 = vmatpush1.bf16.msra.mxu1 %v17463_v55  ;;  %10598 = vmatprep.subr.bf16.mxu0 %v17468_v60  ;;  %v17504_v55 = vld [vmem:[%s24051_s3 + $0xb2c] ss:$28 sps:$4 sm:$0xff]  }
 0x395   :  { %v15515_v9 = vpop.f32.mrb[12].mxu0  ;;  %10899 = vmatprep.subr.bf16.mxu1 %v17471_v30  ;;  %v15537_v13 = vpop.f32.mrb[12].mxu1  ;;  %v17502_v60 = vld [vmem:[%s24051_s3 + $0xb28] ss:$28 sps:$4 sm:$0xff]   ;;  %v17507_v30 = vld [vmem:[%s24051_s3 + $0xb34] ss:$28 sps:$4 sm:$0xff]  }
 0x396   :  { %v15516_v17 = vpop.f32.mrb[13].mxu0  ;;  %v15538_v18 = vpop.f32.mrb[13].mxu1 }
 0x397   :  { %v15517_v19 = vadd.f32 %v15516_v17, %v15515_v9  ;;  %v15518_v20 = vpop.f32.mrb[14].mxu0  ;;  %10599 = vmatpush1.bf16.msra.mxu0 %v17466_v61  ;;  %v15539_v21 = vadd.f32 %v15538_v18, %v15537_v13  ;;  %v15540_v23 = vpop.f32.mrb[14].mxu1  ;;  %v17505_v61 = vld [vmem:[%s24051_s3 + $0xb30] ss:$28 sps:$4 sm:$0xff]   ;;  %v17511_v9 = vld [vmem:[%s24051_s3 + $0xb68] ss:$28 sps:$4 sm:$0xff]  }
 0x398   :  { %10900 = vmatpush1.bf16.msra.mxu1 %v17469_v35  ;;  %v15519_v24 = vpop.f32.mrb[15].mxu0  ;;  %v15541_v22 = vpop.f32.mrb[15].mxu1  ;;  %10600 = vmatprep.subr.bf16.mxu0 %v17474_v4  ;;  %v17510_v35 = vld [vmem:[%s24051_s3 + $0xb64] ss:$28 sps:$4 sm:$0xff]   ;;  %v17522_v18 = vld [vmem:[%s24051_s3 + $0xbd4] ss:$28 sps:$4 sm:$0xff]  }
 0x399   :  { %v5705_v26 = vadd.f32 %v15517_v19, %v892_v12  ;;  %v15520_v28 = vadd.f32 %v15519_v24, %v15518_v20  ;;  %v15542_v29 = vadd.f32 %v15541_v22, %v15540_v23  ;;  %10901 = vmatprep.subr.bf16.mxu1 %v17477_v7  ;;  %v17508_v4 = vld [vmem:[%s24051_s3 + $0xb60] ss:$28 sps:$4 sm:$0xff]   ;;  %v17513_v7 = vld [vmem:[%s24051_s3 + $0xb6c] ss:$28 sps:$4 sm:$0xff]  }
 0x39a   :  { %v17519_v13 = vld [vmem:[%s24051_s3 + $0xba4] ss:$28 sps:$4 sm:$0xff]   ;;  %v17525_v19 = vld [vmem:[%s24051_s3 + $0xbdc] ss:$28 sps:$4 sm:$0xff]   ;;  %v17520_v23 = vld [vmem:[%s24051_s3 + $0xbd0] ss:$28 sps:$4 sm:$0xff]  }
 0x39b   :  { %v5708_v36 = vadd.f32 %v15520_v28, %v892_v12  ;;  %v21570_v37 = vadd.f32 %v15539_v21, %v5705_v26  ;;  %10601 = vmatpush1.bf16.msra.mxu0 %v17472_v14  ;;  %v17516_v12 = vld [vmem:[%s24051_s3 + $0xb9c] ss:$28 sps:$4 sm:$0xff]  }
 0x39c   :  { %10902 = vmatpush1.bf16.msra.mxu1 %v17475_v47  ;;  %10602 = vmatprep.subr.bf16.mxu0 %v17480_v25  ;;  %v17514_v14 = vld [vmem:[%s24051_s3 + $0xb98] ss:$28 sps:$4 sm:$0xff]   ;;  %v17517_v17 = vld [vmem:[%s24051_s3 + $0xba0] ss:$28 sps:$4 sm:$0xff]  }
 0x39d   :  { %v21578_v40 = vadd.f32 %v15542_v29, %v5708_v36  ;;  %10903 = vmatprep.subr.bf16.mxu1 %v17483_v33  ;;  %v17523_v29 = vld [vmem:[%s24051_s3 + $0xbd8] ss:$28 sps:$4 sm:$0xff]  }
 0x39f   :  { %10603 = vmatpush1.bf16.msra.mxu0 %v17478_v15  ;;  %v17528_v15 = vld [vmem:[%s24051_s3 + $0xc0c] ss:$28 sps:$4 sm:$0xff]  }
 0x3a0   :  { %10904 = vmatpush1.bf16.msra.mxu1 %v17481_v38  ;;  %10615 = vmatprep.subr.bf16.mxu0 %v17486_v39  ;;  %v17526_v39 = vld [vmem:[%s24051_s3 + $0xc08] ss:$28 sps:$4 sm:$0xff]  }
 0x3a1   :  { %10916 = vmatprep.subr.bf16.mxu1 %v17489_v42 }
 0x3a2   :  { %10605 = vmatmul.mubr.bf16.vlgmr.msra.gmra.mrb[20].mxu0 %v20760_v59 }
 0x3a3   :  { %10906 = vmatmul.mubr.bf16.vlgmr.msra.gmra.mrb[20].mxu1 %v20760_v59  ;;  %10616 = vmatpush1.bf16.msra.mxu0 %v17484_v41  ;;  %v17531_v41 = vld [vmem:[%s24051_s3 + $0xc14] ss:$28 sps:$4 sm:$0xff]  }
 0x3a4   :  { %10647 = vmatprep.mubr.bf16.mxu0 %v20778_v8  ;;  %10917 = vmatpush1.bf16.msra.mxu1 %v17487_v43 }
 0x3a5   :  { %10948 = vmatprep.mubr.bf16.mxu1 %v20778_v8  ;;  %10617 = vmatprep.subr.bf16.mxu0 %v17492_v44  ;;  %v17529_v44 = vld [vmem:[%s24051_s3 + $0xc10] ss:$28 sps:$4 sm:$0xff]  }
 0x3a6   :  { %10918 = vmatprep.subr.bf16.mxu1 %v17495_v49 }
 0x3a7   :  { %10618 = vmatpush1.bf16.msra.mxu0 %v17490_v45 }
 0x3a8   :  { %10919 = vmatpush1.bf16.msra.mxu1 %v17493_v46  ;;  %10619 = vmatprep.subr.bf16.mxu0 %v17498_v50  ;;  %v17532_v46 = vld [vmem:[%s24051_s3 + $0xc40] ss:$28 sps:$4 sm:$0xff]  }
 0x3a9   :  { %10920 = vmatprep.subr.bf16.mxu1 %v17501_v51  ;;  %v17535_v51 = vld [vmem:[%s24051_s3 + $0xc48] ss:$28 sps:$4 sm:$0xff]  }
 0x3ab   :  { %10620 = vmatpush1.bf16.msra.mxu0 %v17496_v52  ;;  %v17540_v52 = vld [vmem:[%s24051_s3 + $0xc7c] ss:$28 sps:$4 sm:$0xff]  }
 0x3ac   :  { %10921 = vmatpush1.bf16.msra.mxu1 %v17499_v54  ;;  %10621 = vmatprep.subr.bf16.mxu0 %v17504_v55  ;;  %v17538_v55 = vld [vmem:[%s24051_s3 + $0xc78] ss:$28 sps:$4 sm:$0xff]  }
 0x3ad   :  { %10922 = vmatprep.subr.bf16.mxu1 %v17507_v30  ;;  %v17541_v30 = vld [vmem:[%s24051_s3 + $0xc80] ss:$28 sps:$4 sm:$0xff]  }
 0x3af   :  { %10622 = vmatpush1.bf16.msra.mxu0 %v17502_v60  ;;  %v17543_v60 = vld [vmem:[%s24051_s3 + $0xc84] ss:$28 sps:$4 sm:$0xff]  }
 0x3b0   :  { %10923 = vmatpush1.bf16.msra.mxu1 %v17505_v61  ;;  %10623 = vmatprep.subr.bf16.mxu0 %v17510_v35  ;;  %v17546_v61 = vld [vmem:[%s24051_s3 + $0xcb4] ss:$28 sps:$4 sm:$0xff]  }
 0x3b1   :  { %10924 = vmatprep.subr.bf16.mxu1 %v17513_v7  ;;  %v17544_v35 = vld [vmem:[%s24051_s3 + $0xcb0] ss:$28 sps:$4 sm:$0xff]   ;;  %v17547_v7 = vld [vmem:[%s24051_s3 + $0xcb8] ss:$28 sps:$4 sm:$0xff]  }
 0x3b3   :  { %10624 = vmatpush1.bf16.msra.mxu0 %v17508_v4  ;;  %v17549_v4 = vld [vmem:[%s24051_s3 + $0xcbc] ss:$28 sps:$4 sm:$0xff]  }
 0x3b4   :  { %10925 = vmatpush1.bf16.msra.mxu1 %v17511_v9  ;;  %10625 = vmatprep.subr.bf16.mxu0 %v17516_v12  ;;  %v17552_v9 = vld [vmem:[%s24051_s3 + $0xcec] ss:$28 sps:$4 sm:$0xff]  }
 0x3b5   :  { %v15559_v20 = vpop.f32.mrb[16].mxu0  ;;  %10926 = vmatprep.subr.bf16.mxu1 %v17519_v13  ;;  %v5827_v21 = vpop.f32.mrb[16].mxu1  ;;  %v17550_v12 = vld [vmem:[%s24051_s3 + $0xce8] ss:$28 sps:$4 sm:$0xff]   ;;  %v17555_v13 = vld [vmem:[%s24051_s3 + $0xcf4] ss:$28 sps:$4 sm:$0xff]  }
 0x3b6   :  { %v15560_v24 = vpop.f32.mrb[17].mxu0  ;;  %v15861_v22 = vpop.f32.mrb[17].mxu1 }
 0x3b7   :  { %v15561_v47 = vadd.f32 %v15560_v24, %v15559_v20  ;;  %v15562_v25 = vpop.f32.mrb[18].mxu0  ;;  %10626 = vmatpush1.bf16.msra.mxu0 %v17514_v14  ;;  %v5830_v26 = vpop.f32.mrb[18].mxu1  ;;  %v17553_v14 = vld [vmem:[%s24051_s3 + $0xcf0] ss:$28 sps:$4 sm:$0xff]   ;;  %v17559_v20 = vld [vmem:[%s24051_s3 + $0xd28] ss:$28 sps:$4 sm:$0xff]  }
 0x3b8   :  { %10927 = vmatpush1.bf16.msra.mxu1 %v17517_v17  ;;  %v15563_v28 = vpop.f32.mrb[19].mxu0  ;;  %10627 = vmatprep.subr.bf16.mxu0 %v17522_v18  ;;  %v15862_v33 = vpop.f32.mrb[19].mxu1  ;;  %v17558_v17 = vld [vmem:[%s24051_s3 + $0xd24] ss:$28 sps:$4 sm:$0xff]  }
 0x3b9   :  { %v15564_v36 = vadd.f32 %v15563_v28, %v15562_v25  ;;  %v5787_v38 = vadd.f32 %v15561_v47, %v21570_v37  ;;  %10928 = vmatprep.subr.bf16.mxu1 %v17525_v19  ;;  %v17534_v37 = vld [vmem:[%s24051_s3 + $0xc44] ss:$28 sps:$4 sm:$0xff]   ;;  %v17561_v19 = vld [vmem:[%s24051_s3 + $0xd2c] ss:$28 sps:$4 sm:$0xff]   ;;  %v17570_v47 = vld [vmem:[%s24051_s3 + $0xd94] ss:$28 sps:$4 sm:$0xff]  }
 0x3ba   :  { %v17556_v18 = vld [vmem:[%s24051_s3 + $0xd20] ss:$28 sps:$4 sm:$0xff]   ;;  %v17568_v25 = vld [vmem:[%s24051_s3 + $0xd90] ss:$28 sps:$4 sm:$0xff]   ;;  %v17571_v28 = vld [vmem:[%s24051_s3 + $0xd98] ss:$28 sps:$4 sm:$0xff]  }
 0x3bb   :  { %v5828_v42 = vadd.f32 %v5827_v21, %v5787_v38  ;;  %10628 = vmatpush1.bf16.msra.mxu0 %v17520_v23  ;;  %v5790_v43 = vadd.f32 %v15564_v36, %v21578_v40  ;;  %v17537_v40 = vld [vmem:[%s24051_s3 + $0xc4c] ss:$28 sps:$4 sm:$0xff]   ;;  %v17564_v21 = vld [vmem:[%s24051_s3 + $0xd5c] ss:$28 sps:$4 sm:$0xff]   ;;  %v17567_v24 = vld [vmem:[%s24051_s3 + $0xd64] ss:$28 sps:$4 sm:$0xff]  }
 0x3bc   :  { %10929 = vmatpush1.bf16.msra.mxu1 %v17523_v29  ;;  %10629 = vmatprep.subr.bf16.mxu0 %v17528_v15  ;;  %v17562_v23 = vld [vmem:[%s24051_s3 + $0xd58] ss:$28 sps:$4 sm:$0xff]   ;;  %v17565_v22 = vld [vmem:[%s24051_s3 + $0xd60] ss:$28 sps:$4 sm:$0xff]   ;;  %v17576_v29 = vld [vmem:[%s24051_s3 + $0xdcc] ss:$28 sps:$4 sm:$0xff]  }
 0x3bd   :  { %v5831_v45 = vadd.f32 %v5830_v26, %v5790_v43  ;;  %10930 = vmatprep.subr.bf16.mxu1 %v17531_v41  ;;  %v5846_v49 = vmax.f32 %v5828_v42, 0.0  ;;  %v17573_v26 = vld [vmem:[%s24051_s3 + $0xd9c] ss:$28 sps:$4 sm:$0xff]   ;;  %v17574_v15 = vld [vmem:[%s24051_s3 + $0xdc8] ss:$28 sps:$4 sm:$0xff]  }
 0x3be   :  { %v17579_v33 = vld [vmem:[%s24051_s3 + $0xdd4] ss:$28 sps:$4 sm:$0xff]   ;;  %v17582_v38 = vld [vmem:[%s24051_s3 + $0xe04] ss:$28 sps:$4 sm:$0xff]   ;;  %v17585_v41 = vld [vmem:[%s24051_s3 + $0xe0c] ss:$28 sps:$4 sm:$0xff]  }
 0x3bf   :  { %v5859_v50 = vmax.f32 %v5831_v45, 0.0  ;;  %10630 = vmatpush1.bf16.msra.mxu0 %v17526_v39  ;;  %v17577_v36 = vld [vmem:[%s24051_s3 + $0xdd0] ss:$28 sps:$4 sm:$0xff]   ;;  %v17580_v39 = vld [vmem:[%s24051_s3 + $0xe00] ss:$28 sps:$4 sm:$0xff]  }
 0x3c0   :  { %10931 = vmatpush1.bf16.msra.mxu1 %v17529_v44  ;;  %10631 = vmatprep.subr.bf16.mxu0 %v17534_v37  ;;  %v17583_v42 = vld [vmem:[%s24051_s3 + $0xe08] ss:$28 sps:$4 sm:$0xff]   ;;  %v17588_v43 = vld [vmem:[%s24051_s3 + $0xe3c] ss:$28 sps:$4 sm:$0xff]  }
 0x3c1   :  { %v21694_v54 = vpack.c.bf16 %v5859_v50, %v5846_v49  ;;  %10932 = vmatprep.subr.bf16.mxu1 %v17537_v40  ;;  %v17591_v44 = vld [vmem:[%s24051_s3 + $0xe44] ss:$28 sps:$4 sm:$0xff]   ;;  %v17586_v37 = vld [vmem:[%s24051_s3 + $0xe38] ss:$28 sps:$4 sm:$0xff]   ;;  %v17592_v40 = vld [vmem:[%s24051_s3 + $0xe70] ss:$28 sps:$4 sm:$0xff]  }
 0x3c2   :  { %v17589_v45 = vld [vmem:[%s24051_s3 + $0xe40] ss:$28 sps:$4 sm:$0xff]   ;;  %v17595_v50 = vld [vmem:[%s24051_s3 + $0xe78] ss:$28 sps:$4 sm:$0xff]  }
 0x3c3   :  { %10632 = vmatpush1.bf16.msra.mxu0 %v17532_v46  ;;  %v17594_v46 = vld [vmem:[%s24051_s3 + $0xe74] ss:$28 sps:$4 sm:$0xff]   ;;  %v17597_v49 = vld [vmem:[%s24051_s3 + $0xe7c] ss:$28 sps:$4 sm:$0xff]  }
 0x3c4   :  { %10933 = vmatpush1.bf16.msra.mxu1 %v17535_v51  ;;  %10633 = vmatprep.subr.bf16.mxu0 %v17540_v52  ;;  %v17600_v51 = vld [vmem:[%s24051_s3 + $0xeac] ss:$28 sps:$4 sm:$0xff]  }
 0x3c5   :  { %10934 = vmatprep.subr.bf16.mxu1 %v17543_v60  ;;  %v17598_v52 = vld [vmem:[%s24051_s3 + $0xea8] ss:$28 sps:$4 sm:$0xff]   ;;  %v17601_v60 = vld [vmem:[%s24051_s3 + $0xeb0] ss:$28 sps:$4 sm:$0xff]  }
 0x3c7   :  { %10634 = vmatpush1.bf16.msra.mxu0 %v17538_v55  ;;  %v17603_v55 = vld [vmem:[%s24051_s3 + $0xeb4] ss:$28 sps:$4 sm:$0xff]  }
 0x3c8   :  { %10935 = vmatpush1.bf16.msra.mxu1 %v17541_v30  ;;  %10635 = vmatprep.subr.bf16.mxu0 %v17546_v61  ;;  %v17606_v30 = vld [vmem:[%s24051_s3 + $0xee4] ss:$28 sps:$4 sm:$0xff]  }
 0x3c9   :  { %10936 = vmatprep.subr.bf16.mxu1 %v17549_v4  ;;  %v17604_v61 = vld [vmem:[%s24051_s3 + $0xee0] ss:$28 sps:$4 sm:$0xff]   ;;  %v17607_v4 = vld [vmem:[%s24051_s3 + $0xee8] ss:$28 sps:$4 sm:$0xff]  }
 0x3cb   :  { %10636 = vmatpush1.bf16.msra.mxu0 %v17544_v35  ;;  %v17609_v35 = vld [vmem:[%s24051_s3 + $0xeec] ss:$28 sps:$4 sm:$0xff]  }
 0x3cc   :  { %10937 = vmatpush1.bf16.msra.mxu1 %v17547_v7  ;;  %10637 = vmatprep.subr.bf16.mxu0 %v17552_v9  ;;  %v17612_v7 = vld [vmem:[%s24051_s3 + $0xf1c] ss:$28 sps:$4 sm:$0xff]  }
 0x3cd   :  { %10938 = vmatprep.subr.bf16.mxu1 %v17555_v13  ;;  %v17610_v9 = vld [vmem:[%s24051_s3 + $0xf18] ss:$28 sps:$4 sm:$0xff]   ;;  %v17613_v13 = vld [vmem:[%s24051_s3 + $0xf20] ss:$28 sps:$4 sm:$0xff]  }
 0x3cf   :  { %10638 = vmatpush1.bf16.msra.mxu0 %v17550_v12  ;;  %v17615_v12 = vld [vmem:[%s24051_s3 + $0xf24] ss:$28 sps:$4 sm:$0xff]  }
 0x3d0   :  { %10939 = vmatpush1.bf16.msra.mxu1 %v17553_v14  ;;  %10639 = vmatprep.subr.bf16.mxu0 %v17558_v17  ;;  %v17618_v14 = vld [vmem:[%s24051_s3 + $0xf54] ss:$28 sps:$4 sm:$0xff]  }
 0x3d1   :  { %10940 = vmatprep.subr.bf16.mxu1 %v17561_v19  ;;  %v17616_v17 = vld [vmem:[%s24051_s3 + $0xf50] ss:$28 sps:$4 sm:$0xff]   ;;  %v17619_v19 = vld [vmem:[%s24051_s3 + $0xf58] ss:$28 sps:$4 sm:$0xff]  }
 0x3d3   :  { %10640 = vmatpush1.bf16.msra.mxu0 %v17556_v18  ;;  %v17621_v18 = vld [vmem:[%s24051_s3 + $0xf5c] ss:$28 sps:$4 sm:$0xff]  }
 0x3d4   :  { %10941 = vmatpush1.bf16.msra.mxu1 %v17559_v20  ;;  %10641 = vmatprep.subr.bf16.mxu0 %v17564_v21  ;;  %v17624_v20 = vld [vmem:[%s24051_s3 + $0xf8c] ss:$28 sps:$4 sm:$0xff]  }
 0x3d5   :  { %10942 = vmatprep.subr.bf16.mxu1 %v17567_v24  ;;  %v17622_v21 = vld [vmem:[%s24051_s3 + $0xf88] ss:$28 sps:$4 sm:$0xff]   ;;  %v17625_v24 = vld [vmem:[%s24051_s3 + $0xf90] ss:$28 sps:$4 sm:$0xff]  }
 0x3d7   :  { %10642 = vmatpush1.bf16.msra.mxu0 %v17562_v23  ;;  %v17627_v23 = vld [vmem:[%s24051_s3 + $0xf94] ss:$28 sps:$4 sm:$0xff]  }
 0x3d8   :  { %10943 = vmatpush1.bf16.msra.mxu1 %v17565_v22  ;;  %10643 = vmatprep.subr.bf16.mxu0 %v17570_v47  ;;  %v17630_v22 = vld [vmem:[%s24051_s3 + $0xfc4] ss:$28 sps:$4 sm:$0xff]  }
 0x3d9   :  { %10944 = vmatprep.subr.bf16.mxu1 %v17573_v26  ;;  %v17628_v47 = vld [vmem:[%s24051_s3 + $0xfc0] ss:$28 sps:$4 sm:$0xff]   ;;  %v17631_v26 = vld [vmem:[%s24051_s3 + $0xfc8] ss:$28 sps:$4 sm:$0xff]  }
 0x3db   :  { %10644 = vmatpush1.bf16.msra.mxu0 %v17568_v25  ;;  %v17633_v25 = vld [vmem:[%s24051_s3 + $0xfcc] ss:$28 sps:$4 sm:$0xff]  }
 0x3dc   :  { %10945 = vmatpush1.bf16.msra.mxu1 %v17571_v28  ;;  %10645 = vmatprep.subr.bf16.mxu0 %v17576_v29  ;;  %v17636_v28 = vld [vmem:[%s24051_s3 + $0xffc] ss:$28 sps:$4 sm:$0xff]   ;;  %v17639_v29 = vld [vmem:[%s24051_s3 + $0x1004] ss:$28 sps:$4 sm:$0xff]  }
 0x3dd   :  { %10946 = vmatprep.subr.bf16.mxu1 %v17579_v33  ;;  %v17637_v33 = vld [vmem:[%s24051_s3 + $0x1000] ss:$28 sps:$4 sm:$0xff]  }
 0x3df   :  { %10646 = vmatpush1.bf16.msra.mxu0 %v17574_v15  ;;  %v17634_v15 = vld [vmem:[%s24051_s3 + $0xff8] ss:$28 sps:$4 sm:$0xff]  }
 0x3e0   :  { %10947 = vmatpush1.bf16.msra.mxu1 %v17577_v36  ;;  %10658 = vmatprep.subr.bf16.mxu0 %v17582_v38  ;;  %v17642_v36 = vld [vmem:[%s24051_s3 + $0x1034] ss:$28 sps:$4 sm:$0xff]   ;;  %v17645_v38 = vld [vmem:[%s24051_s3 + $0x103c] ss:$28 sps:$4 sm:$0xff]  }
 0x3e1   :  { %10959 = vmatprep.subr.bf16.mxu1 %v17585_v41  ;;  %v17643_v41 = vld [vmem:[%s24051_s3 + $0x1038] ss:$28 sps:$4 sm:$0xff]  }
 0x3e2   :  { %10648 = vmatmul.mubr.bf16.vlgmr.msra.gmra.mrb[20].mxu0 %v20768_v62 }
 0x3e3   :  { %10949 = vmatmul.mubr.bf16.vlgmr.msra.gmra.mrb[20].mxu1 %v20768_v62  ;;  %10659 = vmatpush1.bf16.msra.mxu0 %v17580_v39  ;;  %v17640_v39 = vld [vmem:[%s24051_s3 + $0x1030] ss:$28 sps:$4 sm:$0xff]  }
 0x3e4   :  { %10690 = vmatprep.mubr.bf16.mxu0 %v21474_v32  ;;  %10960 = vmatpush1.bf16.msra.mxu1 %v17583_v42  ;;  %v17648_v42 = vld [vmem:[%s24051_s3 + $0x106c] ss:$28 sps:$4 sm:$0xff]  }
 0x3e5   :  { %10991 = vmatprep.mubr.bf16.mxu1 %v21474_v32  ;;  %10660 = vmatprep.subr.bf16.mxu0 %v17588_v43  ;;  %v17651_v43 = vld [vmem:[%s24051_s3 + $0x1074] ss:$28 sps:$4 sm:$0xff]  }
 0x3e6   :  { %10961 = vmatprep.subr.bf16.mxu1 %v17591_v44  ;;  %v17646_v44 = vld [vmem:[%s24051_s3 + $0x1068] ss:$28 sps:$4 sm:$0xff]  }
 0x3e7   :  { %10661 = vmatpush1.bf16.msra.mxu0 %v17586_v37  ;;  %v17649_v37 = vld [vmem:[%s24051_s3 + $0x1070] ss:$28 sps:$4 sm:$0xff]  }
 0x3e8   :  { %10962 = vmatpush1.bf16.msra.mxu1 %v17589_v45  ;;  %10662 = vmatprep.subr.bf16.mxu0 %v17594_v46  ;;  %v17654_v45 = vld [vmem:[%s24051_s3 + $0x10a4] ss:$28 sps:$4 sm:$0xff]   ;;  %v17657_v46 = vld [vmem:[%s24051_s3 + $0x10ac] ss:$28 sps:$4 sm:$0xff]  }
 0x3e9   :  { %10963 = vmatprep.subr.bf16.mxu1 %v17597_v49  ;;  %v17655_v49 = vld [vmem:[%s24051_s3 + $0x10a8] ss:$28 sps:$4 sm:$0xff]  }
 0x3eb   :  { %10663 = vmatpush1.bf16.msra.mxu0 %v17592_v40  ;;  %v17652_v40 = vld [vmem:[%s24051_s3 + $0x10a0] ss:$28 sps:$4 sm:$0xff]  }
 0x3ec   :  { %10964 = vmatpush1.bf16.msra.mxu1 %v17595_v50  ;;  %10664 = vmatprep.subr.bf16.mxu0 %v17600_v51  ;;  %v17660_v50 = vld [vmem:[%s24051_s3 + $0x10dc] ss:$28 sps:$4 sm:$0xff]   ;;  %v17663_v51 = vld [vmem:[%s24051_s3 + $0x10e4] ss:$28 sps:$4 sm:$0xff]  }
 0x3ed   :  { %10965 = vmatprep.subr.bf16.mxu1 %v17603_v55  ;;  %v17661_v55 = vld [vmem:[%s24051_s3 + $0x10e0] ss:$28 sps:$4 sm:$0xff]  }
 0x3ef   :  { %10665 = vmatpush1.bf16.msra.mxu0 %v17598_v52  ;;  %v17658_v52 = vld [vmem:[%s24051_s3 + $0x10d8] ss:$28 sps:$4 sm:$0xff]  }
 0x3f0   :  { %10966 = vmatpush1.bf16.msra.mxu1 %v17601_v60  ;;  %10666 = vmatprep.subr.bf16.mxu0 %v17606_v30  ;;  %v17666_v60 = vld [vmem:[%s24051_s3 + $0x1114] ss:$28 sps:$4 sm:$0xff]   ;;  %v17669_v30 = vld [vmem:[%s24051_s3 + $0x111c] ss:$28 sps:$4 sm:$0xff]  }
 0x3f1   :  { %10967 = vmatprep.subr.bf16.mxu1 %v17609_v35  ;;  %v17667_v35 = vld [vmem:[%s24051_s3 + $0x1118] ss:$28 sps:$4 sm:$0xff]  }
 0x3f3   :  { %10667 = vmatpush1.bf16.msra.mxu0 %v17604_v61  ;;  %v17664_v61 = vld [vmem:[%s24051_s3 + $0x1110] ss:$28 sps:$4 sm:$0xff]  }
 0x3f4   :  { %10968 = vmatpush1.bf16.msra.mxu1 %v17607_v4  ;;  %10668 = vmatprep.subr.bf16.mxu0 %v17612_v7  ;;  %v17672_v4 = vld [vmem:[%s24051_s3 + $0x114c] ss:$28 sps:$4 sm:$0xff]   ;;  %v17675_v7 = vld [vmem:[%s24051_s3 + $0x1154] ss:$28 sps:$4 sm:$0xff]  }
 0x3f5   :  { %10969 = vmatprep.subr.bf16.mxu1 %v17615_v12  ;;  %v17673_v12 = vld [vmem:[%s24051_s3 + $0x1150] ss:$28 sps:$4 sm:$0xff]  }
 0x3f7   :  { %10669 = vmatpush1.bf16.msra.mxu0 %v17610_v9  ;;  %v17670_v9 = vld [vmem:[%s24051_s3 + $0x1148] ss:$28 sps:$4 sm:$0xff]  }
 0x3f8   :  { %10970 = vmatpush1.bf16.msra.mxu1 %v17613_v13  ;;  %10670 = vmatprep.subr.bf16.mxu0 %v17618_v14  ;;  %v17678_v13 = vld [vmem:[%s24051_s3 + $0x1184] ss:$28 sps:$4 sm:$0xff]   ;;  %v17681_v14 = vld [vmem:[%s24051_s3 + $0x118c] ss:$28 sps:$4 sm:$0xff]  }
 0x3f9   :  { %10971 = vmatprep.subr.bf16.mxu1 %v17621_v18  ;;  %v17679_v18 = vld [vmem:[%s24051_s3 + $0x1188] ss:$28 sps:$4 sm:$0xff]  }
 0x3fb   :  { %10671 = vmatpush1.bf16.msra.mxu0 %v17616_v17  ;;  %v17676_v17 = vld [vmem:[%s24051_s3 + $0x1180] ss:$28 sps:$4 sm:$0xff]  }
 0x3fc   :  { %10972 = vmatpush1.bf16.msra.mxu1 %v17619_v19  ;;  %10672 = vmatprep.subr.bf16.mxu0 %v17624_v20  ;;  %v17684_v19 = vld [vmem:[%s24051_s3 + $0x11bc] ss:$28 sps:$4 sm:$0xff]   ;;  %v17687_v20 = vld [vmem:[%s24051_s3 + $0x11c4] ss:$28 sps:$4 sm:$0xff]  }
 0x3fd   :  { %10973 = vmatprep.subr.bf16.mxu1 %v17627_v23  ;;  %v17685_v23 = vld [vmem:[%s24051_s3 + $0x11c0] ss:$28 sps:$4 sm:$0xff]  }
 0x3ff   :  { %10673 = vmatpush1.bf16.msra.mxu0 %v17622_v21  ;;  %v17682_v21 = vld [vmem:[%s24051_s3 + $0x11b8] ss:$28 sps:$4 sm:$0xff]  }
 0x400   :  { %10974 = vmatpush1.bf16.msra.mxu1 %v17625_v24  ;;  %10674 = vmatprep.subr.bf16.mxu0 %v17630_v22  ;;  %v17690_v24 = vld [vmem:[%s24051_s3 + $0x11f4] ss:$28 sps:$4 sm:$0xff]   ;;  %v17693_v22 = vld [vmem:[%s24051_s3 + $0x11fc] ss:$28 sps:$4 sm:$0xff]  }
 0x401   :  { %10975 = vmatprep.subr.bf16.mxu1 %v17633_v25  ;;  %v17691_v25 = vld [vmem:[%s24051_s3 + $0x11f8] ss:$28 sps:$4 sm:$0xff]  }
 0x403   :  { %10675 = vmatpush1.bf16.msra.mxu0 %v17628_v47  ;;  %v17688_v47 = vld [vmem:[%s24051_s3 + $0x11f0] ss:$28 sps:$4 sm:$0xff]  }
 0x404   :  { %10976 = vmatpush1.bf16.msra.mxu1 %v17631_v26  ;;  %10676 = vmatprep.subr.bf16.mxu0 %v17636_v28  ;;  %v17696_v26 = vld [vmem:[%s24051_s3 + $0x122c] ss:$28 sps:$4 sm:$0xff]   ;;  %v17699_v28 = vld [vmem:[%s24051_s3 + $0x1234] ss:$28 sps:$4 sm:$0xff]  }
 0x405   :  { %10977 = vmatprep.subr.bf16.mxu1 %v17639_v29  ;;  %v17694_v29 = vld [vmem:[%s24051_s3 + $0x1228] ss:$28 sps:$4 sm:$0xff]  }
 0x407   :  { %10677 = vmatpush1.bf16.msra.mxu0 %v17634_v15  ;;  %v17697_v15 = vld [vmem:[%s24051_s3 + $0x1230] ss:$28 sps:$4 sm:$0xff]  }
 0x408   :  { %10978 = vmatpush1.bf16.msra.mxu1 %v17637_v33  ;;  %10678 = vmatprep.subr.bf16.mxu0 %v17642_v36  ;;  %v17702_v33 = vld [vmem:[%s24051_s3 + $0x1264] ss:$28 sps:$4 sm:$0xff]   ;;  %v17705_v36 = vld [vmem:[%s24051_s3 + $0x126c] ss:$28 sps:$4 sm:$0xff]  }
 0x409   :  { %10979 = vmatprep.subr.bf16.mxu1 %v17645_v38  ;;  %v17700_v38 = vld [vmem:[%s24051_s3 + $0x1260] ss:$28 sps:$4 sm:$0xff]  }
 0x40b   :  { %10679 = vmatpush1.bf16.msra.mxu0 %v17640_v39  ;;  %v17703_v39 = vld [vmem:[%s24051_s3 + $0x1268] ss:$28 sps:$4 sm:$0xff]  }
 0x40c   :  { %10980 = vmatpush1.bf16.msra.mxu1 %v17643_v41  ;;  %10680 = vmatprep.subr.bf16.mxu0 %v17648_v42  ;;  %v17708_v41 = vld [vmem:[%s24051_s3 + $0x129c] ss:$28 sps:$4 sm:$0xff]   ;;  %v17711_v42 = vld [vmem:[%s24051_s3 + $0x12a4] ss:$28 sps:$4 sm:$0xff]  }
 0x40d   :  { %10981 = vmatprep.subr.bf16.mxu1 %v17651_v43  ;;  %v17706_v43 = vld [vmem:[%s24051_s3 + $0x1298] ss:$28 sps:$4 sm:$0xff]  }
 0x40f   :  { %10681 = vmatpush1.bf16.msra.mxu0 %v17646_v44  ;;  %v17709_v44 = vld [vmem:[%s24051_s3 + $0x12a0] ss:$28 sps:$4 sm:$0xff]  }
 0x410   :  { %10982 = vmatpush1.bf16.msra.mxu1 %v17649_v37  ;;  %10682 = vmatprep.subr.bf16.mxu0 %v17654_v45  ;;  %v17714_v37 = vld [vmem:[%s24051_s3 + $0x12d4] ss:$28 sps:$4 sm:$0xff]   ;;  %v17717_v45 = vld [vmem:[%s24051_s3 + $0x12dc] ss:$28 sps:$4 sm:$0xff]  }
 0x411   :  { %10983 = vmatprep.subr.bf16.mxu1 %v17657_v46  ;;  %v17712_v46 = vld [vmem:[%s24051_s3 + $0x12d0] ss:$28 sps:$4 sm:$0xff]  }
 0x413   :  { %10683 = vmatpush1.bf16.msra.mxu0 %v17652_v40  ;;  %v17715_v40 = vld [vmem:[%s24051_s3 + $0x12d8] ss:$28 sps:$4 sm:$0xff]  }
 0x414   :  { %10984 = vmatpush1.bf16.msra.mxu1 %v17655_v49  ;;  %10684 = vmatprep.subr.bf16.mxu0 %v17660_v50  ;;  %v17720_v49 = vld [vmem:[%s24051_s3 + $0x130c] ss:$28 sps:$4 sm:$0xff]   ;;  %v17723_v50 = vld [vmem:[%s24051_s3 + $0x1314] ss:$28 sps:$4 sm:$0xff]  }
 0x415   :  { %10985 = vmatprep.subr.bf16.mxu1 %v17663_v51  ;;  %v17718_v51 = vld [vmem:[%s24051_s3 + $0x1308] ss:$28 sps:$4 sm:$0xff]  }
 0x417   :  { %10685 = vmatpush1.bf16.msra.mxu0 %v17658_v52  ;;  %v17721_v52 = vld [vmem:[%s24051_s3 + $0x1310] ss:$28 sps:$4 sm:$0xff]  }
 0x418   :  { %10986 = vmatpush1.bf16.msra.mxu1 %v17661_v55  ;;  %10686 = vmatprep.subr.bf16.mxu0 %v17666_v60  ;;  %v17726_v55 = vld [vmem:[%s24051_s3 + $0x1344] ss:$28 sps:$4 sm:$0xff]   ;;  %v17729_v60 = vld [vmem:[%s24051_s3 + $0x134c] ss:$28 sps:$4 sm:$0xff]  }
 0x419   :  { %10987 = vmatprep.subr.bf16.mxu1 %v17669_v30  ;;  %v17724_v30 = vld [vmem:[%s24051_s3 + $0x1340] ss:$28 sps:$4 sm:$0xff]  }
 0x41b   :  { %10687 = vmatpush1.bf16.msra.mxu0 %v17664_v61  ;;  %v17727_v61 = vld [vmem:[%s24051_s3 + $0x1348] ss:$28 sps:$4 sm:$0xff]  }
 0x41c   :  { %10988 = vmatpush1.bf16.msra.mxu1 %v17667_v35  ;;  %10688 = vmatprep.subr.bf16.mxu0 %v17672_v4  ;;  %v17732_v35 = vld [vmem:[%s24051_s3 + $0x137c] ss:$28 sps:$4 sm:$0xff]   ;;  %v17735_v4 = vld [vmem:[%s24051_s3 + $0x1384] ss:$28 sps:$4 sm:$0xff]  }
 0x41d   :  { %10989 = vmatprep.subr.bf16.mxu1 %v17675_v7  ;;  %v17730_v7 = vld [vmem:[%s24051_s3 + $0x1378] ss:$28 sps:$4 sm:$0xff]  }
 0x41f   :  { %10689 = vmatpush1.bf16.msra.mxu0 %v17670_v9  ;;  %v17733_v9 = vld [vmem:[%s24051_s3 + $0x1380] ss:$28 sps:$4 sm:$0xff]  }
 0x420   :  { %10990 = vmatpush1.bf16.msra.mxu1 %v17673_v12  ;;  %10701 = vmatprep.subr.bf16.mxu0 %v17678_v13  ;;  %v17738_v12 = vld [vmem:[%s24051_s3 + $0x13b4] ss:$28 sps:$4 sm:$0xff]   ;;  %v17741_v13 = vld [vmem:[%s24051_s3 + $0x13bc] ss:$28 sps:$4 sm:$0xff]  }
 0x421   :  { %11002 = vmatprep.subr.bf16.mxu1 %v17681_v14  ;;  %v17736_v14 = vld [vmem:[%s24051_s3 + $0x13b0] ss:$28 sps:$4 sm:$0xff]  }
 0x422   :  { %10691 = vmatmul.mubr.bf16.vlgmr.msra.gmra.mrb[20].mxu0 %v21464_v27 }
 0x423   :  { %10992 = vmatmul.mubr.bf16.vlgmr.msra.gmra.mrb[20].mxu1 %v21464_v27  ;;  %10702 = vmatpush1.bf16.msra.mxu0 %v17676_v17  ;;  %v17739_v17 = vld [vmem:[%s24051_s3 + $0x13b8] ss:$28 sps:$4 sm:$0xff]  }
 0x424   :  { %10733 = vmatprep.mubr.bf16.mxu0 %v21482_v34  ;;  %11003 = vmatpush1.bf16.msra.mxu1 %v17679_v18  ;;  %v17744_v18 = vld [vmem:[%s24051_s3 + $0x13ec] ss:$28 sps:$4 sm:$0xff]  }
 0x425   :  { %11034 = vmatprep.mubr.bf16.mxu1 %v21482_v34  ;;  %10703 = vmatprep.subr.bf16.mxu0 %v17684_v19  ;;  %v17747_v19 = vld [vmem:[%s24051_s3 + $0x13f4] ss:$28 sps:$4 sm:$0xff]  }
 0x426   :  { %11004 = vmatprep.subr.bf16.mxu1 %v17687_v20  ;;  %v17742_v20 = vld [vmem:[%s24051_s3 + $0x13e8] ss:$28 sps:$4 sm:$0xff]  }
 0x427   :  { %10704 = vmatpush1.bf16.msra.mxu0 %v17682_v21  ;;  %v17745_v21 = vld [vmem:[%s24051_s3 + $0x13f0] ss:$28 sps:$4 sm:$0xff]  }
 0x428   :  { %11005 = vmatpush1.bf16.msra.mxu1 %v17685_v23  ;;  %10705 = vmatprep.subr.bf16.mxu0 %v17690_v24  ;;  %v17750_v23 = vld [vmem:[%s24051_s3 + $0x1424] ss:$28 sps:$4 sm:$0xff]   ;;  %v17753_v24 = vld [vmem:[%s24051_s3 + $0x142c] ss:$28 sps:$4 sm:$0xff]  }
 0x429   :  { %11006 = vmatprep.subr.bf16.mxu1 %v17693_v22  ;;  %v17748_v22 = vld [vmem:[%s24051_s3 + $0x1420] ss:$28 sps:$4 sm:$0xff]  }
 0x42b   :  { %10706 = vmatpush1.bf16.msra.mxu0 %v17688_v47  ;;  %v17751_v47 = vld [vmem:[%s24051_s3 + $0x1428] ss:$28 sps:$4 sm:$0xff]  }
 0x42c   :  { %11007 = vmatpush1.bf16.msra.mxu1 %v17691_v25  ;;  %10707 = vmatprep.subr.bf16.mxu0 %v17696_v26  ;;  %v17756_v25 = vld [vmem:[%s24051_s3 + $0x145c] ss:$28 sps:$4 sm:$0xff]   ;;  %v17759_v26 = vld [vmem:[%s24051_s3 + $0x1464] ss:$28 sps:$4 sm:$0xff]  }
 0x42d   :  { %11008 = vmatprep.subr.bf16.mxu1 %v17699_v28  ;;  %v17754_v28 = vld [vmem:[%s24051_s3 + $0x1458] ss:$28 sps:$4 sm:$0xff]  }
 0x42f   :  { %10708 = vmatpush1.bf16.msra.mxu0 %v17694_v29  ;;  %v17757_v29 = vld [vmem:[%s24051_s3 + $0x1460] ss:$28 sps:$4 sm:$0xff]  }
 0x430   :  { %11009 = vmatpush1.bf16.msra.mxu1 %v17697_v15  ;;  %10709 = vmatprep.subr.bf16.mxu0 %v17702_v33  ;;  %v17762_v15 = vld [vmem:[%s24051_s3 + $0x1494] ss:$28 sps:$4 sm:$0xff]   ;;  %v17765_v33 = vld [vmem:[%s24051_s3 + $0x149c] ss:$28 sps:$4 sm:$0xff]  }
 0x431   :  { %11010 = vmatprep.subr.bf16.mxu1 %v17705_v36  ;;  %v17760_v36 = vld [vmem:[%s24051_s3 + $0x1490] ss:$28 sps:$4 sm:$0xff]  }
 0x433   :  { %10710 = vmatpush1.bf16.msra.mxu0 %v17700_v38  ;;  %v17763_v38 = vld [vmem:[%s24051_s3 + $0x1498] ss:$28 sps:$4 sm:$0xff]  }
 0x434   :  { %11011 = vmatpush1.bf16.msra.mxu1 %v17703_v39  ;;  %10711 = vmatprep.subr.bf16.mxu0 %v17708_v41  ;;  %v17768_v39 = vld [vmem:[%s24051_s3 + $0x14cc] ss:$28 sps:$4 sm:$0xff]   ;;  %v17771_v41 = vld [vmem:[%s24051_s3 + $0x14d4] ss:$28 sps:$4 sm:$0xff]  }
 0x435   :  { %11012 = vmatprep.subr.bf16.mxu1 %v17711_v42  ;;  %v17766_v42 = vld [vmem:[%s24051_s3 + $0x14c8] ss:$28 sps:$4 sm:$0xff]  }
 0x437   :  { %10712 = vmatpush1.bf16.msra.mxu0 %v17706_v43  ;;  %v17769_v43 = vld [vmem:[%s24051_s3 + $0x14d0] ss:$28 sps:$4 sm:$0xff]  }
 0x438   :  { %11013 = vmatpush1.bf16.msra.mxu1 %v17709_v44  ;;  %10713 = vmatprep.subr.bf16.mxu0 %v17714_v37  ;;  %v17774_v44 = vld [vmem:[%s24051_s3 + $0x1504] ss:$28 sps:$4 sm:$0xff]   ;;  %v17777_v37 = vld [vmem:[%s24051_s3 + $0x150c] ss:$28 sps:$4 sm:$0xff]  }
 0x439   :  { %11014 = vmatprep.subr.bf16.mxu1 %v17717_v45  ;;  %v17772_v45 = vld [vmem:[%s24051_s3 + $0x1500] ss:$28 sps:$4 sm:$0xff]  }
 0x43b   :  { %10714 = vmatpush1.bf16.msra.mxu0 %v17712_v46  ;;  %v17775_v46 = vld [vmem:[%s24051_s3 + $0x1508] ss:$28 sps:$4 sm:$0xff]  }
 0x43c   :  { %11015 = vmatpush1.bf16.msra.mxu1 %v17715_v40  ;;  %10715 = vmatprep.subr.bf16.mxu0 %v17720_v49  ;;  %v17780_v40 = vld [vmem:[%s24051_s3 + $0x153c] ss:$28 sps:$4 sm:$0xff]   ;;  %v17783_v49 = vld [vmem:[%s24051_s3 + $0x1544] ss:$28 sps:$4 sm:$0xff]  }
 0x43d   :  { %11016 = vmatprep.subr.bf16.mxu1 %v17723_v50  ;;  %v17778_v50 = vld [vmem:[%s24051_s3 + $0x1538] ss:$28 sps:$4 sm:$0xff]  }
 0x43f   :  { %10716 = vmatpush1.bf16.msra.mxu0 %v17718_v51  ;;  %v17781_v51 = vld [vmem:[%s24051_s3 + $0x1540] ss:$28 sps:$4 sm:$0xff]  }
 0x440   :  { %11017 = vmatpush1.bf16.msra.mxu1 %v17721_v52  ;;  %10717 = vmatprep.subr.bf16.mxu0 %v17726_v55  ;;  %v17786_v52 = vld [vmem:[%s24051_s3 + $0x1574] ss:$28 sps:$4 sm:$0xff]   ;;  %v17789_v55 = vld [vmem:[%s24051_s3 + $0x157c] ss:$28 sps:$4 sm:$0xff]  }
 0x441   :  { %11018 = vmatprep.subr.bf16.mxu1 %v17729_v60  ;;  %v17784_v60 = vld [vmem:[%s24051_s3 + $0x1570] ss:$28 sps:$4 sm:$0xff]  }
 0x443   :  { %10718 = vmatpush1.bf16.msra.mxu0 %v17724_v30  ;;  %v17787_v30 = vld [vmem:[%s24051_s3 + $0x1578] ss:$28 sps:$4 sm:$0xff]  }
 0x444   :  { %11019 = vmatpush1.bf16.msra.mxu1 %v17727_v61  ;;  %10719 = vmatprep.subr.bf16.mxu0 %v17732_v35  ;;  %v17792_v61 = vld [vmem:[%s24051_s3 + $0x15ac] ss:$28 sps:$4 sm:$0xff]   ;;  %v17795_v35 = vld [vmem:[%s24051_s3 + $0x15b4] ss:$28 sps:$4 sm:$0xff]  }
 0x445   :  { %11020 = vmatprep.subr.bf16.mxu1 %v17735_v4  ;;  %v17790_v4 = vld [vmem:[%s24051_s3 + $0x15a8] ss:$28 sps:$4 sm:$0xff]  }
 0x447   :  { %10720 = vmatpush1.bf16.msra.mxu0 %v17730_v7  ;;  %v17793_v7 = vld [vmem:[%s24051_s3 + $0x15b0] ss:$28 sps:$4 sm:$0xff]  }
 0x448   :  { %11021 = vmatpush1.bf16.msra.mxu1 %v17733_v9  ;;  %10721 = vmatprep.subr.bf16.mxu0 %v17738_v12  ;;  %v17798_v9 = vld [vmem:[%s24051_s3 + $0x15e4] ss:$28 sps:$4 sm:$0xff]   ;;  %v17801_v12 = vld [vmem:[%s24051_s3 + $0x15ec] ss:$28 sps:$4 sm:$0xff]  }
 0x449   :  { %11022 = vmatprep.subr.bf16.mxu1 %v17741_v13  ;;  %v17796_v13 = vld [vmem:[%s24051_s3 + $0x15e0] ss:$28 sps:$4 sm:$0xff]  }
 0x44b   :  { %10722 = vmatpush1.bf16.msra.mxu0 %v17736_v14  ;;  %v17799_v14 = vld [vmem:[%s24051_s3 + $0x15e8] ss:$28 sps:$4 sm:$0xff]  }
 0x44c   :  { %11023 = vmatpush1.bf16.msra.mxu1 %v17739_v17  ;;  %10723 = vmatprep.subr.bf16.mxu0 %v17744_v18  ;;  %v17804_v17 = vld [vmem:[%s24051_s3 + $0x161c] ss:$28 sps:$4 sm:$0xff]   ;;  %v17807_v18 = vld [vmem:[%s24051_s3 + $0x1624] ss:$28 sps:$4 sm:$0xff]  }
 0x44d   :  { %11024 = vmatprep.subr.bf16.mxu1 %v17747_v19  ;;  %v17802_v19 = vld [vmem:[%s24051_s3 + $0x1618] ss:$28 sps:$4 sm:$0xff]  }
 0x44f   :  { %10724 = vmatpush1.bf16.msra.mxu0 %v17742_v20  ;;  %v17805_v20 = vld [vmem:[%s24051_s3 + $0x1620] ss:$28 sps:$4 sm:$0xff]  }
 0x450   :  { %11025 = vmatpush1.bf16.msra.mxu1 %v17745_v21  ;;  %10725 = vmatprep.subr.bf16.mxu0 %v17750_v23  ;;  %v17810_v21 = vld [vmem:[%s24051_s3 + $0x1654] ss:$28 sps:$4 sm:$0xff]   ;;  %v17813_v23 = vld [vmem:[%s24051_s3 + $0x165c] ss:$28 sps:$4 sm:$0xff]  }
 0x451   :  { %11026 = vmatprep.subr.bf16.mxu1 %v17753_v24  ;;  %v17808_v24 = vld [vmem:[%s24051_s3 + $0x1650] ss:$28 sps:$4 sm:$0xff]  }
 0x453   :  { %10726 = vmatpush1.bf16.msra.mxu0 %v17748_v22  ;;  %v17811_v22 = vld [vmem:[%s24051_s3 + $0x1658] ss:$28 sps:$4 sm:$0xff]  }
 0x454   :  { %11027 = vmatpush1.bf16.msra.mxu1 %v17751_v47  ;;  %10727 = vmatprep.subr.bf16.mxu0 %v17756_v25  ;;  %v17816_v47 = vld [vmem:[%s24051_s3 + $0x168c] ss:$28 sps:$4 sm:$0xff]   ;;  %v17819_v25 = vld [vmem:[%s24051_s3 + $0x1694] ss:$28 sps:$4 sm:$0xff]  }
 0x455   :  { %11028 = vmatprep.subr.bf16.mxu1 %v17759_v26  ;;  %v17814_v26 = vld [vmem:[%s24051_s3 + $0x1688] ss:$28 sps:$4 sm:$0xff]  }
 0x457   :  { %10728 = vmatpush1.bf16.msra.mxu0 %v17754_v28  ;;  %v17817_v28 = vld [vmem:[%s24051_s3 + $0x1690] ss:$28 sps:$4 sm:$0xff]  }
 0x458   :  { %11029 = vmatpush1.bf16.msra.mxu1 %v17757_v29  ;;  %10729 = vmatprep.subr.bf16.mxu0 %v17762_v15  ;;  %v17822_v29 = vld [vmem:[%s24051_s3 + $0x14] ss:$28 sps:$4 sm:$0xff]  }
 0x459   :  { %11030 = vmatprep.subr.bf16.mxu1 %v17765_v33  ;;  %v17823_v15 = vld [vmem:[%s24051_s3 + $0x1d8] ss:$28 sps:$4 sm:$0xff]   ;;  %v17820_v33 = vld [vmem:[%s24051_s3 + $0x10] ss:$28 sps:$4 sm:$0xff]  }
 0x45b   :  { %10730 = vmatpush1.bf16.msra.mxu0 %v17760_v36  ;;  %v17824_v36 = vld [vmem:[%s24051_s3 + $0x18] ss:$28 sps:$4 sm:$0xff]  }
 0x45c   :  { %11031 = vmatpush1.bf16.msra.mxu1 %v17763_v38  ;;  %10731 = vmatprep.subr.bf16.mxu0 %v17768_v39  ;;  %v17827_v38 = vld [vmem:[%s24051_s3 + $0x4c] ss:$28 sps:$4 sm:$0xff]  }
 0x45d   :  { %11032 = vmatprep.subr.bf16.mxu1 %v17771_v41  ;;  %v17828_v39 = vld [vmem:[%s24051_s3 + $0x210] ss:$28 sps:$4 sm:$0xff]   ;;  %v17825_v41 = vld [vmem:[%s24051_s3 + $0x48] ss:$28 sps:$4 sm:$0xff]  }
 0x45f   :  { %10732 = vmatpush1.bf16.msra.mxu0 %v17766_v42  ;;  %v17829_v42 = vld [vmem:[%s24051_s3 + $0x50] ss:$28 sps:$4 sm:$0xff]  }
 0x460   :  { %11033 = vmatpush1.bf16.msra.mxu1 %v17769_v43  ;;  %10744 = vmatprep.subr.bf16.mxu0 %v17774_v44  ;;  %v17832_v43 = vld [vmem:[%s24051_s3 + $0x84] ss:$28 sps:$4 sm:$0xff]  }
 0x461   :  { %11045 = vmatprep.subr.bf16.mxu1 %v17777_v37  ;;  %v17833_v44 = vld [vmem:[%s24051_s3 + $0x248] ss:$28 sps:$4 sm:$0xff]   ;;  %v17830_v37 = vld [vmem:[%s24051_s3 + $0x80] ss:$28 sps:$4 sm:$0xff]  }
 0x462   :  { %10734 = vmatmul.mubr.bf16.vlgmr.msra.gmra.mrb[20].mxu0 %v21472_v31 }
 0x463   :  { %11035 = vmatmul.mubr.bf16.vlgmr.msra.gmra.mrb[20].mxu1 %v21472_v31  ;;  %10745 = vmatpush1.bf16.msra.mxu0 %v17772_v45  ;;  %v17834_v45 = vld [vmem:[%s24051_s3 + $0x88] ss:$28 sps:$4 sm:$0xff]  }
 0x464   :  { %11046 = vmatpush1.bf16.msra.mxu1 %v17775_v46  ;;  %10746 = vmatprep.subr.bf16.mxu0 %v17780_v40  ;;  %v17838_v46 = vld [vmem:[%s24051_s3 + $0x280] ss:$28 sps:$4 sm:$0xff]   ;;  %v17835_v40 = vld [vmem:[%s24051_s3 + $0xb8] ss:$28 sps:$4 sm:$0xff]  }
 0x465   :  { %11047 = vmatprep.subr.bf16.mxu1 %v17783_v49  ;;  %10776 = vmatprep.mubr.bf16.mxu0 %v18546_v16  ;;  %v17839_v49 = vld [vmem:[%s24051_s3 + $0xc0] ss:$28 sps:$4 sm:$0xff]  }
 0x466   :  { %11077 = vmatprep.mubr.bf16.mxu1 %v18546_v16 }
 0x467   :  { %10747 = vmatpush1.bf16.msra.mxu0 %v17778_v50  ;;  %v17842_v50 = vld [vmem:[%s24051_s3 + $0xf4] ss:$28 sps:$4 sm:$0xff]  }
 0x468   :  { %11048 = vmatpush1.bf16.msra.mxu1 %v17781_v51  ;;  %10748 = vmatprep.subr.bf16.mxu0 %v17786_v52  ;;  %v17843_v51 = vld [vmem:[%s24051_s3 + $0x2b8] ss:$28 sps:$4 sm:$0xff]   ;;  %v17840_v52 = vld [vmem:[%s24051_s3 + $0xf0] ss:$28 sps:$4 sm:$0xff]  }
 0x469   :  { %11049 = vmatprep.subr.bf16.mxu1 %v17789_v55  ;;  %v17844_v55 = vld [vmem:[%s24051_s3 + $0xf8] ss:$28 sps:$4 sm:$0xff]  }
 0x46b   :  { %10749 = vmatpush1.bf16.msra.mxu0 %v17784_v60  ;;  %v17847_v60 = vld [vmem:[%s24051_s3 + $0x12c] ss:$28 sps:$4 sm:$0xff]  }
 0x46c   :  { %11050 = vmatpush1.bf16.msra.mxu1 %v17787_v30  ;;  %10750 = vmatprep.subr.bf16.mxu0 %v17792_v61  ;;  %v17848_v30 = vld [vmem:[%s24051_s3 + $0x2f0] ss:$28 sps:$4 sm:$0xff]   ;;  %v17845_v61 = vld [vmem:[%s24051_s3 + $0x128] ss:$28 sps:$4 sm:$0xff]  }
 0x46d   :  { %11051 = vmatprep.subr.bf16.mxu1 %v17795_v35  ;;  %v17849_v35 = vld [vmem:[%s24051_s3 + $0x130] ss:$28 sps:$4 sm:$0xff]  }
 0x46f   :  { %10751 = vmatpush1.bf16.msra.mxu0 %v17790_v4  ;;  %v17852_v4 = vld [vmem:[%s24051_s3 + $0x164] ss:$28 sps:$4 sm:$0xff]  }
 0x470   :  { %11052 = vmatpush1.bf16.msra.mxu1 %v17793_v7  ;;  %10752 = vmatprep.subr.bf16.mxu0 %v17798_v9  ;;  %v17853_v7 = vld [vmem:[%s24051_s3 + $0x328] ss:$28 sps:$4 sm:$0xff]   ;;  %v17850_v9 = vld [vmem:[%s24051_s3 + $0x160] ss:$28 sps:$4 sm:$0xff]  }
 0x471   :  { %11053 = vmatprep.subr.bf16.mxu1 %v17801_v12  ;;  %v17854_v12 = vld [vmem:[%s24051_s3 + $0x168] ss:$28 sps:$4 sm:$0xff]  }
 0x473   :  { %10753 = vmatpush1.bf16.msra.mxu0 %v17796_v13  ;;  %v17857_v13 = vld [vmem:[%s24051_s3 + $0x19c] ss:$28 sps:$4 sm:$0xff]  }
 0x474   :  { %11054 = vmatpush1.bf16.msra.mxu1 %v17799_v14  ;;  %10754 = vmatprep.subr.bf16.mxu0 %v17804_v17  ;;  %v17858_v14 = vld [vmem:[%s24051_s3 + $0x360] ss:$28 sps:$4 sm:$0xff]   ;;  %v17855_v17 = vld [vmem:[%s24051_s3 + $0x198] ss:$28 sps:$4 sm:$0xff]  }
 0x475   :  { %11055 = vmatprep.subr.bf16.mxu1 %v17807_v18  ;;  %v17859_v18 = vld [vmem:[%s24051_s3 + $0x1a0] ss:$28 sps:$4 sm:$0xff]  }
 0x477   :  { %10755 = vmatpush1.bf16.msra.mxu0 %v17802_v19  ;;  %v17862_v19 = vld [vmem:[%s24051_s3 + $0x1d4] ss:$28 sps:$4 sm:$0xff]  }
 0x478   :  { %11056 = vmatpush1.bf16.msra.mxu1 %v17805_v20  ;;  %10756 = vmatprep.subr.bf16.mxu0 %v17810_v21  ;;  %v17863_v20 = vld [vmem:[%s24051_s3 + $0x558] ss:$28 sps:$4 sm:$0xff]   ;;  %v17860_v21 = vld [vmem:[%s24051_s3 + $0x1d0] ss:$28 sps:$4 sm:$0xff]  }
 0x479   :  { %11057 = vmatprep.subr.bf16.mxu1 %v17813_v23  ;;  %v17864_v23 = vld [vmem:[%s24051_s3 + $0x398] ss:$28 sps:$4 sm:$0xff]  }
 0x47b   :  { %10757 = vmatpush1.bf16.msra.mxu0 %v17808_v24  ;;  %v17867_v24 = vld [vmem:[%s24051_s3 + $0x20c] ss:$28 sps:$4 sm:$0xff]  }
 0x47c   :  { %11058 = vmatpush1.bf16.msra.mxu1 %v17811_v22  ;;  %10758 = vmatprep.subr.bf16.mxu0 %v17816_v47  ;;  %v17868_v22 = vld [vmem:[%s24051_s3 + $0x590] ss:$28 sps:$4 sm:$0xff]   ;;  %v17865_v47 = vld [vmem:[%s24051_s3 + $0x208] ss:$28 sps:$4 sm:$0xff]  }
 0x47d   :  { %11059 = vmatprep.subr.bf16.mxu1 %v17819_v25  ;;  %v17869_v25 = vld [vmem:[%s24051_s3 + $0x3d0] ss:$28 sps:$4 sm:$0xff]  }
 0x47f   :  { %10759 = vmatpush1.bf16.msra.mxu0 %v17814_v26  ;;  %v17872_v26 = vld [vmem:[%s24051_s3 + $0x244] ss:$28 sps:$4 sm:$0xff]  }
 0x480   :  { %11060 = vmatpush1.bf16.msra.mxu1 %v17817_v28  ;;  %11088 = vmatprep.subr.bf16.mxu0 %v17822_v29  ;;  %v17873_v28 = vld [vmem:[%s24051_s3 + $0x5c8] ss:$28 sps:$4 sm:$0xff]   ;;  %v17870_v29 = vld [vmem:[%s24051_s3 + $0x240] ss:$28 sps:$4 sm:$0xff]  }
 0x481   :  { %15574 = vmatprep.subr.bf16.mxu1 %v17823_v15  ;;  %v17874_v15 = vld [vmem:[%s24051_s3 + $0x408] ss:$28 sps:$4 sm:$0xff]  }
 0x482   :  { %10777 = vmatmul.mubr.bf16.vlgmr.msra.gmra.mrb[20].mxu0 %v21694_v54 }
 0x483   :  { %11078 = vmatmul.mubr.bf16.vlgmr.msra.gmra.mrb[20].mxu1 %v21694_v54  ;;  %11089 = vmatpush1.bf16.msra.mxu0 %v17820_v33  ;;  %v17877_v33 = vld [vmem:[%s24051_s3 + $0x27c] ss:$28 sps:$4 sm:$0xff]  }
 0x484   :  { %11120 = vmatprep.mubr.bf16.mxu0 %v20037_v57  ;;  %15575 = vmatpush3.bf16.msra.mxu1 %v17824_v36  ;;  %v17878_v36 = vld [vmem:[%s24051_s3 + $0x600] ss:$28 sps:$4 sm:$0xff]  }
 0x485   :  { %11421 = vmatprep.mubr.bf16.mxu1 %v20037_v57  ;;  %11090 = vmatprep.subr.bf16.mxu0 %v17827_v38  ;;  %v17837_v57 = vld [vmem:[%s24051_s3 + $0xbc] ss:$28 sps:$4 sm:$0xff]  }
 0x486   :  { %15576 = vmatprep.subr.bf16.mxu1 %v17828_v39  ;;  %v17875_v38 = vld [vmem:[%s24051_s3 + $0x278] ss:$28 sps:$4 sm:$0xff]   ;;  %v17879_v39 = vld [vmem:[%s24051_s3 + $0x440] ss:$28 sps:$4 sm:$0xff]  }
 0x487   :  { %11091 = vmatpush1.bf16.msra.mxu0 %v17825_v41  ;;  %v17882_v41 = vld [vmem:[%s24051_s3 + $0x2b4] ss:$28 sps:$4 sm:$0xff]  }
 0x488   :  { %15577 = vmatpush3.bf16.msra.mxu1 %v17829_v42  ;;  %11092 = vmatprep.subr.bf16.mxu0 %v17832_v43  ;;  %v17883_v42 = vld [vmem:[%s24051_s3 + $0x638] ss:$28 sps:$4 sm:$0xff]   ;;  %v17880_v43 = vld [vmem:[%s24051_s3 + $0x2b0] ss:$28 sps:$4 sm:$0xff]  }
 0x489   :  { %15578 = vmatprep.subr.bf16.mxu1 %v17833_v44  ;;  %v17884_v44 = vld [vmem:[%s24051_s3 + $0x478] ss:$28 sps:$4 sm:$0xff]  }
 0x48b   :  { %11093 = vmatpush1.bf16.msra.mxu0 %v17830_v37  ;;  %v17887_v37 = vld [vmem:[%s24051_s3 + $0x2ec] ss:$28 sps:$4 sm:$0xff]  }
 0x48c   :  { %15579 = vmatpush3.bf16.msra.mxu1 %v17834_v45  ;;  %11094 = vmatprep.subr.bf16.mxu0 %v17837_v57  ;;  %v17888_v45 = vld [vmem:[%s24051_s3 + $0x670] ss:$28 sps:$4 sm:$0xff]   ;;  %v17885_v57 = vld [vmem:[%s24051_s3 + $0x2e8] ss:$28 sps:$4 sm:$0xff]  }
 0x48d   :  { %15580 = vmatprep.subr.bf16.mxu1 %v17838_v46  ;;  %v17889_v46 = vld [vmem:[%s24051_s3 + $0x4b0] ss:$28 sps:$4 sm:$0xff]  }
 0x48f   :  { %11095 = vmatpush1.bf16.msra.mxu0 %v17835_v40  ;;  %v17892_v40 = vld [vmem:[%s24051_s3 + $0x324] ss:$28 sps:$4 sm:$0xff]  }
 0x490   :  { %15581 = vmatpush3.bf16.msra.mxu1 %v17839_v49  ;;  %11096 = vmatprep.subr.bf16.mxu0 %v17842_v50  ;;  %v17893_v49 = vld [vmem:[%s24051_s3 + $0x6a8] ss:$28 sps:$4 sm:$0xff]   ;;  %v17890_v50 = vld [vmem:[%s24051_s3 + $0x320] ss:$28 sps:$4 sm:$0xff]  }
 0x491   :  { %15582 = vmatprep.subr.bf16.mxu1 %v17843_v51  ;;  %v17894_v51 = vld [vmem:[%s24051_s3 + $0x4e8] ss:$28 sps:$4 sm:$0xff]  }
 0x493   :  { %11097 = vmatpush1.bf16.msra.mxu0 %v17840_v52  ;;  %v17897_v52 = vld [vmem:[%s24051_s3 + $0x35c] ss:$28 sps:$4 sm:$0xff]  }
 0x494   :  { %15583 = vmatpush3.bf16.msra.mxu1 %v17844_v55  ;;  %11098 = vmatprep.subr.bf16.mxu0 %v17847_v60  ;;  %v17898_v55 = vld [vmem:[%s24051_s3 + $0x6e0] ss:$28 sps:$4 sm:$0xff]   ;;  %v17895_v60 = vld [vmem:[%s24051_s3 + $0x358] ss:$28 sps:$4 sm:$0xff]  }
 0x495   :  { %15584 = vmatprep.subr.bf16.mxu1 %v17848_v30  ;;  %v17899_v30 = vld [vmem:[%s24051_s3 + $0x520] ss:$28 sps:$4 sm:$0xff]  }
 0x497   :  { %11099 = vmatpush1.bf16.msra.mxu0 %v17845_v61  ;;  %v17902_v61 = vld [vmem:[%s24051_s3 + $0x394] ss:$28 sps:$4 sm:$0xff]  }
 0x498   :  { %15585 = vmatpush3.bf16.msra.mxu1 %v17849_v35  ;;  %11100 = vmatprep.subr.bf16.mxu0 %v17852_v4  ;;  %v17903_v35 = vld [vmem:[%s24051_s3 + $0x8d8] ss:$28 sps:$4 sm:$0xff]   ;;  %v17900_v4 = vld [vmem:[%s24051_s3 + $0x390] ss:$28 sps:$4 sm:$0xff]  }
 0x499   :  { %15586 = vmatprep.subr.bf16.mxu1 %v17853_v7  ;;  %v17904_v7 = vld [vmem:[%s24051_s3 + $0x718] ss:$28 sps:$4 sm:$0xff]  }
 0x49b   :  { %11101 = vmatpush1.bf16.msra.mxu0 %v17850_v9  ;;  %v17907_v9 = vld [vmem:[%s24051_s3 + $0x3cc] ss:$28 sps:$4 sm:$0xff]  }
 0x49c   :  { %15587 = vmatpush3.bf16.msra.mxu1 %v17854_v12  ;;  %11102 = vmatprep.subr.bf16.mxu0 %v17857_v13  ;;  %v17908_v12 = vld [vmem:[%s24051_s3 + $0x910] ss:$28 sps:$4 sm:$0xff]   ;;  %v17905_v13 = vld [vmem:[%s24051_s3 + $0x3c8] ss:$28 sps:$4 sm:$0xff]  }
 0x49d   :  { %15588 = vmatprep.subr.bf16.mxu1 %v17858_v14  ;;  %v17909_v14 = vld [vmem:[%s24051_s3 + $0x750] ss:$28 sps:$4 sm:$0xff]  }
 0x49f   :  { %11103 = vmatpush1.bf16.msra.mxu0 %v17855_v17  ;;  %v17913_v17 = vld [vmem:[%s24051_s3 + $0x948] ss:$28 sps:$4 sm:$0xff]  }
 0x4a0   :  { %15589 = vmatpush3.bf16.msra.mxu1 %v17859_v18  ;;  %11104 = vmatprep.subr.bf16.mxu0 %v17862_v19  ;;  %v17914_v18 = vld [vmem:[%s24051_s3 + $0x788] ss:$28 sps:$4 sm:$0xff]   ;;  %v17917_v19 = vld [vmem:[%s24051_s3 + $0x43c] ss:$28 sps:$4 sm:$0xff]  }
 0x4a1   :  { %15596 = vmatprep.subr.bf16.mxu1 %v17863_v20  ;;  %v17918_v20 = vld [vmem:[%s24051_s3 + $0x980] ss:$28 sps:$4 sm:$0xff]  }
 0x4a3   :  { %11422 = vmatmul.mubr.bf16.vlgmr.msra.gmra.mrb[24].mxu1 %v20027_v53  ;;  %11105 = vmatpush1.bf16.msra.mxu0 %v17860_v21  ;;  %v17915_v21 = vld [vmem:[%s24051_s3 + $0x438] ss:$28 sps:$4 sm:$0xff]  }
 0x4a4   :  { %15597 = vmatpush3.bf16.msra.mxu1 %v17864_v23  ;;  %11462 = vmatprep.mubr.bf16.mxu1 %v20039_v58  ;;  %v17919_v23 = vld [vmem:[%s24051_s3 + $0x7c0] ss:$28 sps:$4 sm:$0xff]  }
 0x4a5   :  { %11106 = vmatprep.subr.bf16.mxu0 %v17867_v24  ;;  %15598 = vmatprep.subr.bf16.mxu1 %v17868_v22  ;;  %v17922_v24 = vld [vmem:[%s24051_s3 + $0x474] ss:$28 sps:$4 sm:$0xff]  }
 0x4a6   :  { %v17923_v22 = vld [vmem:[%s24051_s3 + $0x9b8] ss:$28 sps:$4 sm:$0xff]  }
 0x4a7   :  { %11107 = vmatpush1.bf16.msra.mxu0 %v17865_v47  ;;  %v17920_v47 = vld [vmem:[%s24051_s3 + $0x470] ss:$28 sps:$4 sm:$0xff]  }
 0x4a8   :  { %15599 = vmatpush3.bf16.msra.mxu1 %v17869_v25  ;;  %11108 = vmatprep.subr.bf16.mxu0 %v17872_v26  ;;  %v17924_v25 = vld [vmem:[%s24051_s3 + $0x7f8] ss:$28 sps:$4 sm:$0xff]   ;;  %v17927_v26 = vld [vmem:[%s24051_s3 + $0x4ac] ss:$28 sps:$4 sm:$0xff]  }
 0x4a9   :  { %15600 = vmatprep.subr.bf16.mxu1 %v17873_v28  ;;  %v17928_v28 = vld [vmem:[%s24051_s3 + $0x9f0] ss:$28 sps:$4 sm:$0xff]  }
 0x4ab   :  { %11109 = vmatpush1.bf16.msra.mxu0 %v17870_v29  ;;  %v17925_v29 = vld [vmem:[%s24051_s3 + $0x4a8] ss:$28 sps:$4 sm:$0xff]  }
 0x4ac   :  { %15601 = vmatpush3.bf16.msra.mxu1 %v17874_v15  ;;  %11110 = vmatprep.subr.bf16.mxu0 %v17877_v33  ;;  %v17929_v15 = vld [vmem:[%s24051_s3 + $0x830] ss:$28 sps:$4 sm:$0xff]   ;;  %v17932_v33 = vld [vmem:[%s24051_s3 + $0x4e4] ss:$28 sps:$4 sm:$0xff]  }
 0x4ad   :  { %15602 = vmatprep.subr.bf16.mxu1 %v17878_v36  ;;  %v17933_v36 = vld [vmem:[%s24051_s3 + $0xa28] ss:$28 sps:$4 sm:$0xff]  }
 0x4af   :  { %11111 = vmatpush1.bf16.msra.mxu0 %v17875_v38  ;;  %v17930_v38 = vld [vmem:[%s24051_s3 + $0x4e0] ss:$28 sps:$4 sm:$0xff]  }
 0x4b0   :  { %15603 = vmatpush3.bf16.msra.mxu1 %v17879_v39  ;;  %11112 = vmatprep.subr.bf16.mxu0 %v17882_v41  ;;  %v17934_v39 = vld [vmem:[%s24051_s3 + $0x868] ss:$28 sps:$4 sm:$0xff]   ;;  %v17937_v41 = vld [vmem:[%s24051_s3 + $0x51c] ss:$28 sps:$4 sm:$0xff]  }
 0x4b1   :  { %15604 = vmatprep.subr.bf16.mxu1 %v17883_v42  ;;  %v17938_v42 = vld [vmem:[%s24051_s3 + $0xa60] ss:$28 sps:$4 sm:$0xff]  }
 0x4b3   :  { %11113 = vmatpush1.bf16.msra.mxu0 %v17880_v43  ;;  %v17935_v43 = vld [vmem:[%s24051_s3 + $0x518] ss:$28 sps:$4 sm:$0xff]  }
 0x4b4   :  { %15605 = vmatpush3.bf16.msra.mxu1 %v17884_v44  ;;  %11114 = vmatprep.subr.bf16.mxu0 %v17887_v37  ;;  %v17939_v44 = vld [vmem:[%s24051_s3 + $0x8a0] ss:$28 sps:$4 sm:$0xff]   ;;  %v17942_v37 = vld [vmem:[%s24051_s3 + $0x554] ss:$28 sps:$4 sm:$0xff]  }
 0x4b5   :  { %15606 = vmatprep.subr.bf16.mxu1 %v17888_v45  ;;  %v17943_v45 = vld [vmem:[%s24051_s3 + $0xc58] ss:$28 sps:$4 sm:$0xff]  }
 0x4b7   :  { %11115 = vmatpush1.bf16.msra.mxu0 %v17885_v57  ;;  %v17940_v57 = vld [vmem:[%s24051_s3 + $0x550] ss:$28 sps:$4 sm:$0xff]  }
 0x4b8   :  { %15607 = vmatpush3.bf16.msra.mxu1 %v17889_v46  ;;  %11116 = vmatprep.subr.bf16.mxu0 %v17892_v40  ;;  %v17944_v46 = vld [vmem:[%s24051_s3 + $0xa98] ss:$28 sps:$4 sm:$0xff]   ;;  %v17947_v40 = vld [vmem:[%s24051_s3 + $0x58c] ss:$28 sps:$4 sm:$0xff]  }
 0x4b9   :  { %15608 = vmatprep.subr.bf16.mxu1 %v17893_v49  ;;  %v17948_v49 = vld [vmem:[%s24051_s3 + $0xc90] ss:$28 sps:$4 sm:$0xff]  }
 0x4bb   :  { %11117 = vmatpush1.bf16.msra.mxu0 %v17890_v50  ;;  %v17945_v50 = vld [vmem:[%s24051_s3 + $0x588] ss:$28 sps:$4 sm:$0xff]  }
 0x4bc   :  { %15609 = vmatpush3.bf16.msra.mxu1 %v17894_v51  ;;  %11118 = vmatprep.subr.bf16.mxu0 %v17897_v52  ;;  %v17949_v51 = vld [vmem:[%s24051_s3 + $0xad0] ss:$28 sps:$4 sm:$0xff]   ;;  %v17952_v52 = vld [vmem:[%s24051_s3 + $0x5c4] ss:$28 sps:$4 sm:$0xff]  }
 0x4bd   :  { %15610 = vmatprep.subr.bf16.mxu1 %v17898_v55  ;;  %v17950_v55 = vld [vmem:[%s24051_s3 + $0x5c0] ss:$28 sps:$4 sm:$0xff]  }
 0x4bf   :  { %11119 = vmatpush1.bf16.msra.mxu0 %v17895_v60  ;;  %v17953_v60 = vld [vmem:[%s24051_s3 + $0xcc8] ss:$28 sps:$4 sm:$0xff]  }
 0x4c0   :  { %15611 = vmatpush3.bf16.msra.mxu1 %v17899_v30  ;;  %11131 = vmatprep.subr.bf16.mxu0 %v17902_v61  ;;  %v17954_v30 = vld [vmem:[%s24051_s3 + $0xb08] ss:$28 sps:$4 sm:$0xff]   ;;  %v17957_v61 = vld [vmem:[%s24051_s3 + $0x5fc] ss:$28 sps:$4 sm:$0xff]  }
 0x4c1   :  { %15618 = vmatprep.subr.bf16.mxu1 %v17903_v35  ;;  %v17955_v35 = vld [vmem:[%s24051_s3 + $0x5f8] ss:$28 sps:$4 sm:$0xff]  }
 0x4c2   :  { %11121 = vmatmul.mubr.bf16.vlgmr.msra.gmra.mrb[24].mxu0 %v20027_v53  ;;  %v17912_v53 = vld [vmem:[%s24051_s3 + $0x404] ss:$28 sps:$4 sm:$0xff]  }
 0x4c3   :  { %11463 = vmatmul.mubr.bf16.vlgmr.msra.gmra.mrb[28].mxu1 %v20035_v56  ;;  %11132 = vmatpush1.bf16.msra.mxu0 %v17900_v4  ;;  %v17958_v4 = vld [vmem:[%s24051_s3 + $0xd00] ss:$28 sps:$4 sm:$0xff]  }
 0x4c4   :  { %11163 = vmatprep.mubr.bf16.mxu0 %v20039_v58  ;;  %15619 = vmatpush3.bf16.msra.mxu1 %v17904_v7  ;;  %v17910_v58 = vld [vmem:[%s24051_s3 + $0x400] ss:$28 sps:$4 sm:$0xff]  }
 0x4c5   :  { %11503 = vmatprep.mubr.bf16.mxu1 %v20770_v63  ;;  %11133 = vmatprep.subr.bf16.mxu0 %v17907_v9  ;;  %v17959_v7 = vld [vmem:[%s24051_s3 + $0xb40] ss:$28 sps:$4 sm:$0xff]   ;;  %v17962_v9 = vld [vmem:[%s24051_s3 + $0x634] ss:$28 sps:$4 sm:$0xff]  }
 0x4c6   :  { %15620 = vmatprep.subr.bf16.mxu1 %v17908_v12  ;;  %v17960_v12 = vld [vmem:[%s24051_s3 + $0x630] ss:$28 sps:$4 sm:$0xff]  }
 0x4c7   :  { %11134 = vmatpush1.bf16.msra.mxu0 %v17905_v13  ;;  %v17963_v13 = vld [vmem:[%s24051_s3 + $0xd38] ss:$28 sps:$4 sm:$0xff]  }
 0x4c8   :  { %15621 = vmatpush3.bf16.msra.mxu1 %v17909_v14  ;;  %11135 = vmatprep.subr.bf16.mxu0 %v17912_v53  ;;  %v17964_v14 = vld [vmem:[%s24051_s3 + $0xb78] ss:$28 sps:$4 sm:$0xff]   ;;  %v17967_v53 = vld [vmem:[%s24051_s3 + $0x66c] ss:$28 sps:$4 sm:$0xff]  }
 0x4c9   :  { %15622 = vmatprep.subr.bf16.mxu1 %v17913_v17  ;;  %v17965_v17 = vld [vmem:[%s24051_s3 + $0x668] ss:$28 sps:$4 sm:$0xff]  }
 0x4cb   :  { %11136 = vmatpush1.bf16.msra.mxu0 %v17910_v58  ;;  %v17968_v58 = vld [vmem:[%s24051_s3 + $0xd70] ss:$28 sps:$4 sm:$0xff]  }
 0x4cc   :  { %15623 = vmatpush3.bf16.msra.mxu1 %v17914_v18  ;;  %11137 = vmatprep.subr.bf16.mxu0 %v17917_v19  ;;  %v17969_v18 = vld [vmem:[%s24051_s3 + $0xbb0] ss:$28 sps:$4 sm:$0xff]   ;;  %v17972_v19 = vld [vmem:[%s24051_s3 + $0x6a4] ss:$28 sps:$4 sm:$0xff]  }
 0x4cd   :  { %15624 = vmatprep.subr.bf16.mxu1 %v17918_v20  ;;  %v17973_v20 = vld [vmem:[%s24051_s3 + $0xda8] ss:$28 sps:$4 sm:$0xff]  }
 0x4cf   :  { %11138 = vmatpush1.bf16.msra.mxu0 %v17915_v21  ;;  %v17970_v21 = vld [vmem:[%s24051_s3 + $0x6a0] ss:$28 sps:$4 sm:$0xff]  }
 0x4d0   :  { %15625 = vmatpush3.bf16.msra.mxu1 %v17919_v23  ;;  %11139 = vmatprep.subr.bf16.mxu0 %v17922_v24  ;;  %v17974_v23 = vld [vmem:[%s24051_s3 + $0xbe8] ss:$28 sps:$4 sm:$0xff]   ;;  %v17977_v24 = vld [vmem:[%s24051_s3 + $0x6dc] ss:$28 sps:$4 sm:$0xff]  }
 0x4d1   :  { %15626 = vmatprep.subr.bf16.mxu1 %v17923_v22  ;;  %v17978_v22 = vld [vmem:[%s24051_s3 + $0xde0] ss:$28 sps:$4 sm:$0xff]  }
 0x4d3   :  { %11140 = vmatpush1.bf16.msra.mxu0 %v17920_v47  ;;  %v17975_v47 = vld [vmem:[%s24051_s3 + $0x6d8] ss:$28 sps:$4 sm:$0xff]  }
 0x4d4   :  { %15627 = vmatpush3.bf16.msra.mxu1 %v17924_v25  ;;  %11141 = vmatprep.subr.bf16.mxu0 %v17927_v26  ;;  %v17979_v25 = vld [vmem:[%s24051_s3 + $0xc20] ss:$28 sps:$4 sm:$0xff]   ;;  %v17982_v26 = vld [vmem:[%s24051_s3 + $0x714] ss:$28 sps:$4 sm:$0xff]  }
 0x4d5   :  { %15628 = vmatprep.subr.bf16.mxu1 %v17928_v28  ;;  %v17980_v28 = vld [vmem:[%s24051_s3 + $0x710] ss:$28 sps:$4 sm:$0xff]  }
 0x4d7   :  { %11142 = vmatpush1.bf16.msra.mxu0 %v17925_v29  ;;  %v17983_v29 = vld [vmem:[%s24051_s3 + $0xfd8] ss:$28 sps:$4 sm:$0xff]  }
 0x4d8   :  { %15629 = vmatpush3.bf16.msra.mxu1 %v17929_v15  ;;  %11143 = vmatprep.subr.bf16.mxu0 %v17932_v33  ;;  %v17984_v15 = vld [vmem:[%s24051_s3 + $0xe18] ss:$28 sps:$4 sm:$0xff]   ;;  %v17987_v33 = vld [vmem:[%s24051_s3 + $0x74c] ss:$28 sps:$4 sm:$0xff]  }
 0x4d9   :  { %15630 = vmatprep.subr.bf16.mxu1 %v17933_v36  ;;  %v17988_v36 = vld [vmem:[%s24051_s3 + $0x1010] ss:$28 sps:$4 sm:$0xff]  }
 0x4db   :  { %11144 = vmatpush1.bf16.msra.mxu0 %v17930_v38  ;;  %v17985_v38 = vld [vmem:[%s24051_s3 + $0x748] ss:$28 sps:$4 sm:$0xff]  }
 0x4dc   :  { %15631 = vmatpush3.bf16.msra.mxu1 %v17934_v39  ;;  %11145 = vmatprep.subr.bf16.mxu0 %v17937_v41  ;;  %v17989_v39 = vld [vmem:[%s24051_s3 + $0xe50] ss:$28 sps:$4 sm:$0xff]   ;;  %v17990_v41 = vld [vmem:[%s24051_s3 + $0x780] ss:$28 sps:$4 sm:$0xff]  }
 0x4dd   :  { %15632 = vmatprep.subr.bf16.mxu1 %v17938_v42  ;;  %v17994_v42 = vld [vmem:[%s24051_s3 + $0xe88] ss:$28 sps:$4 sm:$0xff]  }
 0x4df   :  { %11146 = vmatpush1.bf16.msra.mxu0 %v17935_v43  ;;  %v17997_v43 = vld [vmem:[%s24051_s3 + $0x7bc] ss:$28 sps:$4 sm:$0xff]  }
 0x4e0   :  { %15633 = vmatpush3.bf16.msra.mxu1 %v17939_v44  ;;  %11147 = vmatprep.subr.bf16.mxu0 %v17942_v37  ;;  %v17995_v44 = vld [vmem:[%s24051_s3 + $0x7b8] ss:$28 sps:$4 sm:$0xff]   ;;  %v17998_v37 = vld [vmem:[%s24051_s3 + $0x1080] ss:$28 sps:$4 sm:$0xff]  }
 0x4e1   :  { %15640 = vmatprep.subr.bf16.mxu1 %v17943_v45  ;;  %v17999_v45 = vld [vmem:[%s24051_s3 + $0xec0] ss:$28 sps:$4 sm:$0xff]  }
 0x4e3   :  { %11504 = vmatmul.mubr.bf16.vlgmr.msra.gmra.mrb[32].mxu1 %v20760_v59  ;;  %11148 = vmatpush1.bf16.msra.mxu0 %v17940_v57  ;;  %v18002_v57 = vld [vmem:[%s24051_s3 + $0x7f4] ss:$28 sps:$4 sm:$0xff]  }
 0x4e4   :  { %15641 = vmatpush3.bf16.msra.mxu1 %v17944_v46  ;;  %11544 = vmatprep.mubr.bf16.mxu1 %v20778_v8  ;;  %v18000_v46 = vld [vmem:[%s24051_s3 + $0x7f0] ss:$28 sps:$4 sm:$0xff]  }
 0x4e5   :  { %11149 = vmatprep.subr.bf16.mxu0 %v17947_v40  ;;  %15642 = vmatprep.subr.bf16.mxu1 %v17948_v49  ;;  %v18003_v40 = vld [vmem:[%s24051_s3 + $0x10b8] ss:$28 sps:$4 sm:$0xff]  }
 0x4e6   :  { %v18004_v49 = vld [vmem:[%s24051_s3 + $0xef8] ss:$28 sps:$4 sm:$0xff]  }
 0x4e7   :  { %11150 = vmatpush1.bf16.msra.mxu0 %v17945_v50  ;;  %v18007_v50 = vld [vmem:[%s24051_s3 + $0x82c] ss:$28 sps:$4 sm:$0xff]  }
 0x4e8   :  { %15643 = vmatpush3.bf16.msra.mxu1 %v17949_v51  ;;  %11151 = vmatprep.subr.bf16.mxu0 %v17952_v52  ;;  %v18005_v51 = vld [vmem:[%s24051_s3 + $0x828] ss:$28 sps:$4 sm:$0xff]   ;;  %v18008_v52 = vld [vmem:[%s24051_s3 + $0x10f0] ss:$28 sps:$4 sm:$0xff]  }
 0x4e9   :  { %15644 = vmatprep.subr.bf16.mxu1 %v17953_v60  ;;  %v18012_v60 = vld [vmem:[%s24051_s3 + $0x864] ss:$28 sps:$4 sm:$0xff]  }
 0x4eb   :  { %11152 = vmatpush1.bf16.msra.mxu0 %v17950_v55  ;;  %v18009_v55 = vld [vmem:[%s24051_s3 + $0xf30] ss:$28 sps:$4 sm:$0xff]  }
 0x4ec   :  { %15645 = vmatpush3.bf16.msra.mxu1 %v17954_v30  ;;  %11153 = vmatprep.subr.bf16.mxu0 %v17957_v61  ;;  %v18013_v30 = vld [vmem:[%s24051_s3 + $0x1128] ss:$28 sps:$4 sm:$0xff]   ;;  %v18010_v61 = vld [vmem:[%s24051_s3 + $0x860] ss:$28 sps:$4 sm:$0xff]  }
 0x4ed   :  { %15646 = vmatprep.subr.bf16.mxu1 %v17958_v4  ;;  %v18017_v4 = vld [vmem:[%s24051_s3 + $0x89c] ss:$28 sps:$4 sm:$0xff]  }
 0x4ef   :  { %11154 = vmatpush1.bf16.msra.mxu0 %v17955_v35  ;;  %v18014_v35 = vld [vmem:[%s24051_s3 + $0xf68] ss:$28 sps:$4 sm:$0xff]  }
 0x4f0   :  { %15647 = vmatpush3.bf16.msra.mxu1 %v17959_v7  ;;  %11155 = vmatprep.subr.bf16.mxu0 %v17962_v9  ;;  %v18018_v7 = vld [vmem:[%s24051_s3 + $0x1160] ss:$28 sps:$4 sm:$0xff]   ;;  %v18015_v9 = vld [vmem:[%s24051_s3 + $0x898] ss:$28 sps:$4 sm:$0xff]  }
 0x4f1   :  { %15648 = vmatprep.subr.bf16.mxu1 %v17963_v13  ;;  %v18022_v13 = vld [vmem:[%s24051_s3 + $0x8d4] ss:$28 sps:$4 sm:$0xff]  }
 0x4f3   :  { %11156 = vmatpush1.bf16.msra.mxu0 %v17960_v12  ;;  %v18019_v12 = vld [vmem:[%s24051_s3 + $0xfa0] ss:$28 sps:$4 sm:$0xff]  }
 0x4f4   :  { %15649 = vmatpush3.bf16.msra.mxu1 %v17964_v14  ;;  %11157 = vmatprep.subr.bf16.mxu0 %v17967_v53  ;;  %v18020_v14 = vld [vmem:[%s24051_s3 + $0x8d0] ss:$28 sps:$4 sm:$0xff]   ;;  %v18023_v53 = vld [vmem:[%s24051_s3 + $0x1358] ss:$28 sps:$4 sm:$0xff]  }
 0x4f5   :  { %15650 = vmatprep.subr.bf16.mxu1 %v17968_v58  ;;  %v18027_v58 = vld [vmem:[%s24051_s3 + $0x90c] ss:$28 sps:$4 sm:$0xff]  }
 0x4f7   :  { %11158 = vmatpush1.bf16.msra.mxu0 %v17965_v17  ;;  %v18024_v17 = vld [vmem:[%s24051_s3 + $0x1198] ss:$28 sps:$4 sm:$0xff]  }
 0x4f8   :  { %15651 = vmatpush3.bf16.msra.mxu1 %v17969_v18  ;;  %11159 = vmatprep.subr.bf16.mxu0 %v17972_v19  ;;  %v18028_v18 = vld [vmem:[%s24051_s3 + $0x1390] ss:$28 sps:$4 sm:$0xff]   ;;  %v18025_v19 = vld [vmem:[%s24051_s3 + $0x908] ss:$28 sps:$4 sm:$0xff]  }
 0x4f9   :  { %15652 = vmatprep.subr.bf16.mxu1 %v17973_v20  ;;  %v18029_v20 = vld [vmem:[%s24051_s3 + $0x11d0] ss:$28 sps:$4 sm:$0xff]  }
 0x4fb   :  { %11160 = vmatpush1.bf16.msra.mxu0 %v17970_v21  ;;  %v18032_v21 = vld [vmem:[%s24051_s3 + $0x944] ss:$28 sps:$4 sm:$0xff]  }
 0x4fc   :  { %15653 = vmatpush3.bf16.msra.mxu1 %v17974_v23  ;;  %11161 = vmatprep.subr.bf16.mxu0 %v17977_v24  ;;  %v18030_v23 = vld [vmem:[%s24051_s3 + $0x940] ss:$28 sps:$4 sm:$0xff]   ;;  %v18033_v24 = vld [vmem:[%s24051_s3 + $0x13c8] ss:$28 sps:$4 sm:$0xff]  }
 0x4fd   :  { %15654 = vmatprep.subr.bf16.mxu1 %v17978_v22  ;;  %v18034_v22 = vld [vmem:[%s24051_s3 + $0x1208] ss:$28 sps:$4 sm:$0xff]  }
 0x4ff   :  { %11162 = vmatpush1.bf16.msra.mxu0 %v17975_v47  ;;  %v18037_v47 = vld [vmem:[%s24051_s3 + $0x97c] ss:$28 sps:$4 sm:$0xff]  }
 0x500   :  { %15655 = vmatpush3.bf16.msra.mxu1 %v17979_v25  ;;  %11174 = vmatprep.subr.bf16.mxu0 %v17982_v26  ;;  %v18035_v25 = vld [vmem:[%s24051_s3 + $0x978] ss:$28 sps:$4 sm:$0xff]   ;;  %v18038_v26 = vld [vmem:[%s24051_s3 + $0x1400] ss:$28 sps:$4 sm:$0xff]  }
 0x501   :  { %15662 = vmatprep.subr.bf16.mxu1 %v17983_v29  ;;  %v18042_v29 = vld [vmem:[%s24051_s3 + $0x9b4] ss:$28 sps:$4 sm:$0xff]  }
 0x502   :  { %11164 = vmatmul.mubr.bf16.vlgmr.msra.gmra.mrb[24].mxu0 %v20035_v56  ;;  %v17992_v56 = vld [vmem:[%s24051_s3 + $0x784] ss:$28 sps:$4 sm:$0xff]  }
 0x503   :  { %11545 = vmatmul.mubr.bf16.vlgmr.msra.gmra.mrb[36].mxu1 %v20768_v62  ;;  %11175 = vmatpush1.bf16.msra.mxu0 %v17980_v28  ;;  %v18039_v28 = vld [vmem:[%s24051_s3 + $0x1240] ss:$28 sps:$4 sm:$0xff]  }
 0x504   :  { %11206 = vmatprep.mubr.bf16.mxu0 %v20770_v63  ;;  %15663 = vmatpush3.bf16.msra.mxu1 %v17984_v15  ;;  %v17993_v63 = vld [vmem:[%s24051_s3 + $0x1048] ss:$28 sps:$4 sm:$0xff]   ;;  %v18040_v15 = vld [vmem:[%s24051_s3 + $0x9b0] ss:$28 sps:$4 sm:$0xff]  }
 0x505   :  { %11585 = vmatprep.mubr.bf16.mxu1 %v21474_v32  ;;  %11176 = vmatprep.subr.bf16.mxu0 %v17987_v33  ;;  %v18043_v33 = vld [vmem:[%s24051_s3 + $0x1438] ss:$28 sps:$4 sm:$0xff]  }
 0x506   :  { %15664 = vmatprep.subr.bf16.mxu1 %v17988_v36  ;;  %v18044_v36 = vld [vmem:[%s24051_s3 + $0x1278] ss:$28 sps:$4 sm:$0xff]  }
 0x507   :  { %11177 = vmatpush1.bf16.msra.mxu0 %v17985_v38  ;;  %v18047_v38 = vld [vmem:[%s24051_s3 + $0x9ec] ss:$28 sps:$4 sm:$0xff]  }
 0x508   :  { %15665 = vmatpush3.bf16.msra.mxu1 %v17989_v39  ;;  %11178 = vmatprep.subr.bf16.mxu0 %v17992_v56  ;;  %v18045_v39 = vld [vmem:[%s24051_s3 + $0x9e8] ss:$28 sps:$4 sm:$0xff]   ;;  %v18048_v56 = vld [vmem:[%s24051_s3 + $0x1470] ss:$28 sps:$4 sm:$0xff]  }
 0x509   :  { %15666 = vmatprep.subr.bf16.mxu1 %v17993_v63  ;;  %v18052_v63 = vld [vmem:[%s24051_s3 + $0xa24] ss:$28 sps:$4 sm:$0xff]  }
 0x50b   :  { %11179 = vmatpush1.bf16.msra.mxu0 %v17990_v41  ;;  %v18049_v41 = vld [vmem:[%s24051_s3 + $0x12b0] ss:$28 sps:$4 sm:$0xff]  }
 0x50c   :  { %15667 = vmatpush3.bf16.msra.mxu1 %v17994_v42  ;;  %11180 = vmatprep.subr.bf16.mxu0 %v17997_v43  ;;  %v18053_v42 = vld [vmem:[%s24051_s3 + $0x14a8] ss:$28 sps:$4 sm:$0xff]   ;;  %v18050_v43 = vld [vmem:[%s24051_s3 + $0xa20] ss:$28 sps:$4 sm:$0xff]  }
 0x50d   :  { %15668 = vmatprep.subr.bf16.mxu1 %v17998_v37  ;;  %v18057_v37 = vld [vmem:[%s24051_s3 + $0xa5c] ss:$28 sps:$4 sm:$0xff]  }
 0x50f   :  { %11181 = vmatpush1.bf16.msra.mxu0 %v17995_v44  ;;  %v18054_v44 = vld [vmem:[%s24051_s3 + $0x12e8] ss:$28 sps:$4 sm:$0xff]  }
 0x510   :  { %15669 = vmatpush3.bf16.msra.mxu1 %v17999_v45  ;;  %11182 = vmatprep.subr.bf16.mxu0 %v18002_v57  ;;  %v18058_v45 = vld [vmem:[%s24051_s3 + $0x14e0] ss:$28 sps:$4 sm:$0xff]   ;;  %v18055_v57 = vld [vmem:[%s24051_s3 + $0xa58] ss:$28 sps:$4 sm:$0xff]  }
 0x511   :  { %15670 = vmatprep.subr.bf16.mxu1 %v18003_v40  ;;  %v18062_v40 = vld [vmem:[%s24051_s3 + $0xa94] ss:$28 sps:$4 sm:$0xff]  }
 0x513   :  { %11183 = vmatpush1.bf16.msra.mxu0 %v18000_v46  ;;  %v18059_v46 = vld [vmem:[%s24051_s3 + $0x1320] ss:$28 sps:$4 sm:$0xff]  }
 0x514   :  { %15671 = vmatpush3.bf16.msra.mxu1 %v18004_v49  ;;  %11184 = vmatprep.subr.bf16.mxu0 %v18007_v50  ;;  %v18060_v49 = vld [vmem:[%s24051_s3 + $0xa90] ss:$28 sps:$4 sm:$0xff]   ;;  %v18063_v50 = vld [vmem:[%s24051_s3 + $0x1518] ss:$28 sps:$4 sm:$0xff]  }
 0x515   :  { %15672 = vmatprep.subr.bf16.mxu1 %v18008_v52  ;;  %v18064_v52 = vld [vmem:[%s24051_s3 + $0xac8] ss:$28 sps:$4 sm:$0xff]  }
 0x517   :  { %11185 = vmatpush1.bf16.msra.mxu0 %v18005_v51  ;;  %v18066_v51 = vld [vmem:[%s24051_s3 + $0xacc] ss:$28 sps:$4 sm:$0xff]  }
 0x518   :  { %15673 = vmatpush3.bf16.msra.mxu1 %v18009_v55  ;;  %11186 = vmatprep.subr.bf16.mxu0 %v18012_v60  ;;  %v18067_v55 = vld [vmem:[%s24051_s3 + $0x1550] ss:$28 sps:$4 sm:$0xff]   ;;  %v18070_v60 = vld [vmem:[%s24051_s3 + $0xb04] ss:$28 sps:$4 sm:$0xff]  }
 0x519   :  { %15674 = vmatprep.subr.bf16.mxu1 %v18013_v30  ;;  %v18074_v30 = vld [vmem:[%s24051_s3 + $0xb3c] ss:$28 sps:$4 sm:$0xff]  }
 0x51b   :  { %11187 = vmatpush1.bf16.msra.mxu0 %v18010_v61  ;;  %v18072_v61 = vld [vmem:[%s24051_s3 + $0xb38] ss:$28 sps:$4 sm:$0xff]  }
 0x51c   :  { %15675 = vmatpush3.bf16.msra.mxu1 %v18014_v35  ;;  %11188 = vmatprep.subr.bf16.mxu0 %v18017_v4  ;;  %v18075_v35 = vld [vmem:[%s24051_s3 + $0x15c0] ss:$28 sps:$4 sm:$0xff]   ;;  %v18078_v4 = vld [vmem:[%s24051_s3 + $0xb74] ss:$28 sps:$4 sm:$0xff]  }
 0x51d   :  { %15676 = vmatprep.subr.bf16.mxu1 %v18018_v7  ;;  %v18076_v7 = vld [vmem:[%s24051_s3 + $0xb70] ss:$28 sps:$4 sm:$0xff]  }
 0x51f   :  { %11189 = vmatpush1.bf16.msra.mxu0 %v18015_v9  ;;  %v22917_v9 = vld [vmem:[%s24053_s4] sm:$0xff] }
 0x520   :  { %15677 = vmatpush3.bf16.msra.mxu1 %v18019_v12  ;;  %11190 = vmatprep.subr.bf16.mxu0 %v18022_v13  ;;  %v18079_v12 = vld [vmem:[%s24051_s3 + $0x15f8] ss:$28 sps:$4 sm:$0xff]   ;;  %v18082_v13 = vld [vmem:[%s24051_s3 + $0xbac] ss:$28 sps:$4 sm:$0xff]  }
 0x521   :  { %15684 = vmatprep.subr.bf16.mxu1 %v18023_v53  ;;  %v6718_v53 = vrot.slane %v22917_v9, %v19970_v6 }
 0x523   :  { %11586 = vmatmul.mubr.bf16.vlgmr.msra.gmra.mrb[40].mxu1 %v21464_v27  ;;  %11191 = vmatpush1.bf16.msra.mxu0 %v18020_v14  ;;  %v6710_v14 = vrot.slane %v22917_v9, %v19967_v5 }
 0x524   :  { %15685 = vmatpush3.bf16.msra.mxu1 %v18024_v17  ;;  %11626 = vmatprep.mubr.bf16.mxu1 %v21482_v34  ;;  %v6714_v17 = vrot.slane %v22917_v9, %v19982_v10 }
 0x525   :  { %11192 = vmatprep.subr.bf16.mxu0 %v18027_v58  ;;  %15686 = vmatprep.subr.bf16.mxu1 %v18028_v18  ;;  %v18080_v58 = vld [vmem:[%s24051_s3 + $0xba8] ss:$28 sps:$4 sm:$0xff]   ;;  %v6722_v18 = vrot.slane %v22917_v9, %v19985_v11  ;;  %v18084_v11 = vld [vmem:[%s24051_s3 + $0xbe0] ss:$28 sps:$4 sm:$0xff]  }
 0x527   :  { %11193 = vmatpush1.bf16.msra.mxu0 %v18025_v19  ;;  %v18083_v19 = vld [vmem:[%s24051_s3 + $0x1630] ss:$28 sps:$4 sm:$0xff]  }
 0x528   :  { %15687 = vmatpush3.bf16.msra.mxu1 %v18029_v20  ;;  %11194 = vmatprep.subr.bf16.mxu0 %v18032_v21  ;;  %v18086_v20 = vld [vmem:[%s24051_s3 + $0xbe4] ss:$28 sps:$4 sm:$0xff]  }
 0x529   :  { %15688 = vmatprep.subr.bf16.mxu1 %v18033_v24 }
 0x52b   :  { %11195 = vmatpush1.bf16.msra.mxu0 %v18030_v23 }
 0x52c   :  { %15689 = vmatpush3.bf16.msra.mxu1 %v18034_v22  ;;  %11196 = vmatprep.subr.bf16.mxu0 %v18037_v47 }
 0x52d   :  { %15690 = vmatprep.subr.bf16.mxu1 %v18038_v26 }
 0x52f   :  { %11197 = vmatpush1.bf16.msra.mxu0 %v18035_v25 }
 0x530   :  { %15691 = vmatpush3.bf16.msra.mxu1 %v18039_v28  ;;  %11198 = vmatprep.subr.bf16.mxu0 %v18042_v29 }
 0x531   :  { %15692 = vmatprep.subr.bf16.mxu1 %v18043_v33 }
 0x533   :  { %11199 = vmatpush1.bf16.msra.mxu0 %v18040_v15 }
 0x534   :  { %15693 = vmatpush3.bf16.msra.mxu1 %v18044_v36  ;;  %11200 = vmatprep.subr.bf16.mxu0 %v18047_v38  ;;  %v18087_v38 = vld [vmem:[%s24051_s3 + $0x1668] ss:$28 sps:$4 sm:$0xff]  }
 0x535   :  { %15694 = vmatprep.subr.bf16.mxu1 %v18048_v56 }
 0x537   :  { %11201 = vmatpush1.bf16.msra.mxu0 %v18045_v39  ;;  %v18090_v39 = vld [vmem:[%s24051_s3 + $0xc1c] ss:$28 sps:$4 sm:$0xff]  }
 0x538   :  { %15695 = vmatpush3.bf16.msra.mxu1 %v18049_v41  ;;  %11202 = vmatprep.subr.bf16.mxu0 %v18052_v63 }
 0x539   :  { %15696 = vmatprep.subr.bf16.mxu1 %v18053_v42 }
 0x53b   :  { %11203 = vmatpush1.bf16.msra.mxu0 %v18050_v43 }
 0x53c   :  { %15697 = vmatpush3.bf16.msra.mxu1 %v18054_v44  ;;  %11204 = vmatprep.subr.bf16.mxu0 %v18057_v37 }
 0x53d   :  { %15698 = vmatprep.subr.bf16.mxu1 %v18058_v45 }
 0x53f   :  { %11205 = vmatpush1.bf16.msra.mxu0 %v18055_v57 }
 0x540   :  { %15699 = vmatpush3.bf16.msra.mxu1 %v18059_v46  ;;  %11217 = vmatprep.subr.bf16.mxu0 %v18062_v40  ;;  %v18088_v40 = vld [vmem:[%s24051_s3 + $0xc18] ss:$28 sps:$4 sm:$0xff]  }
 0x541   :  { %15863 = vmatprep.subr.bf16.mxu1 %v18547_v48 }
 0x542   :  { %11207 = vmatmul.mubr.bf16.vlgmr.msra.gmra.mrb[24].mxu0 %v20760_v59  ;;  %v18068_v59 = vld [vmem:[%s24051_s3 + $0xb00] ss:$28 sps:$4 sm:$0xff]  }
 0x543   :  { %11627 = vmatmul.mubr.bf16.vlgmr.msra.gmra.mrb[44].mxu1 %v21472_v31  ;;  %11218 = vmatpush1.bf16.msra.mxu0 %v18060_v49 }
 0x544   :  { %11249 = vmatprep.mubr.bf16.mxu0 %v20778_v8  ;;  %15864 = vmatpush3.bf16.msra.mxu1 %v18063_v50  ;;  %v18071_v8 = vld [vmem:[%s24051_s3 + $0x1588] ss:$28 sps:$4 sm:$0xff]  }
 0x545   :  { %11219 = vmatprep.subr.bf16.mxu0 %v18066_v51  ;;  %15865 = vmatprep.subr.bf16.mxu1 %v18547_v48 }
 0x546   :  { %15879 = vmatprep.mubr.msk.bf16.mxu1 %vm18548_vm0, %v18547_v48 }
 0x547   :  { %11220 = vmatpush1.bf16.msra.mxu0 %v18064_v52  ;;  %v18091_v52 = vld [vmem:[%s24051_s3 + $0x16a0] ss:$28 sps:$4 sm:$0xff]  }
 0x548   :  { %15866 = vmatpush3.bf16.msra.mxu1 %v18067_v55  ;;  %11221 = vmatprep.subr.bf16.mxu0 %v18070_v60  ;;  %v18094_v55 = vld [vmem:[%s24051_s3 + $0xc54] ss:$28 sps:$4 sm:$0xff]  }
 0x549   :  { %15867 = vmatprep.subr.bf16.mxu1 %v18547_v48 }
 0x54b   :  { %11222 = vmatpush1.bf16.msra.mxu0 %v18068_v59 }
 0x54c   :  { %15868 = vmatpush3.bf16.msra.mxu1 %v18071_v8  ;;  %11223 = vmatprep.subr.bf16.mxu0 %v18074_v30  ;;  %v18097_v8 = vld [vmem:[%s24052_s5 + $0x4] ss:$12 sps:$4 sm:$0xff]  }
 0x54d   :  { %15869 = vmatprep.subr.bf16.mxu1 %v18547_v48 }
 0x54f   :  { %11224 = vmatpush1.bf16.msra.mxu0 %v18072_v61  ;;  %v18092_v61 = vld [vmem:[%s24051_s3 + $0xc50] ss:$28 sps:$4 sm:$0xff]  }
 0x550   :  { %15870 = vmatpush3.bf16.msra.mxu1 %v18075_v35  ;;  %11225 = vmatprep.subr.bf16.mxu0 %v18078_v4  ;;  %v18095_v35 = vld [vmem:[%s24052_s5] ss:$12 sps:$4 sm:$0xff]  }
 0x551   :  { %15871 = vmatprep.subr.bf16.mxu1 %v18547_v48  ;;  %v18100_v4 = vld [vmem:[%s24051_s3 + $0xc8c] ss:$28 sps:$4 sm:$0xff]  }
 0x553   :  { %11226 = vmatpush1.bf16.msra.mxu0 %v18076_v7  ;;  %v18103_v7 = vld [vmem:[%s24052_s5 + $0x1c] ss:$12 sps:$4 sm:$0xff]  }
 0x554   :  { %15872 = vmatpush3.bf16.msra.mxu1 %v18079_v12  ;;  %11227 = vmatprep.subr.bf16.mxu0 %v18082_v13  ;;  %v18098_v12 = vld [vmem:[%s24051_s3 + $0xc88] ss:$28 sps:$4 sm:$0xff]  }
 0x555   :  { %v10778_v21 = vpop.f32.mrb[20].mxu0  ;;  %15873 = vmatprep.subr.bf16.mxu1 %v18547_v48  ;;  %v18101_v13 = vld [vmem:[%s24052_s5 + $0x18] ss:$12 sps:$4 sm:$0xff]  }
 0x556   :  { %v15947_v23 = vadd.f32 %v10778_v21, %v6710_v14  ;;  %v11079_v24 = vpop.f32.mrb[20].mxu1  ;;  %v10780_v22 = vpop.f32.mrb[21].mxu0  ;;  %v18113_v21 = vld [vmem:[%s24052_s5 + $0x48] ss:$12 sps:$4 sm:$0xff]  }
 0x557   :  { %v15951_v47 = vadd.f32 %v11079_v24, %v6718_v53  ;;  %v15948_v25 = vadd.f32 %v10780_v22, %v6714_v17  ;;  %v11081_v26 = vpop.f32.mrb[21].mxu1  ;;  %v10782_v28 = vpop.f32.mrb[22].mxu0  ;;  %11228 = vmatpush1.bf16.msra.mxu0 %v18080_v58  ;;  %v18107_v58 = vld [vmem:[%s24052_s5 + $0x30] ss:$12 sps:$4 sm:$0xff]  }
 0x558   :  { %v15952_v29 = vadd.f32 %v11081_v26, %v6722_v18  ;;  %v15949_v15 = vadd.f32 %v10782_v28, %v6710_v14  ;;  %v11083_v33 = vpop.f32.mrb[22].mxu1  ;;  %15874 = vmatpush3.bf16.msra.mxu1 %v18083_v19  ;;  %v10784_v36 = vpop.f32.mrb[23].mxu0  ;;  %11229 = vmatprep.subr.bf16.mxu0 %v18086_v20  ;;  %v11676_v42 = vmax.f32 %v15947_v23, 0.0  ;;  %v18106_v14 = vld [vmem:[%s24051_s3 + $0xcc4] ss:$28 sps:$4 sm:$0xff]  }
 0x559   :  { %v15953_v56 = vadd.f32 %v11083_v33, %v6718_v53  ;;  %v15950_v41 = vadd.f32 %v10784_v36, %v6714_v17  ;;  %v11085_v63 = vpop.f32.mrb[23].mxu1  ;;  %15875 = vmatprep.subr.bf16.mxu1 %v18547_v48  ;;  %v11678_v37 = vmax.f32 %v15951_v47, 0.0  ;;  %v11677_v45 = vmax.f32 %v15948_v25, 0.0  ;;  %v18109_v53 = vld [vmem:[%s24052_s5 + $0x34] ss:$12 sps:$4 sm:$0xff]  }
 0x55a   :  { %v11683_v43 = vmax.f32 %v15949_v15, 0.0  ;;  %v15954_v44 = vadd.f32 %v11085_v63, %v6722_v18  ;;  %v11679_v49 = vmax.f32 %v15952_v29, 0.0  ;;  %v18104_v17 = vld [vmem:[%s24051_s3 + $0xcc0] ss:$28 sps:$4 sm:$0xff]   ;;  %v18115_v19 = vld [vmem:[%s24052_s5 + $0x4c] ss:$12 sps:$4 sm:$0xff]  }
 0x55b   :  { %v11685_v57 = vmax.f32 %v15953_v56, 0.0  ;;  %v11684_v46 = vmax.f32 %v15950_v41, 0.0  ;;  %11230 = vmatpush1.bf16.msra.mxu0 %v18084_v11  ;;  %v18112_v18 = vld [vmem:[%s24051_s3 + $0xcfc] ss:$28 sps:$4 sm:$0xff]   ;;  %v18118_v23 = vld [vmem:[%s24051_s3 + $0xd34] ss:$28 sps:$4 sm:$0xff]  }
 0x55c   :  { %v22957_v50 = vpack.c.bf16 %v11683_v43, %v11676_v42  ;;  %v11686_v51 = vmax.f32 %v15954_v44, 0.0  ;;  %15876 = vmatpush3.bf16.msra.mxu1 %v18087_v38  ;;  %11231 = vmatprep.subr.bf16.mxu0 %v18090_v39  ;;  %v18110_v20 = vld [vmem:[%s24051_s3 + $0xcf8] ss:$28 sps:$4 sm:$0xff]   ;;  %v18121_v24 = vld [vmem:[%s24052_s5 + $0x64] ss:$12 sps:$4 sm:$0xff]  }
 0x55d   :  { %v22965_v60 = vpack.c.bf16 %v11685_v57, %v11678_v37  ;;  %v22967_v59 = vpack.c.bf16 %v11684_v46, %v11677_v45  ;;  %15877 = vmatprep.subr.bf16.mxu1 %v18547_v48  ;;  %v18116_v22 = vld [vmem:[%s24051_s3 + $0xd30] ss:$28 sps:$4 sm:$0xff]   ;;  %v18127_v26 = vld [vmem:[%s24052_s5 + $0x7c] ss:$12 sps:$4 sm:$0xff]   ;;  %v18125_v11 = vld [vmem:[%s24052_s5 + $0x78] ss:$12 sps:$4 sm:$0xff]  }
 0x55e   :  { %v22973_v30 = vpack.c.bf16 %v11686_v51, %v11679_v49  ;;  %v18119_v47 = vld [vmem:[%s24052_s5 + $0x60] ss:$12 sps:$4 sm:$0xff]   ;;  %v18122_v28 = vld [vmem:[%s24051_s3 + $0xd68] ss:$28 sps:$4 sm:$0xff]   ;;  %v18131_v41 = vld [vmem:[%s24052_s5 + $0x90] ss:$12 sps:$4 sm:$0xff]  }
 0x55f   :  { %11232 = vmatpush1.bf16.msra.mxu0 %v18088_v40  ;;  %v18124_v25 = vld [vmem:[%s24051_s3 + $0xd6c] ss:$28 sps:$4 sm:$0xff]   ;;  %v18130_v29 = vld [vmem:[%s24051_s3 + $0xda4] ss:$28 sps:$4 sm:$0xff]   ;;  %v18136_v63 = vld [vmem:[%s24051_s3 + $0xddc] ss:$28 sps:$4 sm:$0xff]  }
 0x560   :  { %15878 = vmatpush3.bf16.msra.mxu1 %v18091_v52  ;;  %11233 = vmatprep.subr.bf16.mxu0 %v18094_v55  ;;  %v18133_v15 = vld [vmem:[%s24052_s5 + $0x94] ss:$12 sps:$4 sm:$0xff]   ;;  %v18139_v43 = vld [vmem:[%s24052_s5 + $0xac] ss:$12 sps:$4 sm:$0xff]   ;;  %v18145_v46 = vld [vmem:[%s24052_s5 + $0xc4] ss:$12 sps:$4 sm:$0xff]  }
 0x561   :  { %12834 = vmatprep.subr.bf16.mxu1 %v18097_v8  ;;  %v18128_v38 = vld [vmem:[%s24051_s3 + $0xda0] ss:$28 sps:$4 sm:$0xff]   ;;  %v18134_v37 = vld [vmem:[%s24051_s3 + $0xdd8] ss:$28 sps:$4 sm:$0xff]   ;;  %v18140_v40 = vld [vmem:[%s24051_s3 + $0xe10] ss:$28 sps:$4 sm:$0xff]  }
 0x562   :  { %v18137_v45 = vld [vmem:[%s24052_s5 + $0xa8] ss:$12 sps:$4 sm:$0xff]   ;;  %v18143_v49 = vld [vmem:[%s24052_s5 + $0xc0] ss:$12 sps:$4 sm:$0xff]   ;;  %v18149_v8 = vld [vmem:[%s24052_s5 + $0xd8] ss:$12 sps:$4 sm:$0xff]  }
 0x563   :  { %15880 = vmatmul.mubr.bf16.vlgmr.msra.gmra.mrb[48].mxu1 %v21694_v54  ;;  %11234 = vmatpush1.bf16.msra.mxu0 %v18092_v61  ;;  %v18142_v57 = vld [vmem:[%s24051_s3 + $0xe14] ss:$28 sps:$4 sm:$0xff]   ;;  %v18148_v51 = vld [vmem:[%s24051_s3 + $0xe4c] ss:$28 sps:$4 sm:$0xff]   ;;  %v18154_v61 = vld [vmem:[%s24051_s3 + $0xe84] ss:$28 sps:$4 sm:$0xff]  }
 0x564   :  { %12835 = vmatpush1.bf16.msra.mxu1 %v18095_v35  ;;  %12866 = vmatprep.mubr.bf16.mxu1 %v22967_v59  ;;  %v18151_v52 = vld [vmem:[%s24052_s5 + $0xdc] ss:$12 sps:$4 sm:$0xff]  }
 0x565   :  { %11235 = vmatprep.subr.bf16.mxu0 %v18100_v4  ;;  %12836 = vmatprep.subr.bf16.mxu1 %v18103_v7  ;;  %v18146_v55 = vld [vmem:[%s24051_s3 + $0xe48] ss:$28 sps:$4 sm:$0xff]   ;;  %v18155_v35 = vld [vmem:[%s24052_s5 + $0xf0] ss:$12 sps:$4 sm:$0xff]   ;;  %v18163_v7 = vld [vmem:[%s24052_s5 + $0x10c] ss:$12 sps:$4 sm:$0xff]  }
 0x566   :  { %v18160_v4 = vld [vmem:[%s24051_s3 + $0xebc] ss:$28 sps:$4 sm:$0xff]  }
 0x567   :  { %11236 = vmatpush1.bf16.msra.mxu0 %v18098_v12  ;;  %v18158_v12 = vld [vmem:[%s24051_s3 + $0xeb8] ss:$28 sps:$4 sm:$0xff]  }
 0x568   :  { %12837 = vmatpush1.bf16.msra.mxu1 %v18101_v13  ;;  %11237 = vmatprep.subr.bf16.mxu0 %v18106_v14  ;;  %v18161_v13 = vld [vmem:[%s24052_s5 + $0x108] ss:$12 sps:$4 sm:$0xff]  }
 0x569   :  { %12838 = vmatprep.subr.bf16.mxu1 %v18109_v53  ;;  %v18166_v14 = vld [vmem:[%s24051_s3 + $0xef4] ss:$28 sps:$4 sm:$0xff]  }
 0x56a   :  { %v18169_v53 = vld [vmem:[%s24052_s5 + $0x124] ss:$12 sps:$4 sm:$0xff]  }
 0x56b   :  { %11238 = vmatpush1.bf16.msra.mxu0 %v18104_v17  ;;  %v18164_v17 = vld [vmem:[%s24051_s3 + $0xef0] ss:$28 sps:$4 sm:$0xff]  }
 0x56c   :  { %12839 = vmatpush1.bf16.msra.mxu1 %v18107_v58  ;;  %11239 = vmatprep.subr.bf16.mxu0 %v18112_v18  ;;  %v18167_v58 = vld [vmem:[%s24052_s5 + $0x120] ss:$12 sps:$4 sm:$0xff]  }
 0x56d   :  { %12840 = vmatprep.subr.bf16.mxu1 %v18115_v19  ;;  %v18172_v18 = vld [vmem:[%s24051_s3 + $0xf2c] ss:$28 sps:$4 sm:$0xff]  }
 0x56e   :  { %v18175_v19 = vld [vmem:[%s24052_s5 + $0x13c] ss:$12 sps:$4 sm:$0xff]  }
 0x56f   :  { %11240 = vmatpush1.bf16.msra.mxu0 %v18110_v20  ;;  %v18170_v20 = vld [vmem:[%s24051_s3 + $0xf28] ss:$28 sps:$4 sm:$0xff]  }
 0x570   :  { %12841 = vmatpush1.bf16.msra.mxu1 %v18113_v21  ;;  %11241 = vmatprep.subr.bf16.mxu0 %v18118_v23  ;;  %v6734_v21 = vrot.slane %v22917_v9, %v867_v2  ;;  %v18173_v23 = vld [vmem:[%s24052_s5 + $0x138] ss:$12 sps:$4 sm:$0xff]   ;;  %v18176_v2 = vld [vmem:[%s24051_s3 + $0xf60] ss:$28 sps:$4 sm:$0xff]  }
 0x571   :  { %12842 = vmatprep.subr.bf16.mxu1 %v18121_v24  ;;  %v18178_v24 = vld [vmem:[%s24051_s3 + $0xf64] ss:$28 sps:$4 sm:$0xff]  }
 0x573   :  { %11242 = vmatpush1.bf16.msra.mxu0 %v18116_v22  ;;  %v18181_v22 = vld [vmem:[%s24052_s5 + $0x154] ss:$12 sps:$4 sm:$0xff]  }
 0x574   :  { %12843 = vmatpush1.bf16.msra.mxu1 %v18119_v47  ;;  %11243 = vmatprep.subr.bf16.mxu0 %v18124_v25 }
 0x575   :  { %12844 = vmatprep.subr.bf16.mxu1 %v18127_v26 }
 0x576   :  { %v15590_v33 = vpop.f32.mrb[24].mxu1 }
 0x577   :  { %v15591_v36 = vpop.f32.mrb[25].mxu1  ;;  %11244 = vmatpush1.bf16.msra.mxu0 %v18122_v28 }
 0x578   :  { %v23052_v39 = vadd.f32 %v15591_v36, %v15590_v33  ;;  %v15593_v56 = vpop.f32.mrb[26].mxu1  ;;  %12845 = vmatpush1.bf16.msra.mxu1 %v18125_v11  ;;  %11245 = vmatprep.subr.bf16.mxu0 %v18130_v29  ;;  %v18179_v11 = vld [vmem:[%s24052_s5 + $0x150] ss:$12 sps:$4 sm:$0xff]   ;;  %v18187_v33 = vld [vmem:[%s24052_s5 + $0x16c] ss:$12 sps:$4 sm:$0xff]  }
 0x579   :  { %v15594_v42 = vpop.f32.mrb[27].mxu1  ;;  %12846 = vmatprep.subr.bf16.mxu1 %v18133_v15  ;;  %v18184_v29 = vld [vmem:[%s24051_s3 + $0xf9c] ss:$28 sps:$4 sm:$0xff]  }
 0x57a   :  { %v23063_v44 = vadd.f32 %v15594_v42, %v15593_v56  ;;  %v11424_v9 = vadd.f32 %v23052_v39, %v6734_v21  ;;  %v18182_v56 = vld [vmem:[%s24051_s3 + $0xf98] ss:$28 sps:$4 sm:$0xff]  }
 0x57b   :  { %11246 = vmatpush1.bf16.msra.mxu0 %v18128_v38  ;;  %v18190_v42 = vld [vmem:[%s24051_s3 + $0xfd4] ss:$28 sps:$4 sm:$0xff]  }
 0x57c   :  { %12847 = vmatpush1.bf16.msra.mxu1 %v18131_v41  ;;  %11247 = vmatprep.subr.bf16.mxu0 %v18136_v63  ;;  %v11427_v36 = vadd.f32 %v23063_v44, %v6734_v21  ;;  %v18185_v63 = vld [vmem:[%s24052_s5 + $0x168] ss:$12 sps:$4 sm:$0xff]   ;;  %v18188_v44 = vld [vmem:[%s24051_s3 + $0xfd0] ss:$28 sps:$4 sm:$0xff]   ;;  %v18224_v21 = vld [vmem:[%s24051_s3 + $0x1120] ss:$28 sps:$4 sm:$0xff]  }
 0x57d   :  { %12848 = vmatprep.subr.bf16.mxu1 %v18139_v43  ;;  %v18193_v43 = vld [vmem:[%s24052_s5 + $0x184] ss:$12 sps:$4 sm:$0xff]  }
 0x57f   :  { %11248 = vmatpush1.bf16.msra.mxu0 %v18134_v37  ;;  %v18191_v37 = vld [vmem:[%s24052_s5 + $0x180] ss:$12 sps:$4 sm:$0xff]  }
 0x580   :  { %12849 = vmatpush1.bf16.msra.mxu1 %v18137_v45  ;;  %11260 = vmatprep.subr.bf16.mxu0 %v18142_v57  ;;  %v18196_v45 = vld [vmem:[%s24051_s3 + $0x100c] ss:$28 sps:$4 sm:$0xff]  }
 0x581   :  { %12850 = vmatprep.subr.bf16.mxu1 %v18145_v46  ;;  %v18199_v57 = vld [vmem:[%s24052_s5 + $0x19c] ss:$12 sps:$4 sm:$0xff]  }
 0x582   :  { %11250 = vmatmul.mubr.bf16.vlgmr.msra.gmra.mrb[24].mxu0 %v20768_v62  ;;  %v18157_v62 = vld [vmem:[%s24052_s5 + $0xf4] ss:$12 sps:$4 sm:$0xff]   ;;  %v18194_v46 = vld [vmem:[%s24051_s3 + $0x1008] ss:$28 sps:$4 sm:$0xff]  }
 0x583   :  { %11261 = vmatpush1.bf16.msra.mxu0 %v18140_v40  ;;  %11292 = vmatprep.mubr.bf16.mxu0 %v21474_v32  ;;  %v18152_v32 = vld [vmem:[%s24051_s3 + $0xe80] ss:$28 sps:$4 sm:$0xff]   ;;  %v18197_v40 = vld [vmem:[%s24052_s5 + $0x198] ss:$12 sps:$4 sm:$0xff]  }
 0x584   :  { %12851 = vmatpush1.bf16.msra.mxu1 %v18143_v49  ;;  %11262 = vmatprep.subr.bf16.mxu0 %v18148_v51  ;;  %v18202_v49 = vld [vmem:[%s24051_s3 + $0x1044] ss:$28 sps:$4 sm:$0xff]  }
 0x585   :  { %12852 = vmatprep.subr.bf16.mxu1 %v18151_v52  ;;  %v18205_v51 = vld [vmem:[%s24052_s5 + $0x1b4] ss:$12 sps:$4 sm:$0xff]  }
 0x586   :  { %v18200_v52 = vld [vmem:[%s24051_s3 + $0x1040] ss:$28 sps:$4 sm:$0xff]  }
 0x587   :  { %11263 = vmatpush1.bf16.msra.mxu0 %v18146_v55  ;;  %v18203_v55 = vld [vmem:[%s24052_s5 + $0x1b0] ss:$12 sps:$4 sm:$0xff]  }
 0x588   :  { %12853 = vmatpush1.bf16.msra.mxu1 %v18149_v8  ;;  %11264 = vmatprep.subr.bf16.mxu0 %v18154_v61  ;;  %v18208_v8 = vld [vmem:[%s24051_s3 + $0x107c] ss:$28 sps:$4 sm:$0xff]  }
 0x589   :  { %12854 = vmatprep.subr.bf16.mxu1 %v18157_v62  ;;  %v18211_v61 = vld [vmem:[%s24052_s5 + $0x1cc] ss:$12 sps:$4 sm:$0xff]  }
 0x58a   :  { %v18206_v62 = vld [vmem:[%s24051_s3 + $0x1078] ss:$28 sps:$4 sm:$0xff]  }
 0x58b   :  { %11265 = vmatpush1.bf16.msra.mxu0 %v18152_v32  ;;  %v18209_v32 = vld [vmem:[%s24052_s5 + $0x1c8] ss:$12 sps:$4 sm:$0xff]  }
 0x58c   :  { %12855 = vmatpush1.bf16.msra.mxu1 %v18155_v35  ;;  %11266 = vmatprep.subr.bf16.mxu0 %v18160_v4  ;;  %v18214_v35 = vld [vmem:[%s24051_s3 + $0x10b4] ss:$28 sps:$4 sm:$0xff]  }
 0x58d   :  { %12856 = vmatprep.subr.bf16.mxu1 %v18163_v7  ;;  %v18217_v4 = vld [vmem:[%s24052_s5 + $0x1e4] ss:$12 sps:$4 sm:$0xff]  }
 0x58e   :  { %v18212_v7 = vld [vmem:[%s24051_s3 + $0x10b0] ss:$28 sps:$4 sm:$0xff]  }
 0x58f   :  { %11267 = vmatpush1.bf16.msra.mxu0 %v18158_v12  ;;  %v18215_v12 = vld [vmem:[%s24052_s5 + $0x1e0] ss:$12 sps:$4 sm:$0xff]  }
 0x590   :  { %12857 = vmatpush1.bf16.msra.mxu1 %v18161_v13  ;;  %11268 = vmatprep.subr.bf16.mxu0 %v18166_v14  ;;  %v18220_v13 = vld [vmem:[%s24051_s3 + $0x10ec] ss:$28 sps:$4 sm:$0xff]  }
 0x591   :  { %12858 = vmatprep.subr.bf16.mxu1 %v18169_v53  ;;  %v18223_v14 = vld [vmem:[%s24052_s5 + $0x1fc] ss:$12 sps:$4 sm:$0xff]  }
 0x592   :  { %v18218_v53 = vld [vmem:[%s24051_s3 + $0x10e8] ss:$28 sps:$4 sm:$0xff]  }
 0x593   :  { %11269 = vmatpush1.bf16.msra.mxu0 %v18164_v17  ;;  %v18221_v17 = vld [vmem:[%s24052_s5 + $0x1f8] ss:$12 sps:$4 sm:$0xff]  }
 0x594   :  { %12859 = vmatpush1.bf16.msra.mxu1 %v18167_v58  ;;  %11270 = vmatprep.subr.bf16.mxu0 %v18172_v18  ;;  %v18226_v58 = vld [vmem:[%s24051_s3 + $0x1124] ss:$28 sps:$4 sm:$0xff]  }
 0x595   :  { %12860 = vmatprep.subr.bf16.mxu1 %v18175_v19  ;;  %v18229_v18 = vld [vmem:[%s24052_s5 + $0x214] ss:$12 sps:$4 sm:$0xff]  }
 0x596   :  { %v15612_v47 = vpop.f32.mrb[28].mxu1 }
 0x597   :  { %v15613_v25 = vpop.f32.mrb[29].mxu1  ;;  %11271 = vmatpush1.bf16.msra.mxu0 %v18170_v20 }
 0x598   :  { %v15614_v26 = vadd.f32 %v15613_v25, %v15612_v47  ;;  %v15615_v28 = vpop.f32.mrb[30].mxu1  ;;  %12861 = vmatpush1.bf16.msra.mxu1 %v18173_v23  ;;  %11272 = vmatprep.subr.bf16.mxu0 %v18178_v24  ;;  %v18232_v47 = vld [vmem:[%s24051_s3 + $0x115c] ss:$28 sps:$4 sm:$0xff]  }
 0x599   :  { %v15616_v15 = vpop.f32.mrb[31].mxu1  ;;  %12862 = vmatprep.subr.bf16.mxu1 %v18181_v22  ;;  %v18227_v22 = vld [vmem:[%s24052_s5 + $0x210] ss:$12 sps:$4 sm:$0xff]  }
 0x59a   :  { %v23168_v38 = vadd.f32 %v15614_v26, %v11424_v9  ;;  %v15617_v39 = vadd.f32 %v15616_v15, %v15615_v28  ;;  %v18230_v28 = vld [vmem:[%s24051_s3 + $0x1158] ss:$28 sps:$4 sm:$0xff]  }
 0x59b   :  { %11273 = vmatpush1.bf16.msra.mxu0 %v18176_v2  ;;  %v18235_v2 = vld [vmem:[%s24052_s5 + $0x22c] ss:$12 sps:$4 sm:$0xff]   ;;  %v18238_v15 = vld [vmem:[%s24051_s3 + $0x1194] ss:$28 sps:$4 sm:$0xff]  }
 0x59c   :  { %v23173_v41 = vadd.f32 %v15617_v39, %v11427_v36  ;;  %12863 = vmatpush1.bf16.msra.mxu1 %v18179_v11  ;;  %11274 = vmatprep.subr.bf16.mxu0 %v18184_v29  ;;  %v18233_v29 = vld [vmem:[%s24052_s5 + $0x228] ss:$12 sps:$4 sm:$0xff]   ;;  %v18236_v36 = vld [vmem:[%s24051_s3 + $0x1190] ss:$28 sps:$4 sm:$0xff]  }
 0x59d   :  { %12864 = vmatprep.subr.bf16.mxu1 %v18187_v33  ;;  %v18241_v33 = vld [vmem:[%s24052_s5 + $0x244] ss:$12 sps:$4 sm:$0xff]   ;;  %v18244_v39 = vld [vmem:[%s24051_s3 + $0x11cc] ss:$28 sps:$4 sm:$0xff]  }
 0x59f   :  { %11275 = vmatpush1.bf16.msra.mxu0 %v18182_v56  ;;  %v18247_v56 = vld [vmem:[%s24052_s5 + $0x25c] ss:$12 sps:$4 sm:$0xff]  }
 0x5a0   :  { %12865 = vmatpush1.bf16.msra.mxu1 %v18185_v63  ;;  %11276 = vmatprep.subr.bf16.mxu0 %v18190_v42  ;;  %v18245_v63 = vld [vmem:[%s24052_s5 + $0x258] ss:$12 sps:$4 sm:$0xff]  }
 0x5a1   :  { %12877 = vmatprep.subr.bf16.mxu1 %v18193_v43  ;;  %v18250_v42 = vld [vmem:[%s24051_s3 + $0x1204] ss:$28 sps:$4 sm:$0xff]   ;;  %v18251_v43 = vld [vmem:[%s24052_s5 + $0x270] ss:$12 sps:$4 sm:$0xff]  }
 0x5a3   :  { %12867 = vmatmul.mubr.bf16.vlgmr.msra.gmra.mrb[52].mxu1 %v22957_v50  ;;  %11277 = vmatpush1.bf16.msra.mxu0 %v18188_v44  ;;  %v18256_v44 = vld [vmem:[%s24051_s3 + $0x123c] ss:$28 sps:$4 sm:$0xff]  }
 0x5a4   :  { %12878 = vmatpush1.bf16.msra.mxu1 %v18191_v37  ;;  %12909 = vmatprep.mubr.bf16.mxu1 %v22973_v30  ;;  %v18259_v37 = vld [vmem:[%s24052_s5 + $0x28c] ss:$12 sps:$4 sm:$0xff]  }
 0x5a5   :  { %11278 = vmatprep.subr.bf16.mxu0 %v18196_v45  ;;  %12879 = vmatprep.subr.bf16.mxu1 %v18199_v57  ;;  %v18254_v45 = vld [vmem:[%s24051_s3 + $0x1238] ss:$28 sps:$4 sm:$0xff]  }
 0x5a6   :  { %v18257_v57 = vld [vmem:[%s24052_s5 + $0x288] ss:$12 sps:$4 sm:$0xff]  }
 0x5a7   :  { %11279 = vmatpush1.bf16.msra.mxu0 %v18194_v46  ;;  %v18262_v46 = vld [vmem:[%s24051_s3 + $0x1274] ss:$28 sps:$4 sm:$0xff]  }
 0x5a8   :  { %12880 = vmatpush1.bf16.msra.mxu1 %v18197_v40  ;;  %11280 = vmatprep.subr.bf16.mxu0 %v18202_v49  ;;  %v18265_v40 = vld [vmem:[%s24052_s5 + $0x2a4] ss:$12 sps:$4 sm:$0xff]  }
 0x5a9   :  { %12881 = vmatprep.subr.bf16.mxu1 %v18205_v51  ;;  %v18260_v49 = vld [vmem:[%s24051_s3 + $0x1270] ss:$28 sps:$4 sm:$0xff]  }
 0x5aa   :  { %v18263_v51 = vld [vmem:[%s24052_s5 + $0x2a0] ss:$12 sps:$4 sm:$0xff]  }
 0x5ab   :  { %11281 = vmatpush1.bf16.msra.mxu0 %v18200_v52  ;;  %v18268_v52 = vld [vmem:[%s24051_s3 + $0x12ac] ss:$28 sps:$4 sm:$0xff]  }
 0x5ac   :  { %12882 = vmatpush1.bf16.msra.mxu1 %v18203_v55  ;;  %11282 = vmatprep.subr.bf16.mxu0 %v18208_v8  ;;  %v18271_v55 = vld [vmem:[%s24052_s5 + $0x2bc] ss:$12 sps:$4 sm:$0xff]  }
 0x5ad   :  { %12883 = vmatprep.subr.bf16.mxu1 %v18211_v61  ;;  %v18266_v8 = vld [vmem:[%s24051_s3 + $0x12a8] ss:$28 sps:$4 sm:$0xff]  }
 0x5ae   :  { %v18269_v61 = vld [vmem:[%s24052_s5 + $0x2b8] ss:$12 sps:$4 sm:$0xff]  }
 0x5af   :  { %11283 = vmatpush1.bf16.msra.mxu0 %v18206_v62  ;;  %v18274_v62 = vld [vmem:[%s24051_s3 + $0x12e4] ss:$28 sps:$4 sm:$0xff]  }
 0x5b0   :  { %12884 = vmatpush1.bf16.msra.mxu1 %v18209_v32  ;;  %11284 = vmatprep.subr.bf16.mxu0 %v18214_v35  ;;  %v18277_v32 = vld [vmem:[%s24052_s5 + $0x2d4] ss:$12 sps:$4 sm:$0xff]  }
 0x5b1   :  { %12885 = vmatprep.subr.bf16.mxu1 %v18217_v4 }
 0x5b3   :  { %11285 = vmatpush1.bf16.msra.mxu0 %v18212_v7  ;;  %v18272_v7 = vld [vmem:[%s24051_s3 + $0x12e0] ss:$28 sps:$4 sm:$0xff]  }
 0x5b4   :  { %12886 = vmatpush1.bf16.msra.mxu1 %v18215_v12  ;;  %11286 = vmatprep.subr.bf16.mxu0 %v18220_v13 }
 0x5b5   :  { %12887 = vmatprep.subr.bf16.mxu1 %v18223_v14  ;;  %v18275_v14 = vld [vmem:[%s24052_s5 + $0x2d0] ss:$12 sps:$4 sm:$0xff]  }
 0x5b6   :  { %v15634_v19 = vpop.f32.mrb[32].mxu1 }
 0x5b7   :  { %v15635_v20 = vpop.f32.mrb[33].mxu1  ;;  %11287 = vmatpush1.bf16.msra.mxu0 %v18218_v53  ;;  %v18280_v53 = vld [vmem:[%s24051_s3 + $0x131c] ss:$28 sps:$4 sm:$0xff]  }
 0x5b8   :  { %v15636_v23 = vadd.f32 %v15635_v20, %v15634_v19  ;;  %v15637_v24 = vpop.f32.mrb[34].mxu1  ;;  %12888 = vmatpush1.bf16.msra.mxu1 %v18221_v17  ;;  %11288 = vmatprep.subr.bf16.mxu0 %v18226_v58  ;;  %v18283_v58 = vld [vmem:[%s24052_s5 + $0x2ec] ss:$12 sps:$4 sm:$0xff]  }
 0x5b9   :  { %v15638_v25 = vpop.f32.mrb[35].mxu1  ;;  %12889 = vmatprep.subr.bf16.mxu1 %v18229_v18  ;;  %v18278_v20 = vld [vmem:[%s24051_s3 + $0x1318] ss:$28 sps:$4 sm:$0xff]  }
 0x5ba   :  { %v23271_v9 = vadd.f32 %v15636_v23, %v23168_v38  ;;  %v15639_v26 = vadd.f32 %v15638_v25, %v15637_v24  ;;  %v18239_v38 = vld [vmem:[%s24052_s5 + $0x240] ss:$12 sps:$4 sm:$0xff]   ;;  %v18281_v23 = vld [vmem:[%s24052_s5 + $0x2e8] ss:$12 sps:$4 sm:$0xff]  }
 0x5bb   :  { %11289 = vmatpush1.bf16.msra.mxu0 %v18224_v21  ;;  %v18286_v24 = vld [vmem:[%s24051_s3 + $0x1354] ss:$28 sps:$4 sm:$0xff]   ;;  %v18287_v25 = vld [vmem:[%s24051_s3 + $0x1388] ss:$28 sps:$4 sm:$0xff]  }
 0x5bc   :  { %v23277_v11 = vadd.f32 %v15639_v26, %v23173_v41  ;;  %12890 = vmatpush1.bf16.msra.mxu1 %v18227_v22  ;;  %11290 = vmatprep.subr.bf16.mxu0 %v18232_v47  ;;  %v18242_v41 = vld [vmem:[%s24051_s3 + $0x11c8] ss:$28 sps:$4 sm:$0xff]   ;;  %v18284_v22 = vld [vmem:[%s24051_s3 + $0x1350] ss:$28 sps:$4 sm:$0xff]   ;;  %v18295_v26 = vld [vmem:[%s24051_s3 + $0x13fc] ss:$28 sps:$4 sm:$0xff]  }
 0x5bd   :  { %12891 = vmatprep.subr.bf16.mxu1 %v18235_v2  ;;  %v18289_v47 = vld [vmem:[%s24051_s3 + $0x138c] ss:$28 sps:$4 sm:$0xff]   ;;  %v18292_v2 = vld [vmem:[%s24051_s3 + $0x13c4] ss:$28 sps:$4 sm:$0xff]  }
 0x5bf   :  { %11291 = vmatpush1.bf16.msra.mxu0 %v18230_v28  ;;  %v18293_v28 = vld [vmem:[%s24051_s3 + $0x13f8] ss:$28 sps:$4 sm:$0xff]  }
 0x5c0   :  { %12892 = vmatpush1.bf16.msra.mxu1 %v18233_v29  ;;  %11303 = vmatprep.subr.bf16.mxu0 %v18238_v15  ;;  %v18296_v29 = vld [vmem:[%s24051_s3 + $0x1430] ss:$28 sps:$4 sm:$0xff]  }
 0x5c1   :  { %12893 = vmatprep.subr.bf16.mxu1 %v18241_v33  ;;  %v18301_v15 = vld [vmem:[%s24051_s3 + $0x146c] ss:$28 sps:$4 sm:$0xff]  }
 0x5c2   :  { %11293 = vmatmul.mubr.bf16.vlgmr.msra.gmra.mrb[24].mxu0 %v21464_v27  ;;  %v18253_v27 = vld [vmem:[%s24052_s5 + $0x274] ss:$12 sps:$4 sm:$0xff]   ;;  %v18299_v33 = vld [vmem:[%s24051_s3 + $0x1468] ss:$28 sps:$4 sm:$0xff]  }
 0x5c3   :  { %11304 = vmatpush1.bf16.msra.mxu0 %v18236_v36  ;;  %11335 = vmatprep.mubr.bf16.mxu0 %v21482_v34  ;;  %v18248_v34 = vld [vmem:[%s24051_s3 + $0x1200] ss:$28 sps:$4 sm:$0xff]  }
 0x5c4   :  { %12894 = vmatpush1.bf16.msra.mxu1 %v18239_v38  ;;  %11305 = vmatprep.subr.bf16.mxu0 %v18244_v39  ;;  %v18304_v36 = vld [vmem:[%s24051_s3 + $0x14a4] ss:$28 sps:$4 sm:$0xff]  }
 0x5c5   :  { %12895 = vmatprep.subr.bf16.mxu1 %v18247_v56  ;;  %v18302_v56 = vld [vmem:[%s24051_s3 + $0x14a0] ss:$28 sps:$4 sm:$0xff]  }
 0x5c7   :  { %11306 = vmatpush1.bf16.msra.mxu0 %v18242_v41 }
 0x5c8   :  { %12896 = vmatpush1.bf16.msra.mxu1 %v18245_v63  ;;  %11307 = vmatprep.subr.bf16.mxu0 %v18250_v42  ;;  %v18307_v42 = vld [vmem:[%s24051_s3 + $0x14dc] ss:$28 sps:$4 sm:$0xff]  }
 0x5c9   :  { %12897 = vmatprep.subr.bf16.mxu1 %v18253_v27 }
 0x5cb   :  { %11308 = vmatpush1.bf16.msra.mxu0 %v18248_v34 }
 0x5cc   :  { %12898 = vmatpush1.bf16.msra.mxu1 %v18251_v43  ;;  %11309 = vmatprep.subr.bf16.mxu0 %v18256_v44  ;;  %v18305_v44 = vld [vmem:[%s24051_s3 + $0x14d8] ss:$28 sps:$4 sm:$0xff]  }
 0x5cd   :  { %12899 = vmatprep.subr.bf16.mxu1 %v18259_v37 }
 0x5cf   :  { %11310 = vmatpush1.bf16.msra.mxu0 %v18254_v45  ;;  %v18310_v45 = vld [vmem:[%s24051_s3 + $0x1514] ss:$28 sps:$4 sm:$0xff]  }
 0x5d0   :  { %12900 = vmatpush1.bf16.msra.mxu1 %v18257_v57  ;;  %11311 = vmatprep.subr.bf16.mxu0 %v18262_v46  ;;  %v18308_v57 = vld [vmem:[%s24051_s3 + $0x1510] ss:$28 sps:$4 sm:$0xff]  }
 0x5d1   :  { %12901 = vmatprep.subr.bf16.mxu1 %v18265_v40  ;;  %v18313_v46 = vld [vmem:[%s24051_s3 + $0x154c] ss:$28 sps:$4 sm:$0xff]  }
 0x5d2   :  { %v18372_v40 = vld [vmem:[%s24052_s5 + $0x300] ss:$12 sps:$4 sm:$0xff]  }
 0x5d3   :  { %11312 = vmatpush1.bf16.msra.mxu0 %v18260_v49  ;;  %v18374_v49 = vld [vmem:[%s24052_s5 + $0x304] ss:$12 sps:$4 sm:$0xff]  }
 0x5d4   :  { %12902 = vmatpush1.bf16.msra.mxu1 %v18263_v51  ;;  %11313 = vmatprep.subr.bf16.mxu0 %v18268_v52  ;;  %v18311_v51 = vld [vmem:[%s24051_s3 + $0x1548] ss:$28 sps:$4 sm:$0xff]  }
 0x5d5   :  { %12903 = vmatprep.subr.bf16.mxu1 %v18271_v55  ;;  %v18377_v52 = vld [vmem:[%s24052_s5 + $0x31c] ss:$12 sps:$4 sm:$0xff]   ;;  %v18375_v55 = vld [vmem:[%s24052_s5 + $0x318] ss:$12 sps:$4 sm:$0xff]  }
 0x5d6   :  { %v15656_v35 = vpop.f32.mrb[36].mxu1 }
 0x5d7   :  { %v15657_v4 = vpop.f32.mrb[37].mxu1  ;;  %11314 = vmatpush1.bf16.msra.mxu0 %v18266_v8  ;;  %v18380_v8 = vld [vmem:[%s24052_s5 + $0x334] ss:$12 sps:$4 sm:$0xff]  }
 0x5d8   :  { %v15658_v12 = vadd.f32 %v15657_v4, %v15656_v35  ;;  %v15659_v13 = vpop.f32.mrb[38].mxu1  ;;  %12904 = vmatpush1.bf16.msra.mxu1 %v18269_v61  ;;  %11315 = vmatprep.subr.bf16.mxu0 %v18274_v62  ;;  %v18314_v61 = vld [vmem:[%s24051_s3 + $0x1580] ss:$28 sps:$4 sm:$0xff]   ;;  %v18383_v35 = vld [vmem:[%s24052_s5 + $0x34c] ss:$12 sps:$4 sm:$0xff]  }
 0x5d9   :  { %v15660_v17 = vpop.f32.mrb[39].mxu1  ;;  %12905 = vmatprep.subr.bf16.mxu1 %v18277_v32  ;;  %v18319_v62 = vld [vmem:[%s24051_s3 + $0x15bc] ss:$28 sps:$4 sm:$0xff]  }
 0x5da   :  { %v11547_v18 = vadd.f32 %v15658_v12, %v23271_v9  ;;  %v15661_v19 = vadd.f32 %v15660_v17, %v15659_v13  ;;  %v18290_v9 = vld [vmem:[%s24051_s3 + $0x13c0] ss:$28 sps:$4 sm:$0xff]   ;;  %v18317_v4 = vld [vmem:[%s24051_s3 + $0x15b8] ss:$28 sps:$4 sm:$0xff]   ;;  %v18386_v13 = vld [vmem:[%s24052_s5 + $0x364] ss:$12 sps:$4 sm:$0xff]  }
 0x5db   :  { %11316 = vmatpush1.bf16.msra.mxu0 %v18272_v7  ;;  %v18378_v32 = vld [vmem:[%s24052_s5 + $0x330] ss:$12 sps:$4 sm:$0xff]   ;;  %v18381_v12 = vld [vmem:[%s24052_s5 + $0x348] ss:$12 sps:$4 sm:$0xff]   ;;  %v18384_v17 = vld [vmem:[%s24052_s5 + $0x360] ss:$12 sps:$4 sm:$0xff]  }
 0x5dc   :  { %v11550_v21 = vadd.f32 %v15661_v19, %v23277_v11  ;;  %12906 = vmatpush1.bf16.msra.mxu1 %v18275_v14  ;;  %11317 = vmatprep.subr.bf16.mxu0 %v18280_v53  ;;  %v18298_v11 = vld [vmem:[%s24051_s3 + $0x1434] ss:$28 sps:$4 sm:$0xff]   ;;  %v18325_v53 = vld [vmem:[%s24051_s3 + $0x162c] ss:$28 sps:$4 sm:$0xff]   ;;  %v18328_v19 = vld [vmem:[%s24051_s3 + $0x1664] ss:$28 sps:$4 sm:$0xff]  }
 0x5dd   :  { %12907 = vmatprep.subr.bf16.mxu1 %v18283_v58  ;;  %v18322_v7 = vld [vmem:[%s24051_s3 + $0x15f4] ss:$28 sps:$4 sm:$0xff]   ;;  %v18389_v58 = vld [vmem:[%s24052_s5 + $0x37c] ss:$12 sps:$4 sm:$0xff]  }
 0x5de   :  { %v18320_v14 = vld [vmem:[%s24051_s3 + $0x15f0] ss:$28 sps:$4 sm:$0xff]  }
 0x5df   :  { %11318 = vmatpush1.bf16.msra.mxu0 %v18278_v20  ;;  %v18387_v20 = vld [vmem:[%s24052_s5 + $0x378] ss:$12 sps:$4 sm:$0xff]  }
 0x5e0   :  { %12908 = vmatpush1.bf16.msra.mxu1 %v18281_v23  ;;  %11319 = vmatprep.subr.bf16.mxu0 %v18286_v24  ;;  %v18392_v23 = vld [vmem:[%s24052_s5 + $0x394] ss:$12 sps:$4 sm:$0xff]  }
 0x5e1   :  { %12920 = vmatprep.subr.bf16.mxu1 %v18374_v49  ;;  %v18410_v49 = vld [vmem:[%s24052_s5 + $0x424] ss:$12 sps:$4 sm:$0xff]  }
 0x5e3   :  { %12910 = vmatmul.mubr.bf16.vlgmr.msra.gmra.mrb[52].mxu1 %v22965_v60  ;;  %11320 = vmatpush1.bf16.msra.mxu0 %v18284_v22  ;;  %v18326_v22 = vld [vmem:[%s24051_s3 + $0x1660] ss:$28 sps:$4 sm:$0xff]  }
 0x5e4   :  { %11321 = vmatprep.subr.bf16.mxu0 %v18289_v47  ;;  %12921 = vmatpush1.bf16.msra.mxu1 %v18372_v40  ;;  %v18405_v40 = vld [vmem:[%s24052_s5 + $0x408] ss:$12 sps:$4 sm:$0xff]  }
 0x5e5   :  { %12922 = vmatprep.subr.bf16.mxu1 %v18377_v52  ;;  %v18342_v52 = vld [vmem:[%s24052_s5 + $0x140] ss:$12 sps:$4 sm:$0xff]  }
 0x5e7   :  { %11322 = vmatpush1.bf16.msra.mxu0 %v18287_v25 }
 0x5e8   :  { %11323 = vmatprep.subr.bf16.mxu0 %v18292_v2  ;;  %12923 = vmatpush1.bf16.msra.mxu1 %v18375_v55  ;;  %v18331_v2 = vld [vmem:[%s24051_s3 + $0x169c] ss:$28 sps:$4 sm:$0xff]  }
 0x5e9   :  { %12924 = vmatprep.subr.bf16.mxu1 %v18380_v8  ;;  %v18413_v55 = vld [vmem:[%s24052_s5 + $0x43c] ss:$12 sps:$4 sm:$0xff]   ;;  %v18343_v8 = vld [vmem:[%s24052_s5 + $0x80] ss:$12 sps:$4 sm:$0xff]  }
 0x5eb   :  { %11324 = vmatpush1.bf16.msra.mxu0 %v18290_v9 }
 0x5ec   :  { %11325 = vmatprep.subr.bf16.mxu0 %v18295_v26  ;;  %12925 = vmatpush1.bf16.msra.mxu1 %v18378_v32  ;;  %v18390_v26 = vld [vmem:[%s24052_s5 + $0x390] ss:$12 sps:$4 sm:$0xff]  }
 0x5ed   :  { %12926 = vmatprep.subr.bf16.mxu1 %v18383_v35 }
 0x5ef   :  { %11326 = vmatpush1.bf16.msra.mxu0 %v18293_v28 }
 0x5f0   :  { %11327 = vmatprep.subr.bf16.mxu0 %v18298_v11  ;;  %12927 = vmatpush1.bf16.msra.mxu1 %v18381_v12 }
 0x5f1   :  { %12928 = vmatprep.subr.bf16.mxu1 %v18386_v13  ;;  %v18346_v13 = vld [vmem:[%s24052_s5 + $0x170] ss:$12 sps:$4 sm:$0xff]  }
 0x5f3   :  { %11328 = vmatpush1.bf16.msra.mxu0 %v18296_v29  ;;  %v18395_v29 = vld [vmem:[%s24052_s5 + $0x3ac] ss:$12 sps:$4 sm:$0xff]  }
 0x5f4   :  { %11329 = vmatprep.subr.bf16.mxu0 %v18301_v15  ;;  %12929 = vmatpush1.bf16.msra.mxu1 %v18384_v17  ;;  %v18329_v15 = vld [vmem:[%s24051_s3 + $0x1698] ss:$28 sps:$4 sm:$0xff]  }
 0x5f5   :  { %12930 = vmatprep.subr.bf16.mxu1 %v18389_v58 }
 0x5f6   :  { %v15678_v38 = vpop.f32.mrb[40].mxu1 }
 0x5f7   :  { %v15679_v39 = vpop.f32.mrb[41].mxu1  ;;  %11330 = vmatpush1.bf16.msra.mxu0 %v18299_v33  ;;  %v18332_v33 = vld [vmem:[%s24052_s5 + $0xc8] ss:$12 sps:$4 sm:$0xff]  }
 0x5f8   :  { %v15680_v41 = vadd.f32 %v15679_v39, %v15678_v38  ;;  %v15681_v63 = vpop.f32.mrb[42].mxu1  ;;  %11331 = vmatprep.subr.bf16.mxu0 %v18304_v36  ;;  %12931 = vmatpush1.bf16.msra.mxu1 %v18387_v20  ;;  %v18393_v38 = vld [vmem:[%s24052_s5 + $0x3a8] ss:$12 sps:$4 sm:$0xff]   ;;  %v18398_v39 = vld [vmem:[%s24052_s5 + $0x3c4] ss:$12 sps:$4 sm:$0xff]  }
 0x5f9   :  { %v15682_v27 = vpop.f32.mrb[43].mxu1  ;;  %12932 = vmatprep.subr.bf16.mxu1 %v18392_v23  ;;  %v18350_v23 = vld [vmem:[%s24052_s5 + $0x260] ss:$12 sps:$4 sm:$0xff]  }
 0x5fa   :  { %v23428_v34 = vadd.f32 %v15680_v41, %v11547_v18  ;;  %v15683_v43 = vadd.f32 %v15682_v27, %v15681_v63  ;;  %v18323_v18 = vld [vmem:[%s24051_s3 + $0x1628] ss:$28 sps:$4 sm:$0xff]   ;;  %v18334_v41 = vld [vmem:[%s24052_s5 + $0xe0] ss:$12 sps:$4 sm:$0xff]  }
 0x5fb   :  { %11332 = vmatpush1.bf16.msra.mxu0 %v18302_v56  ;;  %v18333_v56 = vld [vmem:[%s24052_s5 + $0x8] ss:$12 sps:$4 sm:$0xff]   ;;  %v18396_v63 = vld [vmem:[%s24052_s5 + $0x3c0] ss:$12 sps:$4 sm:$0xff]  }
 0x5fc   :  { %v23433_v37 = vadd.f32 %v15683_v43, %v11550_v21  ;;  %11333 = vmatprep.subr.bf16.mxu0 %v18307_v42  ;;  %12933 = vmatpush1.bf16.msra.mxu1 %v18390_v26  ;;  %v18401_v42 = vld [vmem:[%s24052_s5 + $0x3dc] ss:$12 sps:$4 sm:$0xff]   ;;  %v18335_v27 = vld [vmem:[%s24052_s5 + $0x20] ss:$12 sps:$4 sm:$0xff]  }
 0x5fd   :  { %12934 = vmatprep.subr.bf16.mxu1 %v18395_v29  ;;  %v18404_v43 = vld [vmem:[%s24052_s5 + $0x3f4] ss:$12 sps:$4 sm:$0xff]   ;;  %v18362_v29 = vld [vmem:[%s24052_s5 + $0x2f0] ss:$12 sps:$4 sm:$0xff]  }
 0x5fe   :  { %v18359_v26 = vld [vmem:[%s24052_s5 + $0x200] ss:$12 sps:$4 sm:$0xff]  }
 0x5ff   :  { %11334 = vmatpush1.bf16.msra.mxu0 %v18305_v44  ;;  %v18338_v44 = vld [vmem:[%s24052_s5 + $0x110] ss:$12 sps:$4 sm:$0xff]  }
 0x600   :  { %11346 = vmatprep.subr.bf16.mxu0 %v18310_v45  ;;  %12935 = vmatpush1.bf16.msra.mxu1 %v18393_v38  ;;  %v18407_v45 = vld [vmem:[%s24052_s5 + $0x40c] ss:$12 sps:$4 sm:$0xff]  }
 0x601   :  { %12936 = vmatprep.subr.bf16.mxu1 %v18398_v39  ;;  %v18366_v38 = vld [vmem:[%s24052_s5 + $0x4b8] ss:$12 sps:$4 sm:$0xff]   ;;  %v18368_v39 = vld [vmem:[%s24052_s5 + $0x4e8] ss:$12 sps:$4 sm:$0xff]  }
 0x602   :  { %11336 = vmatmul.mubr.bf16.vlgmr.msra.gmra.mrb[24].mxu0 %v21472_v31  ;;  %v18316_v31 = vld [vmem:[%s24051_s3 + $0x1584] ss:$28 sps:$4 sm:$0xff]  }
 0x603   :  { %11347 = vmatpush1.bf16.msra.mxu0 %v18308_v57  ;;  %11378 = vmatprep.mubr.bf16.mxu0 %v18546_v16  ;;  %v18339_v57 = vld [vmem:[%s24052_s5 + $0x50] ss:$12 sps:$4 sm:$0xff]  }
 0x604   :  { %11348 = vmatprep.subr.bf16.mxu0 %v18313_v46  ;;  %12937 = vmatpush1.bf16.msra.mxu1 %v18396_v63  ;;  %v18340_v46 = vld [vmem:[%s24052_s5 + $0x128] ss:$12 sps:$4 sm:$0xff]  }
 0x605   :  { %12938 = vmatprep.subr.bf16.mxu1 %v18401_v42  ;;  %v18416_v63 = vld [vmem:[%s24052_s5 + $0x454] ss:$12 sps:$4 sm:$0xff]   ;;  %v18414_v42 = vld [vmem:[%s24052_s5 + $0x450] ss:$12 sps:$4 sm:$0xff]  }
 0x607   :  { %11349 = vmatpush1.bf16.msra.mxu0 %v18311_v51  ;;  %v18341_v51 = vld [vmem:[%s24052_s5 + $0x68] ss:$12 sps:$4 sm:$0xff]  }
 0x608   :  { %11350 = vmatprep.subr.bf16.mxu0 %v18316_v31  ;;  %v18408_v31 = vld [vmem:[%s24052_s5 + $0x420] ss:$12 sps:$4 sm:$0xff]  }
 0x60b   :  { %11351 = vmatpush1.bf16.msra.mxu0 %v18314_v61  ;;  %v18344_v61 = vld [vmem:[%s24052_s5 + $0x158] ss:$12 sps:$4 sm:$0xff]  }
 0x60c   :  { %11352 = vmatprep.subr.bf16.mxu0 %v18319_v62  ;;  %v18411_v62 = vld [vmem:[%s24052_s5 + $0x438] ss:$12 sps:$4 sm:$0xff]  }
 0x60f   :  { %11353 = vmatpush1.bf16.msra.mxu0 %v18317_v4 }
 0x610   :  { %11354 = vmatprep.subr.bf16.mxu0 %v18322_v7  ;;  %v18345_v7 = vld [vmem:[%s24052_s5 + $0x98] ss:$12 sps:$4 sm:$0xff]  }
 0x613   :  { %11355 = vmatpush1.bf16.msra.mxu0 %v18320_v14 }
 0x614   :  { %11356 = vmatprep.subr.bf16.mxu0 %v18325_v53 }
 0x616   :  { %v15700_v21 = vpop.f32.mrb[44].mxu1 }
 0x617   :  { %v15701_v24 = vpop.f32.mrb[45].mxu1  ;;  %11357 = vmatpush1.bf16.msra.mxu0 %v18323_v18  ;;  %v18347_v18 = vld [vmem:[%s24052_s5 + $0xb0] ss:$12 sps:$4 sm:$0xff]  }
 0x618   :  { %v15702_v47 = vadd.f32 %v15701_v24, %v15700_v21  ;;  %v15703_v25 = vpop.f32.mrb[46].mxu1  ;;  %11358 = vmatprep.subr.bf16.mxu0 %v18328_v19  ;;  %v18348_v19 = vld [vmem:[%s24052_s5 + $0x248] ss:$12 sps:$4 sm:$0xff]   ;;  %v18351_v24 = vld [vmem:[%s24052_s5 + $0x1a0] ss:$12 sps:$4 sm:$0xff]  }
 0x619   :  { %v15704_v9 = vpop.f32.mrb[47].mxu1  ;;  %v18349_v21 = vld [vmem:[%s24052_s5 + $0x188] ss:$12 sps:$4 sm:$0xff]  }
 0x61a   :  { %v15705_v28 = vadd.f32 %v15704_v9, %v15703_v25  ;;  %v11629_v11 = vadd.f32 %v15702_v47, %v23428_v34  ;;  %v18336_v34 = vld [vmem:[%s24052_s5 + $0xf8] ss:$12 sps:$4 sm:$0xff]   ;;  %v18356_v25 = vld [vmem:[%s24052_s5 + $0x2a8] ss:$12 sps:$4 sm:$0xff]   ;;  %v18358_v9 = vld [vmem:[%s24052_s5 + $0x2c0] ss:$12 sps:$4 sm:$0xff]  }
 0x61b   :  { %11359 = vmatpush1.bf16.msra.mxu0 %v18326_v22  ;;  %v18352_v22 = vld [vmem:[%s24052_s5 + $0x278] ss:$12 sps:$4 sm:$0xff]  }
 0x61c   :  { %11360 = vmatprep.subr.bf16.mxu0 %v18331_v2  ;;  %v11632_v36 = vadd.f32 %v15705_v28, %v23433_v37  ;;  %v18402_v37 = vld [vmem:[%s24052_s5 + $0x3f0] ss:$12 sps:$4 sm:$0xff]   ;;  %v18353_v47 = vld [vmem:[%s24052_s5 + $0x1b8] ss:$12 sps:$4 sm:$0xff]   ;;  %v18357_v2 = vld [vmem:[%s24052_s5 + $0x1e8] ss:$12 sps:$4 sm:$0xff]  }
 0x61d   :  { %v18360_v28 = vld [vmem:[%s24052_s5 + $0x2d8] ss:$12 sps:$4 sm:$0xff]  }
 0x61f   :  { %11361 = vmatpush1.bf16.msra.mxu0 %v18329_v15  ;;  %v18363_v15 = vld [vmem:[%s24052_s5 + $0x230] ss:$12 sps:$4 sm:$0xff]  }
 0x620   :  { %15715 = vmatprep.subr.bf16.mxu0 %v18332_v33  ;;  %v18364_v33 = vld [vmem:[%s24052_s5 + $0x488] ss:$12 sps:$4 sm:$0xff]  }
 0x622   :  { %11379 = vmatmul.mubr.bf16.vlgmr.msra.gmra.mrb[24].mxu0 %v21694_v54  ;;  %v18399_v54 = vld [vmem:[%s24052_s5 + $0x3d8] ss:$12 sps:$4 sm:$0xff]  }
 0x623   :  { %15716 = vmatpush3.bf16.msra.mxu0 %v18333_v56  ;;  %13038 = vmatprep.mubr.bf16.mxu0 %v22967_v59  ;;  %v18337_v59 = vld [vmem:[%s24052_s5 + $0x38] ss:$12 sps:$4 sm:$0xff]   ;;  %v18369_v56 = vld [vmem:[%s24052_s5 + $0x500] ss:$12 sps:$4 sm:$0xff]  }
 0x624   :  { %15717 = vmatprep.subr.bf16.mxu0 %v18334_v41  ;;  %12939 = vmatpush1.bf16.msra.mxu1 %v18399_v54  ;;  %v18370_v41 = vld [vmem:[%s24052_s5 + $0x518] ss:$12 sps:$4 sm:$0xff]   ;;  %v18417_v54 = vld [vmem:[%s24052_s5 + $0x468] ss:$12 sps:$4 sm:$0xff]  }
 0x625   :  { %12940 = vmatprep.subr.bf16.mxu1 %v18404_v43  ;;  %v18422_v43 = vld [vmem:[%s24052_s5 + $0x484] ss:$12 sps:$4 sm:$0xff]  }
 0x627   :  { %15718 = vmatpush3.bf16.msra.mxu0 %v18335_v27  ;;  %v18371_v27 = vld [vmem:[%s24052_s5 + $0x530] ss:$12 sps:$4 sm:$0xff]  }
 0x628   :  { %15719 = vmatprep.subr.bf16.mxu0 %v18336_v34  ;;  %12941 = vmatpush1.bf16.msra.mxu1 %v18402_v37  ;;  %v18419_v34 = vld [vmem:[%s24052_s5 + $0x46c] ss:$12 sps:$4 sm:$0xff]  }
 0x629   :  { %12942 = vmatprep.subr.bf16.mxu1 %v18407_v45 }
 0x62b   :  { %15720 = vmatpush3.bf16.msra.mxu0 %v18337_v59  ;;  %v18545_v59 = vld [vmem:[%s24053_s4] sm:$0xff] }
 0x62c   :  { %15721 = vmatprep.subr.bf16.mxu0 %v18338_v44  ;;  %12943 = vmatpush1.bf16.msra.mxu1 %v18405_v40  ;;  %v6726_v44 = vrot.slane %v18545_v59, %v20711_v1  ;;  %v6730_v37 = vrot.slane %v18545_v59, %v863_v3  ;;  %v18425_v1 = vld [vmem:[%s24052_s5 + $0x49c] ss:$12 sps:$4 sm:$0xff]   ;;  %v18423_v3 = vld [vmem:[%s24052_s5 + $0x498] ss:$12 sps:$4 sm:$0xff]  }
 0x62d   :  { %12944 = vmatprep.subr.bf16.mxu1 %v18410_v49 }
 0x62f   :  { %15722 = vmatpush3.bf16.msra.mxu0 %v18339_v57 }
 0x630   :  { %15723 = vmatprep.subr.bf16.mxu0 %v18340_v46  ;;  %12945 = vmatpush1.bf16.msra.mxu1 %v18408_v31 }
 0x631   :  { %12946 = vmatprep.subr.bf16.mxu1 %v18413_v55 }
 0x633   :  { %15724 = vmatpush3.bf16.msra.mxu0 %v18341_v51 }
 0x634   :  { %15725 = vmatprep.subr.bf16.mxu0 %v18342_v52  ;;  %12947 = vmatpush1.bf16.msra.mxu1 %v18411_v62 }
 0x635   :  { %12948 = vmatprep.subr.bf16.mxu1 %v18416_v63 }
 0x636   :  { %v11669_v32 = vpop.f32.mrb[48].mxu1 }
 0x637   :  { %v11670_v35 = vadd.f32 %v11669_v32, %v11629_v11  ;;  %v15881_v4 = vpop.f32.mrb[49].mxu1  ;;  %15726 = vmatpush3.bf16.msra.mxu0 %v18343_v8  ;;  %v18361_v11 = vld [vmem:[%s24052_s5 + $0x218] ss:$12 sps:$4 sm:$0xff]  }
 0x638   :  { %v11672_v12 = vpop.f32.mrb[50].mxu1  ;;  %15727 = vmatprep.subr.bf16.mxu0 %v18344_v61  ;;  %12949 = vmatpush1.bf16.msra.mxu1 %v18414_v42  ;;  %v18428_v4 = vld [vmem:[%s24052_s5 + $0x4b4] ss:$12 sps:$4 sm:$0xff]   ;;  %v18457_v42 = vld [vmem:[%s24052_s5 + $0x398] ss:$12 sps:$4 sm:$0xff]  }
 0x639   :  { %v11673_v14 = vadd.f32 %v11672_v12, %v11632_v36  ;;  %v15882_v53 = vpop.f32.mrb[51].mxu1  ;;  %v11682_v17 = vmax.f32 %v11670_v35, 0.0  ;;  %v18365_v36 = vld [vmem:[%s24052_s5 + $0x4a0] ss:$12 sps:$4 sm:$0xff]   ;;  %12950 = vmatprep.subr.bf16.mxu1 %v18419_v34  ;;  %v18458_v34 = vld [vmem:[%s24052_s5 + $0x470] ss:$12 sps:$4 sm:$0xff]  }
 0x63a   :  { %v18431_v12 = vld [vmem:[%s24052_s5 + $0x4cc] ss:$12 sps:$4 sm:$0xff]  }
 0x63b   :  { %v11689_v58 = vmax.f32 %v11673_v14, 0.0  ;;  %15728 = vmatpush3.bf16.msra.mxu0 %v18345_v7  ;;  %v18426_v7 = vld [vmem:[%s24052_s5 + $0x4b0] ss:$12 sps:$4 sm:$0xff]   ;;  %v18432_v53 = vld [vmem:[%s24052_s5 + $0x4e0] ss:$12 sps:$4 sm:$0xff]  }
 0x63c   :  { %15729 = vmatprep.subr.bf16.mxu0 %v18346_v13  ;;  %12951 = vmatpush1.bf16.msra.mxu1 %v18417_v54  ;;  %v18429_v13 = vld [vmem:[%s24052_s5 + $0x4c8] ss:$12 sps:$4 sm:$0xff]   ;;  %v18434_v14 = vld [vmem:[%s24052_s5 + $0x4e4] ss:$12 sps:$4 sm:$0xff]  }
 0x63d   :  { %v23624_v20 = vpack.c.bf16 %v11689_v58, %v11682_v17  ;;  %12963 = vmatprep.subr.bf16.mxu1 %v18422_v43  ;;  %v18437_v17 = vld [vmem:[%s24052_s5 + $0x4fc] ss:$12 sps:$4 sm:$0xff]   ;;  %v18435_v58 = vld [vmem:[%s24052_s5 + $0x4f8] ss:$12 sps:$4 sm:$0xff]  }
 0x63f   :  { %15730 = vmatpush3.bf16.msra.mxu0 %v18347_v18  ;;  %v18440_v18 = vld [vmem:[%s24052_s5 + $0x514] ss:$12 sps:$4 sm:$0xff]  }
 0x640   :  { %15737 = vmatprep.subr.bf16.mxu0 %v18348_v19 }
 0x642   :  { %13039 = vmatmul.mubr.bf16.vlgmr.msra.gmra.mrb[28].mxu0 %v22957_v50  ;;  %v18354_v50 = vld [vmem:[%s24052_s5 + $0x290] ss:$12 sps:$4 sm:$0xff]  }
 0x643   :  { %15738 = vmatpush3.bf16.msra.mxu0 %v18349_v21  ;;  %13079 = vmatprep.mubr.bf16.mxu0 %v22973_v30  ;;  %v18355_v30 = vld [vmem:[%s24052_s5 + $0x1d0] ss:$12 sps:$4 sm:$0xff]  }
 0x644   :  { %15739 = vmatprep.subr.bf16.mxu0 %v18350_v23  ;;  %v18438_v21 = vld [vmem:[%s24052_s5 + $0x510] ss:$12 sps:$4 sm:$0xff]  }
 0x647   :  { %15740 = vmatpush3.bf16.msra.mxu0 %v18351_v24  ;;  %v18443_v24 = vld [vmem:[%s24052_s5 + $0x52c] ss:$12 sps:$4 sm:$0xff]  }
 0x648   :  { %15741 = vmatprep.subr.bf16.mxu0 %v18352_v22 }
 0x64b   :  { %15742 = vmatpush3.bf16.msra.mxu0 %v18353_v47 }
 0x64c   :  { %15743 = vmatprep.subr.bf16.mxu0 %v18354_v50 }
 0x64f   :  { %15744 = vmatpush3.bf16.msra.mxu0 %v18355_v30 }
 0x650   :  { %15745 = vmatprep.subr.bf16.mxu0 %v18356_v25  ;;  %v18441_v25 = vld [vmem:[%s24052_s5 + $0x528] ss:$12 sps:$4 sm:$0xff]  }
 0x653   :  { %15746 = vmatpush3.bf16.msra.mxu0 %v18357_v2  ;;  %v18444_v2 = vld [vmem:[%s24052_s5 + $0x3c8] ss:$12 sps:$4 sm:$0xff]  }
 0x654   :  { %15747 = vmatprep.subr.bf16.mxu0 %v18358_v9  ;;  %v18445_v9 = vld [vmem:[%s24052_s5 + $0x308] ss:$12 sps:$4 sm:$0xff]  }
 0x657   :  { %15748 = vmatpush3.bf16.msra.mxu0 %v18359_v26  ;;  %v18446_v26 = vld [vmem:[%s24052_s5 + $0x3e0] ss:$12 sps:$4 sm:$0xff]  }
 0x658   :  { %15749 = vmatprep.subr.bf16.mxu0 %v18360_v28  ;;  %v18447_v28 = vld [vmem:[%s24052_s5 + $0x320] ss:$12 sps:$4 sm:$0xff]  }
 0x65b   :  { %15750 = vmatpush3.bf16.msra.mxu0 %v18361_v11  ;;  %v18448_v11 = vld [vmem:[%s24052_s5 + $0x3f8] ss:$12 sps:$4 sm:$0xff]  }
 0x65c   :  { %15751 = vmatprep.subr.bf16.mxu0 %v18362_v29  ;;  %v18449_v29 = vld [vmem:[%s24052_s5 + $0x338] ss:$12 sps:$4 sm:$0xff]  }
 0x65f   :  { %15752 = vmatpush3.bf16.msra.mxu0 %v18363_v15  ;;  %v18451_v15 = vld [vmem:[%s24052_s5 + $0x350] ss:$12 sps:$4 sm:$0xff]  }
 0x660   :  { %15883 = vmatprep.subr.bf16.mxu0 %v18547_v48 }
 0x662   :  { %13080 = vmatmul.mubr.bf16.vlgmr.msra.gmra.mrb[32].mxu0 %v22965_v60  ;;  %v18367_v60 = vld [vmem:[%s24052_s5 + $0x4d0] ss:$12 sps:$4 sm:$0xff]  }
 0x663   :  { %15884 = vmatpush3.bf16.msra.mxu0 %v18364_v33  ;;  %15899 = vmatprep.mubr.msk.bf16.mxu0 %vm18548_vm0, %v18547_v48  ;;  %v18452_v33 = vld [vmem:[%s24052_s5 + $0x428] ss:$12 sps:$4 sm:$0xff]  }
 0x664   :  { %15885 = vmatprep.subr.bf16.mxu0 %v18547_v48 }
 0x667   :  { %15886 = vmatpush3.bf16.msra.mxu0 %v18365_v36  ;;  %v18453_v36 = vld [vmem:[%s24052_s5 + $0x368] ss:$12 sps:$4 sm:$0xff]  }
 0x668   :  { %15887 = vmatprep.subr.bf16.mxu0 %v18547_v48 }
 0x66b   :  { %15888 = vmatpush3.bf16.msra.mxu0 %v18366_v38  ;;  %v18454_v38 = vld [vmem:[%s24052_s5 + $0x440] ss:$12 sps:$4 sm:$0xff]  }
 0x66c   :  { %15889 = vmatprep.subr.bf16.mxu0 %v18547_v48 }
 0x66f   :  { %15890 = vmatpush3.bf16.msra.mxu0 %v18367_v60  ;;  %v23819_v60 = vld [vmem:[%s24055_s6] sm:$0x7] }
 0x670   :  { %15891 = vmatprep.subr.bf16.mxu0 %v18547_v48 }
 0x673   :  { %15892 = vmatpush3.bf16.msra.mxu0 %v18368_v39  ;;  %v18455_v39 = vld [vmem:[%s24052_s5 + $0x380] ss:$12 sps:$4 sm:$0xff]  }
 0x674   :  { %15893 = vmatprep.subr.bf16.mxu0 %v18547_v48 }
 0x677   :  { %15894 = vmatpush3.bf16.msra.mxu0 %v18369_v56  ;;  %v18456_v56 = vld [vmem:[%s24052_s5 + $0x458] ss:$12 sps:$4 sm:$0xff]  }
 0x678   :  { %15895 = vmatprep.subr.bf16.mxu0 %v18547_v48 }
 0x67b   :  { %15896 = vmatpush3.bf16.msra.mxu0 %v18370_v41  ;;  %v11934_v41 = vrot.slane %v23819_v60, %v19970_v6 }
 0x67c   :  { %15897 = vmatprep.subr.bf16.mxu0 %v18547_v48 }
 0x67f   :  { %15898 = vmatpush3.bf16.msra.mxu0 %v18371_v27 }
 0x680   :  { %15903 = vmatprep.subr.bf16.mxu0 %v18547_v48 }
 0x682   :  { %15900 = vmatmul.mubr.bf16.vlgmr.msra.gmra.mrb[36].mxu0 %v23624_v20 }
 0x683   :  { %15919 = vmatprep.mubr.msk.bf16.mxu0 %vm18548_vm0, %v18547_v48 }
 0x6f5   :  { %v11380_v45 = vpop.f32.mrb[24].mxu0 }
 0x6f6   :  { %v15955_v57 = vadd.f32 %v11380_v45, %v6726_v44  ;;  %v11382_v46 = vpop.f32.mrb[25].mxu0 }
 0x6f7   :  { %v15956_v40 = vadd.f32 %v11382_v46, %v6730_v37  ;;  %v11384_v49 = vpop.f32.mrb[26].mxu0  ;;  %v18460_v46 = vld [vmem:[%s24054_s7 + $0x40] sm:$0xff]  }
 0x6f8   :  { %v15957_v51 = vadd.f32 %v11384_v49, %v6726_v44  ;;  %v11386_v52 = vpop.f32.mrb[27].mxu0  ;;  %v11680_v55 = vmax.f32 %v15955_v57, 0.0  ;;  %v18459_v57 = vld [vmem:[%s24052_s5 + $0x3b0] ss:$12 sps:$4 sm:$0xff]   ;;  %v18461_v49 = vld [vmem:[%s24054_s7] sm:$0xff]  }
 0x6f9   :  { %v15958_v31 = vadd.f32 %v11386_v52, %v6730_v37  ;;  %v11681_v61 = vmax.f32 %v15956_v40, 0.0  ;;  %v18463_v52 = vld [vmem:[%s24054_s7 + $0x8] sm:$0xff]  }
 0x6fa   :  { %v11687_v8 = vmax.f32 %v15957_v51, 0.0  ;;  %v18462_v51 = vld [vmem:[%s24054_s7 + $0x48] sm:$0xff]  }
 0x6fb   :  { %v11688_v62 = vmax.f32 %v15958_v31, 0.0  ;;  %v18464_v31 = vld [vmem:[%s24054_s7 + $0x50] sm:$0xff]  }
 0x6fc   :  { %v23733_v32 = vpack.c.bf16 %v11687_v8, %v11680_v55  ;;  %v18465_v55 = vld [vmem:[%s24054_s7 + $0x10] sm:$0xff]   ;;  %v18466_v8 = vld [vmem:[%s24054_s7 + $0x58] sm:$0xff]  }
 0x6fd   :  { %v11695_v35 = vpack.c.bf16 %v11688_v62, %v11681_v61  ;;  %v18467_v61 = vld [vmem:[%s24054_s7 + $0x18] sm:$0xff]   ;;  %v18468_v62 = vld [vmem:[%s24054_s7 + $0x60] sm:$0xff]  }
 0x6ff   :  { %12952 = vmatprep.mubr.bf16.mxu1 %v11695_v35 }
 0x700   :  { %12953 = vmatmul.mubr.bf16.vlgmr.msra.gmra.mrb[52].mxu1 %v23733_v32 }
 0x701   :  { %12964 = vmatpush1.bf16.msra.mxu1 %v18420_v0  ;;  %12995 = vmatprep.mubr.bf16.mxu1 %v18546_v16 }
 0x702   :  { %12965 = vmatprep.subr.bf16.mxu1 %v18425_v1 }
 0x705   :  { %12966 = vmatpush1.bf16.msra.mxu1 %v18423_v3 }
 0x706   :  { %12967 = vmatprep.subr.bf16.mxu1 %v18428_v4 }
 0x709   :  { %12968 = vmatpush1.bf16.msra.mxu1 %v18426_v7  ;;  %v18471_v7 = vld [vmem:[%s24054_s7 + $0x28] sm:$0xff]  }
 0x70a   :  { %12969 = vmatprep.subr.bf16.mxu1 %v18431_v12  ;;  %v18472_v12 = vld [vmem:[%s24054_s7 + $0x70] sm:$0xff]  }
 0x70d   :  { %12970 = vmatpush1.bf16.msra.mxu1 %v18429_v13  ;;  %v18473_v13 = vld [vmem:[%s24054_s7 + $0x30] sm:$0xff]  }
 0x70e   :  { %12971 = vmatprep.subr.bf16.mxu1 %v18434_v14  ;;  %v18474_v14 = vld [vmem:[%s24054_s7 + $0x78] sm:$0xff]  }
 0x711   :  { %12972 = vmatpush1.bf16.msra.mxu1 %v18432_v53  ;;  %v18475_v53 = vld [vmem:[%s24054_s7 + $0x38] sm:$0xff]  }
 0x712   :  { %12973 = vmatprep.subr.bf16.mxu1 %v18437_v17  ;;  %v18476_v17 = vld [vmem:[%s24054_s7 + $0x80] sm:$0xff]  }
 0x713   :  { %15904 = vmatpush3.bf16.msra.mxu0 %v18476_v17  ;;  %v18517_v17 = vld [vmem:[%s24057_s11 + $0x20] sm:$0xff]  }
 0x714   :  { %15905 = vmatprep.subr.bf16.mxu0 %v18547_v48 }
 0x715   :  { %12974 = vmatpush1.bf16.msra.mxu1 %v18435_v58  ;;  %v15731_v19 = vpop.f32.mrb[28].mxu0  ;;  %v18477_v58 = vld [vmem:[%s24054_s7 + $0x88] sm:$0xff]  }
 0x716   :  { %v15732_v23 = vpop.f32.mrb[29].mxu0  ;;  %12975 = vmatprep.subr.bf16.mxu1 %v18440_v18  ;;  %v18478_v18 = vld [vmem:[%s24054_s7 + $0x90] sm:$0xff]  }
 0x717   :  { %v15733_v22 = vadd.f32 %v15732_v23, %v15731_v19  ;;  %v15734_v47 = vpop.f32.mrb[30].mxu0  ;;  %15906 = vmatpush3.bf16.msra.mxu0 %v18477_v58  ;;  %v18479_v19 = vld [vmem:[%s24054_s7 + $0x98] sm:$0xff]   ;;  %v18481_v23 = vld [vmem:[%s24054_s7 + $0xa8] sm:$0xff]  }
 0x718   :  { %v15735_v50 = vpop.f32.mrb[31].mxu0  ;;  %15907 = vmatprep.subr.bf16.mxu0 %v18547_v48  ;;  %v18518_v58 = vld [vmem:[%s24057_s11 + $0x68] sm:$0xff]  }
 0x719   :  { %12976 = vmatpush1.bf16.msra.mxu1 %v18438_v21  ;;  %v15736_v30 = vadd.f32 %v15735_v50, %v15734_v47  ;;  %v13041_v54 = vadd.f32 %v15733_v22, %v11934_v41  ;;  %v18480_v21 = vld [vmem:[%s24054_s7 + $0xa0] sm:$0xff]   ;;  %v18483_v22 = vld [vmem:[%s24054_s7 + $0xb8] sm:$0xff]   ;;  %v11926_v47 = vrot.slane %v23819_v60, %v19967_v5  ;;  %v11930_v50 = vrot.slane %v23819_v60, %v19982_v10 }
 0x71a   :  { %12977 = vmatprep.subr.bf16.mxu1 %v18443_v24  ;;  %v18482_v24 = vld [vmem:[%s24054_s7 + $0xb0] sm:$0xff]  }
 0x71b   :  { %v13044_v37 = vadd.f32 %v15736_v30, %v11934_v41  ;;  %15908 = vmatpush3.bf16.msra.mxu0 %v18478_v18 }
 0x71c   :  { %15909 = vmatprep.subr.bf16.mxu0 %v18547_v48 }
 0x71d   :  { %12978 = vmatpush1.bf16.msra.mxu1 %v18441_v25 }
 0x71e   :  { %15759 = vmatprep.subr.bf16.mxu1 %v18444_v2 }
 0x71f   :  { %15910 = vmatpush3.bf16.msra.mxu0 %v18479_v19 }
 0x720   :  { %12996 = vmatmul.mubr.bf16.vlgmr.msra.gmra.mrb[52].mxu1 %v23624_v20  ;;  %v18450_v20 = vld [vmem:[%s24052_s5 + $0x410] ss:$12 sps:$4 sm:$0xff]   ;;  %15911 = vmatprep.subr.bf16.mxu0 %v18547_v48 }
 0x721   :  { %15760 = vmatpush3.bf16.msra.mxu1 %v18445_v9  ;;  %13120 = vmatprep.mubr.bf16.mxu1 %v11695_v35  ;;  %v18470_v35 = vld [vmem:[%s24054_s7 + $0x68] sm:$0xff]  }
 0x722   :  { %15761 = vmatprep.subr.bf16.mxu1 %v18446_v26 }
 0x723   :  { %15912 = vmatpush3.bf16.msra.mxu0 %v18480_v21 }
 0x724   :  { %15913 = vmatprep.subr.bf16.mxu0 %v18547_v48 }
 0x725   :  { %15762 = vmatpush3.bf16.msra.mxu1 %v18447_v28 }
 0x726   :  { %15763 = vmatprep.subr.bf16.mxu1 %v18448_v11 }
 0x727   :  { %15914 = vmatpush3.bf16.msra.mxu0 %v18481_v23 }
 0x728   :  { %15915 = vmatprep.subr.bf16.mxu0 %v18547_v48 }
 0x729   :  { %15764 = vmatpush3.bf16.msra.mxu1 %v18449_v29 }
 0x72a   :  { %15765 = vmatprep.subr.bf16.mxu1 %v18450_v20 }
 0x72b   :  { %15916 = vmatpush3.bf16.msra.mxu0 %v18482_v24 }
 0x72c   :  { %15917 = vmatprep.subr.bf16.mxu0 %v18547_v48 }
 0x72d   :  { %15766 = vmatpush3.bf16.msra.mxu1 %v18451_v15 }
 0x72e   :  { %15767 = vmatprep.subr.bf16.mxu1 %v18452_v33 }
 0x72f   :  { %15918 = vmatpush3.bf16.msra.mxu0 %v18483_v22 }
 0x731   :  { %15768 = vmatpush3.bf16.msra.mxu1 %v18453_v36 }
 0x732   :  { %15769 = vmatprep.subr.bf16.mxu1 %v18454_v38 }
 0x735   :  { %15770 = vmatpush3.bf16.msra.mxu1 %v18455_v39  ;;  %v15753_v63 = vpop.f32.mrb[32].mxu0 }
 0x736   :  { %v15754_v27 = vpop.f32.mrb[33].mxu0  ;;  %15771 = vmatprep.subr.bf16.mxu1 %v18456_v56 }
 0x737   :  { %v15755_v43 = vadd.f32 %v15754_v27, %v15753_v63  ;;  %v15756_v59 = vpop.f32.mrb[34].mxu0 }
 0x738   :  { %v15757_v44 = vpop.f32.mrb[35].mxu0 }
 0x739   :  { %v23835_v45 = vadd.f32 %v15755_v43, %v13041_v54  ;;  %v15758_v6 = vadd.f32 %v15757_v44, %v15756_v59  ;;  %15772 = vmatpush3.bf16.msra.mxu1 %v18457_v42 }
 0x73a   :  { %15773 = vmatprep.subr.bf16.mxu1 %v18458_v34 }
 0x73b   :  { %v23843_v40 = vadd.f32 %v15758_v6, %v13044_v37  ;;  %v18486_v6 = vld [vmem:[%s24056_s9 + $0x4] ss:$8 sps:$4 sm:$0xff]  }
 0x73d   :  { %15774 = vmatpush3.bf16.msra.mxu1 %v18459_v57  ;;  %v18489_v57 = vld [vmem:[%s24056_s9 + $0x14] ss:$8 sps:$4 sm:$0xff]  }
 0x73e   :  { %15790 = vmatprep.subr.bf16.mxu1 %v18460_v46  ;;  %v18492_v46 = vld [vmem:[%s24056_s9 + $0x24] ss:$8 sps:$4 sm:$0xff]  }
 0x740   :  { %13121 = vmatmul.mubr.bf16.vlgmr.msra.gmra.mrb[56].mxu1 %v23733_v32  ;;  %v18469_v32 = vld [vmem:[%s24054_s7 + $0x20] sm:$0xff]  }
 0x741   :  { %15791 = vmatpush3.bf16.msra.mxu1 %v18461_v49  ;;  %v18495_v49 = vld [vmem:[%s24056_s9 + $0x34] ss:$8 sps:$4 sm:$0xff]  }
 0x742   :  { %15792 = vmatprep.subr.bf16.mxu1 %v18462_v51  ;;  %v18493_v51 = vld [vmem:[%s24056_s9 + $0x30] ss:$8 sps:$4 sm:$0xff]  }
 0x745   :  { %15793 = vmatpush3.bf16.msra.mxu1 %v18463_v52  ;;  %v18498_v52 = vld [vmem:[%s24056_s9 + $0x44] ss:$8 sps:$4 sm:$0xff]  }
 0x746   :  { %15794 = vmatprep.subr.bf16.mxu1 %v18464_v31  ;;  %v18496_v31 = vld [vmem:[%s24056_s9 + $0x40] ss:$8 sps:$4 sm:$0xff]  }
 0x749   :  { %15795 = vmatpush3.bf16.msra.mxu1 %v18465_v55  ;;  %v18501_v55 = vld [vmem:[%s24056_s9 + $0x54] ss:$8 sps:$4 sm:$0xff]  }
 0x74a   :  { %15796 = vmatprep.subr.bf16.mxu1 %v18466_v8  ;;  %v18499_v8 = vld [vmem:[%s24056_s9 + $0x50] ss:$8 sps:$4 sm:$0xff]  }
 0x74d   :  { %15797 = vmatpush3.bf16.msra.mxu1 %v18467_v61  ;;  %v18504_v61 = vld [vmem:[%s24056_s9 + $0x64] ss:$8 sps:$4 sm:$0xff]  }
 0x74e   :  { %15798 = vmatprep.subr.bf16.mxu1 %v18468_v62  ;;  %v18502_v62 = vld [vmem:[%s24056_s9 + $0x60] ss:$8 sps:$4 sm:$0xff]  }
 0x751   :  { %15799 = vmatpush3.bf16.msra.mxu1 %v18469_v32  ;;  %v18507_v32 = vld [vmem:[%s24056_s9 + $0x74] ss:$8 sps:$4 sm:$0xff]  }
 0x752   :  { %15800 = vmatprep.subr.bf16.mxu1 %v18470_v35  ;;  %v18505_v35 = vld [vmem:[%s24056_s9 + $0x70] ss:$8 sps:$4 sm:$0xff]  }
 0x755   :  { %v23876_v0 = vpop.f32.mrb[36].mxu0  ;;  %15801 = vmatpush3.bf16.msra.mxu1 %v18471_v7  ;;  %v18512_v7 = vld [vmem:[%s24057_s11 + $0x50] sm:$0xff]  }
 0x756   :  { %v15901_v1 = vpop.f32.mrb[37].mxu0  ;;  %15802 = vmatprep.subr.bf16.mxu1 %v18472_v12  ;;  %v18513_v12 = vld [vmem:[%s24057_s11 + $0x10] sm:$0xff]  }
 0x757   :  { %v23878_v3 = vpop.f32.mrb[38].mxu0  ;;  %v18509_v1 = vld [vmem:[%s24057_s11] sm:$0xff]  }
 0x758   :  { %v15902_v4 = vpop.f32.mrb[39].mxu0 }
 0x759   :  { %15803 = vmatpush3.bf16.msra.mxu1 %v18473_v13  ;;  %v18511_v4 = vld [vmem:[%s24057_s11 + $0x8] sm:$0xff]   ;;  %v18514_v13 = vld [vmem:[%s24057_s11 + $0x58] sm:$0xff]  }
 0x75a   :  { %15804 = vmatprep.subr.bf16.mxu1 %v18474_v14  ;;  %v18515_v14 = vld [vmem:[%s24057_s11 + $0x18] sm:$0xff]  }
 0x75d   :  { %15805 = vmatpush3.bf16.msra.mxu1 %v18475_v53  ;;  %v18516_v53 = vld [vmem:[%s24057_s11 + $0x60] sm:$0xff]  }
 0x75e   :  { %13579 = vmatprep.subr.bf16.mxu1 %v18486_v6 }
 0x7f3   :  { %v12997_v30 = vpop.f32.mrb[52].mxu1 }
 0x7f4   :  { %v15959_v25 = vadd.f32 %v12997_v30, %v11926_v47  ;;  %v12999_v2 = vpop.f32.mrb[53].mxu1 }
 0x7f5   :  { %v15960_v9 = vadd.f32 %v12999_v2, %v11930_v50  ;;  %v13001_v26 = vpop.f32.mrb[54].mxu1 }
 0x7f6   :  { %v15961_v28 = vadd.f32 %v13001_v26, %v11926_v47  ;;  %v13003_v11 = vpop.f32.mrb[55].mxu1  ;;  %v13170_v48 = vmax.f32 %v15959_v25, 0.0  ;;  %v15441_v47 = vld [vmem:[%s24058_s8] ss:$0 sm:$0xff] }
 0x7f7   :  { %v15962_v29 = vadd.f32 %v13003_v11, %v11930_v50  ;;  %v13171_v15 = vmax.f32 %v15960_v9, 0.0 }
 0x7f8   :  { %v13173_v20 = vmax.f32 %v15961_v28, 0.0 }
 0x7f9   :  { %v13174_v33 = vmax.f32 %v15962_v29, 0.0 }
 0x7fa   :  { %v13176_v36 = vpack.c.bf16 %v13173_v20, %v13170_v48 }
 0x7fb   :  { %v13177_v38 = vpack.c.bf16 %v13174_v33, %v13171_v15 }
 0x7fd   :  { %13410 = vmatprep.mubr.bf16.mxu1 %v13177_v38 }
 0x7fe   :  { %13411 = vmatmul.mubr.bf16.vlgmr.msra.gmra.mrb[60].mxu1 %v13176_v36 }
 0x7ff   :  { %13611 = vmatprep.mubr.bf16.mxu1 %v18546_v16  ;;  %v18484_v16 = vld [vmem:[%s24056_s9] ss:$8 sps:$4 sm:$0xff]  }
 0x800   :  { %13580 = vmatpush1.bf16.msra.mxu1 %v18484_v16 }
 0x801   :  { %13581 = vmatprep.subr.bf16.mxu1 %v18489_v57 }
 0x813   :  { %v15775_v39 = vpop.f32.mrb[56].mxu1 }
 0x814   :  { %v15776_v60 = vpop.f32.mrb[57].mxu1 }
 0x815   :  { %v15777_v56 = vadd.f32 %v15776_v60, %v15775_v39  ;;  %v15778_v41 = vpop.f32.mrb[58].mxu1 }
 0x816   :  { %v15779_v63 = vpop.f32.mrb[59].mxu1 }
 0x817   :  { %v13123_v42 = vadd.f32 %v15777_v56, %v23835_v45  ;;  %v15780_v27 = vadd.f32 %v15779_v63, %v15778_v41  ;;  %v18487_v45 = vld [vmem:[%s24056_s9 + $0x10] ss:$8 sps:$4 sm:$0xff]   ;;  %v18519_v63 = vld [vmem:[%s24057_s11 + $0x28] sm:$0xff]  }
 0x818   :  { %13582 = vmatpush1.bf16.msra.mxu1 %v18487_v45 }
 0x819   :  { %v13164_v34 = vadd.f32 %v23876_v0, %v13123_v42  ;;  %v13126_v54 = vadd.f32 %v15780_v27, %v23843_v40  ;;  %v18490_v40 = vld [vmem:[%s24056_s9 + $0x20] ss:$8 sps:$4 sm:$0xff]   ;;  %13583 = vmatprep.subr.bf16.mxu1 %v18492_v46  ;;  %v18520_v42 = vld [vmem:[%s24057_s11 + $0x70] sm:$0xff]  }
 0x81a   :  { %v18508_v0 = vld [vmem:[%s24057_s11 + $0x40] sm:$0xff]   ;;  %v18521_v27 = vld [vmem:[%s24057_s11 + $0x30] sm:$0xff]  }
 0x81b   :  { %v13167_v43 = vadd.f32 %v23878_v3, %v13126_v54  ;;  %v13172_v59 = vmax.f32 %v13164_v34, 0.0  ;;  %15821 = vmatprep.subr.bf16.mxu0 %v18508_v0  ;;  %v18510_v3 = vld [vmem:[%s24057_s11 + $0x48] sm:$0xff]   ;;  %v18522_v34 = vld [vmem:[%s24057_s11 + $0x78] sm:$0xff]  }
 0x81c   :  { %13584 = vmatpush1.bf16.msra.mxu1 %v18490_v40  ;;  %v18523_v54 = vld [vmem:[%s24057_s11 + $0x38] sm:$0xff]  }
 0x81d   :  { %v13175_v44 = vmax.f32 %v13167_v43, 0.0  ;;  %13585 = vmatprep.subr.bf16.mxu1 %v18495_v49  ;;  %v13487_v43 = vld [vmem:[%s24059_s10] sm:$0x3] }
 0x81f   :  { %v13178_v37 = vpack.c.bf16 %v13175_v44, %v13172_v59  ;;  %v13492_v59 = vrot.slane %v13487_v43, %v19967_v5  ;;  %v13496_v44 = vrot.slane %v13487_v43, %v19982_v10  ;;  %v15482_v5 = vld [vmem:[%s24060_s12] ss:$0 sm:$0xff] }
 0x820   :  { %13586 = vmatpush1.bf16.msra.mxu1 %v18493_v51 }
 0x821   :  { %15920 = vmatmul.mubr.bf16.vlgmr.msra.gmra.mrb[40].mxu0 %v13178_v37  ;;  %13587 = vmatprep.subr.bf16.mxu1 %v18498_v52 }
 0x822   :  { %15822 = vmatpush3.bf16.msra.mxu0 %v18509_v1 }
 0x823   :  { %15823 = vmatprep.subr.bf16.mxu0 %v18510_v3 }
 0x824   :  { %13588 = vmatpush1.bf16.msra.mxu1 %v18496_v31 }
 0x825   :  { %13589 = vmatprep.subr.bf16.mxu1 %v18501_v55 }
 0x826   :  { %15824 = vmatpush3.bf16.msra.mxu0 %v18511_v4 }
 0x827   :  { %15825 = vmatprep.subr.bf16.mxu0 %v18512_v7 }
 0x828   :  { %13590 = vmatpush1.bf16.msra.mxu1 %v18499_v8 }
 0x829   :  { %13591 = vmatprep.subr.bf16.mxu1 %v18504_v61 }
 0x82a   :  { %15826 = vmatpush3.bf16.msra.mxu0 %v18513_v12 }
 0x82b   :  { %15827 = vmatprep.subr.bf16.mxu0 %v18514_v13 }
 0x82c   :  { %13592 = vmatpush1.bf16.msra.mxu1 %v18502_v62 }
 0x82d   :  { %13593 = vmatprep.subr.bf16.mxu1 %v18507_v32 }
 0x82e   :  { %15828 = vmatpush3.bf16.msra.mxu0 %v18515_v14 }
 0x82f   :  { %15829 = vmatprep.subr.bf16.mxu0 %v18516_v53 }
 0x830   :  { %13594 = vmatpush1.bf16.msra.mxu1 %v18505_v35 }
 0x832   :  { %15830 = vmatpush3.bf16.msra.mxu0 %v18517_v17 }
 0x833   :  { %15831 = vmatprep.subr.bf16.mxu0 %v18518_v58 }
 0x836   :  { %15832 = vmatpush3.bf16.msra.mxu0 %v18519_v63 }
 0x837   :  { %15833 = vmatprep.subr.bf16.mxu0 %v18520_v42 }
 0x83a   :  { %15834 = vmatpush3.bf16.msra.mxu0 %v18521_v27 }
 0x83b   :  { %15835 = vmatprep.subr.bf16.mxu0 %v18522_v34 }
 0x83e   :  { %15836 = vmatpush3.bf16.msra.mxu0 %v18523_v54 }
 0x8d1   :  { %v15806_v18 = vpop.f32.mrb[60].mxu1 }
 0x8d2   :  { %v15807_v19 = vpop.f32.mrb[61].mxu1 }
 0x8d3   :  { %v15808_v21 = vadd.f32 %v15807_v19, %v15806_v18  ;;  %v15809_v23 = vpop.f32.mrb[62].mxu1 }
 0x8d4   :  { %v15810_v24 = vpop.f32.mrb[63].mxu1 }
 0x8d5   :  { %v15811_v22 = vadd.f32 %v15810_v24, %v15809_v23  ;;  %v13413_v50 = vadd.f32 %v15808_v21, %v15441_v47 }
 0x8d7   :  { %v13416_v9 = vadd.f32 %v15811_v22, %v15441_v47 }
 0x8f4   :  { %v13453_v30 = vpop.f32.mrb[40].mxu0 }
 0x8f5   :  { %v13454_v25 = vadd.f32 %v13453_v30, %v13413_v50  ;;  %v15921_v2 = vpop.f32.mrb[41].mxu0 }
 0x8f6   :  { %v13456_v26 = vpop.f32.mrb[42].mxu0 }
 0x8f7   :  { %v13460_v28 = vmul.f32 0.5, %v13454_v25  ;;  %v13457_v11 = vadd.f32 %v13456_v26, %v13416_v9  ;;  %v15922_v29 = vpop.f32.mrb[43].mxu0 }
 0x8f9   :  { %18524 = vtanh.f32 %v13460_v28  ;;  %v13461_v48 = vmul.f32 0.5, %v13457_v11 }
 0x8fb   :  { %18526 = vtanh.f32 %v13461_v48 }
 0x903   :  { %v18525_v20 = vpop.eup %18524 }
 0x904   :  { %v13464_v15 = vadd.f32 1.0, %v18525_v20 }
 0x905   :  { %v18527_v33 = vpop.eup %18526 }
 0x906   :  { %v13466_v36 = vmul.f32 0.5, %v13464_v15  ;;  %v13465_v38 = vadd.f32 1.0, %v18527_v33 }
 0x908   :  { %v13467_v39 = vmul.f32 0.5, %v13465_v38  ;;  %v13468_v60 = vmul.f32 %v13466_v36, %v13454_v25 }
 0x90a   :  { %v13469_v56 = vmul.f32 %v13467_v39, %v13457_v11 }
 0x90c   :  { %v13470_v41 = vpack.c.bf16 %v13469_v56, %v13468_v60 }
 0x90e   :  { %13612 = vmatmul.mubr.bf16.vlgmr.msra.gmra.mrb[64].mxu1 %v13470_v41 }
 0x9e1   :  { %v13613_v37 = vpop.f32.mrb[64].mxu1 }
 0x9e2   :  { %v13614_v16 = vadd.f32 %v13613_v37, %v13492_v59  ;;  %v13615_v6 = vpop.f32.mrb[65].mxu1 }
 0x9e3   :  { %v13616_v45 = vadd.f32 %v13615_v6, %v13496_v44  ;;  %v13617_v57 = vpop.f32.mrb[66].mxu1 }
 0x9e4   :  { %v13618_v46 = vadd.f32 %v13617_v57, %v13492_v59  ;;  %v13619_v40 = vpop.f32.mrb[67].mxu1  ;;  %v13622_v51 = vmax.f32 %v13614_v16, 0.0 }
 0x9e5   :  { %v13620_v49 = vadd.f32 %v13619_v40, %v13496_v44  ;;  %v13623_v31 = vmax.f32 %v13616_v45, 0.0 }
 0x9e6   :  { %v13624_v52 = vmax.f32 %v13618_v46, 0.0 }
 0x9e7   :  { %v13625_v55 = vmax.f32 %v13620_v49, 0.0 }
 0x9e8   :  { %v13626_v8 = vpack.c.bf16 %v13624_v52, %v13622_v51 }
 0x9e9   :  { %v13627_v61 = vpack.c.bf16 %v13625_v55, %v13623_v31 }
 0x9eb   :  { %13795 = vmatprep.mubr.bf16.mxu0 %v13627_v61 }
 0x9ec   :  { %13796 = vmatmul.mubr.bf16.vlgmr.msra.gmra.mrb[44].mxu0 %v13626_v8 }
 0xabf   :  { %v15837_v62 = vpop.f32.mrb[44].mxu0 }
 0xac0   :  { %v15838_v10 = vpop.f32.mrb[45].mxu0 }
 0xac1   :  { %v15839_v32 = vadd.f32 %v15838_v10, %v15837_v62  ;;  %v15840_v35 = vpop.f32.mrb[46].mxu0 }
 0xac2   :  { %v15841_v0 = vpop.f32.mrb[47].mxu0 }
 0xac3   :  { %v13798_v1 = vadd.f32 %v15839_v32, %v15482_v5  ;;  %v15842_v3 = vadd.f32 %v15841_v0, %v15840_v35 }
 0xac5   :  { %13804 = vst [vmem:[%s24061_s13] sm:$0xff] %v13798_v1  ;;  %v13801_v4 = vadd.f32 %v15842_v3, %v15482_v5 }
 0xac7   :  { %13805 = vst [vmem:[%s24061_s13 + $0x8] sm:$0xff] %v13801_v4 }

</bundles_post_ra>
